<compile_context>
chip_gen: v7x
topology: tpu7x:2x2x1
jax: 0.10.0
libtpu: 0.0.40
codegen_flags: <defaults>
</compile_context>

<pallas_src>
import functools

import jax
import jax.numpy as jnp
from jax.experimental import pallas as pl
from jax.experimental.pallas import tpu as pltpu


# ----------------------------------------------------------------------------
# Tiling helpers (shared by param-prep and the forward pass)
# ----------------------------------------------------------------------------

_FC1_KSTEPS = 2   # 2 K steps -> ~2.8 MB bf16 weight tile; double-buffered it
                  # stays well inside v5e's 16 MiB default scoped VMEM.


def _round_up(x, m):
    return ((x + m - 1) // m) * m


def _fc1_k_tiles(K):
    """(tk, Kp) for fc1: tk a multiple of 128, Kp = tk * _FC1_KSTEPS."""
    Kp0 = _round_up(K, 128)
    tk = _round_up(-(-Kp0 // _FC1_KSTEPS), 128)
    return tk, tk * _FC1_KSTEPS


def _pad2d(a, rows, cols):
    r, c = a.shape
    return jnp.pad(a, ((0, rows - r), (0, cols - c)))


# ----------------------------------------------------------------------------
# Pallas kernels
# ----------------------------------------------------------------------------

def _mm_bias_relu_kernel(x_ref, w_ref, b_ref, o_ref):
    """Fused matmul + bias + ReLU; single K step, no accumulator round trip."""
    out = jnp.dot(x_ref[...], w_ref[...],
                  preferred_element_type=jnp.float32) + b_ref[...]
    o_ref[...] = jnp.maximum(out, 0.0).astype(o_ref.dtype)


def _fused_fc_kernel(x_ref, w1_ref, b1_ref, w2_ref, b2_ref, w3_ref, b3_ref,
                     o_ref, acc_ref):
    """fc1 (K-tiled, f32 acc) with a fused ReLU -> fc2 -> ReLU -> fc3 epilogue."""
    k = pl.program_id(0)

    @pl.when(k == 0)
    def _():
        acc_ref[...] = jnp.zeros_like(acc_ref)

    acc_ref[...] += jnp.dot(x_ref[...], w1_ref[...],
                            preferred_element_type=jnp.float32)

    @pl.when(k == pl.num_programs(0) - 1)
    def _():
        h1 = jnp.maximum(acc_ref[...] + b1_ref[...], 0.0)        # (Mp, 256) f32
        h2 = jnp.dot(h1.astype(w2_ref.dtype), w2_ref[...],
                     preferred_element_type=jnp.float32) + b2_ref[...]
        h2 = jnp.maximum(h2, 0.0)                                # (Mp, 128) f32
        out = jnp.dot(h2.astype(w3_ref.dtype), w3_ref[...],
                      preferred_element_type=jnp.float32) + b3_ref[...]
        o_ref[...] = out.astype(o_ref.dtype)


# ----------------------------------------------------------------------------
# Pallas call wrappers
# ----------------------------------------------------------------------------

def conv_matmul(cols, wp, bp, n_out, out_dtype=jnp.bfloat16):
    """y = relu(cols @ W + b) for an im2col'd conv layer.

    cols: (M, K) activations (unpadded, bf16)
    wp:   (Kp, Np) pre-padded bf16 weight (BN already folded)
    bp:   (1, Np)  pre-padded f32 bias
    Single K step; 1 grid step or 2 "parallel" M blocks (megacore on v7x).
    """
    M, K = cols.shape
    Kp, Np = wp.shape

    if M > 1024:                    # 2 parallel M blocks, tm multiple of 256
        msteps = 2
        Mp = _round_up(M, 512)
    else:                           # whole matmul in one gridless call
        msteps = 1
        Mp = _round_up(M, 256)
    tm = Mp // msteps

    xp = _pad2d(cols.astype(jnp.bfloat16), Mp, Kp)

    if msteps == 1:
        out = pl.pallas_call(
            _mm_bias_relu_kernel,
            out_shape=jax.ShapeDtypeStruct((Mp, Np), out_dtype),
            in_specs=[pl.BlockSpec(memory_space=pltpu.MemorySpace.VMEM)] * 3,
            out_specs=pl.BlockSpec(memory_space=pltpu.MemorySpace.VMEM),
        )(xp, wp, bp)
    else:
        out = pl.pallas_call(
            _mm_bias_relu_kernel,
            out_shape=jax.ShapeDtypeStruct((Mp, Np), out_dtype),
            grid_spec=pltpu.PrefetchScalarGridSpec(
                num_scalar_prefetch=0,
                grid=(msteps,),
                in_specs=[
                    pl.BlockSpec((tm, Kp), lambda i: (i, 0)),
                    pl.BlockSpec((Kp, Np), lambda i: (0, 0)),
                    pl.BlockSpec((1, Np), lambda i: (0, 0)),
                ],
                out_specs=pl.BlockSpec((tm, Np), lambda i: (i, 0)),
            ),
            compiler_params=pltpu.CompilerParams(
                dimension_semantics=("parallel",)),
        )(xp, wp, bp)

    return out[:M, :n_out]


def fused_fc(flat, w1p, b1p, w2p, b2p, w3p, b3p, num_classes):
    """Single-launch fc1(ReLU) -> fc2(ReLU) -> fc3.

    fc1 streams its (Kp, 256) bf16 weight in _FC1_KSTEPS contiguous K tiles
    (full 256-wide N), accumulating into a f32 VMEM scratch; fc2/fc3 weights
    are VMEM-resident and applied in the last-K epilogue.
    """
    M, K = flat.shape
    Kp, N1 = w1p.shape
    N2 = w2p.shape[1]
    Cp = w3p.shape[1]
    tk = Kp // _FC1_KSTEPS
    Mp = _round_up(M, 16)

    xp = _pad2d(flat.astype(jnp.bfloat16), Mp, Kp)

    out = pl.pallas_call(
        _fused_fc_kernel,
        out_shape=jax.ShapeDtypeStruct((Mp, Cp), jnp.float32),
        grid_spec=pltpu.PrefetchScalarGridSpec(
            num_scalar_prefetch=0,
            grid=(_FC1_KSTEPS,),
            in_specs=[
                pl.BlockSpec((Mp, tk), lambda k: (0, k)),   # activations
                pl.BlockSpec((tk, N1), lambda k: (k, 0)),   # fc1 weight tile
                pl.BlockSpec((1, N1), lambda k: (0, 0)),    # fc1 bias
                pl.BlockSpec((N1, N2), lambda k: (0, 0)),   # fc2 weight
                pl.BlockSpec((1, N2), lambda k: (0, 0)),    # fc2 bias
                pl.BlockSpec((N2, Cp), lambda k: (0, 0)),   # fc3 weight
                pl.BlockSpec((1, Cp), lambda k: (0, 0)),    # fc3 bias
            ],
            out_specs=pl.BlockSpec((Mp, Cp), lambda k: (0, 0)),
            scratch_shapes=[pltpu.VMEM((Mp, N1), jnp.float32)],
        ),
        compiler_params=pltpu.CompilerParams(
            dimension_semantics=("arbitrary",),
            vmem_limit_bytes=32 * 1024 * 1024),
    )(xp, w1p, b1p, w2p, b2p, w3p, b3p)

    # Padded M rows carry relu(bias) garbage by construction; trim them here.
    return out[:M, :num_classes]


# ----------------------------------------------------------------------------
# Plain-JAX glue (im2col, maxpool) — bandwidth-trivial, left to XLA to fuse
# ----------------------------------------------------------------------------

def im2col(x, kh, kw, pad):
    """x: (N, H, W, C) NHWC -> patches (N*Ho*Wo, kh*kw*C)."""
    if pad:
        x = jnp.pad(x, ((0, 0), (pad, pad), (pad, pad), (0, 0)))
    N, H, W, C = x.shape
    Ho, Wo = H - kh + 1, W - kw + 1
    patches = [x[:, i:i + Ho, j:j + Wo, :] for i in range(kh) for j in range(kw)]
    cols = jnp.stack(patches, axis=3)            # (N, Ho, Wo, kh*kw, C)
    return cols.reshape(N * Ho * Wo, kh * kw * C), (N, Ho, Wo)


def maxpool2x2(x):
    """(N, H, W, C) -> (N, H//2, W//2, C)."""
    return jnp.maximum(
        jnp.maximum(x[:, 0::2, 0::2, :], x[:, 0::2, 1::2, :]),
        jnp.maximum(x[:, 1::2, 0::2, :], x[:, 1::2, 1::2, :]))


# ----------------------------------------------------------------------------
# One-time parameter preparation (outside the jitted forward)
# ----------------------------------------------------------------------------

def conv_weight_to_matrix(w):
    """(Cout, Cin, kh, kw) -> (kh*kw*Cin, Cout), matching im2col ordering."""
    cout, cin, kh, kw = w.shape
    return jnp.transpose(w, (2, 3, 1, 0)).reshape(kh * kw * cin, cout)


def fold_bn(w_mat, b, gamma, beta, mean, var, eps=1e-5):
    scale = gamma / jnp.sqrt(var + eps)
    return w_mat * scale[None, :], (b - mean) * scale + beta


def prepare_params(p):
    """Fold BN, transpose fc weights, zero-pad and bf16-cast — done once."""
    out = {}

    def prep_conv(w, b, bn):
        w_mat = conv_weight_to_matrix(w)
        w_mat, bf = fold_bn(w_mat, b, **bn)
        K, N = w_mat.shape
        Kp, Np = _round_up(K, 128), _round_up(N, 128)
        return (_pad2d(w_mat.astype(jnp.bfloat16), Kp, Np),
                _pad2d(bf.astype(jnp.float32).reshape(1, -1), 1, Np))

    out["c1_w"], out["c1_b"] = prep_conv(p["conv1_w"], p["conv1_b"], p["bn1"])
    out["c2_w"], out["c2_b"] = prep_conv(p["conv2_w"], p["conv2_b"], p["bn2"])
    out["c3_w"], out["c3_b"] = prep_conv(p["conv3_w"], p["conv3_b"], p["bn3"])

    # fc1: permute rows from PyTorch's NCHW flatten order to our NHWC flatten
    # order, then transpose to (K, N) — all at prep time (no runtime .T).
    c3 = p["conv3_w"].shape[0]                                   # 64
    n_fc1, k_fc1 = p["fc1_w"].shape                              # 256, 64*13*13
    hw = int(round((k_fc1 // c3) ** 0.5))                        # 13
    w1 = (p["fc1_w"].reshape(n_fc1, c3, hw, hw)
          .transpose(0, 2, 3, 1).reshape(n_fc1, k_fc1).T)        # (10816, 256)
    _, Kp1 = _fc1_k_tiles(k_fc1)
    N1 = _round_up(n_fc1, 128)                                   # 256
    out["fc1_w"] = _pad2d(w1.astype(jnp.bfloat16), Kp1, N1)
    out["fc1_b"] = _pad2d(p["fc1_b"].astype(jnp.float32).reshape(1, -1), 1, N1)

    # fc2 / fc3 — small, VMEM-resident in the fused fc kernel.
    w2 = p["fc2_w"].T                                            # (256, 64)
    n2p = _round_up(w2.shape[1], 128)                            # 128
    out["fc2_w"] = _pad2d(w2.astype(jnp.bfloat16), w2.shape[0], n2p)
    out["fc2_b"] = _pad2d(p["fc2_b"].astype(jnp.float32).reshape(1, -1), 1, n2p)

    w3 = p["fc3_w"].T                                            # (64, C)
    cp = _round_up(w3.shape[1], 128)                             # 128
    out["fc3_w"] = _pad2d(w3.astype(jnp.bfloat16), n2p, cp)
    out["fc3_b"] = _pad2d(p["fc3_b"].astype(jnp.float32).reshape(1, -1), 1, cp)
    return out


# ----------------------------------------------------------------------------
# Synthetic parameters (shapes from Net33_2.__init__; BN eval-mode stats)
# ----------------------------------------------------------------------------

def init_params(in_channels, num_classes, key):
    ks = jax.random.split(key, 12)

    def conv(k, cout, cin):
        return jax.random.normal(k, (cout, cin, 3, 3), jnp.float32) * 0.05

    def lin(k, out_f, in_f):
        return jax.random.normal(k, (out_f, in_f), jnp.float32) * 0.02

    def bn(c):
        return dict(gamma=jnp.ones((c,), jnp.float32),
                    beta=jnp.zeros((c,), jnp.float32),
                    mean=jnp.zeros((c,), jnp.float32),
                    var=jnp.ones((c,), jnp.float32))

    return dict(
        conv1_w=conv(ks[0], 16, in_channels),
        conv1_b=jax.random.normal(ks[1], (16,), jnp.float32) * 0.01, bn1=bn(16),
        conv2_w=conv(ks[2], 32, 16),
        conv2_b=jax.random.normal(ks[3], (32,), jnp.float32) * 0.01, bn2=bn(32),
        conv3_w=conv(ks[4], 64, 32),
        conv3_b=jax.random.normal(ks[5], (64,), jnp.float32) * 0.01, bn3=bn(64),
        fc1_w=lin(ks[6], 256, 64 * 13 * 13),
        fc1_b=jax.random.normal(ks[7], (256,), jnp.float32) * 0.01,
        fc2_w=lin(ks[8], 64, 256),
        fc2_b=jax.random.normal(ks[9], (64,), jnp.float32) * 0.01,
        fc3_w=lin(ks[10], num_classes, 64),
        fc3_b=jax.random.normal(ks[11], (num_classes,), jnp.float32) * 0.01,
    )


# ----------------------------------------------------------------------------
# Forward pass (jitted; takes only pre-prepared arrays)
# ----------------------------------------------------------------------------

def net33_2_forward(x_nchw, w, *, num_classes):
    batch = x_nchw.shape[0]
    # NCHW -> NHWC, bf16 activations (f32 accumulation inside the kernels).
    x = jnp.transpose(x_nchw, (0, 2, 3, 1)).astype(jnp.bfloat16)

    # ---- layer1: Conv(in,16,3x3,pad=1) + BN + ReLU ----
    cols, (n, h, wd) = im2col(x, 3, 3, 1)
    x = conv_matmul(cols, w["c1_w"], w["c1_b"], 16).reshape(n, h, wd, 16)

    # ---- layer2: Conv(16,32,3x3) + BN + ReLU + MaxPool2 ----
    cols, (n, h, wd) = im2col(x, 3, 3, 0)
    x = conv_matmul(cols, w["c2_w"], w["c2_b"], 32).reshape(n, h, wd, 32)
    x = maxpool2x2(x)

    # ---- layer3: Conv(32,64,3x3,pad=1) + BN + ReLU ----
    cols, (n, h, wd) = im2col(x, 3, 3, 1)
    x = conv_matmul(cols, w["c3_w"], w["c3_b"], 64).reshape(n, h, wd, 64)

    # ---- flatten (NHWC order; fc1 rows were pre-permuted to match) ----
    flat = x.reshape(batch, -1)                         # (N, 64*13*13)

    # ---- fused fc1(ReLU) + fc2(ReLU) + fc3 in a single Pallas launch ----
    return fused_fc(flat, w["fc1_w"], w["fc1_b"], w["fc2_w"], w["fc2_b"],
                    w["fc3_w"], w["fc3_b"], num_classes)


# ----------------------------------------------------------------------------
# Main
# ----------------------------------------------------------------------------

if __name__ == "__main__":
    # fc1 expects 64*13*13 features -> the module implies 28x28 spatial input.
    batch, in_channels, num_classes = 2, 3, 10

    key = jax.random.PRNGKey(0)
    k_x, k_p = jax.random.split(key)
    x = jax.random.normal(k_x, (batch, in_channels, 28, 28), jnp.float32)

    params = init_params(in_channels, num_classes, k_p)
    prepped = prepare_params(params)   # one-time: fold BN, transpose, pad, bf16

    fwd = jax.jit(functools.partial(net33_2_forward, num_classes=num_classes))
    logits = fwd(x, prepped)
    jax.block_until_ready(logits)

    assert logits.shape == (batch, num_classes), logits.shape
    print("KERNEL_OK")
</pallas_src>

<mosaic_0001>
module attributes {stable_mosaic.version = 11 : i64} {
  func.func @_mm_bias_relu_kernel(%arg0: i32, %arg1: memref<1024x128xbf16, #tpu.memory_space<vmem>>, %arg2: memref<128x128xbf16, #tpu.memory_space<vmem>>, %arg3: memref<1x128xf32, #tpu.memory_space<vmem>>, %arg4: memref<1024x128xbf16, #tpu.memory_space<vmem>>) attributes {dimension_semantics = [#tpu.dimension_semantics<parallel>], iteration_bounds = array<i64: 2>, scalar_prefetch = 0 : i64, scratch_operands = 0 : i64, tpu.core_type = #tpu.core_type<tc>, window_params = [{transform_indices = @transform_0, window_bounds = array<i64: 1024, 128>}, {pipeline_mode = #tpu.pipeline_mode<synchronous>, transform_indices = @transform_1, window_bounds = array<i64: 128, 128>}, {pipeline_mode = #tpu.pipeline_mode<synchronous>, transform_indices = @transform_2, window_bounds = array<i64: 1, 128>}, {transform_indices = @transform_3, window_bounds = array<i64: 1024, 128>}]} {
    %c0 = arith.constant 0 : index
    %c0_0 = arith.constant 0 : index
    %0 = vector.load %arg1[%c0, %c0_0] : memref<1024x128xbf16, #tpu.memory_space<vmem>>, vector<1024x128xbf16>
    %c0_1 = arith.constant 0 : index
    %c0_2 = arith.constant 0 : index
    %1 = vector.load %arg2[%c0_1, %c0_2] : memref<128x128xbf16, #tpu.memory_space<vmem>>, vector<128x128xbf16>
    %cst = arith.constant dense<0.000000e+00> : vector<1024x128xf32>
    %2 = tpu.matmul %0, %1, %cst {dimension_numbers = #tpu.dot_dimension_numbers<[1], [0], [0], [1], [0, 0, 1, 1], [], []>} : vector<1024x128xbf16>, vector<128x128xbf16>, vector<1024x128xf32> -> vector<1024x128xf32>
    %c0_3 = arith.constant 0 : index
    %c0_4 = arith.constant 0 : index
    %3 = vector.load %arg3[%c0_3, %c0_4] : memref<1x128xf32, #tpu.memory_space<vmem>>, vector<1x128xf32>
    %4 = vector.broadcast %3 : vector<1x128xf32> to vector<1024x128xf32>
    %5 = arith.addf %2, %4 : vector<1024x128xf32>
    %cst_5 = arith.constant 0.000000e+00 : f32
    %6 = vector.broadcast %cst_5 : f32 to vector<1024x128xf32>
    %7 = arith.maximumf %5, %6 : vector<1024x128xf32>
    %8 = arith.truncf %7 : vector<1024x128xf32> to vector<1024x128xbf16>
    %c0_6 = arith.constant 0 : index
    %c0_7 = arith.constant 0 : index
    %9 = vector.load %arg4[%c0_6, %c0_7] : memref<1024x128xbf16, #tpu.memory_space<vmem>>, vector<1024x128xbf16>
    tpu.vector_store %arg4[%c0_6, %c0_7], %8 {strides = array<i32>} : memref<1024x128xbf16, #tpu.memory_space<vmem>>, vector<1024x128xbf16>,
    return
  }
  func.func @transform_0(%arg0: i32) -> (i32, i32) {
    %c0_i32 = arith.constant 0 : i32
    %c0_i32_0 = arith.constant 0 : i32
    return %arg0, %c0_i32 : i32, i32
  }
  func.func @transform_1(%arg0: i32) -> (i32, i32) {
    %c0_i32 = arith.constant 0 : i32
    %c0_i32_0 = arith.constant 0 : i32
    %c0_i32_1 = arith.constant 0 : i32
    return %c0_i32, %c0_i32_0 : i32, i32
  }
  func.func @transform_2(%arg0: i32) -> (i32, i32) {
    %c0_i32 = arith.constant 0 : i32
    %c0_i32_0 = arith.constant 0 : i32
    %c0_i32_1 = arith.constant 0 : i32
    return %c0_i32, %c0_i32_0 : i32, i32
  }
  func.func @transform_3(%arg0: i32) -> (i32, i32) {
    %c0_i32 = arith.constant 0 : i32
    %c0_i32_0 = arith.constant 0 : i32
    return %arg0, %c0_i32 : i32, i32
  }
}

module attributes {stable_mosaic.version = 11 : i64} {
  func.func @_mm_bias_relu_kernel(%arg0: i32, %arg1: memref<768x256xbf16, #tpu.memory_space<vmem>>, %arg2: memref<256x128xbf16, #tpu.memory_space<vmem>>, %arg3: memref<1x128xf32, #tpu.memory_space<vmem>>, %arg4: memref<768x128xbf16, #tpu.memory_space<vmem>>) attributes {dimension_semantics = [#tpu.dimension_semantics<parallel>], iteration_bounds = array<i64: 2>, scalar_prefetch = 0 : i64, scratch_operands = 0 : i64, tpu.core_type = #tpu.core_type<tc>, window_params = [{transform_indices = @transform_0, window_bounds = array<i64: 768, 256>}, {pipeline_mode = #tpu.pipeline_mode<synchronous>, transform_indices = @transform_1, window_bounds = array<i64: 256, 128>}, {pipeline_mode = #tpu.pipeline_mode<synchronous>, transform_indices = @transform_2, window_bounds = array<i64: 1, 128>}, {transform_indices = @transform_3, window_bounds = array<i64: 768, 128>}]} {
    %c0 = arith.constant 0 : index
    %c0_0 = arith.constant 0 : index
    %0 = vector.load %arg1[%c0, %c0_0] : memref<768x256xbf16, #tpu.memory_space<vmem>>, vector<768x256xbf16>
    %c0_1 = arith.constant 0 : index
    %c0_2 = arith.constant 0 : index
    %1 = vector.load %arg2[%c0_1, %c0_2] : memref<256x128xbf16, #tpu.memory_space<vmem>>, vector<256x128xbf16>
    %cst = arith.constant dense<0.000000e+00> : vector<768x128xf32>
    %2 = tpu.matmul %0, %1, %cst {dimension_numbers = #tpu.dot_dimension_numbers<[1], [0], [0], [1], [0, 0, 1, 1], [], []>} : vector<768x256xbf16>, vector<256x128xbf16>, vector<768x128xf32> -> vector<768x128xf32>
    %c0_3 = arith.constant 0 : index
    %c0_4 = arith.constant 0 : index
    %3 = vector.load %arg3[%c0_3, %c0_4] : memref<1x128xf32, #tpu.memory_space<vmem>>, vector<1x128xf32>
    %4 = vector.broadcast %3 : vector<1x128xf32> to vector<768x128xf32>
    %5 = arith.addf %2, %4 : vector<768x128xf32>
    %cst_5 = arith.constant 0.000000e+00 : f32
    %6 = vector.broadcast %cst_5 : f32 to vector<768x128xf32>
    %7 = arith.maximumf %5, %6 : vector<768x128xf32>
    %8 = arith.truncf %7 : vector<768x128xf32> to vector<768x128xbf16>
    %c0_6 = arith.constant 0 : index
    %c0_7 = arith.constant 0 : index
    %9 = vector.load %arg4[%c0_6, %c0_7] : memref<768x128xbf16, #tpu.memory_space<vmem>>, vector<768x128xbf16>
    tpu.vector_store %arg4[%c0_6, %c0_7], %8 {strides = array<i32>} : memref<768x128xbf16, #tpu.memory_space<vmem>>, vector<768x128xbf16>,
    return
  }
  func.func @transform_0(%arg0: i32) -> (i32, i32) {
    %c0_i32 = arith.constant 0 : i32
    %c0_i32_0 = arith.constant 0 : i32
    return %arg0, %c0_i32 : i32, i32
  }
  func.func @transform_1(%arg0: i32) -> (i32, i32) {
    %c0_i32 = arith.constant 0 : i32
    %c0_i32_0 = arith.constant 0 : i32
    %c0_i32_1 = arith.constant 0 : i32
    return %c0_i32, %c0_i32_0 : i32, i32
  }
  func.func @transform_2(%arg0: i32) -> (i32, i32) {
    %c0_i32 = arith.constant 0 : i32
    %c0_i32_0 = arith.constant 0 : i32
    %c0_i32_1 = arith.constant 0 : i32
    return %c0_i32, %c0_i32_0 : i32, i32
  }
  func.func @transform_3(%arg0: i32) -> (i32, i32) {
    %c0_i32 = arith.constant 0 : i32
    %c0_i32_0 = arith.constant 0 : i32
    return %arg0, %c0_i32 : i32, i32
  }
}

module attributes {stable_mosaic.version = 11 : i64} {
  func.func @_mm_bias_relu_kernel(%arg0: memref<512x384xbf16, #tpu.memory_space<vmem>>, %arg1: memref<384x128xbf16, #tpu.memory_space<vmem>>, %arg2: memref<1x128xf32, #tpu.memory_space<vmem>>, %arg3: memref<512x128xbf16, #tpu.memory_space<vmem>>) attributes {dimension_semantics = [], scalar_prefetch = 0 : i64, scratch_operands = 0 : i64, tpu.core_type = #tpu.core_type<tc>} {
    %c0 = arith.constant 0 : index
    %c0_0 = arith.constant 0 : index
    %0 = vector.load %arg0[%c0, %c0_0] : memref<512x384xbf16, #tpu.memory_space<vmem>>, vector<512x384xbf16>
    %c0_1 = arith.constant 0 : index
    %c0_2 = arith.constant 0 : index
    %1 = vector.load %arg1[%c0_1, %c0_2] : memref<384x128xbf16, #tpu.memory_space<vmem>>, vector<384x128xbf16>
    %cst = arith.constant dense<0.000000e+00> : vector<512x128xf32>
    %2 = tpu.matmul %0, %1, %cst {dimension_numbers = #tpu.dot_dimension_numbers<[1], [0], [0], [1], [0, 0, 1, 1], [], []>} : vector<512x384xbf16>, vector<384x128xbf16>, vector<512x128xf32> -> vector<512x128xf32>
    %c0_3 = arith.constant 0 : index
    %c0_4 = arith.constant 0 : index
    %3 = vector.load %arg2[%c0_3, %c0_4] : memref<1x128xf32, #tpu.memory_space<vmem>>, vector<1x128xf32>
    %4 = vector.broadcast %3 : vector<1x128xf32> to vector<512x128xf32>
    %5 = arith.addf %2, %4 : vector<512x128xf32>
    %cst_5 = arith.constant 0.000000e+00 : f32
    %6 = vector.broadcast %cst_5 : f32 to vector<512x128xf32>
    %7 = arith.maximumf %5, %6 : vector<512x128xf32>
    %8 = arith.truncf %7 : vector<512x128xf32> to vector<512x128xbf16>
    %c0_6 = arith.constant 0 : index
    %c0_7 = arith.constant 0 : index
    %9 = vector.load %arg3[%c0_6, %c0_7] : memref<512x128xbf16, #tpu.memory_space<vmem>>, vector<512x128xbf16>
    tpu.vector_store %arg3[%c0_6, %c0_7], %8 {strides = array<i32>} : memref<512x128xbf16, #tpu.memory_space<vmem>>, vector<512x128xbf16>,
    return
  }
}

module attributes {stable_mosaic.version = 11 : i64} {
  func.func @_fused_fc_kernel(%arg0: i32, %arg1: memref<16x5504xbf16, #tpu.memory_space<vmem>>, %arg2: memref<5504x256xbf16, #tpu.memory_space<vmem>>, %arg3: memref<1x256xf32, #tpu.memory_space<vmem>>, %arg4: memref<256x128xbf16, #tpu.memory_space<vmem>>, %arg5: memref<1x128xf32, #tpu.memory_space<vmem>>, %arg6: memref<128x128xbf16, #tpu.memory_space<vmem>>, %arg7: memref<1x128xf32, #tpu.memory_space<vmem>>, %arg8: memref<16x128xf32, #tpu.memory_space<vmem>>, %arg9: memref<16x256xf32, #tpu.memory_space<vmem>>) attributes {dimension_semantics = [#tpu.dimension_semantics<arbitrary>], iteration_bounds = array<i64: 2>, scalar_prefetch = 0 : i64, scratch_operands = 1 : i64, tpu.core_type = #tpu.core_type<tc>, window_params = [{transform_indices = @transform_0, window_bounds = array<i64: 16, 5504>}, {transform_indices = @transform_1, window_bounds = array<i64: 5504, 256>}, {pipeline_mode = #tpu.pipeline_mode<synchronous>, transform_indices = @transform_2, window_bounds = array<i64: 1, 256>}, {pipeline_mode = #tpu.pipeline_mode<synchronous>, transform_indices = @transform_3, window_bounds = array<i64: 256, 128>}, {pipeline_mode = #tpu.pipeline_mode<synchronous>, transform_indices = @transform_4, window_bounds = array<i64: 1, 128>}, {pipeline_mode = #tpu.pipeline_mode<synchronous>, transform_indices = @transform_5, window_bounds = array<i64: 128, 128>}, {pipeline_mode = #tpu.pipeline_mode<synchronous>, transform_indices = @transform_6, window_bounds = array<i64: 1, 128>}, {pipeline_mode = #tpu.pipeline_mode<synchronous>, transform_indices = @transform_7, window_bounds = array<i64: 16, 128>}]} {
    %c0_i32 = arith.constant 0 : i32
    %0 = arith.cmpi eq, %arg0, %c0_i32 : i32
    %1 = arith.extui %0 : i1 to i32
    %c0_i32_0 = arith.constant 0 : i32
    %2 = arith.cmpi ne, %1, %c0_i32_0 : i32
    scf.if %2 {
      %cst_9 = arith.constant 0.000000e+00 : f32
      %12 = vector.broadcast %cst_9 : f32 to vector<16x256xf32>
      %c0_10 = arith.constant 0 : index
      %c0_11 = arith.constant 0 : index
      %13 = vector.load %arg9[%c0_10, %c0_11] : memref<16x256xf32, #tpu.memory_space<vmem>>, vector<16x256xf32>
      tpu.vector_store %arg9[%c0_10, %c0_11], %12 {strides = array<i32>} : memref<16x256xf32, #tpu.memory_space<vmem>>, vector<16x256xf32>,
    } else {
    }
    %c0 = arith.constant 0 : index
    %c0_1 = arith.constant 0 : index
    %3 = vector.load %arg9[%c0, %c0_1] : memref<16x256xf32, #tpu.memory_space<vmem>>, vector<16x256xf32>
    %c0_2 = arith.constant 0 : index
    %c0_3 = arith.constant 0 : index
    %4 = vector.load %arg1[%c0_2, %c0_3] : memref<16x5504xbf16, #tpu.memory_space<vmem>>, vector<16x5504xbf16>
    %c0_4 = arith.constant 0 : index
    %c0_5 = arith.constant 0 : index
    %5 = vector.load %arg2[%c0_4, %c0_5] : memref<5504x256xbf16, #tpu.memory_space<vmem>>, vector<5504x256xbf16>
    %cst = arith.constant dense<0.000000e+00> : vector<16x256xf32>
    %6 = tpu.matmul %4, %5, %cst {dimension_numbers = #tpu.dot_dimension_numbers<[1], [0], [0], [1], [0, 0, 1, 1], [], []>} : vector<16x5504xbf16>, vector<5504x256xbf16>, vector<16x256xf32> -> vector<16x256xf32>
    %7 = arith.addf %3, %6 : vector<16x256xf32>
    %c0_6 = arith.constant 0 : index
    %c0_7 = arith.constant 0 : index
    %8 = vector.load %arg9[%c0_6, %c0_7] : memref<16x256xf32, #tpu.memory_space<vmem>>, vector<16x256xf32>
    tpu.vector_store %arg9[%c0_6, %c0_7], %7 {strides = array<i32>} : memref<16x256xf32, #tpu.memory_space<vmem>>, vector<16x256xf32>,
    %c1_i32 = arith.constant 1 : i32
    %9 = arith.cmpi eq, %arg0, %c1_i32 : i32
    %10 = arith.extui %9 : i1 to i32
    %c0_i32_8 = arith.constant 0 : i32
    %11 = arith.cmpi ne, %10, %c0_i32_8 : i32
    scf.if %11 {
      %c0_9 = arith.constant 0 : index
      %c0_10 = arith.constant 0 : index
      %12 = vector.load %arg9[%c0_9, %c0_10] : memref<16x256xf32, #tpu.memory_space<vmem>>, vector<16x256xf32>
      %c0_11 = arith.constant 0 : index
      %c0_12 = arith.constant 0 : index
      %13 = vector.load %arg3[%c0_11, %c0_12] : memref<1x256xf32, #tpu.memory_space<vmem>>, vector<1x256xf32>
      %14 = vector.broadcast %13 : vector<1x256xf32> to vector<16x256xf32>
      %15 = arith.addf %12, %14 : vector<16x256xf32>
      %cst_13 = arith.constant 0.000000e+00 : f32
      %16 = vector.broadcast %cst_13 : f32 to vector<16x256xf32>
      %17 = arith.maximumf %15, %16 : vector<16x256xf32>
      %18 = arith.truncf %17 : vector<16x256xf32> to vector<16x256xbf16>
      %c0_14 = arith.constant 0 : index
      %c0_15 = arith.constant 0 : index
      %19 = vector.load %arg4[%c0_14, %c0_15] : memref<256x128xbf16, #tpu.memory_space<vmem>>, vector<256x128xbf16>
      %cst_16 = arith.constant dense<0.000000e+00> : vector<16x128xf32>
      %20 = tpu.matmul %18, %19, %cst_16 {dimension_numbers = #tpu.dot_dimension_numbers<[1], [0], [0], [1], [0, 0, 1, 1], [], []>} : vector<16x256xbf16>, vector<256x128xbf16>, vector<16x128xf32> -> vector<16x128xf32>
      %c0_17 = arith.constant 0 : index
      %c0_18 = arith.constant 0 : index
      %21 = vector.load %arg5[%c0_17, %c0_18] : memref<1x128xf32, #tpu.memory_space<vmem>>, vector<1x128xf32>
      %22 = vector.broadcast %21 : vector<1x128xf32> to vector<16x128xf32>
      %23 = arith.addf %20, %22 : vector<16x128xf32>
      %cst_19 = arith.constant 0.000000e+00 : f32
      %24 = vector.broadcast %cst_19 : f32 to vector<16x128xf32>
      %25 = arith.maximumf %23, %24 : vector<16x128xf32>
      %26 = arith.truncf %25 : vector<16x128xf32> to vector<16x128xbf16>
      %c0_20 = arith.constant 0 : index
      %c0_21 = arith.constant 0 : index
      %27 = vector.load %arg6[%c0_20, %c0_21] : memref<128x128xbf16, #tpu.memory_space<vmem>>, vector<128x128xbf16>
      %cst_22 = arith.constant dense<0.000000e+00> : vector<16x128xf32>
      %28 = tpu.matmul %26, %27, %cst_22 {dimension_numbers = #tpu.dot_dimension_numbers<[1], [0], [0], [1], [0, 0, 1, 1], [], []>} : vector<16x128xbf16>, vector<128x128xbf16>, vector<16x128xf32> -> vector<16x128xf32>
      %c0_23 = arith.constant 0 : index
      %c0_24 = arith.constant 0 : index
      %29 = vector.load %arg7[%c0_23, %c0_24] : memref<1x128xf32, #tpu.memory_space<vmem>>, vector<1x128xf32>
      %30 = vector.broadcast %29 : vector<1x128xf32> to vector<16x128xf32>
      %31 = arith.addf %28, %30 : vector<16x128xf32>
      %c0_25 = arith.constant 0 : index
      %c0_26 = arith.constant 0 : index
      %32 = vector.load %arg8[%c0_25, %c0_26] : memref<16x128xf32, #tpu.memory_space<vmem>>, vector<16x128xf32>
      tpu.vector_store %arg8[%c0_25, %c0_26], %31 {strides = array<i32>} : memref<16x128xf32, #tpu.memory_space<vmem>>, vector<16x128xf32>,
    } else {
    }
    return
  }
  func.func @transform_0(%arg0: i32) -> (i32, i32) {
    %c0_i32 = arith.constant 0 : i32
    %c0_i32_0 = arith.constant 0 : i32
    return %c0_i32, %arg0 : i32, i32
  }
  func.func @transform_1(%arg0: i32) -> (i32, i32) {
    %c0_i32 = arith.constant 0 : i32
    %c0_i32_0 = arith.constant 0 : i32
    return %arg0, %c0_i32 : i32, i32
  }
  func.func @transform_2(%arg0: i32) -> (i32, i32) {
    %c0_i32 = arith.constant 0 : i32
    %c0_i32_0 = arith.constant 0 : i32
    %c0_i32_1 = arith.constant 0 : i32
    return %c0_i32, %c0_i32_0 : i32, i32
  }
  func.func @transform_3(%arg0: i32) -> (i32, i32) {
    %c0_i32 = arith.constant 0 : i32
    %c0_i32_0 = arith.constant 0 : i32
    %c0_i32_1 = arith.constant 0 : i32
    return %c0_i32, %c0_i32_0 : i32, i32
  }
  func.func @transform_4(%arg0: i32) -> (i32, i32) {
    %c0_i32 = arith.constant 0 : i32
    %c0_i32_0 = arith.constant 0 : i32
    %c0_i32_1 = arith.constant 0 : i32
    return %c0_i32, %c0_i32_0 : i32, i32
  }
  func.func @transform_5(%arg0: i32) -> (i32, i32) {
    %c0_i32 = arith.constant 0 : i32
    %c0_i32_0 = arith.constant 0 : i32
    %c0_i32_1 = arith.constant 0 : i32
    return %c0_i32, %c0_i32_0 : i32, i32
  }
  func.func @transform_6(%arg0: i32) -> (i32, i32) {
    %c0_i32 = arith.constant 0 : i32
    %c0_i32_0 = arith.constant 0 : i32
    %c0_i32_1 = arith.constant 0 : i32
    return %c0_i32, %c0_i32_0 : i32, i32
  }
  func.func @transform_7(%arg0: i32) -> (i32, i32) {
    %c0_i32 = arith.constant 0 : i32
    %c0_i32_0 = arith.constant 0 : i32
    %c0_i32_1 = arith.constant 0 : i32
    return %c0_i32, %c0_i32_0 : i32, i32
  }
}

</mosaic_0001>

<bundles_post_ra>
// kernel: net33_2_forward.4
= control target key start
LH: loop header
LB: loop body
LE: loop exit
PB: predicated region body
PF: predicated region fallthrough
CT: control target
= control target key end

     0   :  { %s3190_s12 = smov 0   ;;  %s3503_s0 = inlined_call_operand.vmem [shape: bf16[2048,128], index: 0, kind: input, shape index: {}]   ;;  %s3504_s1 = inlined_call_operand.vmem [shape: bf16[128,128], index: 1, kind: input, shape index: {}]   ;;  %s3505_s2 = inlined_call_operand.vmem [shape: f32[1,128], index: 2, kind: input, shape index: {}]   ;;  %s3506_s3 = inlined_call_operand.vmem [shape: bf16[2048,128], index: 3, kind: output, shape index: {}]  }
   0x1 LB: > { %s2127_s13 = sadd.s32 4294967295, %s3168_s12   ;;  %p2131_p0 = scmp.ge.s32.totalorder %s3168_s12, 1  ;;  %s3168_s12 = sphi %s3190_s12, %s13_s12  }
   0x2   : > { %p138_p1 = scmp.lt.s32.totalorder %s3168_s12, 3 }
   0x4   : > { %p139_p2 = pnand %p2131_p0, %p138_p1 }
   0x5   : > { %v3090_v0 = vld [vmem:[%s3504_s1] sm:$0xff] (!%p139_p2)   ;;  %s2132_s16 = sshll.u32 (!%p139_p2), %s2127_s13, 7  ;;  %v3091_v1 = vld [vmem:[%s3504_s1 + $0x8] sm:$0xff] (!%p139_p2)   ;;  %v3092_v2 = vld [vmem:[%s3504_s1 + $0x10] sm:$0xff] (!%p139_p2)  }
   0x6   : > { %142 = sbr.rel (%p139_p2) target bundleno = 380 (0x17c), region = 32  ;;  %p163_p3 = scmp.lt.s32.totalorder (!%p139_p2), %s2132_s16, 255  ;;  %2922 = vmatprep.subr.bf16.mxu0 (!%p139_p2), %v3090_v0  ;;  %3066 = vmatprep.subr.bf16.mxu1 (!%p139_p2), %v3090_v0  ;;  %v3093_v3 = vld [vmem:[%s3504_s1 + $0x18] sm:$0xff] (!%p139_p2)   ;;  %v3094_v6 = vld [vmem:[%s3504_s1 + $0x20] sm:$0xff] (!%p139_p2)   ;;  %v3095_v7 = vld [vmem:[%s3504_s1 + $0x28] sm:$0xff] (!%p139_p2)  }
   0x7   : > { %2923 = vmatpush3.bf16.msra.mxu0 (!%p139_p2), %v3090_v0  ;;  %3074 = vmatpush3.bf16.msra.mxu1 (!%p139_p2), %v3090_v0  ;;  %v3096_v8 = vld [vmem:[%s3504_s1 + $0x30] sm:$0xff] (!%p139_p2)   ;;  %v3097_v9 = vld [vmem:[%s3504_s1 + $0x38] sm:$0xff] (!%p139_p2)  }
   0x8   : > { %2924 = vmatprep.subr.bf16.mxu0 (!%p139_p2), %v3091_v1  ;;  %3067 = vmatprep.subr.bf16.mxu1 (!%p139_p2), %v3091_v1 }
   0xb   : > { %2925 = vmatpush3.bf16.msra.mxu0 (!%p139_p2), %v3091_v1  ;;  %3075 = vmatpush3.bf16.msra.mxu1 (!%p139_p2), %v3091_v1 }
   0xc   : > { %2926 = vmatprep.subr.bf16.mxu0 (!%p139_p2), %v3092_v2  ;;  %3068 = vmatprep.subr.bf16.mxu1 (!%p139_p2), %v3092_v2 }
   0xd   : > { %s3508_s16 = smov (!%p163_p3, %s2132_s16), 255 }
   0xe   : > { %s2133_s21 = sshll.u32 %s3508_s16, 2 }
   0xf   : > { %s3215_s24 = scalar_lea.vmem %s3503_s0, %s2133_s21  ;;  %2927 = vmatpush3.bf16.msra.mxu0 %v3092_v2  ;;  %3076 = vmatpush3.bf16.msra.mxu1 %v3092_v2  ;;  %s3314_s13 = scalar_lea.vmem %s3506_s3, %s2133_s21 }
  0x10   : > { %v3098_v4 = vld [vmem:[%s3215_s24] sm:$0xff]   ;;  %2928 = vmatprep.subr.bf16.mxu0 %v3093_v3  ;;  %3069 = vmatprep.subr.bf16.mxu1 %v3093_v3  ;;  %v3100_v10 = vld [vmem:[%s3215_s24 + $0x8] sm:$0xff]   ;;  %v3102_v12 = vld [vmem:[%s3215_s24 + $0x10] sm:$0xff]  }
  0x11   : > { %v3099_v5 = vld [vmem:[%s3215_s24 + $0x100] sm:$0xff]   ;;  %2938 = vmatprep.mubr.bf16.mxu0 %v3098_v4  ;;  %v3101_v11 = vld [vmem:[%s3215_s24 + $0x108] sm:$0xff]   ;;  %v3103_v13 = vld [vmem:[%s3215_s24 + $0x110] sm:$0xff]  }
  0x12   : > { %3002 = vmatprep.mubr.bf16.mxu1 %v3099_v5  ;;  %v3104_v14 = vld [vmem:[%s3215_s24 + $0x18] sm:$0xff]   ;;  %v3106_v16 = vld [vmem:[%s3215_s24 + $0x20] sm:$0xff]   ;;  %v3108_v18 = vld [vmem:[%s3215_s24 + $0x28] sm:$0xff]  }
  0x13   : > { %2929 = vmatpush3.bf16.msra.mxu0 %v3093_v3  ;;  %3077 = vmatpush3.bf16.msra.mxu1 %v3093_v3  ;;  %v3105_v15 = vld [vmem:[%s3215_s24 + $0x118] sm:$0xff]   ;;  %v3107_v17 = vld [vmem:[%s3215_s24 + $0x120] sm:$0xff]   ;;  %v3109_v19 = vld [vmem:[%s3215_s24 + $0x128] sm:$0xff]  }
  0x14   : > { %2930 = vmatprep.subr.bf16.mxu0 %v3094_v6  ;;  %3070 = vmatprep.subr.bf16.mxu1 %v3094_v6  ;;  %v3110_v20 = vld [vmem:[%s3215_s24 + $0x30] sm:$0xff]   ;;  %v3112_v22 = vld [vmem:[%s3215_s24 + $0x38] sm:$0xff]   ;;  %v3114_v24 = vld [vmem:[%s3215_s24 + $0x40] sm:$0xff]  }
  0x15   : > { %v3111_v21 = vld [vmem:[%s3215_s24 + $0x130] sm:$0xff]   ;;  %v3113_v23 = vld [vmem:[%s3215_s24 + $0x138] sm:$0xff]   ;;  %v3115_v25 = vld [vmem:[%s3215_s24 + $0x140] sm:$0xff]  }
  0x16   : > { %v3116_v26 = vld [vmem:[%s3215_s24 + $0x48] sm:$0xff]   ;;  %v3118_v28 = vld [vmem:[%s3215_s24 + $0x50] sm:$0xff]   ;;  %v3120_v30 = vld [vmem:[%s3215_s24 + $0x58] sm:$0xff]  }
  0x17   : > { %2931 = vmatpush3.bf16.msra.mxu0 %v3094_v6  ;;  %3078 = vmatpush3.bf16.msra.mxu1 %v3094_v6  ;;  %v3117_v27 = vld [vmem:[%s3215_s24 + $0x148] sm:$0xff]   ;;  %v3119_v29 = vld [vmem:[%s3215_s24 + $0x150] sm:$0xff]   ;;  %v3121_v31 = vld [vmem:[%s3215_s24 + $0x158] sm:$0xff]  }
  0x18   : > { %2932 = vmatprep.subr.bf16.mxu0 %v3095_v7  ;;  %3071 = vmatprep.subr.bf16.mxu1 %v3095_v7  ;;  %v3122_v32 = vld [vmem:[%s3215_s24 + $0x60] sm:$0xff]   ;;  %v3124_v34 = vld [vmem:[%s3215_s24 + $0x68] sm:$0xff]   ;;  %v3126_v36 = vld [vmem:[%s3215_s24 + $0x70] sm:$0xff]  }
  0x19   : > { %v3123_v33 = vld [vmem:[%s3215_s24 + $0x160] sm:$0xff]   ;;  %v3125_v35 = vld [vmem:[%s3215_s24 + $0x168] sm:$0xff]   ;;  %v3127_v37 = vld [vmem:[%s3215_s24 + $0x170] sm:$0xff]  }
  0x1a   : > { %v3128_v38 = vld [vmem:[%s3215_s24 + $0x78] sm:$0xff]   ;;  %v3130_v40 = vld [vmem:[%s3215_s24 + $0x80] sm:$0xff]   ;;  %v3132_v42 = vld [vmem:[%s3215_s24 + $0x88] sm:$0xff]  }
  0x1b   : > { %2933 = vmatpush3.bf16.msra.mxu0 %v3095_v7  ;;  %3079 = vmatpush3.bf16.msra.mxu1 %v3095_v7  ;;  %v3129_v39 = vld [vmem:[%s3215_s24 + $0x178] sm:$0xff]   ;;  %v3131_v41 = vld [vmem:[%s3215_s24 + $0x180] sm:$0xff]   ;;  %v3133_v43 = vld [vmem:[%s3215_s24 + $0x188] sm:$0xff]  }
  0x1c   : > { %2934 = vmatprep.subr.bf16.mxu0 %v3096_v8  ;;  %3072 = vmatprep.subr.bf16.mxu1 %v3096_v8  ;;  %v3134_v44 = vld [vmem:[%s3215_s24 + $0x90] sm:$0xff]   ;;  %v3136_v46 = vld [vmem:[%s3215_s24 + $0x98] sm:$0xff]   ;;  %v3138_v48 = vld [vmem:[%s3215_s24 + $0xa0] sm:$0xff]  }
  0x1d   : > { %v3135_v45 = vld [vmem:[%s3215_s24 + $0x190] sm:$0xff]   ;;  %v3137_v47 = vld [vmem:[%s3215_s24 + $0x198] sm:$0xff]   ;;  %v3139_v49 = vld [vmem:[%s3215_s24 + $0x1a0] sm:$0xff]  }
  0x1e   : > { %v3140_v50 = vld [vmem:[%s3215_s24 + $0xa8] sm:$0xff]   ;;  %v3142_v52 = vld [vmem:[%s3215_s24 + $0xb0] sm:$0xff]   ;;  %v3144_v54 = vld [vmem:[%s3215_s24 + $0xb8] sm:$0xff]  }
  0x1f   : > { %2935 = vmatpush3.bf16.msra.mxu0 %v3096_v8  ;;  %3080 = vmatpush3.bf16.msra.mxu1 %v3096_v8  ;;  %v3141_v51 = vld [vmem:[%s3215_s24 + $0x1a8] sm:$0xff]   ;;  %v3143_v53 = vld [vmem:[%s3215_s24 + $0x1b0] sm:$0xff]   ;;  %v3145_v55 = vld [vmem:[%s3215_s24 + $0x1b8] sm:$0xff]  }
  0x20   : > { %2936 = vmatprep.subr.bf16.mxu0 %v3097_v9  ;;  %3073 = vmatprep.subr.bf16.mxu1 %v3097_v9  ;;  %v3146_v56 = vld [vmem:[%s3215_s24 + $0xc0] sm:$0xff]   ;;  %v3148_v58 = vld [vmem:[%s3215_s24 + $0xc8] sm:$0xff]   ;;  %v3150_v60 = vld [vmem:[%s3215_s24 + $0xd0] sm:$0xff]  }
  0x21   : > { %v3147_v57 = vld [vmem:[%s3215_s24 + $0x1c0] sm:$0xff]   ;;  %v3149_v59 = vld [vmem:[%s3215_s24 + $0x1c8] sm:$0xff]   ;;  %v3151_v61 = vld [vmem:[%s3215_s24 + $0x1d0] sm:$0xff]  }
  0x22   : > { %v3152_v62 = vld [vmem:[%s3215_s24 + $0xd8] sm:$0xff]   ;;  %v3154_v0 = vld [vmem:[%s3215_s24 + $0xe0] sm:$0xff]   ;;  %v3156_v2 = vld [vmem:[%s3215_s24 + $0xe8] sm:$0xff]  }
  0x23   : > { %2937 = vmatpush3.bf16.msra.mxu0 %v3097_v9  ;;  %3081 = vmatpush3.bf16.msra.mxu1 %v3097_v9  ;;  %v3153_v63 = vld [vmem:[%s3215_s24 + $0x1d8] sm:$0xff]   ;;  %v3155_v1 = vld [vmem:[%s3215_s24 + $0x1e0] sm:$0xff]   ;;  %v3157_v3 = vld [vmem:[%s3215_s24 + $0x1e8] sm:$0xff]  }
  0x24   : > { %v3158_v4 = vld [vmem:[%s3215_s24 + $0xf0] sm:$0xff]   ;;  %v3160_v6 = vld [vmem:[%s3215_s24 + $0xf8] sm:$0xff]   ;;  %v3299_v8 = vld [vmem:[%s3505_s2] ss:$0 sm:$0xff] }
  0x25   : > { %v3159_v5 = vld [vmem:[%s3215_s24 + $0x1f0] sm:$0xff]   ;;  %v3161_v7 = vld [vmem:[%s3215_s24 + $0x1f8] sm:$0xff]  }
  0x26   : > { %2939 = vmatmul.mubr.bf16.vlgmr.msra.gmra.mrb[0].mxu0 %v3100_v10  ;;  %3003 = vmatmul.mubr.bf16.vlgmr.msra.gmra.mrb[0].mxu1 %v3101_v11 }
  0x27   : > { %2942 = vmatprep.mubr.bf16.mxu0 %v3102_v12  ;;  %3006 = vmatprep.mubr.bf16.mxu1 %v3103_v13 }
  0x2e   : > { %2943 = vmatmul.mubr.bf16.gmra.mrb[4].mxu0 %v3104_v14  ;;  %3007 = vmatmul.mubr.bf16.gmra.mrb[4].mxu1 %v3105_v15 }
  0x2f   : > { %2946 = vmatprep.mubr.bf16.mxu0 %v3106_v16  ;;  %3010 = vmatprep.mubr.bf16.mxu1 %v3107_v17 }
  0x36   : > { %2947 = vmatmul.mubr.bf16.gmra.mrb[8].mxu0 %v3108_v18  ;;  %3011 = vmatmul.mubr.bf16.gmra.mrb[8].mxu1 %v3109_v19 }
  0x37   : > { %2950 = vmatprep.mubr.bf16.mxu0 %v3110_v20  ;;  %3014 = vmatprep.mubr.bf16.mxu1 %v3111_v21 }
  0x3e   : > { %2951 = vmatmul.mubr.bf16.gmra.mrb[12].mxu0 %v3112_v22  ;;  %3015 = vmatmul.mubr.bf16.gmra.mrb[12].mxu1 %v3113_v23 }
  0x3f   : > { %2954 = vmatprep.mubr.bf16.mxu0 %v3114_v24  ;;  %3018 = vmatprep.mubr.bf16.mxu1 %v3115_v25 }
  0x46   : > { %2955 = vmatmul.mubr.bf16.gmra.mrb[16].mxu0 %v3116_v26  ;;  %3019 = vmatmul.mubr.bf16.gmra.mrb[16].mxu1 %v3117_v27 }
  0x47   : > { %2958 = vmatprep.mubr.bf16.mxu0 %v3118_v28  ;;  %3022 = vmatprep.mubr.bf16.mxu1 %v3119_v29 }
  0x4e   : > { %2959 = vmatmul.mubr.bf16.gmra.mrb[20].mxu0 %v3120_v30  ;;  %3023 = vmatmul.mubr.bf16.gmra.mrb[20].mxu1 %v3121_v31 }
  0x4f   : > { %2962 = vmatprep.mubr.bf16.mxu0 %v3122_v32  ;;  %3026 = vmatprep.mubr.bf16.mxu1 %v3123_v33 }
  0x56   : > { %2963 = vmatmul.mubr.bf16.gmra.mrb[24].mxu0 %v3124_v34  ;;  %3027 = vmatmul.mubr.bf16.gmra.mrb[24].mxu1 %v3125_v35 }
  0x57   : > { %2966 = vmatprep.mubr.bf16.mxu0 %v3126_v36  ;;  %3030 = vmatprep.mubr.bf16.mxu1 %v3127_v37 }
  0x5e   : > { %2967 = vmatmul.mubr.bf16.gmra.mrb[28].mxu0 %v3128_v38  ;;  %3031 = vmatmul.mubr.bf16.gmra.mrb[28].mxu1 %v3129_v39 }
  0x5f   : > { %2970 = vmatprep.mubr.bf16.mxu0 %v3130_v40  ;;  %3034 = vmatprep.mubr.bf16.mxu1 %v3131_v41 }
  0x66   : > { %2971 = vmatmul.mubr.bf16.gmra.mrb[32].mxu0 %v3132_v42  ;;  %3035 = vmatmul.mubr.bf16.gmra.mrb[32].mxu1 %v3133_v43 }
  0x67   : > { %2974 = vmatprep.mubr.bf16.mxu0 %v3134_v44  ;;  %3038 = vmatprep.mubr.bf16.mxu1 %v3135_v45 }
  0x6e   : > { %2975 = vmatmul.mubr.bf16.gmra.mrb[36].mxu0 %v3136_v46  ;;  %3039 = vmatmul.mubr.bf16.gmra.mrb[36].mxu1 %v3137_v47 }
  0x6f   : > { %2978 = vmatprep.mubr.bf16.mxu0 %v3138_v48  ;;  %3042 = vmatprep.mubr.bf16.mxu1 %v3139_v49 }
  0x76   : > { %2979 = vmatmul.mubr.bf16.gmra.mrb[40].mxu0 %v3140_v50  ;;  %3043 = vmatmul.mubr.bf16.gmra.mrb[40].mxu1 %v3141_v51 }
  0x77   : > { %2982 = vmatprep.mubr.bf16.mxu0 %v3142_v52  ;;  %3046 = vmatprep.mubr.bf16.mxu1 %v3143_v53 }
  0x7e   : > { %2983 = vmatmul.mubr.bf16.gmra.mrb[44].mxu0 %v3144_v54  ;;  %3047 = vmatmul.mubr.bf16.gmra.mrb[44].mxu1 %v3145_v55 }
  0x7f   : > { %2986 = vmatprep.mubr.bf16.mxu0 %v3146_v56  ;;  %3050 = vmatprep.mubr.bf16.mxu1 %v3147_v57 }
  0x86   : > { %2987 = vmatmul.mubr.bf16.gmra.mrb[48].mxu0 %v3148_v58  ;;  %3051 = vmatmul.mubr.bf16.gmra.mrb[48].mxu1 %v3149_v59 }
  0x87   : > { %2990 = vmatprep.mubr.bf16.mxu0 %v3150_v60  ;;  %3054 = vmatprep.mubr.bf16.mxu1 %v3151_v61 }
  0x8e   : > { %2991 = vmatmul.mubr.bf16.gmra.mrb[52].mxu0 %v3152_v62  ;;  %3055 = vmatmul.mubr.bf16.gmra.mrb[52].mxu1 %v3153_v63 }
  0x8f   : > { %2994 = vmatprep.mubr.bf16.mxu0 %v3154_v0  ;;  %3058 = vmatprep.mubr.bf16.mxu1 %v3155_v1 }
  0x96   : > { %2995 = vmatmul.mubr.bf16.gmra.mrb[56].mxu0 %v3156_v2  ;;  %3059 = vmatmul.mubr.bf16.gmra.mrb[56].mxu1 %v3157_v3 }
  0x97   : > { %2998 = vmatprep.mubr.bf16.mxu0 %v3158_v4  ;;  %3062 = vmatprep.mubr.bf16.mxu1 %v3159_v5 }
  0x9e   : > { %2999 = vmatmul.mubr.bf16.gmra.mrb[60].mxu0 %v3160_v6  ;;  %3063 = vmatmul.mubr.bf16.gmra.mrb[60].mxu1 %v3161_v7 }
  0xf9   : > { %v2940_v9 = vpop.f32.mrb[0].mxu0  ;;  %v3004_v10 = vpop.f32.mrb[0].mxu1 }
  0xfa   : > { %v801_v11 = vadd.f32 %v2940_v9, %v3299_v8  ;;  %v1057_v12 = vadd.f32 %v3004_v10, %v3299_v8  ;;  %v792_v13 = vpop.f32.mrb[1].mxu0  ;;  %v1048_v14 = vpop.f32.mrb[1].mxu1 }
  0xfb   : > { %v793_v15 = vadd.f32 %v3299_v8, %v792_v13  ;;  %v1049_v16 = vadd.f32 %v3299_v8, %v1048_v14  ;;  %v2941_v17 = vpop.f32.mrb[2].mxu0  ;;  %v3005_v18 = vpop.f32.mrb[2].mxu1 }
  0xfc   : > { %v804_v19 = vadd.f32 %v2941_v17, %v3299_v8  ;;  %v1060_v20 = vadd.f32 %v3005_v18, %v3299_v8  ;;  %v795_v21 = vpop.f32.mrb[3].mxu0  ;;  %v1051_v22 = vpop.f32.mrb[3].mxu1  ;;  %v1305_v25 = vmax.f32 %v801_v11, 0.0  ;;  %v1369_v26 = vmax.f32 %v1057_v12, 0.0 }
  0xfd   : > { %v796_v23 = vadd.f32 %v3299_v8, %v795_v21  ;;  %v1052_v24 = vadd.f32 %v3299_v8, %v1051_v22  ;;  %v1303_v29 = vmax.f32 %v793_v15, 0.0  ;;  %v1367_v30 = vmax.f32 %v1049_v16, 0.0 }
  0xfe   : > { %v1306_v27 = vmax.f32 %v804_v19, 0.0  ;;  %v1370_v28 = vmax.f32 %v1060_v20, 0.0 }
  0xff   : > { %v1304_v31 = vmax.f32 %v796_v23, 0.0  ;;  %v1368_v32 = vmax.f32 %v1052_v24, 0.0 }
 0x100   : > { %v2475_v33 = vpack.c.bf16 %v1306_v27, %v1305_v25  ;;  %v2635_v34 = vpack.c.bf16 %v1370_v28, %v1369_v26 }
 0x101   : > { %v2470_v35 = vpack.c.bf16 %v1304_v31, %v1303_v29  ;;  %v2630_v36 = vpack.c.bf16 %v1368_v32, %v1367_v30  ;;  %v2944_v37 = vpop.f32.mrb[4].mxu0  ;;  %v3008_v38 = vpop.f32.mrb[4].mxu1 }
 0x102   : > { %2787 = vst [vmem:[%s3314_s13 + $0x8] sm:$0xff] %v2475_v33   ;;  %2819 = vst [vmem:[%s3314_s13 + $0x108] sm:$0xff] %v2635_v34   ;;  %v817_v39 = vadd.f32 %v2944_v37, %v3299_v8  ;;  %v1073_v40 = vadd.f32 %v3008_v38, %v3299_v8  ;;  %v808_v41 = vpop.f32.mrb[5].mxu0  ;;  %v1064_v42 = vpop.f32.mrb[5].mxu1 }
 0x103   : > { %2471 = vst [vmem:[%s3314_s13] sm:$0xff] %v2470_v35   ;;  %2818 = vst [vmem:[%s3314_s13 + $0x100] sm:$0xff] %v2630_v36   ;;  %v809_v43 = vadd.f32 %v3299_v8, %v808_v41  ;;  %v1065_v44 = vadd.f32 %v3299_v8, %v1064_v42  ;;  %v2945_v45 = vpop.f32.mrb[6].mxu0  ;;  %v3009_v46 = vpop.f32.mrb[6].mxu1 }
 0x104   : > { %v820_v47 = vadd.f32 %v2945_v45, %v3299_v8  ;;  %v1076_v48 = vadd.f32 %v3009_v46, %v3299_v8  ;;  %v811_v49 = vpop.f32.mrb[7].mxu0  ;;  %v1067_v50 = vpop.f32.mrb[7].mxu1  ;;  %v1309_v53 = vmax.f32 %v817_v39, 0.0  ;;  %v1373_v54 = vmax.f32 %v1073_v40, 0.0 }
 0x105   : > { %v812_v51 = vadd.f32 %v3299_v8, %v811_v49  ;;  %v1068_v52 = vadd.f32 %v3299_v8, %v1067_v50  ;;  %v1307_v57 = vmax.f32 %v809_v43, 0.0  ;;  %v1371_v58 = vmax.f32 %v1065_v44, 0.0 }
 0x106   : > { %v1310_v55 = vmax.f32 %v820_v47, 0.0  ;;  %v1374_v56 = vmax.f32 %v1076_v48, 0.0 }
 0x107   : > { %v1308_v59 = vmax.f32 %v812_v51, 0.0  ;;  %v1372_v60 = vmax.f32 %v1068_v52, 0.0 }
 0x108   : > { %v2485_v61 = vpack.c.bf16 %v1310_v55, %v1309_v53  ;;  %v2645_v62 = vpack.c.bf16 %v1374_v56, %v1373_v54 }
 0x109   : > { %v2480_v63 = vpack.c.bf16 %v1308_v59, %v1307_v57  ;;  %v2640_v0 = vpack.c.bf16 %v1372_v60, %v1371_v58  ;;  %v2948_v1 = vpop.f32.mrb[8].mxu0  ;;  %v3012_v2 = vpop.f32.mrb[8].mxu1 }
 0x10a   : > { %2789 = vst [vmem:[%s3314_s13 + $0x18] sm:$0xff] %v2485_v61   ;;  %2821 = vst [vmem:[%s3314_s13 + $0x118] sm:$0xff] %v2645_v62   ;;  %v833_v3 = vadd.f32 %v2948_v1, %v3299_v8  ;;  %v1089_v4 = vadd.f32 %v3012_v2, %v3299_v8  ;;  %v824_v5 = vpop.f32.mrb[9].mxu0  ;;  %v1080_v6 = vpop.f32.mrb[9].mxu1 }
 0x10b   : > { %2788 = vst [vmem:[%s3314_s13 + $0x10] sm:$0xff] %v2480_v63   ;;  %2820 = vst [vmem:[%s3314_s13 + $0x110] sm:$0xff] %v2640_v0   ;;  %v825_v7 = vadd.f32 %v3299_v8, %v824_v5  ;;  %v1081_v9 = vadd.f32 %v3299_v8, %v1080_v6  ;;  %v2949_v10 = vpop.f32.mrb[10].mxu0  ;;  %v3013_v11 = vpop.f32.mrb[10].mxu1 }
 0x10c   : > { %v836_v12 = vadd.f32 %v2949_v10, %v3299_v8  ;;  %v1092_v13 = vadd.f32 %v3013_v11, %v3299_v8  ;;  %v827_v14 = vpop.f32.mrb[11].mxu0  ;;  %v1083_v15 = vpop.f32.mrb[11].mxu1  ;;  %v1313_v18 = vmax.f32 %v833_v3, 0.0  ;;  %v1377_v19 = vmax.f32 %v1089_v4, 0.0 }
 0x10d   : > { %v828_v16 = vadd.f32 %v3299_v8, %v827_v14  ;;  %v1084_v17 = vadd.f32 %v3299_v8, %v1083_v15  ;;  %v1311_v22 = vmax.f32 %v825_v7, 0.0  ;;  %v1375_v23 = vmax.f32 %v1081_v9, 0.0 }
 0x10e   : > { %v1314_v20 = vmax.f32 %v836_v12, 0.0  ;;  %v1378_v21 = vmax.f32 %v1092_v13, 0.0 }
 0x10f   : > { %v1312_v24 = vmax.f32 %v828_v16, 0.0  ;;  %v1376_v25 = vmax.f32 %v1084_v17, 0.0 }
 0x110   : > { %v2495_v26 = vpack.c.bf16 %v1314_v20, %v1313_v18  ;;  %v2655_v27 = vpack.c.bf16 %v1378_v21, %v1377_v19 }
 0x111   : > { %v2490_v28 = vpack.c.bf16 %v1312_v24, %v1311_v22  ;;  %v2650_v29 = vpack.c.bf16 %v1376_v25, %v1375_v23  ;;  %v2952_v30 = vpop.f32.mrb[12].mxu0  ;;  %v3016_v31 = vpop.f32.mrb[12].mxu1 }
 0x112   : > { %2791 = vst [vmem:[%s3314_s13 + $0x28] sm:$0xff] %v2495_v26   ;;  %2823 = vst [vmem:[%s3314_s13 + $0x128] sm:$0xff] %v2655_v27   ;;  %v849_v32 = vadd.f32 %v2952_v30, %v3299_v8  ;;  %v1105_v33 = vadd.f32 %v3016_v31, %v3299_v8  ;;  %v840_v34 = vpop.f32.mrb[13].mxu0  ;;  %v1096_v35 = vpop.f32.mrb[13].mxu1 }
 0x113   : > { %2790 = vst [vmem:[%s3314_s13 + $0x20] sm:$0xff] %v2490_v28   ;;  %2822 = vst [vmem:[%s3314_s13 + $0x120] sm:$0xff] %v2650_v29   ;;  %v841_v36 = vadd.f32 %v3299_v8, %v840_v34  ;;  %v1097_v37 = vadd.f32 %v3299_v8, %v1096_v35  ;;  %v2953_v38 = vpop.f32.mrb[14].mxu0  ;;  %v3017_v39 = vpop.f32.mrb[14].mxu1 }
 0x114   : > { %v852_v40 = vadd.f32 %v2953_v38, %v3299_v8  ;;  %v1108_v41 = vadd.f32 %v3017_v39, %v3299_v8  ;;  %v843_v42 = vpop.f32.mrb[15].mxu0  ;;  %v1099_v43 = vpop.f32.mrb[15].mxu1  ;;  %v1317_v46 = vmax.f32 %v849_v32, 0.0  ;;  %v1381_v47 = vmax.f32 %v1105_v33, 0.0 }
 0x115   : > { %v844_v44 = vadd.f32 %v3299_v8, %v843_v42  ;;  %v1100_v45 = vadd.f32 %v3299_v8, %v1099_v43  ;;  %v1315_v50 = vmax.f32 %v841_v36, 0.0  ;;  %v1379_v51 = vmax.f32 %v1097_v37, 0.0 }
 0x116   : > { %v1318_v48 = vmax.f32 %v852_v40, 0.0  ;;  %v1382_v49 = vmax.f32 %v1108_v41, 0.0 }
 0x117   : > { %v1316_v52 = vmax.f32 %v844_v44, 0.0  ;;  %v1380_v53 = vmax.f32 %v1100_v45, 0.0 }
 0x118   : > { %v2505_v54 = vpack.c.bf16 %v1318_v48, %v1317_v46  ;;  %v2665_v55 = vpack.c.bf16 %v1382_v49, %v1381_v47 }
 0x119   : > { %v2500_v56 = vpack.c.bf16 %v1316_v52, %v1315_v50  ;;  %v2660_v57 = vpack.c.bf16 %v1380_v53, %v1379_v51  ;;  %v2956_v58 = vpop.f32.mrb[16].mxu0  ;;  %v3020_v59 = vpop.f32.mrb[16].mxu1 }
 0x11a   : > { %2793 = vst [vmem:[%s3314_s13 + $0x38] sm:$0xff] %v2505_v54   ;;  %2825 = vst [vmem:[%s3314_s13 + $0x138] sm:$0xff] %v2665_v55   ;;  %v865_v60 = vadd.f32 %v2956_v58, %v3299_v8  ;;  %v1121_v61 = vadd.f32 %v3020_v59, %v3299_v8  ;;  %v856_v62 = vpop.f32.mrb[17].mxu0  ;;  %v1112_v63 = vpop.f32.mrb[17].mxu1 }
 0x11b   : > { %2792 = vst [vmem:[%s3314_s13 + $0x30] sm:$0xff] %v2500_v56   ;;  %2824 = vst [vmem:[%s3314_s13 + $0x130] sm:$0xff] %v2660_v57   ;;  %v857_v0 = vadd.f32 %v3299_v8, %v856_v62  ;;  %v1113_v1 = vadd.f32 %v3299_v8, %v1112_v63  ;;  %v2957_v2 = vpop.f32.mrb[18].mxu0  ;;  %v3021_v3 = vpop.f32.mrb[18].mxu1 }
 0x11c   : > { %v868_v4 = vadd.f32 %v2957_v2, %v3299_v8  ;;  %v1124_v5 = vadd.f32 %v3021_v3, %v3299_v8  ;;  %v859_v6 = vpop.f32.mrb[19].mxu0  ;;  %v1115_v7 = vpop.f32.mrb[19].mxu1  ;;  %v1321_v11 = vmax.f32 %v865_v60, 0.0  ;;  %v1385_v12 = vmax.f32 %v1121_v61, 0.0 }
 0x11d   : > { %v860_v9 = vadd.f32 %v3299_v8, %v859_v6  ;;  %v1116_v10 = vadd.f32 %v3299_v8, %v1115_v7  ;;  %v1319_v15 = vmax.f32 %v857_v0, 0.0  ;;  %v1383_v16 = vmax.f32 %v1113_v1, 0.0 }
 0x11e   : > { %v1322_v13 = vmax.f32 %v868_v4, 0.0  ;;  %v1386_v14 = vmax.f32 %v1124_v5, 0.0 }
 0x11f   : > { %v1320_v17 = vmax.f32 %v860_v9, 0.0  ;;  %v1384_v18 = vmax.f32 %v1116_v10, 0.0 }
 0x120   : > { %v2515_v19 = vpack.c.bf16 %v1322_v13, %v1321_v11  ;;  %v2675_v20 = vpack.c.bf16 %v1386_v14, %v1385_v12 }
 0x121   : > { %v2510_v21 = vpack.c.bf16 %v1320_v17, %v1319_v15  ;;  %v2670_v22 = vpack.c.bf16 %v1384_v18, %v1383_v16  ;;  %v2960_v23 = vpop.f32.mrb[20].mxu0  ;;  %v3024_v24 = vpop.f32.mrb[20].mxu1 }
 0x122   : > { %2795 = vst [vmem:[%s3314_s13 + $0x48] sm:$0xff] %v2515_v19   ;;  %2827 = vst [vmem:[%s3314_s13 + $0x148] sm:$0xff] %v2675_v20   ;;  %v881_v25 = vadd.f32 %v2960_v23, %v3299_v8  ;;  %v1137_v26 = vadd.f32 %v3024_v24, %v3299_v8  ;;  %v872_v27 = vpop.f32.mrb[21].mxu0  ;;  %v1128_v28 = vpop.f32.mrb[21].mxu1 }
 0x123   : > { %2794 = vst [vmem:[%s3314_s13 + $0x40] sm:$0xff] %v2510_v21   ;;  %2826 = vst [vmem:[%s3314_s13 + $0x140] sm:$0xff] %v2670_v22   ;;  %v873_v29 = vadd.f32 %v3299_v8, %v872_v27  ;;  %v1129_v30 = vadd.f32 %v3299_v8, %v1128_v28  ;;  %v2961_v31 = vpop.f32.mrb[22].mxu0  ;;  %v3025_v32 = vpop.f32.mrb[22].mxu1 }
 0x124   : > { %v884_v33 = vadd.f32 %v2961_v31, %v3299_v8  ;;  %v1140_v34 = vadd.f32 %v3025_v32, %v3299_v8  ;;  %v875_v35 = vpop.f32.mrb[23].mxu0  ;;  %v1131_v36 = vpop.f32.mrb[23].mxu1  ;;  %v1325_v39 = vmax.f32 %v881_v25, 0.0  ;;  %v1389_v40 = vmax.f32 %v1137_v26, 0.0 }
 0x125   : > { %v876_v37 = vadd.f32 %v3299_v8, %v875_v35  ;;  %v1132_v38 = vadd.f32 %v3299_v8, %v1131_v36  ;;  %v1323_v43 = vmax.f32 %v873_v29, 0.0  ;;  %v1387_v44 = vmax.f32 %v1129_v30, 0.0 }
 0x126   : > { %v1326_v41 = vmax.f32 %v884_v33, 0.0  ;;  %v1390_v42 = vmax.f32 %v1140_v34, 0.0 }
 0x127   : > { %v1324_v45 = vmax.f32 %v876_v37, 0.0  ;;  %v1388_v46 = vmax.f32 %v1132_v38, 0.0 }
 0x128   : > { %v2525_v47 = vpack.c.bf16 %v1326_v41, %v1325_v39  ;;  %v2685_v48 = vpack.c.bf16 %v1390_v42, %v1389_v40 }
 0x129   : > { %v2520_v49 = vpack.c.bf16 %v1324_v45, %v1323_v43  ;;  %v2680_v50 = vpack.c.bf16 %v1388_v46, %v1387_v44  ;;  %v2964_v51 = vpop.f32.mrb[24].mxu0  ;;  %v3028_v52 = vpop.f32.mrb[24].mxu1 }
 0x12a   : > { %2797 = vst [vmem:[%s3314_s13 + $0x58] sm:$0xff] %v2525_v47   ;;  %2829 = vst [vmem:[%s3314_s13 + $0x158] sm:$0xff] %v2685_v48   ;;  %v897_v53 = vadd.f32 %v2964_v51, %v3299_v8  ;;  %v1153_v54 = vadd.f32 %v3028_v52, %v3299_v8  ;;  %v888_v55 = vpop.f32.mrb[25].mxu0  ;;  %v1144_v56 = vpop.f32.mrb[25].mxu1 }
 0x12b   : > { %2796 = vst [vmem:[%s3314_s13 + $0x50] sm:$0xff] %v2520_v49   ;;  %2828 = vst [vmem:[%s3314_s13 + $0x150] sm:$0xff] %v2680_v50   ;;  %v889_v57 = vadd.f32 %v3299_v8, %v888_v55  ;;  %v1145_v58 = vadd.f32 %v3299_v8, %v1144_v56  ;;  %v2965_v59 = vpop.f32.mrb[26].mxu0  ;;  %v3029_v60 = vpop.f32.mrb[26].mxu1 }
 0x12c   : > { %v900_v61 = vadd.f32 %v2965_v59, %v3299_v8  ;;  %v1156_v62 = vadd.f32 %v3029_v60, %v3299_v8  ;;  %v891_v63 = vpop.f32.mrb[27].mxu0  ;;  %v1147_v0 = vpop.f32.mrb[27].mxu1  ;;  %v1329_v3 = vmax.f32 %v897_v53, 0.0  ;;  %v1393_v4 = vmax.f32 %v1153_v54, 0.0 }
 0x12d   : > { %v892_v1 = vadd.f32 %v3299_v8, %v891_v63  ;;  %v1148_v2 = vadd.f32 %v3299_v8, %v1147_v0  ;;  %v1327_v7 = vmax.f32 %v889_v57, 0.0  ;;  %v1391_v9 = vmax.f32 %v1145_v58, 0.0 }
 0x12e   : > { %v1330_v5 = vmax.f32 %v900_v61, 0.0  ;;  %v1394_v6 = vmax.f32 %v1156_v62, 0.0 }
 0x12f   : > { %v1328_v10 = vmax.f32 %v892_v1, 0.0  ;;  %v1392_v11 = vmax.f32 %v1148_v2, 0.0 }
 0x130   : > { %v2535_v12 = vpack.c.bf16 %v1330_v5, %v1329_v3  ;;  %v2695_v13 = vpack.c.bf16 %v1394_v6, %v1393_v4 }
 0x131   : > { %v2530_v14 = vpack.c.bf16 %v1328_v10, %v1327_v7  ;;  %v2690_v15 = vpack.c.bf16 %v1392_v11, %v1391_v9  ;;  %v2968_v16 = vpop.f32.mrb[28].mxu0  ;;  %v3032_v17 = vpop.f32.mrb[28].mxu1 }
 0x132   : > { %2799 = vst [vmem:[%s3314_s13 + $0x68] sm:$0xff] %v2535_v12   ;;  %2831 = vst [vmem:[%s3314_s13 + $0x168] sm:$0xff] %v2695_v13   ;;  %v913_v18 = vadd.f32 %v2968_v16, %v3299_v8  ;;  %v1169_v19 = vadd.f32 %v3032_v17, %v3299_v8  ;;  %v904_v20 = vpop.f32.mrb[29].mxu0  ;;  %v1160_v21 = vpop.f32.mrb[29].mxu1 }
 0x133   : > { %2798 = vst [vmem:[%s3314_s13 + $0x60] sm:$0xff] %v2530_v14   ;;  %2830 = vst [vmem:[%s3314_s13 + $0x160] sm:$0xff] %v2690_v15   ;;  %v905_v22 = vadd.f32 %v3299_v8, %v904_v20  ;;  %v1161_v23 = vadd.f32 %v3299_v8, %v1160_v21  ;;  %v2969_v24 = vpop.f32.mrb[30].mxu0  ;;  %v3033_v25 = vpop.f32.mrb[30].mxu1 }
 0x134   : > { %v916_v26 = vadd.f32 %v2969_v24, %v3299_v8  ;;  %v1172_v27 = vadd.f32 %v3033_v25, %v3299_v8  ;;  %v907_v28 = vpop.f32.mrb[31].mxu0  ;;  %v1163_v29 = vpop.f32.mrb[31].mxu1  ;;  %v1333_v32 = vmax.f32 %v913_v18, 0.0  ;;  %v1397_v33 = vmax.f32 %v1169_v19, 0.0 }
 0x135   : > { %v908_v30 = vadd.f32 %v3299_v8, %v907_v28  ;;  %v1164_v31 = vadd.f32 %v3299_v8, %v1163_v29  ;;  %v1331_v36 = vmax.f32 %v905_v22, 0.0  ;;  %v1395_v37 = vmax.f32 %v1161_v23, 0.0 }
 0x136   : > { %v1334_v34 = vmax.f32 %v916_v26, 0.0  ;;  %v1398_v35 = vmax.f32 %v1172_v27, 0.0 }
 0x137   : > { %v1332_v38 = vmax.f32 %v908_v30, 0.0  ;;  %v1396_v39 = vmax.f32 %v1164_v31, 0.0 }
 0x138   : > { %v2545_v40 = vpack.c.bf16 %v1334_v34, %v1333_v32  ;;  %v2705_v41 = vpack.c.bf16 %v1398_v35, %v1397_v33 }
 0x139   : > { %v2540_v42 = vpack.c.bf16 %v1332_v38, %v1331_v36  ;;  %v2700_v43 = vpack.c.bf16 %v1396_v39, %v1395_v37  ;;  %v2972_v44 = vpop.f32.mrb[32].mxu0  ;;  %v3036_v45 = vpop.f32.mrb[32].mxu1 }
 0x13a   : > { %2801 = vst [vmem:[%s3314_s13 + $0x78] sm:$0xff] %v2545_v40   ;;  %2833 = vst [vmem:[%s3314_s13 + $0x178] sm:$0xff] %v2705_v41   ;;  %v929_v46 = vadd.f32 %v2972_v44, %v3299_v8  ;;  %v1185_v47 = vadd.f32 %v3036_v45, %v3299_v8  ;;  %v920_v48 = vpop.f32.mrb[33].mxu0  ;;  %v1176_v49 = vpop.f32.mrb[33].mxu1 }
 0x13b   : > { %2800 = vst [vmem:[%s3314_s13 + $0x70] sm:$0xff] %v2540_v42   ;;  %2832 = vst [vmem:[%s3314_s13 + $0x170] sm:$0xff] %v2700_v43   ;;  %v921_v50 = vadd.f32 %v3299_v8, %v920_v48  ;;  %v1177_v51 = vadd.f32 %v3299_v8, %v1176_v49  ;;  %v2973_v52 = vpop.f32.mrb[34].mxu0  ;;  %v3037_v53 = vpop.f32.mrb[34].mxu1 }
 0x13c   : > { %v932_v54 = vadd.f32 %v2973_v52, %v3299_v8  ;;  %v1188_v55 = vadd.f32 %v3037_v53, %v3299_v8  ;;  %v923_v56 = vpop.f32.mrb[35].mxu0  ;;  %v1179_v57 = vpop.f32.mrb[35].mxu1  ;;  %v1337_v60 = vmax.f32 %v929_v46, 0.0  ;;  %v1401_v61 = vmax.f32 %v1185_v47, 0.0 }
 0x13d   : > { %v924_v58 = vadd.f32 %v3299_v8, %v923_v56  ;;  %v1180_v59 = vadd.f32 %v3299_v8, %v1179_v57  ;;  %v1335_v0 = vmax.f32 %v921_v50, 0.0  ;;  %v1399_v1 = vmax.f32 %v1177_v51, 0.0 }
 0x13e   : > { %v1338_v62 = vmax.f32 %v932_v54, 0.0  ;;  %v1402_v63 = vmax.f32 %v1188_v55, 0.0 }
 0x13f   : > { %v1336_v2 = vmax.f32 %v924_v58, 0.0  ;;  %v1400_v3 = vmax.f32 %v1180_v59, 0.0 }
 0x140   : > { %v2555_v4 = vpack.c.bf16 %v1338_v62, %v1337_v60  ;;  %v2715_v5 = vpack.c.bf16 %v1402_v63, %v1401_v61 }
 0x141   : > { %v2550_v6 = vpack.c.bf16 %v1336_v2, %v1335_v0  ;;  %v2710_v7 = vpack.c.bf16 %v1400_v3, %v1399_v1  ;;  %v2976_v9 = vpop.f32.mrb[36].mxu0  ;;  %v3040_v10 = vpop.f32.mrb[36].mxu1 }
 0x142   : > { %2803 = vst [vmem:[%s3314_s13 + $0x88] sm:$0xff] %v2555_v4   ;;  %2835 = vst [vmem:[%s3314_s13 + $0x188] sm:$0xff] %v2715_v5   ;;  %v945_v11 = vadd.f32 %v2976_v9, %v3299_v8  ;;  %v1201_v12 = vadd.f32 %v3040_v10, %v3299_v8  ;;  %v936_v13 = vpop.f32.mrb[37].mxu0  ;;  %v1192_v14 = vpop.f32.mrb[37].mxu1 }
 0x143   : > { %2802 = vst [vmem:[%s3314_s13 + $0x80] sm:$0xff] %v2550_v6   ;;  %2834 = vst [vmem:[%s3314_s13 + $0x180] sm:$0xff] %v2710_v7   ;;  %v937_v15 = vadd.f32 %v3299_v8, %v936_v13  ;;  %v1193_v16 = vadd.f32 %v3299_v8, %v1192_v14  ;;  %v2977_v17 = vpop.f32.mrb[38].mxu0  ;;  %v3041_v18 = vpop.f32.mrb[38].mxu1 }
 0x144   : > { %v948_v19 = vadd.f32 %v2977_v17, %v3299_v8  ;;  %v1204_v20 = vadd.f32 %v3041_v18, %v3299_v8  ;;  %v939_v21 = vpop.f32.mrb[39].mxu0  ;;  %v1195_v22 = vpop.f32.mrb[39].mxu1  ;;  %v1341_v25 = vmax.f32 %v945_v11, 0.0  ;;  %v1405_v26 = vmax.f32 %v1201_v12, 0.0 }
 0x145   : > { %v940_v23 = vadd.f32 %v3299_v8, %v939_v21  ;;  %v1196_v24 = vadd.f32 %v3299_v8, %v1195_v22  ;;  %v1339_v29 = vmax.f32 %v937_v15, 0.0  ;;  %v1403_v30 = vmax.f32 %v1193_v16, 0.0 }
 0x146   : > { %v1342_v27 = vmax.f32 %v948_v19, 0.0  ;;  %v1406_v28 = vmax.f32 %v1204_v20, 0.0 }
 0x147   : > { %v1340_v31 = vmax.f32 %v940_v23, 0.0  ;;  %v1404_v32 = vmax.f32 %v1196_v24, 0.0 }
 0x148   : > { %v2565_v33 = vpack.c.bf16 %v1342_v27, %v1341_v25  ;;  %v2725_v34 = vpack.c.bf16 %v1406_v28, %v1405_v26 }
 0x149   : > { %v2560_v35 = vpack.c.bf16 %v1340_v31, %v1339_v29  ;;  %v2720_v36 = vpack.c.bf16 %v1404_v32, %v1403_v30  ;;  %v2980_v37 = vpop.f32.mrb[40].mxu0  ;;  %v3044_v38 = vpop.f32.mrb[40].mxu1 }
 0x14a   : > { %2805 = vst [vmem:[%s3314_s13 + $0x98] sm:$0xff] %v2565_v33   ;;  %2837 = vst [vmem:[%s3314_s13 + $0x198] sm:$0xff] %v2725_v34   ;;  %v961_v39 = vadd.f32 %v2980_v37, %v3299_v8  ;;  %v1217_v40 = vadd.f32 %v3044_v38, %v3299_v8  ;;  %v952_v41 = vpop.f32.mrb[41].mxu0  ;;  %v1208_v42 = vpop.f32.mrb[41].mxu1 }
 0x14b   : > { %2804 = vst [vmem:[%s3314_s13 + $0x90] sm:$0xff] %v2560_v35   ;;  %2836 = vst [vmem:[%s3314_s13 + $0x190] sm:$0xff] %v2720_v36   ;;  %v953_v43 = vadd.f32 %v3299_v8, %v952_v41  ;;  %v1209_v44 = vadd.f32 %v3299_v8, %v1208_v42  ;;  %v2981_v45 = vpop.f32.mrb[42].mxu0  ;;  %v3045_v46 = vpop.f32.mrb[42].mxu1 }
 0x14c   : > { %v964_v47 = vadd.f32 %v2981_v45, %v3299_v8  ;;  %v1220_v48 = vadd.f32 %v3045_v46, %v3299_v8  ;;  %v955_v49 = vpop.f32.mrb[43].mxu0  ;;  %v1211_v50 = vpop.f32.mrb[43].mxu1  ;;  %v1345_v53 = vmax.f32 %v961_v39, 0.0  ;;  %v1409_v54 = vmax.f32 %v1217_v40, 0.0 }
 0x14d   : > { %v956_v51 = vadd.f32 %v3299_v8, %v955_v49  ;;  %v1212_v52 = vadd.f32 %v3299_v8, %v1211_v50  ;;  %v1343_v57 = vmax.f32 %v953_v43, 0.0  ;;  %v1407_v58 = vmax.f32 %v1209_v44, 0.0 }
 0x14e   : > { %v1346_v55 = vmax.f32 %v964_v47, 0.0  ;;  %v1410_v56 = vmax.f32 %v1220_v48, 0.0 }
 0x14f   : > { %v1344_v59 = vmax.f32 %v956_v51, 0.0  ;;  %v1408_v60 = vmax.f32 %v1212_v52, 0.0 }
 0x150   : > { %v2575_v61 = vpack.c.bf16 %v1346_v55, %v1345_v53  ;;  %v2735_v62 = vpack.c.bf16 %v1410_v56, %v1409_v54 }
 0x151   : > { %v2570_v63 = vpack.c.bf16 %v1344_v59, %v1343_v57  ;;  %v2730_v0 = vpack.c.bf16 %v1408_v60, %v1407_v58  ;;  %v2984_v1 = vpop.f32.mrb[44].mxu0  ;;  %v3048_v2 = vpop.f32.mrb[44].mxu1 }
 0x152   : > { %2807 = vst [vmem:[%s3314_s13 + $0xa8] sm:$0xff] %v2575_v61   ;;  %2839 = vst [vmem:[%s3314_s13 + $0x1a8] sm:$0xff] %v2735_v62   ;;  %v977_v3 = vadd.f32 %v2984_v1, %v3299_v8  ;;  %v1233_v4 = vadd.f32 %v3048_v2, %v3299_v8  ;;  %v968_v5 = vpop.f32.mrb[45].mxu0  ;;  %v1224_v6 = vpop.f32.mrb[45].mxu1 }
 0x153   : > { %2806 = vst [vmem:[%s3314_s13 + $0xa0] sm:$0xff] %v2570_v63   ;;  %2838 = vst [vmem:[%s3314_s13 + $0x1a0] sm:$0xff] %v2730_v0   ;;  %v969_v7 = vadd.f32 %v3299_v8, %v968_v5  ;;  %v1225_v9 = vadd.f32 %v3299_v8, %v1224_v6  ;;  %v2985_v10 = vpop.f32.mrb[46].mxu0  ;;  %v3049_v11 = vpop.f32.mrb[46].mxu1 }
 0x154   : > { %v980_v12 = vadd.f32 %v2985_v10, %v3299_v8  ;;  %v1236_v13 = vadd.f32 %v3049_v11, %v3299_v8  ;;  %v971_v14 = vpop.f32.mrb[47].mxu0  ;;  %v1227_v15 = vpop.f32.mrb[47].mxu1  ;;  %v1349_v18 = vmax.f32 %v977_v3, 0.0  ;;  %v1413_v19 = vmax.f32 %v1233_v4, 0.0 }
 0x155   : > { %v972_v16 = vadd.f32 %v3299_v8, %v971_v14  ;;  %v1228_v17 = vadd.f32 %v3299_v8, %v1227_v15  ;;  %v1347_v22 = vmax.f32 %v969_v7, 0.0  ;;  %v1411_v23 = vmax.f32 %v1225_v9, 0.0 }
 0x156   : > { %v1350_v20 = vmax.f32 %v980_v12, 0.0  ;;  %v1414_v21 = vmax.f32 %v1236_v13, 0.0 }
 0x157   : > { %v1348_v24 = vmax.f32 %v972_v16, 0.0  ;;  %v1412_v25 = vmax.f32 %v1228_v17, 0.0 }
 0x158   : > { %v2585_v26 = vpack.c.bf16 %v1350_v20, %v1349_v18  ;;  %v2745_v27 = vpack.c.bf16 %v1414_v21, %v1413_v19 }
 0x159   : > { %v2580_v28 = vpack.c.bf16 %v1348_v24, %v1347_v22  ;;  %v2740_v29 = vpack.c.bf16 %v1412_v25, %v1411_v23  ;;  %v2988_v30 = vpop.f32.mrb[48].mxu0  ;;  %v3052_v31 = vpop.f32.mrb[48].mxu1 }
 0x15a   : > { %2809 = vst [vmem:[%s3314_s13 + $0xb8] sm:$0xff] %v2585_v26   ;;  %2841 = vst [vmem:[%s3314_s13 + $0x1b8] sm:$0xff] %v2745_v27   ;;  %v993_v32 = vadd.f32 %v2988_v30, %v3299_v8  ;;  %v1249_v33 = vadd.f32 %v3052_v31, %v3299_v8  ;;  %v984_v34 = vpop.f32.mrb[49].mxu0  ;;  %v1240_v35 = vpop.f32.mrb[49].mxu1 }
 0x15b   : > { %2808 = vst [vmem:[%s3314_s13 + $0xb0] sm:$0xff] %v2580_v28   ;;  %2840 = vst [vmem:[%s3314_s13 + $0x1b0] sm:$0xff] %v2740_v29   ;;  %v985_v36 = vadd.f32 %v3299_v8, %v984_v34  ;;  %v1241_v37 = vadd.f32 %v3299_v8, %v1240_v35  ;;  %v2989_v38 = vpop.f32.mrb[50].mxu0  ;;  %v3053_v39 = vpop.f32.mrb[50].mxu1 }
 0x15c   : > { %v996_v40 = vadd.f32 %v2989_v38, %v3299_v8  ;;  %v1252_v41 = vadd.f32 %v3053_v39, %v3299_v8  ;;  %v987_v42 = vpop.f32.mrb[51].mxu0  ;;  %v1243_v43 = vpop.f32.mrb[51].mxu1  ;;  %v1353_v46 = vmax.f32 %v993_v32, 0.0  ;;  %v1417_v47 = vmax.f32 %v1249_v33, 0.0 }
 0x15d   : > { %v988_v44 = vadd.f32 %v3299_v8, %v987_v42  ;;  %v1244_v45 = vadd.f32 %v3299_v8, %v1243_v43  ;;  %v1351_v50 = vmax.f32 %v985_v36, 0.0  ;;  %v1415_v51 = vmax.f32 %v1241_v37, 0.0 }
 0x15e   : > { %v1354_v48 = vmax.f32 %v996_v40, 0.0  ;;  %v1418_v49 = vmax.f32 %v1252_v41, 0.0 }
 0x15f   : > { %v1352_v52 = vmax.f32 %v988_v44, 0.0  ;;  %v1416_v53 = vmax.f32 %v1244_v45, 0.0 }
 0x160   : > { %v2595_v54 = vpack.c.bf16 %v1354_v48, %v1353_v46  ;;  %v2755_v55 = vpack.c.bf16 %v1418_v49, %v1417_v47 }
 0x161   : > { %v2590_v56 = vpack.c.bf16 %v1352_v52, %v1351_v50  ;;  %v2750_v57 = vpack.c.bf16 %v1416_v53, %v1415_v51  ;;  %v2992_v58 = vpop.f32.mrb[52].mxu0  ;;  %v3056_v59 = vpop.f32.mrb[52].mxu1 }
 0x162   : > { %2811 = vst [vmem:[%s3314_s13 + $0xc8] sm:$0xff] %v2595_v54   ;;  %2843 = vst [vmem:[%s3314_s13 + $0x1c8] sm:$0xff] %v2755_v55   ;;  %v1009_v60 = vadd.f32 %v2992_v58, %v3299_v8  ;;  %v1265_v61 = vadd.f32 %v3056_v59, %v3299_v8  ;;  %v1000_v62 = vpop.f32.mrb[53].mxu0  ;;  %v1256_v63 = vpop.f32.mrb[53].mxu1 }
 0x163   : > { %2810 = vst [vmem:[%s3314_s13 + $0xc0] sm:$0xff] %v2590_v56   ;;  %2842 = vst [vmem:[%s3314_s13 + $0x1c0] sm:$0xff] %v2750_v57   ;;  %v1001_v0 = vadd.f32 %v3299_v8, %v1000_v62  ;;  %v1257_v1 = vadd.f32 %v3299_v8, %v1256_v63  ;;  %v2993_v2 = vpop.f32.mrb[54].mxu0  ;;  %v3057_v3 = vpop.f32.mrb[54].mxu1 }
 0x164   : > { %v1012_v4 = vadd.f32 %v2993_v2, %v3299_v8  ;;  %v1268_v5 = vadd.f32 %v3057_v3, %v3299_v8  ;;  %v1003_v6 = vpop.f32.mrb[55].mxu0  ;;  %v1259_v7 = vpop.f32.mrb[55].mxu1  ;;  %v1357_v11 = vmax.f32 %v1009_v60, 0.0  ;;  %v1421_v12 = vmax.f32 %v1265_v61, 0.0 }
 0x165   : > { %v1004_v9 = vadd.f32 %v3299_v8, %v1003_v6  ;;  %v1260_v10 = vadd.f32 %v3299_v8, %v1259_v7  ;;  %v1355_v15 = vmax.f32 %v1001_v0, 0.0  ;;  %v1419_v16 = vmax.f32 %v1257_v1, 0.0 }
 0x166   : > { %v1358_v13 = vmax.f32 %v1012_v4, 0.0  ;;  %v1422_v14 = vmax.f32 %v1268_v5, 0.0 }
 0x167   : > { %v1356_v17 = vmax.f32 %v1004_v9, 0.0  ;;  %v1420_v18 = vmax.f32 %v1260_v10, 0.0 }
 0x168   : > { %v2605_v19 = vpack.c.bf16 %v1358_v13, %v1357_v11  ;;  %v2765_v20 = vpack.c.bf16 %v1422_v14, %v1421_v12 }
 0x169   : > { %v2600_v21 = vpack.c.bf16 %v1356_v17, %v1355_v15  ;;  %v2760_v22 = vpack.c.bf16 %v1420_v18, %v1419_v16  ;;  %v2996_v23 = vpop.f32.mrb[56].mxu0  ;;  %v3060_v24 = vpop.f32.mrb[56].mxu1 }
 0x16a   : > { %2813 = vst [vmem:[%s3314_s13 + $0xd8] sm:$0xff] %v2605_v19   ;;  %2845 = vst [vmem:[%s3314_s13 + $0x1d8] sm:$0xff] %v2765_v20   ;;  %v1025_v25 = vadd.f32 %v2996_v23, %v3299_v8  ;;  %v1281_v26 = vadd.f32 %v3060_v24, %v3299_v8  ;;  %v1016_v27 = vpop.f32.mrb[57].mxu0  ;;  %v1272_v28 = vpop.f32.mrb[57].mxu1 }
 0x16b   : > { %2812 = vst [vmem:[%s3314_s13 + $0xd0] sm:$0xff] %v2600_v21   ;;  %2844 = vst [vmem:[%s3314_s13 + $0x1d0] sm:$0xff] %v2760_v22   ;;  %v1017_v29 = vadd.f32 %v3299_v8, %v1016_v27  ;;  %v1273_v30 = vadd.f32 %v3299_v8, %v1272_v28  ;;  %v2997_v31 = vpop.f32.mrb[58].mxu0  ;;  %v3061_v32 = vpop.f32.mrb[58].mxu1 }
 0x16c   : > { %v1028_v33 = vadd.f32 %v2997_v31, %v3299_v8  ;;  %v1284_v34 = vadd.f32 %v3061_v32, %v3299_v8  ;;  %v1019_v35 = vpop.f32.mrb[59].mxu0  ;;  %v1275_v36 = vpop.f32.mrb[59].mxu1  ;;  %v1361_v39 = vmax.f32 %v1025_v25, 0.0  ;;  %v1425_v40 = vmax.f32 %v1281_v26, 0.0 }
 0x16d   : > { %v1020_v37 = vadd.f32 %v3299_v8, %v1019_v35  ;;  %v1276_v38 = vadd.f32 %v3299_v8, %v1275_v36  ;;  %v1359_v43 = vmax.f32 %v1017_v29, 0.0  ;;  %v1423_v44 = vmax.f32 %v1273_v30, 0.0 }
 0x16e   : > { %v1362_v41 = vmax.f32 %v1028_v33, 0.0  ;;  %v1426_v42 = vmax.f32 %v1284_v34, 0.0 }
 0x16f   : > { %v1360_v45 = vmax.f32 %v1020_v37, 0.0  ;;  %v1424_v46 = vmax.f32 %v1276_v38, 0.0 }
 0x170   : > { %v2615_v47 = vpack.c.bf16 %v1362_v41, %v1361_v39  ;;  %v2775_v48 = vpack.c.bf16 %v1426_v42, %v1425_v40 }
 0x171   : > { %v2610_v49 = vpack.c.bf16 %v1360_v45, %v1359_v43  ;;  %v2770_v50 = vpack.c.bf16 %v1424_v46, %v1423_v44  ;;  %v3000_v51 = vpop.f32.mrb[60].mxu0  ;;  %v3064_v52 = vpop.f32.mrb[60].mxu1 }
 0x172   : > { %2815 = vst [vmem:[%s3314_s13 + $0xe8] sm:$0xff] %v2615_v47   ;;  %2847 = vst [vmem:[%s3314_s13 + $0x1e8] sm:$0xff] %v2775_v48   ;;  %v1041_v53 = vadd.f32 %v3000_v51, %v3299_v8  ;;  %v1297_v54 = vadd.f32 %v3064_v52, %v3299_v8  ;;  %v1032_v55 = vpop.f32.mrb[61].mxu0  ;;  %v1288_v56 = vpop.f32.mrb[61].mxu1 }
 0x173   : > { %2814 = vst [vmem:[%s3314_s13 + $0xe0] sm:$0xff] %v2610_v49   ;;  %2846 = vst [vmem:[%s3314_s13 + $0x1e0] sm:$0xff] %v2770_v50   ;;  %v1033_v57 = vadd.f32 %v3299_v8, %v1032_v55  ;;  %v1289_v58 = vadd.f32 %v3299_v8, %v1288_v56  ;;  %v3001_v59 = vpop.f32.mrb[62].mxu0  ;;  %v3065_v60 = vpop.f32.mrb[62].mxu1 }
 0x174   : > { %v1044_v61 = vadd.f32 %v3001_v59, %v3299_v8  ;;  %v1300_v62 = vadd.f32 %v3065_v60, %v3299_v8  ;;  %v1035_v63 = vpop.f32.mrb[63].mxu0  ;;  %v1291_v0 = vpop.f32.mrb[63].mxu1  ;;  %v1365_v3 = vmax.f32 %v1041_v53, 0.0  ;;  %v1429_v4 = vmax.f32 %v1297_v54, 0.0 }
 0x175   : > { %v1036_v1 = vadd.f32 %v3299_v8, %v1035_v63  ;;  %v1292_v2 = vadd.f32 %v3299_v8, %v1291_v0  ;;  %v1363_v7 = vmax.f32 %v1033_v57, 0.0  ;;  %v1427_v9 = vmax.f32 %v1289_v58, 0.0 }
 0x176   : > { %v1366_v5 = vmax.f32 %v1044_v61, 0.0  ;;  %v1430_v6 = vmax.f32 %v1300_v62, 0.0 }
 0x177   : > { %v1364_v10 = vmax.f32 %v1036_v1, 0.0  ;;  %v1428_v11 = vmax.f32 %v1292_v2, 0.0 }
 0x178   : > { %v2625_v12 = vpack.c.bf16 %v1366_v5, %v1365_v3  ;;  %v2785_v13 = vpack.c.bf16 %v1430_v6, %v1429_v4 }
 0x179   : > { %v2620_v14 = vpack.c.bf16 %v1364_v10, %v1363_v7  ;;  %v2780_v15 = vpack.c.bf16 %v1428_v11, %v1427_v9 }
 0x17a   : > { %2817 = vst [vmem:[%s3314_s13 + $0xf8] sm:$0xff] %v2625_v12   ;;  %2849 = vst [vmem:[%s3314_s13 + $0x1f8] sm:$0xff] %v2785_v13  }
 0x17b   : > { %2816 = vst [vmem:[%s3314_s13 + $0xf0] sm:$0xff] %v2620_v14   ;;  %2848 = vst [vmem:[%s3314_s13 + $0x1f0] sm:$0xff] %v2780_v15  }
 0x17c PF: > { %s13_s12 = sadd.s32 1, %s3168_s12  }
 0x17d   : > { %p10_p4 = scmp.ge.s32.totalorder %s13_s12, 4  }
 0x17f   :  { %12 = sbr.rel (!%p10_p4) target bundleno = 1 (0x1), region = 62 }

// kernel: net33_2_forward.5
= control target key start
LH: loop header
LB: loop body
LE: loop exit
PB: predicated region body
PF: predicated region fallthrough
CT: control target
= control target key end

     0   :  { %s2771_s12 = smov 0   ;;  %s3121_s0 = inlined_call_operand.vmem [shape: bf16[1536,256], index: 0, kind: input, shape index: {}]   ;;  %s3122_s1 = inlined_call_operand.vmem [shape: bf16[256,128], index: 1, kind: input, shape index: {}]   ;;  %s3123_s2 = inlined_call_operand.vmem [shape: f32[1,128], index: 2, kind: input, shape index: {}]   ;;  %s3124_s3 = inlined_call_operand.vmem [shape: bf16[1536,128], index: 3, kind: output, shape index: {}]  }
   0x1 LB: > { %s1938_s13 = sadd.s32 4294967295, %s2748_s12   ;;  %p1942_p0 = scmp.ge.s32.totalorder %s2748_s12, 1  ;;  %s2748_s12 = sphi %s2771_s12, %s13_s12  }
   0x2   : > { %p139_p1 = scmp.lt.s32.totalorder %s2748_s12, 3 }
   0x4   : > { %p140_p2 = pnand %p1942_p0, %p139_p1 }
   0x5   : > { %v2582_v0 = vld [vmem:[%s3122_s1] sm:$0xff] (!%p140_p2)   ;;  %v2750_v1 = vmov (!%p140_p2), 0   ;;  %s164_s16 = smul.u32 (!%p140_p2), 96, %s1938_s13  ;;  %v2583_v2 = vld [vmem:[%s3122_s1 + $0x8] sm:$0xff] (!%p140_p2)   ;;  %v2584_v3 = vld [vmem:[%s3122_s1 + $0x10] sm:$0xff] (!%p140_p2)  }
   0x6   : > { %143 = sbr.rel (%p140_p2) target bundleno = 475 (0x1db), region = 32  ;;  %889 = vmatprep.subr.bf16.mxu0 (!%p140_p2), %v2750_v1  ;;  %2541 = vmatprep.subr.bf16.mxu1 (!%p140_p2), %v2750_v1  ;;  %v2585_v4 = vld [vmem:[%s3122_s1 + $0x18] sm:$0xff] (!%p140_p2)   ;;  %v2586_v5 = vld [vmem:[%s3122_s1 + $0x20] sm:$0xff] (!%p140_p2)   ;;  %v2587_v7 = vld [vmem:[%s3122_s1 + $0x28] sm:$0xff] (!%p140_p2)  }
   0x7   : > { %890 = vmatpush1.bf16.msra.mxu0 (!%p140_p2), %v2582_v0  ;;  %2557 = vmatpush1.bf16.msra.mxu1 (!%p140_p2), %v2582_v0  ;;  %p165_p3 = scmp.lt.s32.totalorder (!%p140_p2), %s164_s16, 191  ;;  %v2588_v9 = vld [vmem:[%s3122_s1 + $0x30] sm:$0xff] (!%p140_p2)   ;;  %v2589_v10 = vld [vmem:[%s3122_s1 + $0x38] sm:$0xff] (!%p140_p2)   ;;  %v2590_v11 = vld [vmem:[%s3122_s1 + $0x40] sm:$0xff] (!%p140_p2)  }
   0x8   : > { %891 = vmatprep.subr.bf16.mxu0 (!%p140_p2), %v2750_v1  ;;  %2542 = vmatprep.subr.bf16.mxu1 (!%p140_p2), %v2750_v1  ;;  %v2591_v12 = vld [vmem:[%s3122_s1 + $0x48] sm:$0xff] (!%p140_p2)   ;;  %v2592_v13 = vld [vmem:[%s3122_s1 + $0x50] sm:$0xff] (!%p140_p2)   ;;  %v2593_v14 = vld [vmem:[%s3122_s1 + $0x58] sm:$0xff] (!%p140_p2)  }
   0x9   : > { %v2594_v15 = vld [vmem:[%s3122_s1 + $0x60] sm:$0xff] (!%p140_p2)   ;;  %v2595_v16 = vld [vmem:[%s3122_s1 + $0x68] sm:$0xff] (!%p140_p2)   ;;  %v2596_v17 = vld [vmem:[%s3122_s1 + $0x70] sm:$0xff] (!%p140_p2)  }
   0xa   : > { %v2597_v18 = vld [vmem:[%s3122_s1 + $0x78] sm:$0xff] (!%p140_p2)  }
   0xb   : > { %892 = vmatpush1.bf16.msra.mxu0 (!%p140_p2), %v2583_v2  ;;  %2558 = vmatpush1.bf16.msra.mxu1 (!%p140_p2), %v2583_v2 }
   0xc   : > { %893 = vmatprep.subr.bf16.mxu0 (!%p140_p2), %v2750_v1  ;;  %2543 = vmatprep.subr.bf16.mxu1 (!%p140_p2), %v2750_v1 }
   0xd   : > { %s3126_s16 = smov (!%p165_p3, %s164_s16), 191 }
   0xe   : > { %s2157_s23 = sshll.u32 %s3126_s16, 3  ;;  %s1945_s29 = sshll.u32 %s3126_s16, 2 }
   0xf   : > { %894 = vmatpush1.bf16.msra.mxu0 %v2584_v3  ;;  %2559 = vmatpush1.bf16.msra.mxu1 %v2584_v3  ;;  %s2808_s28 = scalar_lea.vmem %s3121_s0, %s2157_s23  ;;  %s2976_s4 = scalar_lea.vmem %s3124_s3, %s1945_s29 }
  0x10   : > { %895 = vmatprep.subr.bf16.mxu0 %v2750_v1  ;;  %2544 = vmatprep.subr.bf16.mxu1 %v2750_v1  ;;  %v2600_v6 = vld [vmem:[%s2808_s28 + $0x4] ss:$8 sps:$4 sm:$0xff]   ;;  %v2598_v19 = vld [vmem:[%s2808_s28] ss:$8 sps:$4 sm:$0xff]   ;;  %v2604_v21 = vld [vmem:[%s2808_s28 + $0x14] ss:$8 sps:$4 sm:$0xff]  }
  0x11   : > { %v2603_v8 = vld [vmem:[%s2808_s28 + $0x184] ss:$8 sps:$4 sm:$0xff]   ;;  %921 = vmatprep.mubr.bf16.mxu0 %v2600_v6  ;;  %v2601_v20 = vld [vmem:[%s2808_s28 + $0x180] ss:$8 sps:$4 sm:$0xff]   ;;  %v2606_v22 = vld [vmem:[%s2808_s28 + $0x194] ss:$8 sps:$4 sm:$0xff]  }
  0x12   : > { %1113 = vmatprep.mubr.bf16.mxu1 %v2603_v8  ;;  %v2608_v23 = vld [vmem:[%s2808_s28 + $0x10] ss:$8 sps:$4 sm:$0xff]   ;;  %v2610_v25 = vld [vmem:[%s2808_s28 + $0x24] ss:$8 sps:$4 sm:$0xff]   ;;  %v2614_v27 = vld [vmem:[%s2808_s28 + $0x20] ss:$8 sps:$4 sm:$0xff]  }
  0x13   : > { %896 = vmatpush1.bf16.msra.mxu0 %v2585_v4  ;;  %2560 = vmatpush1.bf16.msra.mxu1 %v2585_v4  ;;  %v2609_v24 = vld [vmem:[%s2808_s28 + $0x190] ss:$8 sps:$4 sm:$0xff]   ;;  %v2612_v26 = vld [vmem:[%s2808_s28 + $0x1a4] ss:$8 sps:$4 sm:$0xff]   ;;  %v2615_v28 = vld [vmem:[%s2808_s28 + $0x1a0] ss:$8 sps:$4 sm:$0xff]  }
  0x14   : > { %897 = vmatprep.subr.bf16.mxu0 %v2750_v1  ;;  %2545 = vmatprep.subr.bf16.mxu1 %v2750_v1  ;;  %v2616_v29 = vld [vmem:[%s2808_s28 + $0x34] ss:$8 sps:$4 sm:$0xff]   ;;  %v2620_v31 = vld [vmem:[%s2808_s28 + $0x30] ss:$8 sps:$4 sm:$0xff]   ;;  %v2622_v33 = vld [vmem:[%s2808_s28 + $0x44] ss:$8 sps:$4 sm:$0xff]  }
  0x15   : > { %v2618_v30 = vld [vmem:[%s2808_s28 + $0x1b4] ss:$8 sps:$4 sm:$0xff]   ;;  %v2621_v32 = vld [vmem:[%s2808_s28 + $0x1b0] ss:$8 sps:$4 sm:$0xff]   ;;  %v2624_v34 = vld [vmem:[%s2808_s28 + $0x1c4] ss:$8 sps:$4 sm:$0xff]  }
  0x16   : > { %v2626_v35 = vld [vmem:[%s2808_s28 + $0x40] ss:$8 sps:$4 sm:$0xff]   ;;  %v2628_v37 = vld [vmem:[%s2808_s28 + $0x54] ss:$8 sps:$4 sm:$0xff]   ;;  %v2632_v39 = vld [vmem:[%s2808_s28 + $0x50] ss:$8 sps:$4 sm:$0xff]  }
  0x17   : > { %898 = vmatpush1.bf16.msra.mxu0 %v2586_v5  ;;  %2561 = vmatpush1.bf16.msra.mxu1 %v2586_v5  ;;  %v2627_v36 = vld [vmem:[%s2808_s28 + $0x1c0] ss:$8 sps:$4 sm:$0xff]   ;;  %v2630_v38 = vld [vmem:[%s2808_s28 + $0x1d4] ss:$8 sps:$4 sm:$0xff]   ;;  %v2633_v40 = vld [vmem:[%s2808_s28 + $0x1d0] ss:$8 sps:$4 sm:$0xff]  }
  0x18   : > { %899 = vmatprep.subr.bf16.mxu0 %v2750_v1  ;;  %2546 = vmatprep.subr.bf16.mxu1 %v2750_v1  ;;  %v2634_v41 = vld [vmem:[%s2808_s28 + $0x64] ss:$8 sps:$4 sm:$0xff]   ;;  %v2638_v43 = vld [vmem:[%s2808_s28 + $0x60] ss:$8 sps:$4 sm:$0xff]   ;;  %v2640_v45 = vld [vmem:[%s2808_s28 + $0x74] ss:$8 sps:$4 sm:$0xff]  }
  0x19   : > { %v2636_v42 = vld [vmem:[%s2808_s28 + $0x1e4] ss:$8 sps:$4 sm:$0xff]   ;;  %v2639_v44 = vld [vmem:[%s2808_s28 + $0x1e0] ss:$8 sps:$4 sm:$0xff]   ;;  %v2642_v46 = vld [vmem:[%s2808_s28 + $0x1f4] ss:$8 sps:$4 sm:$0xff]  }
  0x1a   : > { %v2644_v47 = vld [vmem:[%s2808_s28 + $0x70] ss:$8 sps:$4 sm:$0xff]   ;;  %v2646_v49 = vld [vmem:[%s2808_s28 + $0x84] ss:$8 sps:$4 sm:$0xff]   ;;  %v2650_v51 = vld [vmem:[%s2808_s28 + $0x80] ss:$8 sps:$4 sm:$0xff]  }
  0x1b   : > { %900 = vmatpush1.bf16.msra.mxu0 %v2587_v7  ;;  %2562 = vmatpush1.bf16.msra.mxu1 %v2587_v7  ;;  %v2645_v48 = vld [vmem:[%s2808_s28 + $0x1f0] ss:$8 sps:$4 sm:$0xff]   ;;  %v2648_v50 = vld [vmem:[%s2808_s28 + $0x204] ss:$8 sps:$4 sm:$0xff]   ;;  %v2651_v52 = vld [vmem:[%s2808_s28 + $0x200] ss:$8 sps:$4 sm:$0xff]  }
  0x1c   : > { %901 = vmatprep.subr.bf16.mxu0 %v2750_v1  ;;  %2547 = vmatprep.subr.bf16.mxu1 %v2750_v1  ;;  %v2652_v53 = vld [vmem:[%s2808_s28 + $0x94] ss:$8 sps:$4 sm:$0xff]   ;;  %v2656_v55 = vld [vmem:[%s2808_s28 + $0x90] ss:$8 sps:$4 sm:$0xff]   ;;  %v2658_v57 = vld [vmem:[%s2808_s28 + $0xa4] ss:$8 sps:$4 sm:$0xff]  }
  0x1d   : > { %v2654_v54 = vld [vmem:[%s2808_s28 + $0x214] ss:$8 sps:$4 sm:$0xff]   ;;  %v2657_v56 = vld [vmem:[%s2808_s28 + $0x210] ss:$8 sps:$4 sm:$0xff]   ;;  %v2660_v58 = vld [vmem:[%s2808_s28 + $0x224] ss:$8 sps:$4 sm:$0xff]  }
  0x1e   : > { %v2662_v59 = vld [vmem:[%s2808_s28 + $0xa0] ss:$8 sps:$4 sm:$0xff]   ;;  %v2664_v61 = vld [vmem:[%s2808_s28 + $0xb4] ss:$8 sps:$4 sm:$0xff]   ;;  %v2668_v63 = vld [vmem:[%s2808_s28 + $0xb0] ss:$8 sps:$4 sm:$0xff]  }
  0x1f   : > { %902 = vmatpush1.bf16.msra.mxu0 %v2588_v9  ;;  %2563 = vmatpush1.bf16.msra.mxu1 %v2588_v9  ;;  %v2663_v60 = vld [vmem:[%s2808_s28 + $0x220] ss:$8 sps:$4 sm:$0xff]   ;;  %v2666_v62 = vld [vmem:[%s2808_s28 + $0x234] ss:$8 sps:$4 sm:$0xff]   ;;  %v2669_v0 = vld [vmem:[%s2808_s28 + $0x230] ss:$8 sps:$4 sm:$0xff]  }
  0x20   : > { %903 = vmatprep.subr.bf16.mxu0 %v2750_v1  ;;  %2548 = vmatprep.subr.bf16.mxu1 %v2750_v1  ;;  %v2672_v2 = vld [vmem:[%s2808_s28 + $0x244] ss:$8 sps:$4 sm:$0xff]   ;;  %v2674_v3 = vld [vmem:[%s2808_s28 + $0xc0] ss:$8 sps:$4 sm:$0xff]   ;;  %v2676_v5 = vld [vmem:[%s2808_s28 + $0xd4] ss:$8 sps:$4 sm:$0xff]  }
  0x21   : > { %v2675_v4 = vld [vmem:[%s2808_s28 + $0x240] ss:$8 sps:$4 sm:$0xff]   ;;  %v2678_v6 = vld [vmem:[%s2808_s28 + $0x254] ss:$8 sps:$4 sm:$0xff]   ;;  %v2680_v7 = vld [vmem:[%s2808_s28 + $0xd0] ss:$8 sps:$4 sm:$0xff]  }
  0x22   : > { %v2681_v8 = vld [vmem:[%s2808_s28 + $0x250] ss:$8 sps:$4 sm:$0xff]   ;;  %v2682_v9 = vld [vmem:[%s2808_s28 + $0xe4] ss:$8 sps:$4 sm:$0xff]  }
  0x23   : > { %904 = vmatpush1.bf16.msra.mxu0 %v2589_v10  ;;  %2564 = vmatpush1.bf16.msra.mxu1 %v2589_v10  ;;  %v2684_v10 = vld [vmem:[%s2808_s28 + $0x264] ss:$8 sps:$4 sm:$0xff]  }
  0x24   : > { %905 = vmatprep.subr.bf16.mxu0 %v2750_v1  ;;  %2549 = vmatprep.subr.bf16.mxu1 %v2750_v1 }
  0x27   : > { %906 = vmatpush1.bf16.msra.mxu0 %v2590_v11  ;;  %2565 = vmatpush1.bf16.msra.mxu1 %v2590_v11  ;;  %v2686_v11 = vld [vmem:[%s2808_s28 + $0xe0] ss:$8 sps:$4 sm:$0xff]  }
  0x28   : > { %907 = vmatprep.subr.bf16.mxu0 %v2750_v1  ;;  %2550 = vmatprep.subr.bf16.mxu1 %v2750_v1 }
  0x2b   : > { %908 = vmatpush1.bf16.msra.mxu0 %v2591_v12  ;;  %2566 = vmatpush1.bf16.msra.mxu1 %v2591_v12  ;;  %v2687_v12 = vld [vmem:[%s2808_s28 + $0x260] ss:$8 sps:$4 sm:$0xff]  }
  0x2c   : > { %909 = vmatprep.subr.bf16.mxu0 %v2750_v1  ;;  %2551 = vmatprep.subr.bf16.mxu1 %v2750_v1 }
  0x2f   : > { %910 = vmatpush1.bf16.msra.mxu0 %v2592_v13  ;;  %2567 = vmatpush1.bf16.msra.mxu1 %v2592_v13  ;;  %v2688_v13 = vld [vmem:[%s2808_s28 + $0xf4] ss:$8 sps:$4 sm:$0xff]  }
  0x30   : > { %911 = vmatprep.subr.bf16.mxu0 %v2750_v1  ;;  %2552 = vmatprep.subr.bf16.mxu1 %v2750_v1 }
  0x33   : > { %912 = vmatpush1.bf16.msra.mxu0 %v2593_v14  ;;  %2568 = vmatpush1.bf16.msra.mxu1 %v2593_v14  ;;  %v2690_v14 = vld [vmem:[%s2808_s28 + $0x274] ss:$8 sps:$4 sm:$0xff]  }
  0x34   : > { %913 = vmatprep.subr.bf16.mxu0 %v2750_v1  ;;  %2553 = vmatprep.subr.bf16.mxu1 %v2750_v1 }
  0x37   : > { %914 = vmatpush1.bf16.msra.mxu0 %v2594_v15  ;;  %2569 = vmatpush1.bf16.msra.mxu1 %v2594_v15  ;;  %v2692_v15 = vld [vmem:[%s2808_s28 + $0xf0] ss:$8 sps:$4 sm:$0xff]  }
  0x38   : > { %915 = vmatprep.subr.bf16.mxu0 %v2750_v1  ;;  %2554 = vmatprep.subr.bf16.mxu1 %v2750_v1 }
  0x3b   : > { %916 = vmatpush1.bf16.msra.mxu0 %v2595_v16  ;;  %2570 = vmatpush1.bf16.msra.mxu1 %v2595_v16  ;;  %v2693_v16 = vld [vmem:[%s2808_s28 + $0x270] ss:$8 sps:$4 sm:$0xff]  }
  0x3c   : > { %917 = vmatprep.subr.bf16.mxu0 %v2750_v1  ;;  %2555 = vmatprep.subr.bf16.mxu1 %v2750_v1 }
  0x3f   : > { %918 = vmatpush1.bf16.msra.mxu0 %v2596_v17  ;;  %2571 = vmatpush1.bf16.msra.mxu1 %v2596_v17  ;;  %v2694_v17 = vld [vmem:[%s2808_s28 + $0x104] ss:$8 sps:$4 sm:$0xff]  }
  0x40   : > { %919 = vmatprep.subr.bf16.mxu0 %v2750_v1  ;;  %2556 = vmatprep.subr.bf16.mxu1 %v2750_v1  ;;  %v2670_v1 = vld [vmem:[%s2808_s28 + $0xc4] ss:$8 sps:$4 sm:$0xff]  }
  0x43   : > { %920 = vmatpush1.bf16.msra.mxu0 %v2597_v18  ;;  %2572 = vmatpush1.bf16.msra.mxu1 %v2597_v18  ;;  %v2696_v18 = vld [vmem:[%s2808_s28 + $0x284] ss:$8 sps:$4 sm:$0xff]  }
  0x46   : > { %922 = vmatmul.mubr.bf16.vlgmr.msra.gmra.mrb[0].mxu0 %v2598_v19  ;;  %1114 = vmatmul.mubr.bf16.vlgmr.msra.gmra.mrb[0].mxu1 %v2601_v20  ;;  %v2698_v19 = vld [vmem:[%s2808_s28 + $0x100] ss:$8 sps:$4 sm:$0xff]  }
  0x47   : > { %929 = vmatprep.mubr.bf16.mxu0 %v2604_v21  ;;  %1121 = vmatprep.mubr.bf16.mxu1 %v2606_v22  ;;  %v2699_v20 = vld [vmem:[%s2808_s28 + $0x280] ss:$8 sps:$4 sm:$0xff]   ;;  %v2700_v21 = vld [vmem:[%s2808_s28 + $0x114] ss:$8 sps:$4 sm:$0xff]  }
  0x48   : > { %v2702_v22 = vld [vmem:[%s2808_s28 + $0x294] ss:$8 sps:$4 sm:$0xff]  }
  0x4e   : > { %930 = vmatmul.mubr.bf16.gmra.mrb[4].mxu0 %v2608_v23  ;;  %1122 = vmatmul.mubr.bf16.gmra.mrb[4].mxu1 %v2609_v24  ;;  %v2704_v23 = vld [vmem:[%s2808_s28 + $0x110] ss:$8 sps:$4 sm:$0xff]  }
  0x4f   : > { %937 = vmatprep.mubr.bf16.mxu0 %v2610_v25  ;;  %1129 = vmatprep.mubr.bf16.mxu1 %v2612_v26  ;;  %v2705_v24 = vld [vmem:[%s2808_s28 + $0x290] ss:$8 sps:$4 sm:$0xff]   ;;  %v2706_v25 = vld [vmem:[%s2808_s28 + $0x124] ss:$8 sps:$4 sm:$0xff]  }
  0x50   : > { %v2708_v26 = vld [vmem:[%s2808_s28 + $0x2a4] ss:$8 sps:$4 sm:$0xff]  }
  0x56   : > { %938 = vmatmul.mubr.bf16.gmra.mrb[8].mxu0 %v2614_v27  ;;  %1130 = vmatmul.mubr.bf16.gmra.mrb[8].mxu1 %v2615_v28  ;;  %v2710_v27 = vld [vmem:[%s2808_s28 + $0x120] ss:$8 sps:$4 sm:$0xff]  }
  0x57   : > { %945 = vmatprep.mubr.bf16.mxu0 %v2616_v29  ;;  %1137 = vmatprep.mubr.bf16.mxu1 %v2618_v30  ;;  %v2711_v28 = vld [vmem:[%s2808_s28 + $0x2a0] ss:$8 sps:$4 sm:$0xff]   ;;  %v2712_v29 = vld [vmem:[%s2808_s28 + $0x134] ss:$8 sps:$4 sm:$0xff]  }
  0x58   : > { %v2714_v30 = vld [vmem:[%s2808_s28 + $0x2b4] ss:$8 sps:$4 sm:$0xff]  }
  0x5e   : > { %946 = vmatmul.mubr.bf16.gmra.mrb[12].mxu0 %v2620_v31  ;;  %1138 = vmatmul.mubr.bf16.gmra.mrb[12].mxu1 %v2621_v32  ;;  %v2716_v31 = vld [vmem:[%s2808_s28 + $0x130] ss:$8 sps:$4 sm:$0xff]  }
  0x5f   : > { %953 = vmatprep.mubr.bf16.mxu0 %v2622_v33  ;;  %1145 = vmatprep.mubr.bf16.mxu1 %v2624_v34  ;;  %v2717_v32 = vld [vmem:[%s2808_s28 + $0x2b0] ss:$8 sps:$4 sm:$0xff]   ;;  %v2718_v33 = vld [vmem:[%s2808_s28 + $0x144] ss:$8 sps:$4 sm:$0xff]  }
  0x60   : > { %v2720_v34 = vld [vmem:[%s2808_s28 + $0x2c4] ss:$8 sps:$4 sm:$0xff]  }
  0x66   : > { %954 = vmatmul.mubr.bf16.gmra.mrb[16].mxu0 %v2626_v35  ;;  %1146 = vmatmul.mubr.bf16.gmra.mrb[16].mxu1 %v2627_v36  ;;  %v2722_v35 = vld [vmem:[%s2808_s28 + $0x140] ss:$8 sps:$4 sm:$0xff]  }
  0x67   : > { %961 = vmatprep.mubr.bf16.mxu0 %v2628_v37  ;;  %1153 = vmatprep.mubr.bf16.mxu1 %v2630_v38  ;;  %v2723_v36 = vld [vmem:[%s2808_s28 + $0x2c0] ss:$8 sps:$4 sm:$0xff]   ;;  %v2724_v37 = vld [vmem:[%s2808_s28 + $0x154] ss:$8 sps:$4 sm:$0xff]  }
  0x68   : > { %v2726_v38 = vld [vmem:[%s2808_s28 + $0x2d4] ss:$8 sps:$4 sm:$0xff]  }
  0x6e   : > { %962 = vmatmul.mubr.bf16.gmra.mrb[20].mxu0 %v2632_v39  ;;  %1154 = vmatmul.mubr.bf16.gmra.mrb[20].mxu1 %v2633_v40  ;;  %v2728_v39 = vld [vmem:[%s2808_s28 + $0x150] ss:$8 sps:$4 sm:$0xff]  }
  0x6f   : > { %969 = vmatprep.mubr.bf16.mxu0 %v2634_v41  ;;  %1161 = vmatprep.mubr.bf16.mxu1 %v2636_v42  ;;  %v2729_v40 = vld [vmem:[%s2808_s28 + $0x2d0] ss:$8 sps:$4 sm:$0xff]   ;;  %v2730_v41 = vld [vmem:[%s2808_s28 + $0x164] ss:$8 sps:$4 sm:$0xff]  }
  0x70   : > { %v2732_v42 = vld [vmem:[%s2808_s28 + $0x2e4] ss:$8 sps:$4 sm:$0xff]  }
  0x76   : > { %970 = vmatmul.mubr.bf16.gmra.mrb[24].mxu0 %v2638_v43  ;;  %1162 = vmatmul.mubr.bf16.gmra.mrb[24].mxu1 %v2639_v44  ;;  %v2734_v43 = vld [vmem:[%s2808_s28 + $0x160] ss:$8 sps:$4 sm:$0xff]  }
  0x77   : > { %977 = vmatprep.mubr.bf16.mxu0 %v2640_v45  ;;  %1169 = vmatprep.mubr.bf16.mxu1 %v2642_v46  ;;  %v2735_v44 = vld [vmem:[%s2808_s28 + $0x2e0] ss:$8 sps:$4 sm:$0xff]   ;;  %v2736_v45 = vld [vmem:[%s2808_s28 + $0x174] ss:$8 sps:$4 sm:$0xff]  }
  0x78   : > { %v2738_v46 = vld [vmem:[%s2808_s28 + $0x2f4] ss:$8 sps:$4 sm:$0xff]  }
  0x7e   : > { %978 = vmatmul.mubr.bf16.gmra.mrb[28].mxu0 %v2644_v47  ;;  %1170 = vmatmul.mubr.bf16.gmra.mrb[28].mxu1 %v2645_v48  ;;  %v2740_v47 = vld [vmem:[%s2808_s28 + $0x170] ss:$8 sps:$4 sm:$0xff]  }
  0x7f   : > { %985 = vmatprep.mubr.bf16.mxu0 %v2646_v49  ;;  %1177 = vmatprep.mubr.bf16.mxu1 %v2648_v50  ;;  %v2741_v48 = vld [vmem:[%s2808_s28 + $0x2f0] ss:$8 sps:$4 sm:$0xff]   ;;  %v2966_v49 = vld [vmem:[%s3123_s2] ss:$0 sm:$0xff] }
  0x86   : > { %986 = vmatmul.mubr.bf16.gmra.mrb[32].mxu0 %v2650_v51  ;;  %1178 = vmatmul.mubr.bf16.gmra.mrb[32].mxu1 %v2651_v52 }
  0x87   : > { %993 = vmatprep.mubr.bf16.mxu0 %v2652_v53  ;;  %1185 = vmatprep.mubr.bf16.mxu1 %v2654_v54 }
  0x8e   : > { %994 = vmatmul.mubr.bf16.gmra.mrb[36].mxu0 %v2656_v55  ;;  %1186 = vmatmul.mubr.bf16.gmra.mrb[36].mxu1 %v2657_v56 }
  0x8f   : > { %1001 = vmatprep.mubr.bf16.mxu0 %v2658_v57  ;;  %1193 = vmatprep.mubr.bf16.mxu1 %v2660_v58 }
  0x96   : > { %1002 = vmatmul.mubr.bf16.gmra.mrb[40].mxu0 %v2662_v59  ;;  %1194 = vmatmul.mubr.bf16.gmra.mrb[40].mxu1 %v2663_v60 }
  0x97   : > { %1009 = vmatprep.mubr.bf16.mxu0 %v2664_v61  ;;  %1201 = vmatprep.mubr.bf16.mxu1 %v2666_v62 }
  0x9e   : > { %1010 = vmatmul.mubr.bf16.gmra.mrb[44].mxu0 %v2668_v63  ;;  %1202 = vmatmul.mubr.bf16.gmra.mrb[44].mxu1 %v2669_v0 }
  0x9f   : > { %1017 = vmatprep.mubr.bf16.mxu0 %v2670_v1  ;;  %1209 = vmatprep.mubr.bf16.mxu1 %v2672_v2 }
  0xa6   : > { %1018 = vmatmul.mubr.bf16.gmra.mrb[48].mxu0 %v2674_v3  ;;  %1210 = vmatmul.mubr.bf16.gmra.mrb[48].mxu1 %v2675_v4 }
  0xa7   : > { %1025 = vmatprep.mubr.bf16.mxu0 %v2676_v5  ;;  %1217 = vmatprep.mubr.bf16.mxu1 %v2678_v6 }
  0xae   : > { %1026 = vmatmul.mubr.bf16.gmra.mrb[52].mxu0 %v2680_v7  ;;  %1218 = vmatmul.mubr.bf16.gmra.mrb[52].mxu1 %v2681_v8 }
  0xaf   : > { %1033 = vmatprep.mubr.bf16.mxu0 %v2682_v9  ;;  %1225 = vmatprep.mubr.bf16.mxu1 %v2684_v10 }
  0xb6   : > { %1034 = vmatmul.mubr.bf16.gmra.mrb[56].mxu0 %v2686_v11  ;;  %1226 = vmatmul.mubr.bf16.gmra.mrb[56].mxu1 %v2687_v12 }
  0xb7   : > { %1041 = vmatprep.mubr.bf16.mxu0 %v2688_v13  ;;  %1233 = vmatprep.mubr.bf16.mxu1 %v2690_v14 }
  0xbe   : > { %1042 = vmatmul.mubr.bf16.gmra.mrb[60].mxu0 %v2692_v15  ;;  %1234 = vmatmul.mubr.bf16.gmra.mrb[60].mxu1 %v2693_v16 }
  0xbf   : > { %1049 = vmatprep.mubr.bf16.mxu0 %v2694_v17  ;;  %1241 = vmatprep.mubr.bf16.mxu1 %v2696_v18 }
  0xc6   : > { %1050 = vmatmul.mubr.bf16.gmra.mrb[64].mxu0 %v2698_v19  ;;  %1242 = vmatmul.mubr.bf16.gmra.mrb[64].mxu1 %v2699_v20 }
  0xc7   : > { %1057 = vmatprep.mubr.bf16.mxu0 %v2700_v21  ;;  %1249 = vmatprep.mubr.bf16.mxu1 %v2702_v22 }
  0xce   : > { %1058 = vmatmul.mubr.bf16.gmra.mrb[68].mxu0 %v2704_v23  ;;  %1250 = vmatmul.mubr.bf16.gmra.mrb[68].mxu1 %v2705_v24 }
  0xcf   : > { %1065 = vmatprep.mubr.bf16.mxu0 %v2706_v25  ;;  %1257 = vmatprep.mubr.bf16.mxu1 %v2708_v26 }
  0xd6   : > { %1066 = vmatmul.mubr.bf16.gmra.mrb[72].mxu0 %v2710_v27  ;;  %1258 = vmatmul.mubr.bf16.gmra.mrb[72].mxu1 %v2711_v28 }
  0xd7   : > { %1073 = vmatprep.mubr.bf16.mxu0 %v2712_v29  ;;  %1265 = vmatprep.mubr.bf16.mxu1 %v2714_v30 }
  0xde   : > { %1074 = vmatmul.mubr.bf16.gmra.mrb[76].mxu0 %v2716_v31  ;;  %1266 = vmatmul.mubr.bf16.gmra.mrb[76].mxu1 %v2717_v32 }
  0xdf   : > { %1081 = vmatprep.mubr.bf16.mxu0 %v2718_v33  ;;  %1273 = vmatprep.mubr.bf16.mxu1 %v2720_v34 }
  0xe6   : > { %1082 = vmatmul.mubr.bf16.gmra.mrb[80].mxu0 %v2722_v35  ;;  %1274 = vmatmul.mubr.bf16.gmra.mrb[80].mxu1 %v2723_v36 }
  0xe7   : > { %1089 = vmatprep.mubr.bf16.mxu0 %v2724_v37  ;;  %1281 = vmatprep.mubr.bf16.mxu1 %v2726_v38 }
  0xee   : > { %1090 = vmatmul.mubr.bf16.gmra.mrb[84].mxu0 %v2728_v39  ;;  %1282 = vmatmul.mubr.bf16.gmra.mrb[84].mxu1 %v2729_v40 }
  0xef   : > { %1097 = vmatprep.mubr.bf16.mxu0 %v2730_v41  ;;  %1289 = vmatprep.mubr.bf16.mxu1 %v2732_v42 }
  0xf6   : > { %1098 = vmatmul.mubr.bf16.gmra.mrb[88].mxu0 %v2734_v43  ;;  %1290 = vmatmul.mubr.bf16.gmra.mrb[88].mxu1 %v2735_v44 }
  0xf7   : > { %1105 = vmatprep.mubr.bf16.mxu0 %v2736_v45  ;;  %1297 = vmatprep.mubr.bf16.mxu1 %v2738_v46 }
  0xfe   : > { %1106 = vmatmul.mubr.bf16.gmra.mrb[92].mxu0 %v2740_v47  ;;  %1298 = vmatmul.mubr.bf16.gmra.mrb[92].mxu1 %v2741_v48 }
 0x119   : > { %v923_v50 = vpop.f32.mrb[0].mxu0  ;;  %v1115_v51 = vpop.f32.mrb[0].mxu1 }
 0x11a   : > { %v924_v52 = vadd.f32 %v2966_v49, %v923_v50  ;;  %v1116_v53 = vadd.f32 %v2966_v49, %v1115_v51  ;;  %v925_v54 = vpop.f32.mrb[1].mxu0  ;;  %v1117_v55 = vpop.f32.mrb[1].mxu1 }
 0x11b   : > { %v926_v56 = vpop.f32.mrb[2].mxu0  ;;  %v1118_v57 = vpop.f32.mrb[2].mxu1 }
 0x11c   : > { %v927_v58 = vadd.f32 %v2966_v49, %v926_v56  ;;  %v1119_v59 = vadd.f32 %v2966_v49, %v1118_v57  ;;  %v928_v60 = vpop.f32.mrb[3].mxu0  ;;  %v1120_v61 = vpop.f32.mrb[3].mxu1  ;;  %v1306_v62 = vmax.f32 %v924_v52, 0.0  ;;  %v1354_v63 = vmax.f32 %v1116_v53, 0.0 }
 0x11e   : > { %v1307_v0 = vmax.f32 %v927_v58, 0.0  ;;  %v1355_v1 = vmax.f32 %v1119_v59, 0.0 }
 0x120   : > { %v2257_v2 = vpack.c.bf16 %v1307_v0, %v1306_v62  ;;  %v2377_v3 = vpack.c.bf16 %v1355_v1, %v1354_v63 }
 0x121   : > { %v931_v4 = vpop.f32.mrb[4].mxu0  ;;  %v1123_v5 = vpop.f32.mrb[4].mxu1 }
 0x122   : > { %2258 = vst [vmem:[%s2976_s4] sm:$0xff] %v2257_v2   ;;  %2517 = vst [vmem:[%s2976_s4 + $0xc0] sm:$0xff] %v2377_v3   ;;  %v932_v6 = vadd.f32 %v2966_v49, %v931_v4  ;;  %v1124_v7 = vadd.f32 %v2966_v49, %v1123_v5  ;;  %v933_v8 = vpop.f32.mrb[5].mxu0  ;;  %v1125_v9 = vpop.f32.mrb[5].mxu1 }
 0x123   : > { %v934_v10 = vpop.f32.mrb[6].mxu0  ;;  %v1126_v11 = vpop.f32.mrb[6].mxu1 }
 0x124   : > { %v935_v12 = vadd.f32 %v2966_v49, %v934_v10  ;;  %v1127_v13 = vadd.f32 %v2966_v49, %v1126_v11  ;;  %v936_v14 = vpop.f32.mrb[7].mxu0  ;;  %v1128_v15 = vpop.f32.mrb[7].mxu1  ;;  %v1308_v16 = vmax.f32 %v932_v6, 0.0  ;;  %v1356_v17 = vmax.f32 %v1124_v7, 0.0 }
 0x126   : > { %v1309_v18 = vmax.f32 %v935_v12, 0.0  ;;  %v1357_v19 = vmax.f32 %v1127_v13, 0.0 }
 0x128   : > { %v2262_v20 = vpack.c.bf16 %v1309_v18, %v1308_v16  ;;  %v2382_v21 = vpack.c.bf16 %v1357_v19, %v1356_v17 }
 0x129   : > { %v939_v22 = vpop.f32.mrb[8].mxu0  ;;  %v1131_v23 = vpop.f32.mrb[8].mxu1 }
 0x12a   : > { %2494 = vst [vmem:[%s2976_s4 + $0x8] sm:$0xff] %v2262_v20   ;;  %2518 = vst [vmem:[%s2976_s4 + $0xc8] sm:$0xff] %v2382_v21   ;;  %v940_v24 = vadd.f32 %v2966_v49, %v939_v22  ;;  %v1132_v25 = vadd.f32 %v2966_v49, %v1131_v23  ;;  %v941_v26 = vpop.f32.mrb[9].mxu0  ;;  %v1133_v27 = vpop.f32.mrb[9].mxu1 }
 0x12b   : > { %v942_v28 = vpop.f32.mrb[10].mxu0  ;;  %v1134_v29 = vpop.f32.mrb[10].mxu1 }
 0x12c   : > { %v943_v30 = vadd.f32 %v2966_v49, %v942_v28  ;;  %v1135_v31 = vadd.f32 %v2966_v49, %v1134_v29  ;;  %v944_v32 = vpop.f32.mrb[11].mxu0  ;;  %v1136_v33 = vpop.f32.mrb[11].mxu1  ;;  %v1310_v34 = vmax.f32 %v940_v24, 0.0  ;;  %v1358_v35 = vmax.f32 %v1132_v25, 0.0 }
 0x12e   : > { %v1311_v36 = vmax.f32 %v943_v30, 0.0  ;;  %v1359_v37 = vmax.f32 %v1135_v31, 0.0 }
 0x130   : > { %v2267_v38 = vpack.c.bf16 %v1311_v36, %v1310_v34  ;;  %v2387_v39 = vpack.c.bf16 %v1359_v37, %v1358_v35 }
 0x131   : > { %v947_v40 = vpop.f32.mrb[12].mxu0  ;;  %v1139_v41 = vpop.f32.mrb[12].mxu1 }
 0x132   : > { %2495 = vst [vmem:[%s2976_s4 + $0x10] sm:$0xff] %v2267_v38   ;;  %2519 = vst [vmem:[%s2976_s4 + $0xd0] sm:$0xff] %v2387_v39   ;;  %v948_v42 = vadd.f32 %v2966_v49, %v947_v40  ;;  %v1140_v43 = vadd.f32 %v2966_v49, %v1139_v41  ;;  %v949_v44 = vpop.f32.mrb[13].mxu0  ;;  %v1141_v45 = vpop.f32.mrb[13].mxu1 }
 0x133   : > { %v950_v46 = vpop.f32.mrb[14].mxu0  ;;  %v1142_v47 = vpop.f32.mrb[14].mxu1 }
 0x134   : > { %v951_v48 = vadd.f32 %v2966_v49, %v950_v46  ;;  %v1143_v50 = vadd.f32 %v2966_v49, %v1142_v47  ;;  %v952_v51 = vpop.f32.mrb[15].mxu0  ;;  %v1144_v52 = vpop.f32.mrb[15].mxu1  ;;  %v1312_v53 = vmax.f32 %v948_v42, 0.0  ;;  %v1360_v54 = vmax.f32 %v1140_v43, 0.0 }
 0x136   : > { %v1313_v55 = vmax.f32 %v951_v48, 0.0  ;;  %v1361_v56 = vmax.f32 %v1143_v50, 0.0 }
 0x138   : > { %v2272_v57 = vpack.c.bf16 %v1313_v55, %v1312_v53  ;;  %v2392_v58 = vpack.c.bf16 %v1361_v56, %v1360_v54 }
 0x139   : > { %v955_v59 = vpop.f32.mrb[16].mxu0  ;;  %v1147_v60 = vpop.f32.mrb[16].mxu1 }
 0x13a   : > { %2496 = vst [vmem:[%s2976_s4 + $0x18] sm:$0xff] %v2272_v57   ;;  %2520 = vst [vmem:[%s2976_s4 + $0xd8] sm:$0xff] %v2392_v58   ;;  %v956_v61 = vadd.f32 %v2966_v49, %v955_v59  ;;  %v1148_v62 = vadd.f32 %v2966_v49, %v1147_v60  ;;  %v957_v63 = vpop.f32.mrb[17].mxu0  ;;  %v1149_v0 = vpop.f32.mrb[17].mxu1 }
 0x13b   : > { %v958_v1 = vpop.f32.mrb[18].mxu0  ;;  %v1150_v2 = vpop.f32.mrb[18].mxu1 }
 0x13c   : > { %v959_v3 = vadd.f32 %v2966_v49, %v958_v1  ;;  %v1151_v4 = vadd.f32 %v2966_v49, %v1150_v2  ;;  %v960_v5 = vpop.f32.mrb[19].mxu0  ;;  %v1152_v6 = vpop.f32.mrb[19].mxu1  ;;  %v1314_v7 = vmax.f32 %v956_v61, 0.0  ;;  %v1362_v8 = vmax.f32 %v1148_v62, 0.0 }
 0x13e   : > { %v1315_v9 = vmax.f32 %v959_v3, 0.0  ;;  %v1363_v10 = vmax.f32 %v1151_v4, 0.0 }
 0x140   : > { %v2277_v11 = vpack.c.bf16 %v1315_v9, %v1314_v7  ;;  %v2397_v12 = vpack.c.bf16 %v1363_v10, %v1362_v8 }
 0x141   : > { %v963_v13 = vpop.f32.mrb[20].mxu0  ;;  %v1155_v14 = vpop.f32.mrb[20].mxu1 }
 0x142   : > { %2497 = vst [vmem:[%s2976_s4 + $0x20] sm:$0xff] %v2277_v11   ;;  %2521 = vst [vmem:[%s2976_s4 + $0xe0] sm:$0xff] %v2397_v12   ;;  %v964_v15 = vadd.f32 %v2966_v49, %v963_v13  ;;  %v1156_v16 = vadd.f32 %v2966_v49, %v1155_v14  ;;  %v965_v17 = vpop.f32.mrb[21].mxu0  ;;  %v1157_v18 = vpop.f32.mrb[21].mxu1 }
 0x143   : > { %v966_v19 = vpop.f32.mrb[22].mxu0  ;;  %v1158_v20 = vpop.f32.mrb[22].mxu1 }
 0x144   : > { %v967_v21 = vadd.f32 %v2966_v49, %v966_v19  ;;  %v1159_v22 = vadd.f32 %v2966_v49, %v1158_v20  ;;  %v968_v23 = vpop.f32.mrb[23].mxu0  ;;  %v1160_v24 = vpop.f32.mrb[23].mxu1  ;;  %v1316_v25 = vmax.f32 %v964_v15, 0.0  ;;  %v1364_v26 = vmax.f32 %v1156_v16, 0.0 }
 0x146   : > { %v1317_v27 = vmax.f32 %v967_v21, 0.0  ;;  %v1365_v28 = vmax.f32 %v1159_v22, 0.0 }
 0x148   : > { %v2282_v29 = vpack.c.bf16 %v1317_v27, %v1316_v25  ;;  %v2402_v30 = vpack.c.bf16 %v1365_v28, %v1364_v26 }
 0x149   : > { %v971_v31 = vpop.f32.mrb[24].mxu0  ;;  %v1163_v32 = vpop.f32.mrb[24].mxu1 }
 0x14a   : > { %2498 = vst [vmem:[%s2976_s4 + $0x28] sm:$0xff] %v2282_v29   ;;  %2522 = vst [vmem:[%s2976_s4 + $0xe8] sm:$0xff] %v2402_v30   ;;  %v972_v33 = vadd.f32 %v2966_v49, %v971_v31  ;;  %v1164_v34 = vadd.f32 %v2966_v49, %v1163_v32  ;;  %v973_v35 = vpop.f32.mrb[25].mxu0  ;;  %v1165_v36 = vpop.f32.mrb[25].mxu1 }
 0x14b   : > { %v974_v37 = vpop.f32.mrb[26].mxu0  ;;  %v1166_v38 = vpop.f32.mrb[26].mxu1 }
 0x14c   : > { %v975_v39 = vadd.f32 %v2966_v49, %v974_v37  ;;  %v1167_v40 = vadd.f32 %v2966_v49, %v1166_v38  ;;  %v976_v41 = vpop.f32.mrb[27].mxu0  ;;  %v1168_v42 = vpop.f32.mrb[27].mxu1  ;;  %v1318_v43 = vmax.f32 %v972_v33, 0.0  ;;  %v1366_v44 = vmax.f32 %v1164_v34, 0.0 }
 0x14e   : > { %v1319_v45 = vmax.f32 %v975_v39, 0.0  ;;  %v1367_v46 = vmax.f32 %v1167_v40, 0.0 }
 0x150   : > { %v2287_v47 = vpack.c.bf16 %v1319_v45, %v1318_v43  ;;  %v2407_v48 = vpack.c.bf16 %v1367_v46, %v1366_v44 }
 0x151   : > { %v979_v50 = vpop.f32.mrb[28].mxu0  ;;  %v1171_v51 = vpop.f32.mrb[28].mxu1 }
 0x152   : > { %2499 = vst [vmem:[%s2976_s4 + $0x30] sm:$0xff] %v2287_v47   ;;  %2523 = vst [vmem:[%s2976_s4 + $0xf0] sm:$0xff] %v2407_v48   ;;  %v980_v52 = vadd.f32 %v2966_v49, %v979_v50  ;;  %v1172_v53 = vadd.f32 %v2966_v49, %v1171_v51  ;;  %v981_v54 = vpop.f32.mrb[29].mxu0  ;;  %v1173_v55 = vpop.f32.mrb[29].mxu1 }
 0x153   : > { %v982_v56 = vpop.f32.mrb[30].mxu0  ;;  %v1174_v57 = vpop.f32.mrb[30].mxu1 }
 0x154   : > { %v983_v58 = vadd.f32 %v2966_v49, %v982_v56  ;;  %v1175_v59 = vadd.f32 %v2966_v49, %v1174_v57  ;;  %v984_v60 = vpop.f32.mrb[31].mxu0  ;;  %v1176_v61 = vpop.f32.mrb[31].mxu1  ;;  %v1320_v62 = vmax.f32 %v980_v52, 0.0  ;;  %v1368_v63 = vmax.f32 %v1172_v53, 0.0 }
 0x156   : > { %v1321_v0 = vmax.f32 %v983_v58, 0.0  ;;  %v1369_v1 = vmax.f32 %v1175_v59, 0.0 }
 0x158   : > { %v2292_v2 = vpack.c.bf16 %v1321_v0, %v1320_v62  ;;  %v2412_v3 = vpack.c.bf16 %v1369_v1, %v1368_v63 }
 0x159   : > { %v987_v4 = vpop.f32.mrb[32].mxu0  ;;  %v1179_v5 = vpop.f32.mrb[32].mxu1 }
 0x15a   : > { %2500 = vst [vmem:[%s2976_s4 + $0x38] sm:$0xff] %v2292_v2   ;;  %2524 = vst [vmem:[%s2976_s4 + $0xf8] sm:$0xff] %v2412_v3   ;;  %v988_v6 = vadd.f32 %v2966_v49, %v987_v4  ;;  %v1180_v7 = vadd.f32 %v2966_v49, %v1179_v5  ;;  %v989_v8 = vpop.f32.mrb[33].mxu0  ;;  %v1181_v9 = vpop.f32.mrb[33].mxu1 }
 0x15b   : > { %v990_v10 = vpop.f32.mrb[34].mxu0  ;;  %v1182_v11 = vpop.f32.mrb[34].mxu1 }
 0x15c   : > { %v991_v12 = vadd.f32 %v2966_v49, %v990_v10  ;;  %v1183_v13 = vadd.f32 %v2966_v49, %v1182_v11  ;;  %v992_v14 = vpop.f32.mrb[35].mxu0  ;;  %v1184_v15 = vpop.f32.mrb[35].mxu1  ;;  %v1322_v16 = vmax.f32 %v988_v6, 0.0  ;;  %v1370_v17 = vmax.f32 %v1180_v7, 0.0 }
 0x15e   : > { %v1323_v18 = vmax.f32 %v991_v12, 0.0  ;;  %v1371_v19 = vmax.f32 %v1183_v13, 0.0 }
 0x160   : > { %v2297_v20 = vpack.c.bf16 %v1323_v18, %v1322_v16  ;;  %v2417_v21 = vpack.c.bf16 %v1371_v19, %v1370_v17 }
 0x161   : > { %v995_v22 = vpop.f32.mrb[36].mxu0  ;;  %v1187_v23 = vpop.f32.mrb[36].mxu1 }
 0x162   : > { %2501 = vst [vmem:[%s2976_s4 + $0x40] sm:$0xff] %v2297_v20   ;;  %2525 = vst [vmem:[%s2976_s4 + $0x100] sm:$0xff] %v2417_v21   ;;  %v996_v24 = vadd.f32 %v2966_v49, %v995_v22  ;;  %v1188_v25 = vadd.f32 %v2966_v49, %v1187_v23  ;;  %v997_v26 = vpop.f32.mrb[37].mxu0  ;;  %v1189_v27 = vpop.f32.mrb[37].mxu1 }
 0x163   : > { %v998_v28 = vpop.f32.mrb[38].mxu0  ;;  %v1190_v29 = vpop.f32.mrb[38].mxu1 }
 0x164   : > { %v999_v30 = vadd.f32 %v2966_v49, %v998_v28  ;;  %v1191_v31 = vadd.f32 %v2966_v49, %v1190_v29  ;;  %v1000_v32 = vpop.f32.mrb[39].mxu0  ;;  %v1192_v33 = vpop.f32.mrb[39].mxu1  ;;  %v1324_v34 = vmax.f32 %v996_v24, 0.0  ;;  %v1372_v35 = vmax.f32 %v1188_v25, 0.0 }
 0x166   : > { %v1325_v36 = vmax.f32 %v999_v30, 0.0  ;;  %v1373_v37 = vmax.f32 %v1191_v31, 0.0 }
 0x168   : > { %v2302_v38 = vpack.c.bf16 %v1325_v36, %v1324_v34  ;;  %v2422_v39 = vpack.c.bf16 %v1373_v37, %v1372_v35 }
 0x169   : > { %v1003_v40 = vpop.f32.mrb[40].mxu0  ;;  %v1195_v41 = vpop.f32.mrb[40].mxu1 }
 0x16a   : > { %2502 = vst [vmem:[%s2976_s4 + $0x48] sm:$0xff] %v2302_v38   ;;  %2526 = vst [vmem:[%s2976_s4 + $0x108] sm:$0xff] %v2422_v39   ;;  %v1004_v42 = vadd.f32 %v2966_v49, %v1003_v40  ;;  %v1196_v43 = vadd.f32 %v2966_v49, %v1195_v41  ;;  %v1005_v44 = vpop.f32.mrb[41].mxu0  ;;  %v1197_v45 = vpop.f32.mrb[41].mxu1 }
 0x16b   : > { %v1006_v46 = vpop.f32.mrb[42].mxu0  ;;  %v1198_v47 = vpop.f32.mrb[42].mxu1 }
 0x16c   : > { %v1007_v48 = vadd.f32 %v2966_v49, %v1006_v46  ;;  %v1199_v50 = vadd.f32 %v2966_v49, %v1198_v47  ;;  %v1008_v51 = vpop.f32.mrb[43].mxu0  ;;  %v1200_v52 = vpop.f32.mrb[43].mxu1  ;;  %v1326_v53 = vmax.f32 %v1004_v42, 0.0  ;;  %v1374_v54 = vmax.f32 %v1196_v43, 0.0 }
 0x16e   : > { %v1327_v55 = vmax.f32 %v1007_v48, 0.0  ;;  %v1375_v56 = vmax.f32 %v1199_v50, 0.0 }
 0x170   : > { %v2307_v57 = vpack.c.bf16 %v1327_v55, %v1326_v53  ;;  %v2427_v58 = vpack.c.bf16 %v1375_v56, %v1374_v54 }
 0x171   : > { %v1011_v59 = vpop.f32.mrb[44].mxu0  ;;  %v1203_v60 = vpop.f32.mrb[44].mxu1 }
 0x172   : > { %2503 = vst [vmem:[%s2976_s4 + $0x50] sm:$0xff] %v2307_v57   ;;  %2527 = vst [vmem:[%s2976_s4 + $0x110] sm:$0xff] %v2427_v58   ;;  %v1012_v61 = vadd.f32 %v2966_v49, %v1011_v59  ;;  %v1204_v62 = vadd.f32 %v2966_v49, %v1203_v60  ;;  %v1013_v63 = vpop.f32.mrb[45].mxu0  ;;  %v1205_v0 = vpop.f32.mrb[45].mxu1 }
 0x173   : > { %v1014_v1 = vpop.f32.mrb[46].mxu0  ;;  %v1206_v2 = vpop.f32.mrb[46].mxu1 }
 0x174   : > { %v1015_v3 = vadd.f32 %v2966_v49, %v1014_v1  ;;  %v1207_v4 = vadd.f32 %v2966_v49, %v1206_v2  ;;  %v1016_v5 = vpop.f32.mrb[47].mxu0  ;;  %v1208_v6 = vpop.f32.mrb[47].mxu1  ;;  %v1328_v7 = vmax.f32 %v1012_v61, 0.0  ;;  %v1376_v8 = vmax.f32 %v1204_v62, 0.0 }
 0x176   : > { %v1329_v9 = vmax.f32 %v1015_v3, 0.0  ;;  %v1377_v10 = vmax.f32 %v1207_v4, 0.0 }
 0x178   : > { %v2312_v11 = vpack.c.bf16 %v1329_v9, %v1328_v7  ;;  %v2432_v12 = vpack.c.bf16 %v1377_v10, %v1376_v8 }
 0x179   : > { %v1019_v13 = vpop.f32.mrb[48].mxu0  ;;  %v1211_v14 = vpop.f32.mrb[48].mxu1 }
 0x17a   : > { %2504 = vst [vmem:[%s2976_s4 + $0x58] sm:$0xff] %v2312_v11   ;;  %2528 = vst [vmem:[%s2976_s4 + $0x118] sm:$0xff] %v2432_v12   ;;  %v1020_v15 = vadd.f32 %v2966_v49, %v1019_v13  ;;  %v1212_v16 = vadd.f32 %v2966_v49, %v1211_v14  ;;  %v1021_v17 = vpop.f32.mrb[49].mxu0  ;;  %v1213_v18 = vpop.f32.mrb[49].mxu1 }
 0x17b   : > { %v1022_v19 = vpop.f32.mrb[50].mxu0  ;;  %v1214_v20 = vpop.f32.mrb[50].mxu1 }
 0x17c   : > { %v1023_v21 = vadd.f32 %v2966_v49, %v1022_v19  ;;  %v1215_v22 = vadd.f32 %v2966_v49, %v1214_v20  ;;  %v1024_v23 = vpop.f32.mrb[51].mxu0  ;;  %v1216_v24 = vpop.f32.mrb[51].mxu1  ;;  %v1330_v25 = vmax.f32 %v1020_v15, 0.0  ;;  %v1378_v26 = vmax.f32 %v1212_v16, 0.0 }
 0x17e   : > { %v1331_v27 = vmax.f32 %v1023_v21, 0.0  ;;  %v1379_v28 = vmax.f32 %v1215_v22, 0.0 }
 0x180   : > { %v2317_v29 = vpack.c.bf16 %v1331_v27, %v1330_v25  ;;  %v2437_v30 = vpack.c.bf16 %v1379_v28, %v1378_v26 }
 0x181   : > { %v1027_v31 = vpop.f32.mrb[52].mxu0  ;;  %v1219_v32 = vpop.f32.mrb[52].mxu1 }
 0x182   : > { %2505 = vst [vmem:[%s2976_s4 + $0x60] sm:$0xff] %v2317_v29   ;;  %2529 = vst [vmem:[%s2976_s4 + $0x120] sm:$0xff] %v2437_v30   ;;  %v1028_v33 = vadd.f32 %v2966_v49, %v1027_v31  ;;  %v1220_v34 = vadd.f32 %v2966_v49, %v1219_v32  ;;  %v1029_v35 = vpop.f32.mrb[53].mxu0  ;;  %v1221_v36 = vpop.f32.mrb[53].mxu1 }
 0x183   : > { %v1030_v37 = vpop.f32.mrb[54].mxu0  ;;  %v1222_v38 = vpop.f32.mrb[54].mxu1 }
 0x184   : > { %v1031_v39 = vadd.f32 %v2966_v49, %v1030_v37  ;;  %v1223_v40 = vadd.f32 %v2966_v49, %v1222_v38  ;;  %v1032_v41 = vpop.f32.mrb[55].mxu0  ;;  %v1224_v42 = vpop.f32.mrb[55].mxu1  ;;  %v1332_v43 = vmax.f32 %v1028_v33, 0.0  ;;  %v1380_v44 = vmax.f32 %v1220_v34, 0.0 }
 0x186   : > { %v1333_v45 = vmax.f32 %v1031_v39, 0.0  ;;  %v1381_v46 = vmax.f32 %v1223_v40, 0.0 }
 0x188   : > { %v2322_v47 = vpack.c.bf16 %v1333_v45, %v1332_v43  ;;  %v2442_v48 = vpack.c.bf16 %v1381_v46, %v1380_v44 }
 0x189   : > { %v1035_v50 = vpop.f32.mrb[56].mxu0  ;;  %v1227_v51 = vpop.f32.mrb[56].mxu1 }
 0x18a   : > { %2506 = vst [vmem:[%s2976_s4 + $0x68] sm:$0xff] %v2322_v47   ;;  %2530 = vst [vmem:[%s2976_s4 + $0x128] sm:$0xff] %v2442_v48   ;;  %v1036_v52 = vadd.f32 %v2966_v49, %v1035_v50  ;;  %v1228_v53 = vadd.f32 %v2966_v49, %v1227_v51  ;;  %v1037_v54 = vpop.f32.mrb[57].mxu0  ;;  %v1229_v55 = vpop.f32.mrb[57].mxu1 }
 0x18b   : > { %v1038_v56 = vpop.f32.mrb[58].mxu0  ;;  %v1230_v57 = vpop.f32.mrb[58].mxu1 }
 0x18c   : > { %v1039_v58 = vadd.f32 %v2966_v49, %v1038_v56  ;;  %v1231_v59 = vadd.f32 %v2966_v49, %v1230_v57  ;;  %v1040_v60 = vpop.f32.mrb[59].mxu0  ;;  %v1232_v61 = vpop.f32.mrb[59].mxu1  ;;  %v1334_v62 = vmax.f32 %v1036_v52, 0.0  ;;  %v1382_v63 = vmax.f32 %v1228_v53, 0.0 }
 0x18e   : > { %v1335_v0 = vmax.f32 %v1039_v58, 0.0  ;;  %v1383_v1 = vmax.f32 %v1231_v59, 0.0 }
 0x190   : > { %v2327_v2 = vpack.c.bf16 %v1335_v0, %v1334_v62  ;;  %v2447_v3 = vpack.c.bf16 %v1383_v1, %v1382_v63 }
 0x191   : > { %v1043_v4 = vpop.f32.mrb[60].mxu0  ;;  %v1235_v5 = vpop.f32.mrb[60].mxu1 }
 0x192   : > { %2507 = vst [vmem:[%s2976_s4 + $0x70] sm:$0xff] %v2327_v2   ;;  %2531 = vst [vmem:[%s2976_s4 + $0x130] sm:$0xff] %v2447_v3   ;;  %v1044_v6 = vadd.f32 %v2966_v49, %v1043_v4  ;;  %v1236_v7 = vadd.f32 %v2966_v49, %v1235_v5  ;;  %v1045_v8 = vpop.f32.mrb[61].mxu0  ;;  %v1237_v9 = vpop.f32.mrb[61].mxu1 }
 0x193   : > { %v1046_v10 = vpop.f32.mrb[62].mxu0  ;;  %v1238_v11 = vpop.f32.mrb[62].mxu1 }
 0x194   : > { %v1047_v12 = vadd.f32 %v2966_v49, %v1046_v10  ;;  %v1239_v13 = vadd.f32 %v2966_v49, %v1238_v11  ;;  %v1048_v14 = vpop.f32.mrb[63].mxu0  ;;  %v1240_v15 = vpop.f32.mrb[63].mxu1  ;;  %v1336_v16 = vmax.f32 %v1044_v6, 0.0  ;;  %v1384_v17 = vmax.f32 %v1236_v7, 0.0 }
 0x196   : > { %v1337_v18 = vmax.f32 %v1047_v12, 0.0  ;;  %v1385_v19 = vmax.f32 %v1239_v13, 0.0 }
 0x198   : > { %v2332_v20 = vpack.c.bf16 %v1337_v18, %v1336_v16  ;;  %v2452_v21 = vpack.c.bf16 %v1385_v19, %v1384_v17 }
 0x199   : > { %v1051_v22 = vpop.f32.mrb[64].mxu0  ;;  %v1243_v23 = vpop.f32.mrb[64].mxu1 }
 0x19a   : > { %2508 = vst [vmem:[%s2976_s4 + $0x78] sm:$0xff] %v2332_v20   ;;  %2532 = vst [vmem:[%s2976_s4 + $0x138] sm:$0xff] %v2452_v21   ;;  %v1052_v24 = vadd.f32 %v2966_v49, %v1051_v22  ;;  %v1244_v25 = vadd.f32 %v2966_v49, %v1243_v23  ;;  %v1053_v26 = vpop.f32.mrb[65].mxu0  ;;  %v1245_v27 = vpop.f32.mrb[65].mxu1 }
 0x19b   : > { %v1054_v28 = vpop.f32.mrb[66].mxu0  ;;  %v1246_v29 = vpop.f32.mrb[66].mxu1 }
 0x19c   : > { %v1055_v30 = vadd.f32 %v2966_v49, %v1054_v28  ;;  %v1247_v31 = vadd.f32 %v2966_v49, %v1246_v29  ;;  %v1056_v32 = vpop.f32.mrb[67].mxu0  ;;  %v1248_v33 = vpop.f32.mrb[67].mxu1  ;;  %v1338_v34 = vmax.f32 %v1052_v24, 0.0  ;;  %v1386_v35 = vmax.f32 %v1244_v25, 0.0 }
 0x19e   : > { %v1339_v36 = vmax.f32 %v1055_v30, 0.0  ;;  %v1387_v37 = vmax.f32 %v1247_v31, 0.0 }
 0x1a0   : > { %v2337_v38 = vpack.c.bf16 %v1339_v36, %v1338_v34  ;;  %v2457_v39 = vpack.c.bf16 %v1387_v37, %v1386_v35 }
 0x1a1   : > { %v1059_v40 = vpop.f32.mrb[68].mxu0  ;;  %v1251_v41 = vpop.f32.mrb[68].mxu1 }
 0x1a2   : > { %2509 = vst [vmem:[%s2976_s4 + $0x80] sm:$0xff] %v2337_v38   ;;  %2533 = vst [vmem:[%s2976_s4 + $0x140] sm:$0xff] %v2457_v39   ;;  %v1060_v42 = vadd.f32 %v2966_v49, %v1059_v40  ;;  %v1252_v43 = vadd.f32 %v2966_v49, %v1251_v41  ;;  %v1061_v44 = vpop.f32.mrb[69].mxu0  ;;  %v1253_v45 = vpop.f32.mrb[69].mxu1 }
 0x1a3   : > { %v1062_v46 = vpop.f32.mrb[70].mxu0  ;;  %v1254_v47 = vpop.f32.mrb[70].mxu1 }
 0x1a4   : > { %v1063_v48 = vadd.f32 %v2966_v49, %v1062_v46  ;;  %v1255_v50 = vadd.f32 %v2966_v49, %v1254_v47  ;;  %v1064_v51 = vpop.f32.mrb[71].mxu0  ;;  %v1256_v52 = vpop.f32.mrb[71].mxu1  ;;  %v1340_v53 = vmax.f32 %v1060_v42, 0.0  ;;  %v1388_v54 = vmax.f32 %v1252_v43, 0.0 }
 0x1a6   : > { %v1341_v55 = vmax.f32 %v1063_v48, 0.0  ;;  %v1389_v56 = vmax.f32 %v1255_v50, 0.0 }
 0x1a8   : > { %v2342_v57 = vpack.c.bf16 %v1341_v55, %v1340_v53  ;;  %v2462_v58 = vpack.c.bf16 %v1389_v56, %v1388_v54 }
 0x1a9   : > { %v1067_v59 = vpop.f32.mrb[72].mxu0  ;;  %v1259_v60 = vpop.f32.mrb[72].mxu1 }
 0x1aa   : > { %2510 = vst [vmem:[%s2976_s4 + $0x88] sm:$0xff] %v2342_v57   ;;  %2534 = vst [vmem:[%s2976_s4 + $0x148] sm:$0xff] %v2462_v58   ;;  %v1068_v61 = vadd.f32 %v2966_v49, %v1067_v59  ;;  %v1260_v62 = vadd.f32 %v2966_v49, %v1259_v60  ;;  %v1069_v63 = vpop.f32.mrb[73].mxu0  ;;  %v1261_v0 = vpop.f32.mrb[73].mxu1 }
 0x1ab   : > { %v1070_v1 = vpop.f32.mrb[74].mxu0  ;;  %v1262_v2 = vpop.f32.mrb[74].mxu1 }
 0x1ac   : > { %v1071_v3 = vadd.f32 %v2966_v49, %v1070_v1  ;;  %v1263_v4 = vadd.f32 %v2966_v49, %v1262_v2  ;;  %v1072_v5 = vpop.f32.mrb[75].mxu0  ;;  %v1264_v6 = vpop.f32.mrb[75].mxu1  ;;  %v1342_v7 = vmax.f32 %v1068_v61, 0.0  ;;  %v1390_v8 = vmax.f32 %v1260_v62, 0.0 }
 0x1ae   : > { %v1343_v9 = vmax.f32 %v1071_v3, 0.0  ;;  %v1391_v10 = vmax.f32 %v1263_v4, 0.0 }
 0x1b0   : > { %v2347_v11 = vpack.c.bf16 %v1343_v9, %v1342_v7  ;;  %v2467_v12 = vpack.c.bf16 %v1391_v10, %v1390_v8 }
 0x1b1   : > { %v1075_v13 = vpop.f32.mrb[76].mxu0  ;;  %v1267_v14 = vpop.f32.mrb[76].mxu1 }
 0x1b2   : > { %2511 = vst [vmem:[%s2976_s4 + $0x90] sm:$0xff] %v2347_v11   ;;  %2535 = vst [vmem:[%s2976_s4 + $0x150] sm:$0xff] %v2467_v12   ;;  %v1076_v15 = vadd.f32 %v2966_v49, %v1075_v13  ;;  %v1268_v16 = vadd.f32 %v2966_v49, %v1267_v14  ;;  %v1077_v17 = vpop.f32.mrb[77].mxu0  ;;  %v1269_v18 = vpop.f32.mrb[77].mxu1 }
 0x1b3   : > { %v1078_v19 = vpop.f32.mrb[78].mxu0  ;;  %v1270_v20 = vpop.f32.mrb[78].mxu1 }
 0x1b4   : > { %v1079_v21 = vadd.f32 %v2966_v49, %v1078_v19  ;;  %v1271_v22 = vadd.f32 %v2966_v49, %v1270_v20  ;;  %v1080_v23 = vpop.f32.mrb[79].mxu0  ;;  %v1272_v24 = vpop.f32.mrb[79].mxu1  ;;  %v1344_v25 = vmax.f32 %v1076_v15, 0.0  ;;  %v1392_v26 = vmax.f32 %v1268_v16, 0.0 }
 0x1b6   : > { %v1345_v27 = vmax.f32 %v1079_v21, 0.0  ;;  %v1393_v28 = vmax.f32 %v1271_v22, 0.0 }
 0x1b8   : > { %v2352_v29 = vpack.c.bf16 %v1345_v27, %v1344_v25  ;;  %v2472_v30 = vpack.c.bf16 %v1393_v28, %v1392_v26 }
 0x1b9   : > { %v1083_v31 = vpop.f32.mrb[80].mxu0  ;;  %v1275_v32 = vpop.f32.mrb[80].mxu1 }
 0x1ba   : > { %2512 = vst [vmem:[%s2976_s4 + $0x98] sm:$0xff] %v2352_v29   ;;  %2536 = vst [vmem:[%s2976_s4 + $0x158] sm:$0xff] %v2472_v30   ;;  %v1084_v33 = vadd.f32 %v2966_v49, %v1083_v31  ;;  %v1276_v34 = vadd.f32 %v2966_v49, %v1275_v32  ;;  %v1085_v35 = vpop.f32.mrb[81].mxu0  ;;  %v1277_v36 = vpop.f32.mrb[81].mxu1 }
 0x1bb   : > { %v1086_v37 = vpop.f32.mrb[82].mxu0  ;;  %v1278_v38 = vpop.f32.mrb[82].mxu1 }
 0x1bc   : > { %v1087_v39 = vadd.f32 %v2966_v49, %v1086_v37  ;;  %v1279_v40 = vadd.f32 %v2966_v49, %v1278_v38  ;;  %v1088_v41 = vpop.f32.mrb[83].mxu0  ;;  %v1280_v42 = vpop.f32.mrb[83].mxu1  ;;  %v1346_v43 = vmax.f32 %v1084_v33, 0.0  ;;  %v1394_v44 = vmax.f32 %v1276_v34, 0.0 }
 0x1be   : > { %v1347_v45 = vmax.f32 %v1087_v39, 0.0  ;;  %v1395_v46 = vmax.f32 %v1279_v40, 0.0 }
 0x1c0   : > { %v2357_v47 = vpack.c.bf16 %v1347_v45, %v1346_v43  ;;  %v2477_v48 = vpack.c.bf16 %v1395_v46, %v1394_v44 }
 0x1c1   : > { %v1091_v50 = vpop.f32.mrb[84].mxu0  ;;  %v1283_v51 = vpop.f32.mrb[84].mxu1 }
 0x1c2   : > { %2513 = vst [vmem:[%s2976_s4 + $0xa0] sm:$0xff] %v2357_v47   ;;  %2537 = vst [vmem:[%s2976_s4 + $0x160] sm:$0xff] %v2477_v48   ;;  %v1092_v52 = vadd.f32 %v2966_v49, %v1091_v50  ;;  %v1284_v53 = vadd.f32 %v2966_v49, %v1283_v51  ;;  %v1093_v54 = vpop.f32.mrb[85].mxu0  ;;  %v1285_v55 = vpop.f32.mrb[85].mxu1 }
 0x1c3   : > { %v1094_v56 = vpop.f32.mrb[86].mxu0  ;;  %v1286_v57 = vpop.f32.mrb[86].mxu1 }
 0x1c4   : > { %v1095_v58 = vadd.f32 %v2966_v49, %v1094_v56  ;;  %v1287_v59 = vadd.f32 %v2966_v49, %v1286_v57  ;;  %v1096_v60 = vpop.f32.mrb[87].mxu0  ;;  %v1288_v61 = vpop.f32.mrb[87].mxu1  ;;  %v1348_v62 = vmax.f32 %v1092_v52, 0.0  ;;  %v1396_v63 = vmax.f32 %v1284_v53, 0.0 }
 0x1c6   : > { %v1349_v0 = vmax.f32 %v1095_v58, 0.0  ;;  %v1397_v1 = vmax.f32 %v1287_v59, 0.0 }
 0x1c8   : > { %v2362_v2 = vpack.c.bf16 %v1349_v0, %v1348_v62  ;;  %v2482_v3 = vpack.c.bf16 %v1397_v1, %v1396_v63 }
 0x1c9   : > { %v1099_v4 = vpop.f32.mrb[88].mxu0  ;;  %v1291_v5 = vpop.f32.mrb[88].mxu1 }
 0x1ca   : > { %2514 = vst [vmem:[%s2976_s4 + $0xa8] sm:$0xff] %v2362_v2   ;;  %2538 = vst [vmem:[%s2976_s4 + $0x168] sm:$0xff] %v2482_v3   ;;  %v1100_v6 = vadd.f32 %v2966_v49, %v1099_v4  ;;  %v1292_v7 = vadd.f32 %v2966_v49, %v1291_v5  ;;  %v1101_v8 = vpop.f32.mrb[89].mxu0  ;;  %v1293_v9 = vpop.f32.mrb[89].mxu1 }
 0x1cb   : > { %v1102_v10 = vpop.f32.mrb[90].mxu0  ;;  %v1294_v11 = vpop.f32.mrb[90].mxu1 }
 0x1cc   : > { %v1103_v12 = vadd.f32 %v2966_v49, %v1102_v10  ;;  %v1295_v13 = vadd.f32 %v2966_v49, %v1294_v11  ;;  %v1104_v14 = vpop.f32.mrb[91].mxu0  ;;  %v1296_v15 = vpop.f32.mrb[91].mxu1  ;;  %v1350_v16 = vmax.f32 %v1100_v6, 0.0  ;;  %v1398_v17 = vmax.f32 %v1292_v7, 0.0 }
 0x1ce   : > { %v1351_v18 = vmax.f32 %v1103_v12, 0.0  ;;  %v1399_v19 = vmax.f32 %v1295_v13, 0.0 }
 0x1d0   : > { %v2367_v20 = vpack.c.bf16 %v1351_v18, %v1350_v16  ;;  %v2487_v21 = vpack.c.bf16 %v1399_v19, %v1398_v17 }
 0x1d1   : > { %v1107_v22 = vpop.f32.mrb[92].mxu0  ;;  %v1299_v23 = vpop.f32.mrb[92].mxu1 }
 0x1d2   : > { %2515 = vst [vmem:[%s2976_s4 + $0xb0] sm:$0xff] %v2367_v20   ;;  %2539 = vst [vmem:[%s2976_s4 + $0x170] sm:$0xff] %v2487_v21   ;;  %v1108_v24 = vadd.f32 %v2966_v49, %v1107_v22  ;;  %v1300_v25 = vadd.f32 %v2966_v49, %v1299_v23  ;;  %v1109_v26 = vpop.f32.mrb[93].mxu0  ;;  %v1301_v27 = vpop.f32.mrb[93].mxu1 }
 0x1d3   : > { %v1110_v28 = vpop.f32.mrb[94].mxu0  ;;  %v1302_v29 = vpop.f32.mrb[94].mxu1 }
 0x1d4   : > { %v1111_v30 = vadd.f32 %v2966_v49, %v1110_v28  ;;  %v1303_v31 = vadd.f32 %v2966_v49, %v1302_v29  ;;  %v1112_v32 = vpop.f32.mrb[95].mxu0  ;;  %v1304_v33 = vpop.f32.mrb[95].mxu1  ;;  %v1352_v34 = vmax.f32 %v1108_v24, 0.0  ;;  %v1400_v35 = vmax.f32 %v1300_v25, 0.0 }
 0x1d6   : > { %v1353_v36 = vmax.f32 %v1111_v30, 0.0  ;;  %v1401_v37 = vmax.f32 %v1303_v31, 0.0 }
 0x1d8   : > { %v2372_v38 = vpack.c.bf16 %v1353_v36, %v1352_v34  ;;  %v2492_v39 = vpack.c.bf16 %v1401_v37, %v1400_v35 }
 0x1da   : > { %2516 = vst [vmem:[%s2976_s4 + $0xb8] sm:$0xff] %v2372_v38   ;;  %2540 = vst [vmem:[%s2976_s4 + $0x178] sm:$0xff] %v2492_v39  }
 0x1db PF: > { %s13_s12 = sadd.s32 1, %s2748_s12  }
 0x1dc   : > { %p10_p4 = scmp.ge.s32.totalorder %s13_s12, 4  }
 0x1de   :  { %12 = sbr.rel (!%p10_p4) target bundleno = 1 (0x1), region = 62 }

// kernel: net33_2_forward.6
= control target key start
LH: loop header
LB: loop body
LE: loop exit
PB: predicated region body
PF: predicated region fallthrough
CT: control target
= control target key end

     0   :  { %v2565_v0 = vmov 0   ;;  %s3269_s1 = inlined_call_operand.vmem [shape: bf16[384,128], index: 1, kind: input, shape index: {}]   ;;  %s3270_s0 = inlined_call_operand.vmem [shape: bf16[512,384], index: 0, kind: input, shape index: {}]   ;;  %s3271_s2 = inlined_call_operand.vmem [shape: f32[1,128], index: 2, kind: input, shape index: {}]   ;;  %s3272_s3 = inlined_call_operand.vmem [shape: bf16[512,128], index: 3, kind: output, shape index: {}]  }
   0x1   :  { %854 = vmatprep.subr.bf16.mxu0 %v2565_v0  ;;  %2380 = vmatprep.subr.bf16.mxu1 %v2565_v0  ;;  %v2413_v1 = vld [vmem:[%s3269_s1] sm:$0xff]   ;;  %v2414_v2 = vld [vmem:[%s3269_s1 + $0x8] sm:$0xff]   ;;  %v2415_v3 = vld [vmem:[%s3269_s1 + $0x10] sm:$0xff]  }
   0x2   :  { %855 = vmatpush1.bf16.msra.mxu0 %v2413_v1  ;;  %2396 = vmatpush1.bf16.msra.mxu1 %v2413_v1  ;;  %v2416_v4 = vld [vmem:[%s3269_s1 + $0x18] sm:$0xff]   ;;  %v2417_v5 = vld [vmem:[%s3269_s1 + $0x20] sm:$0xff]   ;;  %v2418_v7 = vld [vmem:[%s3269_s1 + $0x28] sm:$0xff]  }
   0x3   :  { %856 = vmatprep.subr.bf16.mxu0 %v2565_v0  ;;  %2381 = vmatprep.subr.bf16.mxu1 %v2565_v0  ;;  %v2431_v6 = vld [vmem:[%s3270_s0 + $0x4] ss:$12 sps:$4 sm:$0xff]   ;;  %v2420_v10 = vld [vmem:[%s3269_s1 + $0x38] sm:$0xff]   ;;  %v2422_v12 = vld [vmem:[%s3269_s1 + $0x48] sm:$0xff]  }
   0x4   :  { %v2434_v8 = vld [vmem:[%s3270_s0 + $0x244] ss:$12 sps:$4 sm:$0xff]   ;;  %886 = vmatprep.mubr.bf16.mxu0 %v2431_v6  ;;  %v2424_v14 = vld [vmem:[%s3269_s1 + $0x58] sm:$0xff]   ;;  %v2426_v16 = vld [vmem:[%s3269_s1 + $0x68] sm:$0xff]  }
   0x5   :  { %1078 = vmatprep.mubr.bf16.mxu1 %v2434_v8  ;;  %v2419_v9 = vld [vmem:[%s3269_s1 + $0x30] sm:$0xff]   ;;  %v2421_v11 = vld [vmem:[%s3269_s1 + $0x40] sm:$0xff]   ;;  %v2428_v18 = vld [vmem:[%s3269_s1 + $0x78] sm:$0xff]  }
   0x6   :  { %857 = vmatpush1.bf16.msra.mxu0 %v2414_v2  ;;  %2397 = vmatpush1.bf16.msra.mxu1 %v2414_v2  ;;  %v2423_v13 = vld [vmem:[%s3269_s1 + $0x50] sm:$0xff]   ;;  %v2425_v15 = vld [vmem:[%s3269_s1 + $0x60] sm:$0xff]   ;;  %v2436_v22 = vld [vmem:[%s3270_s0 + $0x1c] ss:$12 sps:$4 sm:$0xff]  }
   0x7   :  { %858 = vmatprep.subr.bf16.mxu0 %v2565_v0  ;;  %2382 = vmatprep.subr.bf16.mxu1 %v2565_v0  ;;  %v2427_v17 = vld [vmem:[%s3269_s1 + $0x70] sm:$0xff]   ;;  %v2435_v19 = vld [vmem:[%s3269_s1 + $0x80] sm:$0xff]   ;;  %v2438_v23 = vld [vmem:[%s3270_s0 + $0x25c] ss:$12 sps:$4 sm:$0xff]  }
   0x8   :  { %v2429_v20 = vld [vmem:[%s3270_s0] ss:$12 sps:$4 sm:$0xff]   ;;  %v2449_v25 = vld [vmem:[%s3269_s1 + $0x90] sm:$0xff]   ;;  %v2440_v26 = vld [vmem:[%s3270_s0 + $0x18] ss:$12 sps:$4 sm:$0xff]  }
   0x9   :  { %v2432_v21 = vld [vmem:[%s3270_s0 + $0x240] ss:$12 sps:$4 sm:$0xff]   ;;  %v2441_v27 = vld [vmem:[%s3270_s0 + $0x258] ss:$12 sps:$4 sm:$0xff]   ;;  %v2447_v31 = vld [vmem:[%s3270_s0 + $0x30] ss:$12 sps:$4 sm:$0xff]  }
   0xa   :  { %859 = vmatpush1.bf16.msra.mxu0 %v2415_v3  ;;  %2398 = vmatpush1.bf16.msra.mxu1 %v2415_v3  ;;  %v2442_v24 = vld [vmem:[%s3269_s1 + $0x88] sm:$0xff]   ;;  %v2443_v28 = vld [vmem:[%s3270_s0 + $0x34] ss:$12 sps:$4 sm:$0xff]   ;;  %v2456_v30 = vld [vmem:[%s3269_s1 + $0x98] sm:$0xff]  }
   0xb   :  { %860 = vmatprep.subr.bf16.mxu0 %v2565_v0  ;;  %2383 = vmatprep.subr.bf16.mxu1 %v2565_v0  ;;  %v2445_v29 = vld [vmem:[%s3270_s0 + $0x274] ss:$12 sps:$4 sm:$0xff]   ;;  %v2448_v33 = vld [vmem:[%s3270_s0 + $0x270] ss:$12 sps:$4 sm:$0xff]   ;;  %v2450_v34 = vld [vmem:[%s3270_s0 + $0x4c] ss:$12 sps:$4 sm:$0xff]  }
   0xc   :  { %v2463_v32 = vld [vmem:[%s3269_s1 + $0xa0] sm:$0xff]   ;;  %v2452_v35 = vld [vmem:[%s3270_s0 + $0x28c] ss:$12 sps:$4 sm:$0xff]   ;;  %v2454_v37 = vld [vmem:[%s3270_s0 + $0x48] ss:$12 sps:$4 sm:$0xff]  }
   0xd   :  { %v2470_v36 = vld [vmem:[%s3269_s1 + $0xa8] sm:$0xff]   ;;  %v2457_v39 = vld [vmem:[%s3270_s0 + $0x64] ss:$12 sps:$4 sm:$0xff]   ;;  %v2484_v42 = vld [vmem:[%s3269_s1 + $0xb8] sm:$0xff]  }
   0xe   :  { %861 = vmatpush1.bf16.msra.mxu0 %v2416_v4  ;;  %2399 = vmatpush1.bf16.msra.mxu1 %v2416_v4  ;;  %v2455_v38 = vld [vmem:[%s3270_s0 + $0x288] ss:$12 sps:$4 sm:$0xff]   ;;  %v2459_v40 = vld [vmem:[%s3270_s0 + $0x2a4] ss:$12 sps:$4 sm:$0xff]   ;;  %v2461_v43 = vld [vmem:[%s3270_s0 + $0x60] ss:$12 sps:$4 sm:$0xff]  }
   0xf   :  { %862 = vmatprep.subr.bf16.mxu0 %v2565_v0  ;;  %2384 = vmatprep.subr.bf16.mxu1 %v2565_v0  ;;  %v2477_v41 = vld [vmem:[%s3269_s1 + $0xb0] sm:$0xff]   ;;  %v2462_v44 = vld [vmem:[%s3270_s0 + $0x2a0] ss:$12 sps:$4 sm:$0xff]   ;;  %v2464_v45 = vld [vmem:[%s3270_s0 + $0x7c] ss:$12 sps:$4 sm:$0xff]  }
  0x10   :  { %v2466_v46 = vld [vmem:[%s3270_s0 + $0x2bc] ss:$12 sps:$4 sm:$0xff]   ;;  %v2468_v47 = vld [vmem:[%s3270_s0 + $0x78] ss:$12 sps:$4 sm:$0xff]   ;;  %v2471_v49 = vld [vmem:[%s3270_s0 + $0x94] ss:$12 sps:$4 sm:$0xff]  }
  0x11   :  { %v2469_v48 = vld [vmem:[%s3270_s0 + $0x2b8] ss:$12 sps:$4 sm:$0xff]   ;;  %v2473_v50 = vld [vmem:[%s3270_s0 + $0x2d4] ss:$12 sps:$4 sm:$0xff]   ;;  %v2475_v51 = vld [vmem:[%s3270_s0 + $0x90] ss:$12 sps:$4 sm:$0xff]  }
  0x12   :  { %863 = vmatpush1.bf16.msra.mxu0 %v2417_v5  ;;  %2400 = vmatpush1.bf16.msra.mxu1 %v2417_v5  ;;  %v2476_v52 = vld [vmem:[%s3270_s0 + $0x2d0] ss:$12 sps:$4 sm:$0xff]   ;;  %v2478_v53 = vld [vmem:[%s3270_s0 + $0xac] ss:$12 sps:$4 sm:$0xff]   ;;  %v2482_v55 = vld [vmem:[%s3270_s0 + $0xa8] ss:$12 sps:$4 sm:$0xff]  }
  0x13   :  { %864 = vmatprep.subr.bf16.mxu0 %v2565_v0  ;;  %2385 = vmatprep.subr.bf16.mxu1 %v2565_v0  ;;  %v2480_v54 = vld [vmem:[%s3270_s0 + $0x2ec] ss:$12 sps:$4 sm:$0xff]   ;;  %v2483_v56 = vld [vmem:[%s3270_s0 + $0x2e8] ss:$12 sps:$4 sm:$0xff]   ;;  %v2485_v57 = vld [vmem:[%s3270_s0 + $0xc4] ss:$12 sps:$4 sm:$0xff]  }
  0x14   :  { %v2487_v58 = vld [vmem:[%s3270_s0 + $0x8] ss:$12 sps:$4 sm:$0xff]   ;;  %v2488_v59 = vld [vmem:[%s3270_s0 + $0xc0] ss:$12 sps:$4 sm:$0xff]   ;;  %v2492_v62 = vld [vmem:[%s3270_s0 + $0x38] ss:$12 sps:$4 sm:$0xff]  }
  0x15   :  { %v2489_v60 = vld [vmem:[%s3270_s0 + $0x20] ss:$12 sps:$4 sm:$0xff]   ;;  %v2490_v61 = vld [vmem:[%s3270_s0 + $0xdc] ss:$12 sps:$4 sm:$0xff]   ;;  %v2493_v63 = vld [vmem:[%s3270_s0 + $0xd8] ss:$12 sps:$4 sm:$0xff]  }
  0x16   :  { %865 = vmatpush1.bf16.msra.mxu0 %v2418_v7  ;;  %2401 = vmatpush1.bf16.msra.mxu1 %v2418_v7  ;;  %v2495_v1 = vld [vmem:[%s3270_s0 + $0xf4] ss:$12 sps:$4 sm:$0xff]   ;;  %v2498_v3 = vld [vmem:[%s3270_s0 + $0xf0] ss:$12 sps:$4 sm:$0xff]   ;;  %v2500_v5 = vld [vmem:[%s3270_s0 + $0x10c] ss:$12 sps:$4 sm:$0xff]  }
  0x17   :  { %866 = vmatprep.subr.bf16.mxu0 %v2565_v0  ;;  %2386 = vmatprep.subr.bf16.mxu1 %v2565_v0  ;;  %v2497_v2 = vld [vmem:[%s3270_s0 + $0x68] ss:$12 sps:$4 sm:$0xff]   ;;  %v2499_v4 = vld [vmem:[%s3270_s0 + $0x80] ss:$12 sps:$4 sm:$0xff]   ;;  %v2502_v6 = vld [vmem:[%s3270_s0 + $0x98] ss:$12 sps:$4 sm:$0xff]  }
  0x18   :  { %v2503_v7 = vld [vmem:[%s3270_s0 + $0x108] ss:$12 sps:$4 sm:$0xff]   ;;  %v2504_v8 = vld [vmem:[%s3270_s0 + $0xb0] ss:$12 sps:$4 sm:$0xff]  }
  0x1a   :  { %867 = vmatpush1.bf16.msra.mxu0 %v2419_v9  ;;  %2402 = vmatpush1.bf16.msra.mxu1 %v2419_v9  ;;  %v2505_v9 = vld [vmem:[%s3270_s0 + $0x124] ss:$12 sps:$4 sm:$0xff]  }
  0x1b   :  { %868 = vmatprep.subr.bf16.mxu0 %v2565_v0  ;;  %2387 = vmatprep.subr.bf16.mxu1 %v2565_v0 }
  0x1e   :  { %869 = vmatpush1.bf16.msra.mxu0 %v2420_v10  ;;  %2403 = vmatpush1.bf16.msra.mxu1 %v2420_v10  ;;  %v2507_v10 = vld [vmem:[%s3270_s0 + $0xc8] ss:$12 sps:$4 sm:$0xff]  }
  0x1f   :  { %870 = vmatprep.subr.bf16.mxu0 %v2565_v0  ;;  %2388 = vmatprep.subr.bf16.mxu1 %v2565_v0 }
  0x22   :  { %871 = vmatpush1.bf16.msra.mxu0 %v2421_v11  ;;  %2404 = vmatpush1.bf16.msra.mxu1 %v2421_v11  ;;  %v2508_v11 = vld [vmem:[%s3270_s0 + $0x120] ss:$12 sps:$4 sm:$0xff]  }
  0x23   :  { %872 = vmatprep.subr.bf16.mxu0 %v2565_v0  ;;  %2389 = vmatprep.subr.bf16.mxu1 %v2565_v0 }
  0x26   :  { %873 = vmatpush1.bf16.msra.mxu0 %v2422_v12  ;;  %2405 = vmatpush1.bf16.msra.mxu1 %v2422_v12  ;;  %v2509_v12 = vld [vmem:[%s3270_s0 + $0xe0] ss:$12 sps:$4 sm:$0xff]  }
  0x27   :  { %874 = vmatprep.subr.bf16.mxu0 %v2565_v0  ;;  %2390 = vmatprep.subr.bf16.mxu1 %v2565_v0 }
  0x2a   :  { %875 = vmatpush1.bf16.msra.mxu0 %v2423_v13  ;;  %2406 = vmatpush1.bf16.msra.mxu1 %v2423_v13  ;;  %v2510_v13 = vld [vmem:[%s3270_s0 + $0x13c] ss:$12 sps:$4 sm:$0xff]  }
  0x2b   :  { %876 = vmatprep.subr.bf16.mxu0 %v2565_v0  ;;  %2391 = vmatprep.subr.bf16.mxu1 %v2565_v0 }
  0x2e   :  { %877 = vmatpush1.bf16.msra.mxu0 %v2424_v14  ;;  %2407 = vmatpush1.bf16.msra.mxu1 %v2424_v14  ;;  %v2512_v14 = vld [vmem:[%s3270_s0 + $0xf8] ss:$12 sps:$4 sm:$0xff]  }
  0x2f   :  { %878 = vmatprep.subr.bf16.mxu0 %v2565_v0  ;;  %2392 = vmatprep.subr.bf16.mxu1 %v2565_v0 }
  0x32   :  { %879 = vmatpush1.bf16.msra.mxu0 %v2425_v15  ;;  %2408 = vmatpush1.bf16.msra.mxu1 %v2425_v15  ;;  %v2513_v15 = vld [vmem:[%s3270_s0 + $0x138] ss:$12 sps:$4 sm:$0xff]  }
  0x33   :  { %880 = vmatprep.subr.bf16.mxu0 %v2565_v0  ;;  %2393 = vmatprep.subr.bf16.mxu1 %v2565_v0 }
  0x36   :  { %881 = vmatpush1.bf16.msra.mxu0 %v2426_v16  ;;  %2409 = vmatpush1.bf16.msra.mxu1 %v2426_v16  ;;  %v2514_v16 = vld [vmem:[%s3270_s0 + $0x110] ss:$12 sps:$4 sm:$0xff]  }
  0x37   :  { %882 = vmatprep.subr.bf16.mxu0 %v2565_v0  ;;  %2394 = vmatprep.subr.bf16.mxu1 %v2565_v0 }
  0x3a   :  { %883 = vmatpush1.bf16.msra.mxu0 %v2427_v17  ;;  %2410 = vmatpush1.bf16.msra.mxu1 %v2427_v17  ;;  %v2515_v17 = vld [vmem:[%s3270_s0 + $0x154] ss:$12 sps:$4 sm:$0xff]  }
  0x3b   :  { %884 = vmatprep.subr.bf16.mxu0 %v2565_v0  ;;  %2395 = vmatprep.subr.bf16.mxu1 %v2565_v0  ;;  %v2494_v0 = vld [vmem:[%s3270_s0 + $0x50] ss:$12 sps:$4 sm:$0xff]  }
  0x3e   :  { %885 = vmatpush1.bf16.msra.mxu0 %v2428_v18  ;;  %2411 = vmatpush1.bf16.msra.mxu1 %v2428_v18  ;;  %v2517_v18 = vld [vmem:[%s3270_s0 + $0x128] ss:$12 sps:$4 sm:$0xff]  }
  0x3f   :  { %2300 = vmatprep.subr.bf16.mxu1 %v2435_v19 }
  0x41   :  { %887 = vmatmul.mubr.bf16.vlgmr.msra.gmra.mrb[0].mxu0 %v2429_v20  ;;  %1079 = vmatmul.mubr.bf16.vlgmr.msra.gmra.mrb[0].mxu1 %v2432_v21  ;;  %v2519_v20 = vld [vmem:[%s3270_s0 + $0x140] ss:$12 sps:$4 sm:$0xff]  }
  0x42   :  { %2301 = vmatpush3.bf16.msra.mxu1 %v2435_v19  ;;  %894 = vmatprep.mubr.bf16.mxu0 %v2436_v22  ;;  %v2518_v19 = vld [vmem:[%s3270_s0 + $0x150] ss:$12 sps:$4 sm:$0xff]   ;;  %v2520_v21 = vld [vmem:[%s3270_s0 + $0x16c] ss:$12 sps:$4 sm:$0xff]  }
  0x43   :  { %1086 = vmatprep.mubr.bf16.mxu1 %v2438_v23  ;;  %2302 = vmatprep.subr.bf16.mxu1 %v2442_v24  ;;  %v2522_v22 = vld [vmem:[%s3270_s0 + $0x158] ss:$12 sps:$4 sm:$0xff]   ;;  %v2523_v23 = vld [vmem:[%s3270_s0 + $0x168] ss:$12 sps:$4 sm:$0xff]  }
  0x46   :  { %2303 = vmatpush3.bf16.msra.mxu1 %v2442_v24  ;;  %v2524_v24 = vld [vmem:[%s3270_s0 + $0x170] ss:$12 sps:$4 sm:$0xff]  }
  0x47   :  { %2304 = vmatprep.subr.bf16.mxu1 %v2449_v25 }
  0x49   :  { %895 = vmatmul.mubr.bf16.gmra.mrb[4].mxu0 %v2440_v26  ;;  %1087 = vmatmul.mubr.bf16.gmra.mrb[4].mxu1 %v2441_v27  ;;  %v2527_v26 = vld [vmem:[%s3270_s0 + $0x188] ss:$12 sps:$4 sm:$0xff]   ;;  %v2528_v27 = vld [vmem:[%s3270_s0 + $0x180] ss:$12 sps:$4 sm:$0xff]  }
  0x4a   :  { %902 = vmatprep.mubr.bf16.mxu0 %v2443_v28  ;;  %1094 = vmatprep.mubr.bf16.mxu1 %v2445_v29  ;;  %v2529_v28 = vld [vmem:[%s3270_s0 + $0x1a0] ss:$12 sps:$4 sm:$0xff]   ;;  %v2530_v29 = vld [vmem:[%s3270_s0 + $0x19c] ss:$12 sps:$4 sm:$0xff]  }
  0x4b   :  { %2305 = vmatpush3.bf16.msra.mxu1 %v2449_v25  ;;  %v2525_v25 = vld [vmem:[%s3270_s0 + $0x184] ss:$12 sps:$4 sm:$0xff]  }
  0x4c   :  { %2306 = vmatprep.subr.bf16.mxu1 %v2456_v30 }
  0x4f   :  { %2307 = vmatpush3.bf16.msra.mxu1 %v2456_v30  ;;  %v2532_v30 = vld [vmem:[%s3270_s0 + $0x1b8] ss:$12 sps:$4 sm:$0xff]  }
  0x50   :  { %2308 = vmatprep.subr.bf16.mxu1 %v2463_v32 }
  0x51   :  { %903 = vmatmul.mubr.bf16.gmra.mrb[8].mxu0 %v2447_v31  ;;  %1095 = vmatmul.mubr.bf16.gmra.mrb[8].mxu1 %v2448_v33  ;;  %v2533_v31 = vld [vmem:[%s3270_s0 + $0x198] ss:$12 sps:$4 sm:$0xff]   ;;  %v2535_v33 = vld [vmem:[%s3270_s0 + $0x1b4] ss:$12 sps:$4 sm:$0xff]  }
  0x52   :  { %910 = vmatprep.mubr.bf16.mxu0 %v2450_v34  ;;  %1102 = vmatprep.mubr.bf16.mxu1 %v2452_v35  ;;  %v2537_v34 = vld [vmem:[%s3270_s0 + $0x1e8] ss:$12 sps:$4 sm:$0xff]   ;;  %v2538_v35 = vld [vmem:[%s3270_s0 + $0x1b0] ss:$12 sps:$4 sm:$0xff]  }
  0x53   :  { %2309 = vmatpush3.bf16.msra.mxu1 %v2463_v32  ;;  %v2534_v32 = vld [vmem:[%s3270_s0 + $0x1d0] ss:$12 sps:$4 sm:$0xff]  }
  0x54   :  { %2310 = vmatprep.subr.bf16.mxu1 %v2470_v36 }
  0x57   :  { %2311 = vmatpush3.bf16.msra.mxu1 %v2470_v36  ;;  %v2539_v36 = vld [vmem:[%s3270_s0 + $0x200] ss:$12 sps:$4 sm:$0xff]  }
  0x58   :  { %2312 = vmatprep.subr.bf16.mxu1 %v2477_v41 }
  0x59   :  { %911 = vmatmul.mubr.bf16.gmra.mrb[12].mxu0 %v2454_v37  ;;  %1103 = vmatmul.mubr.bf16.gmra.mrb[12].mxu1 %v2455_v38  ;;  %v2540_v37 = vld [vmem:[%s3270_s0 + $0x1cc] ss:$12 sps:$4 sm:$0xff]  }
  0x5a   :  { %918 = vmatprep.mubr.bf16.mxu0 %v2457_v39  ;;  %1110 = vmatprep.mubr.bf16.mxu1 %v2459_v40  ;;  %v2542_v38 = vld [vmem:[%s3270_s0 + $0x218] ss:$12 sps:$4 sm:$0xff]   ;;  %v2543_v39 = vld [vmem:[%s3270_s0 + $0x1c8] ss:$12 sps:$4 sm:$0xff]   ;;  %v2544_v40 = vld [vmem:[%s3270_s0 + $0x230] ss:$12 sps:$4 sm:$0xff]  }
  0x5b   :  { %2313 = vmatpush3.bf16.msra.mxu1 %v2477_v41  ;;  %v2545_v41 = vld [vmem:[%s3270_s0 + $0x1e4] ss:$12 sps:$4 sm:$0xff]  }
  0x5c   :  { %2314 = vmatprep.subr.bf16.mxu1 %v2484_v42 }
  0x5f   :  { %2315 = vmatpush3.bf16.msra.mxu1 %v2484_v42  ;;  %v2547_v42 = vld [vmem:[%s3270_s0 + $0x248] ss:$12 sps:$4 sm:$0xff]  }
  0x61   :  { %919 = vmatmul.mubr.bf16.gmra.mrb[16].mxu0 %v2461_v43  ;;  %1111 = vmatmul.mubr.bf16.gmra.mrb[16].mxu1 %v2462_v44  ;;  %v2548_v43 = vld [vmem:[%s3270_s0 + $0x1e0] ss:$12 sps:$4 sm:$0xff]  }
  0x62   :  { %926 = vmatprep.mubr.bf16.mxu0 %v2464_v45  ;;  %1118 = vmatprep.mubr.bf16.mxu1 %v2466_v46  ;;  %v2549_v44 = vld [vmem:[%s3270_s0 + $0x260] ss:$12 sps:$4 sm:$0xff]   ;;  %v2550_v45 = vld [vmem:[%s3270_s0 + $0x1fc] ss:$12 sps:$4 sm:$0xff]   ;;  %v2552_v46 = vld [vmem:[%s3270_s0 + $0x278] ss:$12 sps:$4 sm:$0xff]  }
  0x69   :  { %927 = vmatmul.mubr.bf16.gmra.mrb[20].mxu0 %v2468_v47  ;;  %1119 = vmatmul.mubr.bf16.gmra.mrb[20].mxu1 %v2469_v48  ;;  %v2553_v47 = vld [vmem:[%s3270_s0 + $0x1f8] ss:$12 sps:$4 sm:$0xff]   ;;  %v2554_v48 = vld [vmem:[%s3270_s0 + $0x290] ss:$12 sps:$4 sm:$0xff]  }
  0x6a   :  { %934 = vmatprep.mubr.bf16.mxu0 %v2471_v49  ;;  %1126 = vmatprep.mubr.bf16.mxu1 %v2473_v50  ;;  %v2555_v49 = vld [vmem:[%s3270_s0 + $0x214] ss:$12 sps:$4 sm:$0xff]  }
  0x6b   :  { %v2557_v50 = vld [vmem:[%s3270_s0 + $0x2a8] ss:$12 sps:$4 sm:$0xff]  }
  0x71   :  { %935 = vmatmul.mubr.bf16.gmra.mrb[24].mxu0 %v2475_v51  ;;  %1127 = vmatmul.mubr.bf16.gmra.mrb[24].mxu1 %v2476_v52  ;;  %v2558_v51 = vld [vmem:[%s3270_s0 + $0x210] ss:$12 sps:$4 sm:$0xff]   ;;  %v2559_v52 = vld [vmem:[%s3270_s0 + $0x2c0] ss:$12 sps:$4 sm:$0xff]  }
  0x72   :  { %942 = vmatprep.mubr.bf16.mxu0 %v2478_v53  ;;  %1134 = vmatprep.mubr.bf16.mxu1 %v2480_v54  ;;  %v2560_v53 = vld [vmem:[%s3270_s0 + $0x22c] ss:$12 sps:$4 sm:$0xff]  }
  0x73   :  { %v2562_v54 = vld [vmem:[%s3270_s0 + $0x2d8] ss:$12 sps:$4 sm:$0xff]  }
  0x79   :  { %943 = vmatmul.mubr.bf16.gmra.mrb[28].mxu0 %v2482_v55  ;;  %1135 = vmatmul.mubr.bf16.gmra.mrb[28].mxu1 %v2483_v56  ;;  %v2563_v55 = vld [vmem:[%s3270_s0 + $0x228] ss:$12 sps:$4 sm:$0xff]   ;;  %v2564_v56 = vld [vmem:[%s3270_s0 + $0x2f0] ss:$12 sps:$4 sm:$0xff]  }
  0x7a   :  { %950 = vmatprep.mubr.bf16.mxu0 %v2485_v57  ;;  %2316 = vmatprep.mubr.bf16.mxu1 %v2487_v58 }
  0x81   :  { %951 = vmatmul.mubr.bf16.gmra.mrb[32].mxu0 %v2488_v59  ;;  %2317 = vmatmul.mubr.bf16.vlgmr.msra.gmra.mrb[32].mxu1 %v2489_v60 }
  0x82   :  { %958 = vmatprep.mubr.bf16.mxu0 %v2490_v61  ;;  %2320 = vmatprep.mubr.bf16.mxu1 %v2492_v62 }
  0x89   :  { %959 = vmatmul.mubr.bf16.gmra.mrb[36].mxu0 %v2493_v63  ;;  %2321 = vmatmul.mubr.bf16.gmra.mrb[36].mxu1 %v2494_v0 }
  0x8a   :  { %966 = vmatprep.mubr.bf16.mxu0 %v2495_v1  ;;  %2324 = vmatprep.mubr.bf16.mxu1 %v2497_v2 }
  0x91   :  { %967 = vmatmul.mubr.bf16.gmra.mrb[40].mxu0 %v2498_v3  ;;  %2325 = vmatmul.mubr.bf16.gmra.mrb[40].mxu1 %v2499_v4 }
  0x92   :  { %974 = vmatprep.mubr.bf16.mxu0 %v2500_v5  ;;  %2328 = vmatprep.mubr.bf16.mxu1 %v2502_v6 }
  0x99   :  { %975 = vmatmul.mubr.bf16.gmra.mrb[44].mxu0 %v2503_v7  ;;  %2329 = vmatmul.mubr.bf16.gmra.mrb[44].mxu1 %v2504_v8 }
  0x9a   :  { %982 = vmatprep.mubr.bf16.mxu0 %v2505_v9  ;;  %2332 = vmatprep.mubr.bf16.mxu1 %v2507_v10 }
  0xa1   :  { %983 = vmatmul.mubr.bf16.gmra.mrb[48].mxu0 %v2508_v11  ;;  %2333 = vmatmul.mubr.bf16.gmra.mrb[48].mxu1 %v2509_v12 }
  0xa2   :  { %990 = vmatprep.mubr.bf16.mxu0 %v2510_v13  ;;  %2336 = vmatprep.mubr.bf16.mxu1 %v2512_v14 }
  0xa9   :  { %991 = vmatmul.mubr.bf16.gmra.mrb[52].mxu0 %v2513_v15  ;;  %2337 = vmatmul.mubr.bf16.gmra.mrb[52].mxu1 %v2514_v16 }
  0xaa   :  { %998 = vmatprep.mubr.bf16.mxu0 %v2515_v17  ;;  %2340 = vmatprep.mubr.bf16.mxu1 %v2517_v18 }
  0xb1   :  { %999 = vmatmul.mubr.bf16.gmra.mrb[56].mxu0 %v2518_v19  ;;  %2341 = vmatmul.mubr.bf16.gmra.mrb[56].mxu1 %v2519_v20 }
  0xb2   :  { %1006 = vmatprep.mubr.bf16.mxu0 %v2520_v21  ;;  %2344 = vmatprep.mubr.bf16.mxu1 %v2522_v22 }
  0xb9   :  { %1007 = vmatmul.mubr.bf16.gmra.mrb[60].mxu0 %v2523_v23  ;;  %2345 = vmatmul.mubr.bf16.gmra.mrb[60].mxu1 %v2524_v24 }
  0xba   :  { %1014 = vmatprep.mubr.bf16.mxu0 %v2525_v25  ;;  %2348 = vmatprep.mubr.bf16.mxu1 %v2527_v26 }
  0xc1   :  { %1015 = vmatmul.mubr.bf16.gmra.mrb[64].mxu0 %v2528_v27  ;;  %2349 = vmatmul.mubr.bf16.gmra.mrb[64].mxu1 %v2529_v28 }
  0xc2   :  { %1022 = vmatprep.mubr.bf16.mxu0 %v2530_v29  ;;  %2352 = vmatprep.mubr.bf16.mxu1 %v2532_v30 }
  0xc9   :  { %1023 = vmatmul.mubr.bf16.gmra.mrb[68].mxu0 %v2533_v31  ;;  %2353 = vmatmul.mubr.bf16.gmra.mrb[68].mxu1 %v2534_v32 }
  0xca   :  { %1030 = vmatprep.mubr.bf16.mxu0 %v2535_v33  ;;  %2356 = vmatprep.mubr.bf16.mxu1 %v2537_v34 }
  0xd1   :  { %1031 = vmatmul.mubr.bf16.gmra.mrb[72].mxu0 %v2538_v35  ;;  %2357 = vmatmul.mubr.bf16.gmra.mrb[72].mxu1 %v2539_v36 }
  0xd2   :  { %1038 = vmatprep.mubr.bf16.mxu0 %v2540_v37  ;;  %2360 = vmatprep.mubr.bf16.mxu1 %v2542_v38 }
  0xd9   :  { %1039 = vmatmul.mubr.bf16.gmra.mrb[76].mxu0 %v2543_v39  ;;  %2361 = vmatmul.mubr.bf16.gmra.mrb[76].mxu1 %v2544_v40 }
  0xda   :  { %1046 = vmatprep.mubr.bf16.mxu0 %v2545_v41  ;;  %2364 = vmatprep.mubr.bf16.mxu1 %v2547_v42 }
  0xe1   :  { %1047 = vmatmul.mubr.bf16.gmra.mrb[80].mxu0 %v2548_v43  ;;  %2365 = vmatmul.mubr.bf16.gmra.mrb[80].mxu1 %v2549_v44 }
  0xe2   :  { %1054 = vmatprep.mubr.bf16.mxu0 %v2550_v45  ;;  %2368 = vmatprep.mubr.bf16.mxu1 %v2552_v46 }
  0xe9   :  { %1055 = vmatmul.mubr.bf16.gmra.mrb[84].mxu0 %v2553_v47  ;;  %2369 = vmatmul.mubr.bf16.gmra.mrb[84].mxu1 %v2554_v48 }
  0xea   :  { %1062 = vmatprep.mubr.bf16.mxu0 %v2555_v49  ;;  %2372 = vmatprep.mubr.bf16.mxu1 %v2557_v50 }
  0xf1   :  { %1063 = vmatmul.mubr.bf16.gmra.mrb[88].mxu0 %v2558_v51  ;;  %2373 = vmatmul.mubr.bf16.gmra.mrb[88].mxu1 %v2559_v52 }
  0xf2   :  { %1070 = vmatprep.mubr.bf16.mxu0 %v2560_v53  ;;  %2376 = vmatprep.mubr.bf16.mxu1 %v2562_v54 }
  0xf9   :  { %1071 = vmatmul.mubr.bf16.gmra.mrb[92].mxu0 %v2563_v55  ;;  %2377 = vmatmul.mubr.bf16.gmra.mrb[92].mxu1 %v2564_v56 }
 0x114   :  { %v2978_v57 = vpop.f32.mrb[0].mxu0  ;;  %v2980_v58 = vpop.f32.mrb[0].mxu1 }
 0x115   :  { %v890_v59 = vpop.f32.mrb[1].mxu0  ;;  %v1082_v60 = vpop.f32.mrb[1].mxu1 }
 0x116   :  { %v2982_v61 = vpop.f32.mrb[2].mxu0  ;;  %v2984_v62 = vpop.f32.mrb[2].mxu1  ;;  %v3041_v59 = vld [vmem:[%s3271_s2] ss:$0 sm:$0xff] }
 0x117   :  { %v893_v63 = vpop.f32.mrb[3].mxu0  ;;  %v1085_v0 = vpop.f32.mrb[3].mxu1 }
 0x118   :  { %v889_v63 = vadd.f32 %v3041_v59, %v2978_v57 }
 0x11c   :  { %v896_v1 = vpop.f32.mrb[4].mxu0  ;;  %v2986_v2 = vpop.f32.mrb[4].mxu1 }
 0x11d   :  { %v898_v3 = vpop.f32.mrb[5].mxu0  ;;  %v1090_v4 = vpop.f32.mrb[5].mxu1  ;;  %v897_v60 = vadd.f32 %v3041_v59, %v896_v1 }
 0x11e   :  { %v899_v5 = vpop.f32.mrb[6].mxu0  ;;  %v2988_v6 = vpop.f32.mrb[6].mxu1 }
 0x11f   :  { %v901_v7 = vpop.f32.mrb[7].mxu0  ;;  %v1093_v8 = vpop.f32.mrb[7].mxu1  ;;  %v900_v4 = vadd.f32 %v3041_v59, %v899_v5 }
 0x124   :  { %v2990_v9 = vpop.f32.mrb[8].mxu0  ;;  %v2992_v10 = vpop.f32.mrb[8].mxu1 }
 0x125   :  { %v906_v11 = vpop.f32.mrb[9].mxu0  ;;  %v1098_v12 = vpop.f32.mrb[9].mxu1 }
 0x126   :  { %v2994_v13 = vpop.f32.mrb[10].mxu0  ;;  %v2996_v14 = vpop.f32.mrb[10].mxu1  ;;  %v892_v12 = vadd.f32 %v3041_v59, %v2982_v61 }
 0x127   :  { %v909_v15 = vpop.f32.mrb[11].mxu0  ;;  %v1101_v16 = vpop.f32.mrb[11].mxu1 }
 0x12c   :  { %v2998_v17 = vpop.f32.mrb[12].mxu0  ;;  %v3000_v18 = vpop.f32.mrb[12].mxu1 }
 0x12d   :  { %v914_v19 = vpop.f32.mrb[13].mxu0  ;;  %v1106_v20 = vpop.f32.mrb[13].mxu1  ;;  %v913_v5 = vadd.f32 %v3041_v59, %v2998_v17  ;;  %v908_v17 = vadd.f32 %v3041_v59, %v2994_v13 }
 0x12e   :  { %v3002_v21 = vpop.f32.mrb[14].mxu0  ;;  %v3004_v22 = vpop.f32.mrb[14].mxu1 }
 0x12f   :  { %v917_v23 = vpop.f32.mrb[15].mxu0  ;;  %v1109_v24 = vpop.f32.mrb[15].mxu1 }
 0x134   :  { %v3006_v25 = vpop.f32.mrb[16].mxu0  ;;  %v3008_v26 = vpop.f32.mrb[16].mxu1 }
 0x135   :  { %v922_v27 = vpop.f32.mrb[17].mxu0  ;;  %v1114_v28 = vpop.f32.mrb[17].mxu1 }
 0x136   :  { %v3010_v29 = vpop.f32.mrb[18].mxu0  ;;  %v3012_v30 = vpop.f32.mrb[18].mxu1 }
 0x137   :  { %v925_v31 = vpop.f32.mrb[19].mxu0  ;;  %v1117_v32 = vpop.f32.mrb[19].mxu1 }
 0x13c   :  { %v3014_v33 = vpop.f32.mrb[20].mxu0  ;;  %v3016_v34 = vpop.f32.mrb[20].mxu1 }
 0x13d   :  { %v930_v35 = vpop.f32.mrb[21].mxu0  ;;  %v1122_v36 = vpop.f32.mrb[21].mxu1 }
 0x13e   :  { %v3018_v37 = vpop.f32.mrb[22].mxu0  ;;  %v3020_v38 = vpop.f32.mrb[22].mxu1  ;;  %v905_v35 = vadd.f32 %v3041_v59, %v2990_v9 }
 0x13f   :  { %v933_v39 = vpop.f32.mrb[23].mxu0  ;;  %v1125_v40 = vpop.f32.mrb[23].mxu1 }
 0x140   :  { %v916_v40 = vadd.f32 %v3041_v59, %v3002_v21 }
 0x144   :  { %v3022_v41 = vpop.f32.mrb[24].mxu0  ;;  %v3024_v42 = vpop.f32.mrb[24].mxu1 }
 0x145   :  { %v938_v43 = vpop.f32.mrb[25].mxu0  ;;  %v1130_v44 = vpop.f32.mrb[25].mxu1 }
 0x146   :  { %v3026_v45 = vpop.f32.mrb[26].mxu0  ;;  %v3028_v46 = vpop.f32.mrb[26].mxu1 }
 0x147   :  { %v941_v47 = vpop.f32.mrb[27].mxu0  ;;  %v1133_v48 = vpop.f32.mrb[27].mxu1 }
 0x14c   :  { %v3030_v49 = vpop.f32.mrb[28].mxu0  ;;  %v3032_v50 = vpop.f32.mrb[28].mxu1 }
 0x14d   :  { %v946_v51 = vpop.f32.mrb[29].mxu0  ;;  %v1138_v52 = vpop.f32.mrb[29].mxu1 }
 0x14e   :  { %v3034_v53 = vpop.f32.mrb[30].mxu0  ;;  %v3036_v54 = vpop.f32.mrb[30].mxu1 }
 0x14f   :  { %v949_v55 = vpop.f32.mrb[31].mxu0  ;;  %v1141_v56 = vpop.f32.mrb[31].mxu1 }
 0x154   :  { %v3046_v0 = vpop.f32.mrb[32].mxu0  ;;  %v2318_v3 = vpop.f32.mrb[32].mxu1 }
 0x155   :  { %v1186_v7 = vadd.f32 %v2318_v3, %v897_v60  ;;  %v954_v8 = vpop.f32.mrb[33].mxu0  ;;  %v1177_v11 = vpop.f32.mrb[33].mxu1 }
 0x156   :  { %v1178_v15 = vadd.f32 %v1177_v11, %v889_v63  ;;  %v3051_v16 = vpop.f32.mrb[34].mxu0  ;;  %v2319_v19 = vpop.f32.mrb[34].mxu1  ;;  %v921_v8 = vadd.f32 %v3041_v59, %v3006_v25 }
 0x157   :  { %v1189_v20 = vadd.f32 %v2319_v19, %v900_v4  ;;  %v957_v1 = vpop.f32.mrb[35].mxu0  ;;  %v1180_v23 = vpop.f32.mrb[35].mxu1  ;;  %v1434_v57 = vmax.f32 %v1186_v7, 0.0  ;;  %v929_v7 = vadd.f32 %v3041_v59, %v3014_v33  ;;  %v932_v19 = vadd.f32 %v3041_v59, %v3018_v37 }
 0x158   :  { %v1181_v24 = vadd.f32 %v1180_v23, %v892_v12  ;;  %v1432_v28 = vmax.f32 %v1178_v15, 0.0  ;;  %v924_v33 = vadd.f32 %v3041_v59, %v3010_v29 }
 0x159   :  { %v1435_v27 = vmax.f32 %v1189_v20, 0.0 }
 0x15a   :  { %v1433_v31 = vmax.f32 %v1181_v24, 0.0 }
 0x15b   :  { %v2077_v32 = vpack.c.bf16 %v1435_v27, %v1434_v57 }
 0x15c   :  { %v2072_v61 = vpack.c.bf16 %v1433_v31, %v1432_v28  ;;  %v3057_v36 = vpop.f32.mrb[36].mxu0  ;;  %v2322_v39 = vpop.f32.mrb[36].mxu1 }
 0x15d   :  { %2229 = vst [vmem:[%s3272_s3 + $0x8] sm:$0xff] %v2077_v32   ;;  %v1202_v43 = vadd.f32 %v2322_v39, %v913_v5  ;;  %v962_v44 = vpop.f32.mrb[37].mxu0  ;;  %v1193_v47 = vpop.f32.mrb[37].mxu1  ;;  %v945_v39 = vadd.f32 %v3041_v59, %v3030_v49  ;;  %v940_v49 = vadd.f32 %v3041_v59, %v3026_v45  ;;  %v953_v45 = vadd.f32 %v3041_v59, %v3046_v0 }
 0x15e   :  { %2073 = vst [vmem:[%s3272_s3] sm:$0xff] %v2072_v61   ;;  %v1194_v9 = vadd.f32 %v1193_v47, %v905_v35  ;;  %v3069_v48 = vpop.f32.mrb[38].mxu0  ;;  %v2323_v51 = vpop.f32.mrb[38].mxu1 }
 0x15f   :  { %v1205_v52 = vadd.f32 %v2323_v51, %v916_v40  ;;  %v965_v21 = vpop.f32.mrb[39].mxu0  ;;  %v1196_v55 = vpop.f32.mrb[39].mxu1  ;;  %v1438_v60 = vmax.f32 %v1202_v43, 0.0  ;;  %v937_v40 = vadd.f32 %v3041_v59, %v3022_v41 }
 0x160   :  { %v1197_v56 = vadd.f32 %v1196_v55, %v908_v17  ;;  %v1436_v3 = vmax.f32 %v1194_v9, 0.0  ;;  %v948_v17 = vadd.f32 %v3041_v59, %v3034_v53 }
 0x161   :  { %v1439_v63 = vmax.f32 %v1205_v52, 0.0 }
 0x162   :  { %v1437_v4 = vmax.f32 %v1197_v56, 0.0 }
 0x163   :  { %v2087_v13 = vpack.c.bf16 %v1439_v63, %v1438_v60 }
 0x164   :  { %v2082_v11 = vpack.c.bf16 %v1437_v4, %v1436_v3  ;;  %v3075_v12 = vpop.f32.mrb[40].mxu0  ;;  %v2326_v15 = vpop.f32.mrb[40].mxu1 }
 0x165   :  { %2231 = vst [vmem:[%s3272_s3 + $0x18] sm:$0xff] %v2087_v13   ;;  %v1218_v20 = vadd.f32 %v2326_v15, %v929_v7  ;;  %v970_v1 = vpop.f32.mrb[41].mxu0  ;;  %v1209_v23 = vpop.f32.mrb[41].mxu1 }
 0x166   :  { %2230 = vst [vmem:[%s3272_s3 + $0x10] sm:$0xff] %v2082_v11   ;;  %v1210_v25 = vadd.f32 %v1209_v23, %v921_v8  ;;  %v3087_v24 = vpop.f32.mrb[42].mxu0  ;;  %v2327_v57 = vpop.f32.mrb[42].mxu1  ;;  %v961_v8 = vadd.f32 %v3041_v59, %v3057_v36  ;;  %v964_v1 = vadd.f32 %v3041_v59, %v3069_v48  ;;  %v956_v36 = vadd.f32 %v3041_v59, %v3051_v16 }
 0x167   :  { %v1221_v27 = vadd.f32 %v2327_v57, %v932_v19  ;;  %v973_v37 = vpop.f32.mrb[43].mxu0  ;;  %v1212_v28 = vpop.f32.mrb[43].mxu1  ;;  %v1442_v5 = vmax.f32 %v1218_v20, 0.0  ;;  %v969_v16 = vadd.f32 %v3041_v59, %v3075_v12 }
 0x168   :  { %v1213_v31 = vadd.f32 %v1212_v28, %v924_v33  ;;  %v1440_v35 = vmax.f32 %v1210_v25, 0.0 }
 0x169   :  { %v1443_v32 = vmax.f32 %v1221_v27, 0.0 }
 0x16a   :  { %v1441_v61 = vmax.f32 %v1213_v31, 0.0 }
 0x16b   :  { %v2097_v29 = vpack.c.bf16 %v1443_v32, %v1442_v5 }
 0x16c   :  { %v2092_v43 = vpack.c.bf16 %v1441_v61, %v1440_v35  ;;  %v976_v44 = vpop.f32.mrb[44].mxu0  ;;  %v2330_v47 = vpop.f32.mrb[44].mxu1 }
 0x16d   :  { %2233 = vst [vmem:[%s3272_s3 + $0x28] sm:$0xff] %v2097_v29   ;;  %v1234_v9 = vadd.f32 %v2330_v47, %v945_v39  ;;  %v978_v51 = vpop.f32.mrb[45].mxu0  ;;  %v1225_v52 = vpop.f32.mrb[45].mxu1  ;;  %v977_v39 = vadd.f32 %v3041_v59, %v976_v44 }
 0x16e   :  { %2232 = vst [vmem:[%s3272_s3 + $0x20] sm:$0xff] %v2092_v43   ;;  %v1226_v41 = vadd.f32 %v1225_v52, %v937_v40  ;;  %v979_v21 = vpop.f32.mrb[46].mxu0  ;;  %v2331_v55 = vpop.f32.mrb[46].mxu1 }
 0x16f   :  { %v1237_v56 = vadd.f32 %v2331_v55, %v948_v17  ;;  %v981_v60 = vpop.f32.mrb[47].mxu0  ;;  %v1228_v53 = vpop.f32.mrb[47].mxu1  ;;  %v1446_v3 = vmax.f32 %v1234_v9, 0.0  ;;  %v980_v17 = vadd.f32 %v3041_v59, %v979_v21 }
 0x170   :  { %v1229_v63 = vadd.f32 %v1228_v53, %v940_v49  ;;  %v1444_v7 = vmax.f32 %v1226_v41, 0.0  ;;  %v972_v49 = vadd.f32 %v3041_v59, %v3087_v24 }
 0x171   :  { %v1447_v4 = vmax.f32 %v1237_v56, 0.0 }
 0x172   :  { %v1445_v13 = vmax.f32 %v1229_v63, 0.0 }
 0x173   :  { %v2107_v11 = vpack.c.bf16 %v1447_v4, %v1446_v3 }
 0x174   :  { %v2102_v15 = vpack.c.bf16 %v1445_v13, %v1444_v7  ;;  %v984_v19 = vpop.f32.mrb[48].mxu0  ;;  %v2334_v20 = vpop.f32.mrb[48].mxu1 }
 0x175   :  { %2235 = vst [vmem:[%s3272_s3 + $0x38] sm:$0xff] %v2107_v11   ;;  %v1250_v23 = vadd.f32 %v2334_v20, %v961_v8  ;;  %v986_v33 = vpop.f32.mrb[49].mxu0  ;;  %v1241_v25 = vpop.f32.mrb[49].mxu1  ;;  %v985_v24 = vadd.f32 %v3041_v59, %v984_v19 }
 0x176   :  { %2234 = vst [vmem:[%s3272_s3 + $0x30] sm:$0xff] %v2102_v15   ;;  %v1242_v0 = vadd.f32 %v1241_v25, %v953_v45  ;;  %v987_v57 = vpop.f32.mrb[50].mxu0  ;;  %v2335_v27 = vpop.f32.mrb[50].mxu1 }
 0x177   :  { %v1253_v37 = vadd.f32 %v2335_v27, %v964_v1  ;;  %v989_v28 = vpop.f32.mrb[51].mxu0  ;;  %v1244_v48 = vpop.f32.mrb[51].mxu1  ;;  %v1450_v5 = vmax.f32 %v1250_v23, 0.0  ;;  %v988_v33 = vadd.f32 %v3041_v59, %v987_v57 }
 0x178   :  { %v1245_v31 = vadd.f32 %v1244_v48, %v956_v36  ;;  %v1448_v35 = vmax.f32 %v1242_v0, 0.0 }
 0x179   :  { %v1451_v32 = vmax.f32 %v1253_v37, 0.0 }
 0x17a   :  { %v1449_v61 = vmax.f32 %v1245_v31, 0.0 }
 0x17b   :  { %v2117_v29 = vpack.c.bf16 %v1451_v32, %v1450_v5 }
 0x17c   :  { %v2112_v40 = vpack.c.bf16 %v1449_v61, %v1448_v35  ;;  %v992_v43 = vpop.f32.mrb[52].mxu0  ;;  %v2338_v47 = vpop.f32.mrb[52].mxu1 }
 0x17d   :  { %2237 = vst [vmem:[%s3272_s3 + $0x48] sm:$0xff] %v2117_v29   ;;  %v1266_v9 = vadd.f32 %v2338_v47, %v977_v39  ;;  %v994_v51 = vpop.f32.mrb[53].mxu0  ;;  %v1257_v52 = vpop.f32.mrb[53].mxu1  ;;  %v993_v7 = vadd.f32 %v3041_v59, %v992_v43 }
 0x17e   :  { %2236 = vst [vmem:[%s3272_s3 + $0x40] sm:$0xff] %v2112_v40   ;;  %v1258_v12 = vadd.f32 %v1257_v52, %v969_v16  ;;  %v995_v44 = vpop.f32.mrb[54].mxu0  ;;  %v2339_v41 = vpop.f32.mrb[54].mxu1 }
 0x17f   :  { %v1269_v55 = vadd.f32 %v2339_v41, %v980_v17  ;;  %v997_v56 = vpop.f32.mrb[55].mxu0  ;;  %v1260_v21 = vpop.f32.mrb[55].mxu1  ;;  %v1454_v53 = vmax.f32 %v1266_v9, 0.0  ;;  %v996_v15 = vadd.f32 %v3041_v59, %v995_v44 }
 0x180   :  { %v1261_v60 = vadd.f32 %v1260_v21, %v972_v49  ;;  %v1452_v3 = vmax.f32 %v1258_v12, 0.0 }
 0x181   :  { %v1455_v63 = vmax.f32 %v1269_v55, 0.0 }
 0x182   :  { %v1453_v4 = vmax.f32 %v1261_v60, 0.0 }
 0x183   :  { %v2127_v13 = vpack.c.bf16 %v1455_v63, %v1454_v53 }
 0x184   :  { %v2122_v8 = vpack.c.bf16 %v1453_v4, %v1452_v3  ;;  %v1000_v11 = vpop.f32.mrb[56].mxu0  ;;  %v2342_v45 = vpop.f32.mrb[56].mxu1 }
 0x185   :  { %2239 = vst [vmem:[%s3272_s3 + $0x58] sm:$0xff] %v2127_v13   ;;  %v1282_v20 = vadd.f32 %v2342_v45, %v993_v7  ;;  %v1002_v1 = vpop.f32.mrb[57].mxu0  ;;  %v1273_v23 = vpop.f32.mrb[57].mxu1  ;;  %v1001_v61 = vadd.f32 %v3041_v59, %v1000_v11 }
 0x186   :  { %2238 = vst [vmem:[%s3272_s3 + $0x50] sm:$0xff] %v2122_v8   ;;  %v1274_v25 = vadd.f32 %v1273_v23, %v985_v24  ;;  %v1003_v19 = vpop.f32.mrb[58].mxu0  ;;  %v2343_v36 = vpop.f32.mrb[58].mxu1 }
 0x187   :  { %v1285_v0 = vadd.f32 %v2343_v36, %v996_v15  ;;  %v1005_v27 = vpop.f32.mrb[59].mxu0  ;;  %v1276_v37 = vpop.f32.mrb[59].mxu1  ;;  %v1458_v48 = vmax.f32 %v1282_v20, 0.0  ;;  %v1004_v47 = vadd.f32 %v3041_v59, %v1003_v19 }
 0x188   :  { %v1277_v28 = vadd.f32 %v1276_v37, %v988_v33  ;;  %v1456_v5 = vmax.f32 %v1274_v25, 0.0 }
 0x189   :  { %v1459_v31 = vmax.f32 %v1285_v0, 0.0 }
 0x18a   :  { %v1457_v32 = vmax.f32 %v1277_v28, 0.0 }
 0x18b   :  { %v2137_v35 = vpack.c.bf16 %v1459_v31, %v1458_v48 }
 0x18c   :  { %v2132_v39 = vpack.c.bf16 %v1457_v32, %v1456_v5  ;;  %v1008_v57 = vpop.f32.mrb[60].mxu0  ;;  %v2346_v29 = vpop.f32.mrb[60].mxu1 }
 0x18d   :  { %2241 = vst [vmem:[%s3272_s3 + $0x68] sm:$0xff] %v2137_v35   ;;  %v1009_v16 = vadd.f32 %v3041_v59, %v1008_v57  ;;  %v1010_v40 = vpop.f32.mrb[61].mxu0  ;;  %v1289_v43 = vpop.f32.mrb[61].mxu1 }
 0x18e   :  { %2240 = vst [vmem:[%s3272_s3 + $0x60] sm:$0xff] %v2132_v39   ;;  %v1290_v17 = vadd.f32 %v1289_v43, %v1001_v61  ;;  %v1011_v9 = vpop.f32.mrb[62].mxu0  ;;  %v2347_v51 = vpop.f32.mrb[62].mxu1 }
 0x18f   :  { %v1298_v52 = vadd.f32 %v2346_v29, %v1009_v16  ;;  %v1012_v49 = vadd.f32 %v3041_v59, %v1011_v9  ;;  %v1013_v12 = vpop.f32.mrb[63].mxu0  ;;  %v1292_v44 = vpop.f32.mrb[63].mxu1 }
 0x190   :  { %v1293_v41 = vadd.f32 %v1292_v44, %v1004_v47  ;;  %v1460_v56 = vmax.f32 %v1290_v17, 0.0 }
 0x191   :  { %v1301_v55 = vadd.f32 %v2347_v51, %v1012_v49  ;;  %v1462_v60 = vmax.f32 %v1298_v52, 0.0 }
 0x192   :  { %v1461_v21 = vmax.f32 %v1293_v41, 0.0 }
 0x193   :  { %v1463_v53 = vmax.f32 %v1301_v55, 0.0 }
 0x194   :  { %v2142_v63 = vpack.c.bf16 %v1461_v21, %v1460_v56  ;;  %v1016_v3 = vpop.f32.mrb[64].mxu0  ;;  %v2350_v4 = vpop.f32.mrb[64].mxu1 }
 0x195   :  { %v2147_v7 = vpack.c.bf16 %v1463_v53, %v1462_v60  ;;  %v1017_v13 = vadd.f32 %v3041_v59, %v1016_v3  ;;  %v1018_v24 = vpop.f32.mrb[65].mxu0  ;;  %v1305_v8 = vpop.f32.mrb[65].mxu1 }
 0x196   :  { %2242 = vst [vmem:[%s3272_s3 + $0x70] sm:$0xff] %v2142_v63   ;;  %v1019_v11 = vpop.f32.mrb[66].mxu0  ;;  %v2351_v45 = vpop.f32.mrb[66].mxu1 }
 0x197   :  { %2243 = vst [vmem:[%s3272_s3 + $0x78] sm:$0xff] %v2147_v7   ;;  %v1306_v15 = vadd.f32 %v1305_v8, %v1017_v13  ;;  %v1020_v20 = vadd.f32 %v3041_v59, %v1019_v11  ;;  %v1021_v1 = vpop.f32.mrb[67].mxu0  ;;  %v1308_v23 = vpop.f32.mrb[67].mxu1 }
 0x199   :  { %v1309_v33 = vadd.f32 %v1308_v23, %v1020_v20  ;;  %v1464_v25 = vmax.f32 %v1306_v15, 0.0  ;;  %v1089_v23 = vadd.f32 %v3041_v59, %v2986_v2 }
 0x19b   :  { %v1465_v19 = vmax.f32 %v1309_v33, 0.0 }
 0x19c   :  { %v1024_v36 = vpop.f32.mrb[68].mxu0  ;;  %v2354_v0 = vpop.f32.mrb[68].mxu1 }
 0x19d   :  { %v2152_v27 = vpack.c.bf16 %v1465_v19, %v1464_v25  ;;  %v1025_v37 = vadd.f32 %v3041_v59, %v1024_v36  ;;  %v1026_v28 = vpop.f32.mrb[69].mxu0  ;;  %v1321_v48 = vpop.f32.mrb[69].mxu1  ;;  %v1081_v19 = vadd.f32 %v3041_v59, %v2980_v58 }
 0x19e   :  { %v1027_v31 = vpop.f32.mrb[70].mxu0  ;;  %v2355_v5 = vpop.f32.mrb[70].mxu1 }
 0x19f   :  { %2244 = vst [vmem:[%s3272_s3 + $0x80] sm:$0xff] %v2152_v27   ;;  %v1314_v32 = vadd.f32 %v2350_v4, %v1025_v37  ;;  %v1028_v35 = vadd.f32 %v3041_v59, %v1027_v31  ;;  %v1029_v61 = vpop.f32.mrb[71].mxu0  ;;  %v1324_v39 = vpop.f32.mrb[71].mxu1  ;;  %v1092_v37 = vadd.f32 %v3041_v59, %v2988_v6 }
 0x1a1   :  { %v1317_v57 = vadd.f32 %v2351_v45, %v1028_v35  ;;  %v1466_v29 = vmax.f32 %v1314_v32, 0.0 }
 0x1a3   :  { %v1467_v16 = vmax.f32 %v1317_v57, 0.0 }
 0x1a4   :  { %v1032_v40 = vpop.f32.mrb[72].mxu0  ;;  %v3162_v43 = vpop.f32.mrb[72].mxu1 }
 0x1a5   :  { %v2157_v47 = vpack.c.bf16 %v1467_v16, %v1466_v29  ;;  %v1033_v17 = vadd.f32 %v3041_v59, %v1032_v40  ;;  %v1034_v9 = vpop.f32.mrb[73].mxu0  ;;  %v1337_v51 = vpop.f32.mrb[73].mxu1 }
 0x1a6   :  { %v1035_v52 = vpop.f32.mrb[74].mxu0  ;;  %v3165_v49 = vpop.f32.mrb[74].mxu1 }
 0x1a7   :  { %2245 = vst [vmem:[%s3272_s3 + $0x88] sm:$0xff] %v2157_v47   ;;  %v1322_v12 = vadd.f32 %v1321_v48, %v1033_v17  ;;  %v1036_v44 = vadd.f32 %v3041_v59, %v1035_v52  ;;  %v1037_v41 = vpop.f32.mrb[75].mxu0  ;;  %v1340_v55 = vpop.f32.mrb[75].mxu1 }
 0x1a9   :  { %v1325_v56 = vadd.f32 %v1324_v39, %v1036_v44  ;;  %v1468_v21 = vmax.f32 %v1322_v12, 0.0 }
 0x1ab   :  { %v1469_v60 = vmax.f32 %v1325_v56, 0.0 }
 0x1ac   :  { %v1040_v53 = vpop.f32.mrb[76].mxu0  ;;  %v3171_v63 = vpop.f32.mrb[76].mxu1 }
 0x1ad   :  { %v2162_v3 = vpack.c.bf16 %v1469_v60, %v1468_v21  ;;  %v1041_v4 = vadd.f32 %v3041_v59, %v1040_v53  ;;  %v1042_v7 = vpop.f32.mrb[77].mxu0  ;;  %v3174_v13 = vpop.f32.mrb[77].mxu1  ;;  %v1108_v53 = vadd.f32 %v3041_v59, %v3004_v22 }
 0x1ae   :  { %v1043_v24 = vpop.f32.mrb[78].mxu0  ;;  %v3176_v8 = vpop.f32.mrb[78].mxu1 }
 0x1af   :  { %2246 = vst [vmem:[%s3272_s3 + $0x90] sm:$0xff] %v2162_v3   ;;  %v1330_v11 = vadd.f32 %v2354_v0, %v1041_v4  ;;  %v1044_v45 = vadd.f32 %v3041_v59, %v1043_v24  ;;  %v1045_v15 = vpop.f32.mrb[79].mxu0  ;;  %v3182_v20 = vpop.f32.mrb[79].mxu1  ;;  %v1100_v24 = vadd.f32 %v3041_v59, %v2996_v14 }
 0x1b1   :  { %v1333_v1 = vadd.f32 %v2355_v5, %v1044_v45  ;;  %v1470_v33 = vmax.f32 %v1330_v11, 0.0  ;;  %v1084_v5 = vadd.f32 %v3041_v59, %v2984_v62  ;;  %v1105_v62 = vadd.f32 %v3041_v59, %v3000_v18 }
 0x1b3   :  { %v1471_v25 = vmax.f32 %v1333_v1, 0.0 }
 0x1b4   :  { %v1048_v36 = vpop.f32.mrb[80].mxu0  ;;  %v2366_v27 = vpop.f32.mrb[80].mxu1 }
 0x1b5   :  { %v2167_v0 = vpack.c.bf16 %v1471_v25, %v1470_v33  ;;  %v1049_v28 = vadd.f32 %v3041_v59, %v1048_v36  ;;  %v1378_v48 = vadd.f32 %v2366_v27, %v1089_v23  ;;  %v1050_v31 = vpop.f32.mrb[81].mxu0  ;;  %v1369_v32 = vpop.f32.mrb[81].mxu1 }
 0x1b6   :  { %v1370_v2 = vadd.f32 %v1369_v32, %v1081_v19  ;;  %v1051_v35 = vpop.f32.mrb[82].mxu0  ;;  %v2367_v61 = vpop.f32.mrb[82].mxu1 }
 0x1b7   :  { %2247 = vst [vmem:[%s3272_s3 + $0x98] sm:$0xff] %v2167_v0   ;;  %v1338_v58 = vadd.f32 %v1337_v51, %v1049_v28  ;;  %v1052_v39 = vadd.f32 %v3041_v59, %v1051_v35  ;;  %v1381_v6 = vadd.f32 %v2367_v61, %v1092_v37  ;;  %v1053_v57 = vpop.f32.mrb[83].mxu0  ;;  %v1372_v29 = vpop.f32.mrb[83].mxu1  ;;  %v1482_v40 = vmax.f32 %v1378_v48, 0.0 }
 0x1b8   :  { %v1373_v16 = vadd.f32 %v1372_v29, %v1084_v5  ;;  %v1480_v9 = vmax.f32 %v1370_v2, 0.0  ;;  %v1097_v51 = vadd.f32 %v3041_v59, %v2992_v10  ;;  %v1121_v0 = vadd.f32 %v3041_v59, %v3016_v34 }
 0x1b9   :  { %v1341_v47 = vadd.f32 %v1340_v55, %v1052_v39  ;;  %v1483_v17 = vmax.f32 %v1381_v6, 0.0  ;;  %v1472_v12 = vmax.f32 %v1338_v58, 0.0  ;;  %v1124_v35 = vadd.f32 %v3041_v59, %v3020_v38 }
 0x1ba   :  { %v1481_v52 = vmax.f32 %v1373_v16, 0.0  ;;  %v1116_v6 = vadd.f32 %v3041_v59, %v3012_v30 }
 0x1bb   :  { %v1473_v44 = vmax.f32 %v1341_v47, 0.0  ;;  %v2197_v41 = vpack.c.bf16 %v1483_v17, %v1482_v40 }
 0x1bc   :  { %v2192_v56 = vpack.c.bf16 %v1481_v52, %v1480_v9  ;;  %v1056_v21 = vpop.f32.mrb[84].mxu0  ;;  %v2370_v60 = vpop.f32.mrb[84].mxu1 }
 0x1bd   :  { %v2172_v3 = vpack.c.bf16 %v1473_v44, %v1472_v12  ;;  %2253 = vst [vmem:[%s3272_s3 + $0xc8] sm:$0xff] %v2197_v41   ;;  %v1057_v55 = vadd.f32 %v3041_v59, %v1056_v21  ;;  %v1394_v18 = vadd.f32 %v2370_v60, %v1105_v62  ;;  %v1058_v4 = vpop.f32.mrb[85].mxu0  ;;  %v1385_v7 = vpop.f32.mrb[85].mxu1  ;;  %v1137_v41 = vadd.f32 %v3041_v59, %v3032_v50 }
 0x1be   :  { %2252 = vst [vmem:[%s3272_s3 + $0xc0] sm:$0xff] %v2192_v56   ;;  %v1386_v10 = vadd.f32 %v1385_v7, %v1097_v51  ;;  %v1059_v11 = vpop.f32.mrb[86].mxu0  ;;  %v2371_v22 = vpop.f32.mrb[86].mxu1 }
 0x1bf   :  { %2248 = vst [vmem:[%s3272_s3 + $0xa0] sm:$0xff] %v2172_v3   ;;  %v1346_v45 = vadd.f32 %v3162_v43, %v1057_v55  ;;  %v1060_v15 = vadd.f32 %v3041_v59, %v1059_v11  ;;  %v1397_v1 = vadd.f32 %v2371_v22, %v1108_v53  ;;  %v1061_v23 = vpop.f32.mrb[87].mxu0  ;;  %v1388_v33 = vpop.f32.mrb[87].mxu1  ;;  %v1486_v14 = vmax.f32 %v1394_v18, 0.0 }
 0x1c0   :  { %v1389_v25 = vadd.f32 %v1388_v33, %v1100_v24  ;;  %v1484_v27 = vmax.f32 %v1386_v10, 0.0  ;;  %v1113_v43 = vadd.f32 %v3041_v59, %v3008_v26  ;;  %v1140_v55 = vadd.f32 %v3041_v59, %v3036_v54 }
 0x1c1   :  { %v1349_v19 = vadd.f32 %v3165_v49, %v1060_v15  ;;  %v1487_v36 = vmax.f32 %v1397_v1, 0.0  ;;  %v1474_v28 = vmax.f32 %v1346_v45, 0.0  ;;  %v1132_v24 = vadd.f32 %v3041_v59, %v3028_v46 }
 0x1c2   :  { %v1485_v37 = vmax.f32 %v1389_v25, 0.0 }
 0x1c3   :  { %v1475_v48 = vmax.f32 %v1349_v19, 0.0  ;;  %v2207_v31 = vpack.c.bf16 %v1487_v36, %v1486_v14 }
 0x1c4   :  { %v2202_v32 = vpack.c.bf16 %v1485_v37, %v1484_v27  ;;  %v1064_v5 = vpop.f32.mrb[88].mxu0  ;;  %v2374_v2 = vpop.f32.mrb[88].mxu1 }
 0x1c5   :  { %v2177_v61 = vpack.c.bf16 %v1475_v48, %v1474_v28  ;;  %2255 = vst [vmem:[%s3272_s3 + $0xd8] sm:$0xff] %v2207_v31   ;;  %v1065_v49 = vadd.f32 %v3041_v59, %v1064_v5  ;;  %v1410_v34 = vadd.f32 %v2374_v2, %v1121_v0  ;;  %v1066_v58 = vpop.f32.mrb[89].mxu0  ;;  %v1401_v39 = vpop.f32.mrb[89].mxu1 }
 0x1c6   :  { %2254 = vst [vmem:[%s3272_s3 + $0xd0] sm:$0xff] %v2202_v32   ;;  %v1402_v26 = vadd.f32 %v1401_v39, %v1113_v43  ;;  %v1067_v57 = vpop.f32.mrb[90].mxu0  ;;  %v2375_v38 = vpop.f32.mrb[90].mxu1 }
 0x1c7   :  { %2249 = vst [vmem:[%s3272_s3 + $0xa8] sm:$0xff] %v2177_v61   ;;  %v1354_v29 = vadd.f32 %v3174_v13, %v1065_v49  ;;  %v1068_v16 = vadd.f32 %v3041_v59, %v1067_v57  ;;  %v1413_v40 = vadd.f32 %v2375_v38, %v1124_v35  ;;  %v1069_v47 = vpop.f32.mrb[91].mxu0  ;;  %v1404_v17 = vpop.f32.mrb[91].mxu1  ;;  %v1490_v30 = vmax.f32 %v1410_v34, 0.0 }
 0x1c8   :  { %v1405_v9 = vadd.f32 %v1404_v17, %v1116_v6  ;;  %v1488_v12 = vmax.f32 %v1402_v26, 0.0  ;;  %v1129_v13 = vadd.f32 %v3041_v59, %v3024_v42 }
 0x1c9   :  { %v1357_v52 = vadd.f32 %v3182_v20, %v1068_v16  ;;  %v1491_v62 = vmax.f32 %v1413_v40, 0.0  ;;  %v1476_v51 = vmax.f32 %v1354_v29, 0.0 }
 0x1ca   :  { %v1489_v44 = vmax.f32 %v1405_v9, 0.0 }
 0x1cb   :  { %v1477_v56 = vmax.f32 %v1357_v52, 0.0  ;;  %v2217_v21 = vpack.c.bf16 %v1491_v62, %v1490_v30 }
 0x1cc   :  { %v2212_v60 = vpack.c.bf16 %v1489_v44, %v1488_v12  ;;  %v1072_v53 = vpop.f32.mrb[92].mxu0  ;;  %v2378_v3 = vpop.f32.mrb[92].mxu1 }
 0x1cd   :  { %v2182_v18 = vpack.c.bf16 %v1477_v56, %v1476_v51  ;;  %2257 = vst [vmem:[%s3272_s3 + $0xe8] sm:$0xff] %v2217_v21   ;;  %v1073_v20 = vadd.f32 %v3041_v59, %v1072_v53  ;;  %v1426_v50 = vadd.f32 %v2378_v3, %v1137_v41  ;;  %v1074_v4 = vpop.f32.mrb[93].mxu0  ;;  %v1417_v7 = vpop.f32.mrb[93].mxu1 }
 0x1ce   :  { %2256 = vst [vmem:[%s3272_s3 + $0xe0] sm:$0xff] %v2212_v60   ;;  %v1418_v42 = vadd.f32 %v1417_v7, %v1129_v13  ;;  %v1075_v10 = vpop.f32.mrb[94].mxu0  ;;  %v2379_v54 = vpop.f32.mrb[94].mxu1 }
 0x1cf   :  { %2250 = vst [vmem:[%s3272_s3 + $0xb0] sm:$0xff] %v2182_v18   ;;  %v1362_v11 = vadd.f32 %v3171_v63, %v1073_v20  ;;  %v1076_v22 = vadd.f32 %v3041_v59, %v1075_v10  ;;  %v1429_v45 = vadd.f32 %v2379_v54, %v1140_v55  ;;  %v1077_v15 = vpop.f32.mrb[95].mxu0  ;;  %v1420_v1 = vpop.f32.mrb[95].mxu1  ;;  %v1494_v46 = vmax.f32 %v1426_v50, 0.0 }
 0x1d0   :  { %v1421_v23 = vadd.f32 %v1420_v1, %v1132_v24  ;;  %v1492_v14 = vmax.f32 %v1418_v42, 0.0 }
 0x1d1   :  { %v1365_v33 = vadd.f32 %v3176_v8, %v1076_v22  ;;  %v1495_v25 = vmax.f32 %v1429_v45, 0.0  ;;  %v1478_v36 = vmax.f32 %v1362_v11, 0.0 }
 0x1d2   :  { %v1493_v19 = vmax.f32 %v1421_v23, 0.0 }
 0x1d3   :  { %v1479_v27 = vmax.f32 %v1365_v33, 0.0  ;;  %v2227_v37 = vpack.c.bf16 %v1495_v25, %v1494_v46 }
 0x1d4   :  { %v2222_v0 = vpack.c.bf16 %v1493_v19, %v1492_v14 }
 0x1d5   :  { %v2187_v28 = vpack.c.bf16 %v1479_v27, %v1478_v36  ;;  %2259 = vst [vmem:[%s3272_s3 + $0xf8] sm:$0xff] %v2227_v37  }
 0x1d6   :  { %2258 = vst [vmem:[%s3272_s3 + $0xf0] sm:$0xff] %v2222_v0  }
 0x1d7   :  { %2251 = vst [vmem:[%s3272_s3 + $0xb8] sm:$0xff] %v2187_v28  }

// kernel: net33_2_forward.7
= control target key start
LH: loop header
LB: loop body
LE: loop exit
PB: predicated region body
PF: predicated region fallthrough
CT: control target
= control target key end

     0   :  { %s8260_s24 = smov 0   ;;  %s8262_s25 = smov 0   ;;  %s9238_s0 = inlined_call_operand.vmem [shape: bf16[16,11008], index: 0, kind: input, shape index: {}]   ;;  %s9239_s1 = inlined_call_operand.vmem [shape: bf16[11008,256], index: 1, kind: input, shape index: {}]   ;;  %s9240_s2 = inlined_call_operand.vmem [shape: f32[1,256], index: 2, kind: input, shape index: {}]   ;;  %s9241_s3 = inlined_call_operand.vmem [shape: bf16[256,128], index: 3, kind: input, shape index: {}]   ;;  %s9242_s4 = inlined_call_operand.vmem [shape: f32[1,128], index: 4, kind: input, shape index: {}]   ;;  %s9243_s5 = inlined_call_operand.vmem [shape: bf16[128,128], index: 5, kind: input, shape index: {}]   ;;  %s9244_s6 = inlined_call_operand.vmem [shape: f32[1,128], index: 6, kind: input, shape index: {}]   ;;  %s9245_s7 = inlined_call_operand.vmem [shape: f32[16,128], index: 7, kind: output, shape index: {}]  }
   0x1   :  { %s8264_s26 = smov 0  }
   0x2 LB: > { %s8276_s27 = sadd.s32 4294967295, %s8214_s26   ;;  %s8279_s28 = sadd.s32 1, %s8214_s26   ;;  %s8214_s26 = sphi %s8264_s26, %s9248_s26   ;;  %s8210_s25 = sphi %s8262_s25, %s9247_s25   ;;  %s8206_s24 = sphi %s8260_s24, %s9246_s24  }
   0x3   : > { %s21_s29 = ssub.s32 %s8214_s26, %s8279_s28  ;;  %s24_s30 = sadd.s32 1, %s8210_s25 }
   0x4   : > { %p22_p0 = scmp.eq.s32.totalorder %s21_s29, 0  ;;  %p31_p1 = scmp.ne.s32.totalorder %s8210_s25, %s8206_s24 }
   0x5   : > { %p32_p2 = scmp.eq.s32.totalorder %s8214_s26, 0  ;;  %p6135_p4 = scmp.ge.s32.totalorder %s8214_s26, 2 }
   0x6   : > { %s8288_s8 = scalar_select %p22_p0, %s8210_s25, %s24_s30  }
   0x7   : > { %p33_p3 = por %p32_p2, %p31_p1  ;;  %224 = sbr.rel (%p6135_p4) target bundleno = 41 (0x29), region = 36 }
   0xe   : > { %227 = sbr.rel (!%p33_p3) target bundleno = 41 (0x29), region = 40  ;;  %s229_s9 = sand.u32 (%p33_p3), 1, %s8210_s25  }
   0xf   : > { %s6905_s10 = smul.u32 (%p33_p3), 172, %s8214_s26 }
  0x10   : > { %s7042_s11 = smul.u32 (%p33_p3), 344, %s229_s9 }
  0x11   : > { %s8296_s14 = scalar_lea.vmem (%p33_p3), %s9238_s0, %s6905_s10 }
  0x12   : > { %v249_v0 = vld [vmem:[%s8296_s14] sm:$0xff] (%p33_p3)  ;;  %v251_v1 = vld [vmem:[%s8296_s14 + $0x8] sm:$0xff] (%p33_p3)  ;;  %v253_v2 = vld [vmem:[%s8296_s14 + $0x10] sm:$0xff] (%p33_p3)  ;;  %s8301_s15 = scalar_lea.vmem (%p33_p3), [#allocation3], %s7042_s11 }
  0x13   : > { %250 = vst [vmem:[%s8301_s15] sm:$0xff] (%p33_p3), %v249_v0  ;;  %252 = vst [vmem:[%s8301_s15 + $0x8] sm:$0xff] (%p33_p3), %v251_v1  ;;  %v255_v3 = vld [vmem:[%s8296_s14 + $0x18] sm:$0xff] (%p33_p3)  ;;  %v257_v4 = vld [vmem:[%s8296_s14 + $0x20] sm:$0xff] (%p33_p3) }
  0x14   : > { %254 = vst [vmem:[%s8301_s15 + $0x10] sm:$0xff] (%p33_p3), %v253_v2  ;;  %v259_v5 = vld [vmem:[%s8296_s14 + $0x28] sm:$0xff] (%p33_p3)  ;;  %256 = vst [vmem:[%s8301_s15 + $0x18] sm:$0xff] (%p33_p3), %v255_v3  ;;  %v261_v6 = vld [vmem:[%s8296_s14 + $0x30] sm:$0xff] (%p33_p3) }
  0x15   : > { %258 = vst [vmem:[%s8301_s15 + $0x20] sm:$0xff] %v257_v4  ;;  %260 = vst [vmem:[%s8301_s15 + $0x28] sm:$0xff] %v259_v5  ;;  %v263_v7 = vld [vmem:[%s8296_s14 + $0x38] sm:$0xff]  ;;  %v265_v8 = vld [vmem:[%s8296_s14 + $0x40] sm:$0xff] }
  0x16   : > { %262 = vst [vmem:[%s8301_s15 + $0x30] sm:$0xff] %v261_v6  ;;  %264 = vst [vmem:[%s8301_s15 + $0x38] sm:$0xff] %v263_v7  ;;  %v267_v9 = vld [vmem:[%s8296_s14 + $0x48] sm:$0xff]  ;;  %v269_v10 = vld [vmem:[%s8296_s14 + $0x50] sm:$0xff] }
  0x17   : > { %266 = vst [vmem:[%s8301_s15 + $0x40] sm:$0xff] %v265_v8  ;;  %v271_v11 = vld [vmem:[%s8296_s14 + $0x58] sm:$0xff]  ;;  %268 = vst [vmem:[%s8301_s15 + $0x48] sm:$0xff] %v267_v9  ;;  %v273_v12 = vld [vmem:[%s8296_s14 + $0x60] sm:$0xff] }
  0x18   : > { %270 = vst [vmem:[%s8301_s15 + $0x50] sm:$0xff] %v269_v10  ;;  %272 = vst [vmem:[%s8301_s15 + $0x58] sm:$0xff] %v271_v11  ;;  %v275_v13 = vld [vmem:[%s8296_s14 + $0x68] sm:$0xff]  ;;  %v277_v14 = vld [vmem:[%s8296_s14 + $0x70] sm:$0xff] }
  0x19   : > { %274 = vst [vmem:[%s8301_s15 + $0x60] sm:$0xff] %v273_v12  ;;  %276 = vst [vmem:[%s8301_s15 + $0x68] sm:$0xff] %v275_v13  ;;  %v279_v15 = vld [vmem:[%s8296_s14 + $0x78] sm:$0xff]  ;;  %v281_v16 = vld [vmem:[%s8296_s14 + $0x80] sm:$0xff] }
  0x1a   : > { %278 = vst [vmem:[%s8301_s15 + $0x70] sm:$0xff] %v277_v14  ;;  %v283_v17 = vld [vmem:[%s8296_s14 + $0x88] sm:$0xff]  ;;  %280 = vst [vmem:[%s8301_s15 + $0x78] sm:$0xff] %v279_v15  ;;  %v285_v18 = vld [vmem:[%s8296_s14 + $0x90] sm:$0xff] }
  0x1b   : > { %282 = vst [vmem:[%s8301_s15 + $0x80] sm:$0xff] %v281_v16  ;;  %284 = vst [vmem:[%s8301_s15 + $0x88] sm:$0xff] %v283_v17  ;;  %v287_v19 = vld [vmem:[%s8296_s14 + $0x98] sm:$0xff]  ;;  %v289_v20 = vld [vmem:[%s8296_s14 + $0xa0] sm:$0xff] }
  0x1c   : > { %286 = vst [vmem:[%s8301_s15 + $0x90] sm:$0xff] %v285_v18  ;;  %288 = vst [vmem:[%s8301_s15 + $0x98] sm:$0xff] %v287_v19  ;;  %v291_v21 = vld [vmem:[%s8296_s14 + $0x158] sm:$0xff]  ;;  %v293_v22 = vld [vmem:[%s8296_s14 + $0x160] sm:$0xff] }
  0x1d   : > { %290 = vst [vmem:[%s8301_s15 + $0xa0] sm:$0xff] %v289_v20  ;;  %v295_v23 = vld [vmem:[%s8296_s14 + $0x168] sm:$0xff]  ;;  %292 = vst [vmem:[%s8301_s15 + $0xac] sm:$0xff] %v291_v21  ;;  %v297_v24 = vld [vmem:[%s8296_s14 + $0x170] sm:$0xff] }
  0x1e   : > { %294 = vst [vmem:[%s8301_s15 + $0xb4] sm:$0xff] %v293_v22  ;;  %296 = vst [vmem:[%s8301_s15 + $0xbc] sm:$0xff] %v295_v23  ;;  %v299_v25 = vld [vmem:[%s8296_s14 + $0x178] sm:$0xff]  ;;  %v301_v26 = vld [vmem:[%s8296_s14 + $0x180] sm:$0xff] }
  0x1f   : > { %298 = vst [vmem:[%s8301_s15 + $0xc4] sm:$0xff] %v297_v24  ;;  %300 = vst [vmem:[%s8301_s15 + $0xcc] sm:$0xff] %v299_v25  ;;  %v303_v27 = vld [vmem:[%s8296_s14 + $0x188] sm:$0xff]  ;;  %v305_v28 = vld [vmem:[%s8296_s14 + $0x190] sm:$0xff] }
  0x20   : > { %302 = vst [vmem:[%s8301_s15 + $0xd4] sm:$0xff] %v301_v26  ;;  %v307_v29 = vld [vmem:[%s8296_s14 + $0x198] sm:$0xff]  ;;  %304 = vst [vmem:[%s8301_s15 + $0xdc] sm:$0xff] %v303_v27  ;;  %v309_v30 = vld [vmem:[%s8296_s14 + $0x1a0] sm:$0xff] }
  0x21   : > { %306 = vst [vmem:[%s8301_s15 + $0xe4] sm:$0xff] %v305_v28  ;;  %308 = vst [vmem:[%s8301_s15 + $0xec] sm:$0xff] %v307_v29  ;;  %v311_v31 = vld [vmem:[%s8296_s14 + $0x1a8] sm:$0xff]  ;;  %v313_v32 = vld [vmem:[%s8296_s14 + $0x1b0] sm:$0xff] }
  0x22   : > { %310 = vst [vmem:[%s8301_s15 + $0xf4] sm:$0xff] %v309_v30  ;;  %312 = vst [vmem:[%s8301_s15 + $0xfc] sm:$0xff] %v311_v31  ;;  %v315_v33 = vld [vmem:[%s8296_s14 + $0x1b8] sm:$0xff]  ;;  %v317_v34 = vld [vmem:[%s8296_s14 + $0x1c0] sm:$0xff] }
  0x23   : > { %314 = vst [vmem:[%s8301_s15 + $0x104] sm:$0xff] %v313_v32  ;;  %v319_v35 = vld [vmem:[%s8296_s14 + $0x1c8] sm:$0xff]  ;;  %316 = vst [vmem:[%s8301_s15 + $0x10c] sm:$0xff] %v315_v33  ;;  %v321_v36 = vld [vmem:[%s8296_s14 + $0x1d0] sm:$0xff] }
  0x24   : > { %318 = vst [vmem:[%s8301_s15 + $0x114] sm:$0xff] %v317_v34  ;;  %320 = vst [vmem:[%s8301_s15 + $0x11c] sm:$0xff] %v319_v35  ;;  %v323_v37 = vld [vmem:[%s8296_s14 + $0x1d8] sm:$0xff]  ;;  %v325_v38 = vld [vmem:[%s8296_s14 + $0x1e0] sm:$0xff] }
  0x25   : > { %322 = vst [vmem:[%s8301_s15 + $0x124] sm:$0xff] %v321_v36  ;;  %324 = vst [vmem:[%s8301_s15 + $0x12c] sm:$0xff] %v323_v37  ;;  %v327_v39 = vld [vmem:[%s8296_s14 + $0x1e8] sm:$0xff]  ;;  %v329_v40 = vld [vmem:[%s8296_s14 + $0x1f0] sm:$0xff] }
  0x26   : > { %326 = vst [vmem:[%s8301_s15 + $0x134] sm:$0xff] %v325_v38  ;;  %v331_v41 = vld [vmem:[%s8296_s14 + $0x1f8] sm:$0xff]  ;;  %328 = vst [vmem:[%s8301_s15 + $0x13c] sm:$0xff] %v327_v39  ;;  %v6137_v42 = vld [vmem:[%s8296_s14 + $0xa8] sm:$0xf] }
  0x27   : > { %330 = vst [vmem:[%s8301_s15 + $0x144] sm:$0xff] %v329_v40  ;;  %332 = vst [vmem:[%s8301_s15 + $0x14c] sm:$0xff] %v331_v41  ;;  %v6139_v43 = vld [vmem:[%s8296_s14 + $0x200] sm:$0xf] }
  0x28   : > { %6138 = vst [vmem:[%s8301_s15 + $0xa8] sm:$0xf] %v6137_v42  ;;  %6140 = vst [vmem:[%s8301_s15 + $0x154] sm:$0xf] %v6139_v43 }
  0x29 PF: > { %p6141_p5 = scmp.ge.s32.totalorder %s8214_s26, 1  ;;  %p358_p6 = scmp.lt.s32.totalorder %s8214_s26, 3 }
  0x2b   : > { %p359_p7 = pnand %p6141_p5, %p358_p6 }
  0x2c   : > { %s365_s16 = sand.u32 (!%p359_p7), 1, %s8206_s24   ;;  %s398_s17 = smul.u32 (!%p359_p7), 688, %s8276_s27 }
  0x2d   : > { %362 = sbr.rel (%p359_p7) target bundleno = 1438 (0x59e), region = 70  ;;  %p6144_p9 = scmp.ne.s32.totalorder (!%p359_p7), %s8276_s27, 0 }
  0x2e   : > { %s7043_s18 = smul.u32 (!%p359_p7), 344, %s365_s16  ;;  %p399_p8 = scmp.lt.s32.totalorder (!%p359_p7), %s398_s17, 1375 }
  0x30   : > { %s8397_s23 = scalar_lea.vmem (!%p359_p7), [#allocation3], %s7043_s18 }
  0x34   : > { %s9250_s17 = smov (!%p399_p8, %s398_s17), 1375  ;;  %409 = sbr.rel (%p6144_p9) target bundleno = 59 (0x3b), region = 78 }
  0x35   : > { %s6906_s19 = sshll.u32 %s9250_s17, 3  ;;  %v8216_v44 = vmov (!%p6144_p9), 0.0  }
  0x36   : > { %s8395_s22 = scalar_lea.vmem %s9239_s1, %s6906_s19  ;;  %410 = vst [vmem:[#allocation2] sm:$0xff] (!%p6144_p9), %v8216_v44  ;;  %411 = vst [vmem:[#allocation2 + $0x8] sm:$0xff] (!%p6144_p9), %v8216_v44 }
  0x37   : > { %412 = vst [vmem:[#allocation2 + $0x10] sm:$0xff] (!%p6144_p9), %v8216_v44  ;;  %413 = vst [vmem:[#allocation2 + $0x18] sm:$0xff] (!%p6144_p9), %v8216_v44 }
  0x3b PF: > { %v7072_v45 = vld [vmem:[%s8395_s22 + $0x4] ss:$8 sps:$4 sm:$0xff]   ;;  %v7076_v47 = vld [vmem:[%s8395_s22] ss:$8 sps:$4 sm:$0xff]   ;;  %v7078_v49 = vld [vmem:[%s8395_s22 + $0x14] ss:$8 sps:$4 sm:$0xff]  }
  0x3c   : > { %v7074_v46 = vld [vmem:[%s8395_s22 + $0xb04] ss:$8 sps:$4 sm:$0xff]   ;;  %4806 = vmatprep.subr.bf16.mxu1 %v7072_v45  ;;  %v7077_v48 = vld [vmem:[%s8395_s22 + $0xb00] ss:$8 sps:$4 sm:$0xff]   ;;  %v7080_v50 = vld [vmem:[%s8395_s22 + $0xb14] ss:$8 sps:$4 sm:$0xff]  }
  0x3d   : > { %5279 = vmatprep.subr.bf16.mxu0 %v7074_v46  ;;  %4807 = vmatpush1.bf16.msra.mxu1 %v7076_v47  ;;  %v7082_v51 = vld [vmem:[%s8395_s22 + $0x10] ss:$8 sps:$4 sm:$0xff]   ;;  %v7084_v53 = vld [vmem:[%s8395_s22 + $0x24] ss:$8 sps:$4 sm:$0xff]   ;;  %v7088_v55 = vld [vmem:[%s8395_s22 + $0x20] ss:$8 sps:$4 sm:$0xff]  }
  0x3e   : > { %5280 = vmatpush1.bf16.msra.mxu0 %v7077_v48  ;;  %4808 = vmatprep.subr.bf16.mxu1 %v7078_v49  ;;  %v7083_v52 = vld [vmem:[%s8395_s22 + $0xb10] ss:$8 sps:$4 sm:$0xff]   ;;  %v7086_v54 = vld [vmem:[%s8395_s22 + $0xb24] ss:$8 sps:$4 sm:$0xff]   ;;  %v7089_v56 = vld [vmem:[%s8395_s22 + $0xb20] ss:$8 sps:$4 sm:$0xff]  }
  0x3f   : > { %5281 = vmatprep.subr.bf16.mxu0 %v7080_v50  ;;  %v7090_v57 = vld [vmem:[%s8395_s22 + $0x34] ss:$8 sps:$4 sm:$0xff]   ;;  %v7094_v59 = vld [vmem:[%s8395_s22 + $0x30] ss:$8 sps:$4 sm:$0xff]   ;;  %v7096_v61 = vld [vmem:[%s8395_s22 + $0x44] ss:$8 sps:$4 sm:$0xff]  }
  0x40   : > { %v7092_v58 = vld [vmem:[%s8395_s22 + $0xb34] ss:$8 sps:$4 sm:$0xff]   ;;  %v7095_v60 = vld [vmem:[%s8395_s22 + $0xb30] ss:$8 sps:$4 sm:$0xff]   ;;  %v7098_v62 = vld [vmem:[%s8395_s22 + $0xb44] ss:$8 sps:$4 sm:$0xff]  }
  0x41   : > { %4809 = vmatpush1.bf16.msra.mxu1 %v7082_v51  ;;  %v7100_v63 = vld [vmem:[%s8395_s22 + $0x40] ss:$8 sps:$4 sm:$0xff]   ;;  %v7102_v1 = vld [vmem:[%s8395_s22 + $0x54] ss:$8 sps:$4 sm:$0xff]   ;;  %v7106_v3 = vld [vmem:[%s8395_s22 + $0x50] ss:$8 sps:$4 sm:$0xff]  }
  0x42   : > { %5282 = vmatpush1.bf16.msra.mxu0 %v7083_v52  ;;  %4810 = vmatprep.subr.bf16.mxu1 %v7084_v53  ;;  %v7101_v0 = vld [vmem:[%s8395_s22 + $0xb40] ss:$8 sps:$4 sm:$0xff]   ;;  %v7104_v2 = vld [vmem:[%s8395_s22 + $0xb54] ss:$8 sps:$4 sm:$0xff]   ;;  %v7107_v4 = vld [vmem:[%s8395_s22 + $0xb50] ss:$8 sps:$4 sm:$0xff]  }
  0x43   : > { %5283 = vmatprep.subr.bf16.mxu0 %v7086_v54  ;;  %v7108_v5 = vld [vmem:[%s8395_s22 + $0x64] ss:$8 sps:$4 sm:$0xff]   ;;  %v7112_v7 = vld [vmem:[%s8395_s22 + $0x60] ss:$8 sps:$4 sm:$0xff]   ;;  %v7114_v9 = vld [vmem:[%s8395_s22 + $0x74] ss:$8 sps:$4 sm:$0xff]  }
  0x44   : > { %v7110_v6 = vld [vmem:[%s8395_s22 + $0xb64] ss:$8 sps:$4 sm:$0xff]   ;;  %v7113_v8 = vld [vmem:[%s8395_s22 + $0xb60] ss:$8 sps:$4 sm:$0xff]   ;;  %v7116_v10 = vld [vmem:[%s8395_s22 + $0xb74] ss:$8 sps:$4 sm:$0xff]  }
  0x45   : > { %4811 = vmatpush1.bf16.msra.mxu1 %v7088_v55  ;;  %v7118_v11 = vld [vmem:[%s8395_s22 + $0x70] ss:$8 sps:$4 sm:$0xff]   ;;  %v7120_v13 = vld [vmem:[%s8395_s22 + $0x84] ss:$8 sps:$4 sm:$0xff]   ;;  %v7124_v15 = vld [vmem:[%s8395_s22 + $0x80] ss:$8 sps:$4 sm:$0xff]  }
  0x46   : > { %5284 = vmatpush1.bf16.msra.mxu0 %v7089_v56  ;;  %4812 = vmatprep.subr.bf16.mxu1 %v7090_v57  ;;  %v7119_v12 = vld [vmem:[%s8395_s22 + $0xb70] ss:$8 sps:$4 sm:$0xff]   ;;  %v7122_v14 = vld [vmem:[%s8395_s22 + $0xb84] ss:$8 sps:$4 sm:$0xff]   ;;  %v7125_v16 = vld [vmem:[%s8395_s22 + $0xb80] ss:$8 sps:$4 sm:$0xff]  }
  0x47   : > { %5285 = vmatprep.subr.bf16.mxu0 %v7092_v58  ;;  %v7126_v17 = vld [vmem:[%s8395_s22 + $0x94] ss:$8 sps:$4 sm:$0xff]   ;;  %v7130_v19 = vld [vmem:[%s8395_s22 + $0x90] ss:$8 sps:$4 sm:$0xff]   ;;  %v7132_v21 = vld [vmem:[%s8395_s22 + $0xa4] ss:$8 sps:$4 sm:$0xff]  }
  0x48   : > { %v7128_v18 = vld [vmem:[%s8395_s22 + $0xb94] ss:$8 sps:$4 sm:$0xff]   ;;  %v7131_v20 = vld [vmem:[%s8395_s22 + $0xb90] ss:$8 sps:$4 sm:$0xff]   ;;  %v7134_v22 = vld [vmem:[%s8395_s22 + $0xba4] ss:$8 sps:$4 sm:$0xff]  }
  0x49   : > { %4813 = vmatpush1.bf16.msra.mxu1 %v7094_v59  ;;  %v7136_v23 = vld [vmem:[%s8395_s22 + $0xa0] ss:$8 sps:$4 sm:$0xff]   ;;  %v7138_v25 = vld [vmem:[%s8395_s22 + $0xb4] ss:$8 sps:$4 sm:$0xff]   ;;  %v7142_v27 = vld [vmem:[%s8395_s22 + $0xb0] ss:$8 sps:$4 sm:$0xff]  }
  0x4a   : > { %5286 = vmatpush1.bf16.msra.mxu0 %v7095_v60  ;;  %4814 = vmatprep.subr.bf16.mxu1 %v7096_v61  ;;  %v7137_v24 = vld [vmem:[%s8395_s22 + $0xba0] ss:$8 sps:$4 sm:$0xff]   ;;  %v7140_v26 = vld [vmem:[%s8395_s22 + $0xbb4] ss:$8 sps:$4 sm:$0xff]   ;;  %v7143_v28 = vld [vmem:[%s8395_s22 + $0xbb0] ss:$8 sps:$4 sm:$0xff]  }
  0x4b   : > { %5287 = vmatprep.subr.bf16.mxu0 %v7098_v62  ;;  %v7170_v29 = vld [vmem:[%s8397_s23 + $0x4] ss:$172 sps:$4 sm:$0xff]   ;;  %v7176_v32 = vld [vmem:[%s8397_s23 + $0x5c] ss:$172 sps:$4 sm:$0xff]   ;;  %v7168_v49 = vld [vmem:[%s8397_s23] ss:$172 sps:$4 sm:$0xff]  }
  0x4c   : > { %v7144_v30 = vld [vmem:[%s8395_s22 + $0xc4] ss:$8 sps:$4 sm:$0xff]   ;;  %4838 = vmatprep.mubr.bf16.mxu1 %v7170_v29  ;;  %v7148_v33 = vld [vmem:[%s8395_s22 + $0xc0] ss:$8 sps:$4 sm:$0xff]   ;;  %v7150_v35 = vld [vmem:[%s8395_s22 + $0xd4] ss:$8 sps:$4 sm:$0xff]   ;;  %5311 = vmatprep.mubr.bf16.mxu0 %v7176_v32 }
  0x4d   : > { %4815 = vmatpush1.bf16.msra.mxu1 %v7100_v63  ;;  %v7146_v31 = vld [vmem:[%s8395_s22 + $0xbc4] ss:$8 sps:$4 sm:$0xff]   ;;  %v7149_v34 = vld [vmem:[%s8395_s22 + $0xbc0] ss:$8 sps:$4 sm:$0xff]   ;;  %v7152_v36 = vld [vmem:[%s8395_s22 + $0xbd4] ss:$8 sps:$4 sm:$0xff]  }
  0x4e   : > { %5288 = vmatpush1.bf16.msra.mxu0 %v7101_v0  ;;  %4816 = vmatprep.subr.bf16.mxu1 %v7102_v1  ;;  %v7154_v37 = vld [vmem:[%s8395_s22 + $0xd0] ss:$8 sps:$4 sm:$0xff]   ;;  %v7156_v39 = vld [vmem:[%s8395_s22 + $0xe4] ss:$8 sps:$4 sm:$0xff]   ;;  %v7160_v41 = vld [vmem:[%s8395_s22 + $0xe0] ss:$8 sps:$4 sm:$0xff]  }
  0x4f   : > { %5289 = vmatprep.subr.bf16.mxu0 %v7104_v2  ;;  %v7155_v38 = vld [vmem:[%s8395_s22 + $0xbd0] ss:$8 sps:$4 sm:$0xff]   ;;  %v7158_v40 = vld [vmem:[%s8395_s22 + $0xbe4] ss:$8 sps:$4 sm:$0xff]   ;;  %v7161_v42 = vld [vmem:[%s8395_s22 + $0xbe0] ss:$8 sps:$4 sm:$0xff]  }
  0x50   : > { %v7162_v43 = vld [vmem:[%s8395_s22 + $0xf4] ss:$8 sps:$4 sm:$0xff]   ;;  %v7166_v45 = vld [vmem:[%s8395_s22 + $0xf0] ss:$8 sps:$4 sm:$0xff]   ;;  %v7173_v47 = vld [vmem:[%s8395_s22 + $0x104] ss:$8 sps:$4 sm:$0xff]  }
  0x51   : > { %4817 = vmatpush1.bf16.msra.mxu1 %v7106_v3  ;;  %v7164_v44 = vld [vmem:[%s8395_s22 + $0xbf4] ss:$8 sps:$4 sm:$0xff]   ;;  %v7167_v46 = vld [vmem:[%s8395_s22 + $0xbf0] ss:$8 sps:$4 sm:$0xff]   ;;  %v7179_v48 = vld [vmem:[%s8395_s22 + $0xc04] ss:$8 sps:$4 sm:$0xff]  }
  0x52   : > { %5290 = vmatpush1.bf16.msra.mxu0 %v7107_v4  ;;  %4818 = vmatprep.subr.bf16.mxu1 %v7108_v5  ;;  %v7171_v50 = vld [vmem:[%s8395_s22 + $0x100] ss:$8 sps:$4 sm:$0xff]   ;;  %v7174_v51 = vld [vmem:[%s8397_s23 + $0x58] ss:$172 sps:$4 sm:$0xff]   ;;  %p6876_p10 = scmp.ne.s32.totalorder %s8276_s27, 1 }
  0x53   : > { %5291 = vmatprep.subr.bf16.mxu0 %v7110_v6  ;;  %v7177_v52 = vld [vmem:[%s8395_s22 + $0xc00] ss:$8 sps:$4 sm:$0xff]   ;;  %v7182_v53 = vld [vmem:[%s8395_s22 + $0x114] ss:$8 sps:$4 sm:$0xff]   ;;  %v7180_v55 = vld [vmem:[%s8395_s22 + $0x110] ss:$8 sps:$4 sm:$0xff]  }
  0x54   : > { %v7185_v54 = vld [vmem:[%s8395_s22 + $0xc14] ss:$8 sps:$4 sm:$0xff]   ;;  %v7183_v56 = vld [vmem:[%s8395_s22 + $0xc10] ss:$8 sps:$4 sm:$0xff]   ;;  %v7188_v57 = vld [vmem:[%s8395_s22 + $0x124] ss:$8 sps:$4 sm:$0xff]  }
  0x55   : > { %4819 = vmatpush1.bf16.msra.mxu1 %v7112_v7  ;;  %v7191_v58 = vld [vmem:[%s8395_s22 + $0xc24] ss:$8 sps:$4 sm:$0xff]   ;;  %v7186_v59 = vld [vmem:[%s8395_s22 + $0x120] ss:$8 sps:$4 sm:$0xff]   ;;  %v7194_v61 = vld [vmem:[%s8395_s22 + $0x134] ss:$8 sps:$4 sm:$0xff]  }
  0x56   : > { %5292 = vmatpush1.bf16.msra.mxu0 %v7113_v8  ;;  %4820 = vmatprep.subr.bf16.mxu1 %v7114_v9  ;;  %v7189_v60 = vld [vmem:[%s8395_s22 + $0xc20] ss:$8 sps:$4 sm:$0xff]   ;;  %v7197_v62 = vld [vmem:[%s8395_s22 + $0xc34] ss:$8 sps:$4 sm:$0xff]   ;;  %v7192_v63 = vld [vmem:[%s8395_s22 + $0x130] ss:$8 sps:$4 sm:$0xff]  }
  0x57   : > { %5293 = vmatprep.subr.bf16.mxu0 %v7116_v10  ;;  %v7195_v0 = vld [vmem:[%s8395_s22 + $0xc30] ss:$8 sps:$4 sm:$0xff]   ;;  %v7200_v1 = vld [vmem:[%s8395_s22 + $0x144] ss:$8 sps:$4 sm:$0xff]   ;;  %v7198_v3 = vld [vmem:[%s8395_s22 + $0x140] ss:$8 sps:$4 sm:$0xff]  }
  0x58   : > { %v7203_v2 = vld [vmem:[%s8395_s22 + $0xc44] ss:$8 sps:$4 sm:$0xff]   ;;  %v7201_v4 = vld [vmem:[%s8395_s22 + $0xc40] ss:$8 sps:$4 sm:$0xff]   ;;  %v7206_v5 = vld [vmem:[%s8395_s22 + $0x154] ss:$8 sps:$4 sm:$0xff]  }
  0x59   : > { %4821 = vmatpush1.bf16.msra.mxu1 %v7118_v11  ;;  %v7209_v6 = vld [vmem:[%s8395_s22 + $0xc54] ss:$8 sps:$4 sm:$0xff]   ;;  %v7204_v7 = vld [vmem:[%s8395_s22 + $0x150] ss:$8 sps:$4 sm:$0xff]   ;;  %v7212_v9 = vld [vmem:[%s8395_s22 + $0x164] ss:$8 sps:$4 sm:$0xff]  }
  0x5a   : > { %5294 = vmatpush1.bf16.msra.mxu0 %v7119_v12  ;;  %4822 = vmatprep.subr.bf16.mxu1 %v7120_v13  ;;  %v7207_v8 = vld [vmem:[%s8395_s22 + $0xc50] ss:$8 sps:$4 sm:$0xff]   ;;  %v7215_v10 = vld [vmem:[%s8395_s22 + $0xc64] ss:$8 sps:$4 sm:$0xff]   ;;  %v7210_v11 = vld [vmem:[%s8395_s22 + $0x160] ss:$8 sps:$4 sm:$0xff]  }
  0x5b   : > { %5295 = vmatprep.subr.bf16.mxu0 %v7122_v14  ;;  %v7213_v12 = vld [vmem:[%s8395_s22 + $0xc60] ss:$8 sps:$4 sm:$0xff]   ;;  %v7218_v13 = vld [vmem:[%s8395_s22 + $0x174] ss:$8 sps:$4 sm:$0xff]   ;;  %vm8219_vm0 = vmmov (!%p6876_p10), 0  }
  0x5c   : > { %v7221_v14 = vld [vmem:[%s8395_s22 + $0xc74] ss:$8 sps:$4 sm:$0xff]   ;;  %v7234_v29 = vld [vmem:[%s8395_s22 + $0x1a0] ss:$8 sps:$4 sm:$0xff]  }
  0x5d   : > { %4823 = vmatpush1.bf16.msra.mxu1 %v7124_v15  ;;  %v7272_v15 = vld [vmem:[%s8397_s23 + $0xc] ss:$172 sps:$4 sm:$0xff]   ;;  %v7245_v32 = vld [vmem:[%s8395_s22 + $0xcb4] ss:$8 sps:$4 sm:$0xff]  }
  0x5e   : > { %5296 = vmatpush1.bf16.msra.mxu0 %v7125_v16  ;;  %4824 = vmatprep.subr.bf16.mxu1 %v7126_v17  ;;  %v7216_v16 = vld [vmem:[%s8395_s22 + $0x170] ss:$8 sps:$4 sm:$0xff]  }
  0x5f   : > { %5297 = vmatprep.subr.bf16.mxu0 %v7128_v18  ;;  %v7219_v17 = vld [vmem:[%s8395_s22 + $0xc70] ss:$8 sps:$4 sm:$0xff]  }
  0x60   : > { %v7278_v18 = vld [vmem:[%s8397_s23 + $0x64] ss:$172 sps:$4 sm:$0xff]  }
  0x61   : > { %4825 = vmatpush1.bf16.msra.mxu1 %v7130_v19  ;;  %v7224_v19 = vld [vmem:[%s8395_s22 + $0x184] ss:$8 sps:$4 sm:$0xff]  }
  0x62   : > { %5298 = vmatpush1.bf16.msra.mxu0 %v7131_v20  ;;  %4826 = vmatprep.subr.bf16.mxu1 %v7132_v21  ;;  %v7227_v20 = vld [vmem:[%s8395_s22 + $0xc84] ss:$8 sps:$4 sm:$0xff]   ;;  %v7222_v21 = vld [vmem:[%s8395_s22 + $0x180] ss:$8 sps:$4 sm:$0xff]  }
  0x63   : > { %5299 = vmatprep.subr.bf16.mxu0 %v7134_v22  ;;  %v7225_v22 = vld [vmem:[%s8395_s22 + $0xc80] ss:$8 sps:$4 sm:$0xff]  }
  0x65   : > { %4827 = vmatpush1.bf16.msra.mxu1 %v7136_v23  ;;  %v7230_v23 = vld [vmem:[%s8395_s22 + $0x194] ss:$8 sps:$4 sm:$0xff]  }
  0x66   : > { %5300 = vmatpush1.bf16.msra.mxu0 %v7137_v24  ;;  %4828 = vmatprep.subr.bf16.mxu1 %v7138_v25  ;;  %v7233_v24 = vld [vmem:[%s8395_s22 + $0xc94] ss:$8 sps:$4 sm:$0xff]   ;;  %v7228_v25 = vld [vmem:[%s8395_s22 + $0x190] ss:$8 sps:$4 sm:$0xff]  }
  0x67   : > { %5301 = vmatprep.subr.bf16.mxu0 %v7140_v26  ;;  %v7231_v26 = vld [vmem:[%s8395_s22 + $0xc90] ss:$8 sps:$4 sm:$0xff]  }
  0x69   : > { %4829 = vmatpush1.bf16.msra.mxu1 %v7142_v27  ;;  %v7236_v27 = vld [vmem:[%s8395_s22 + $0x1a4] ss:$8 sps:$4 sm:$0xff]  }
  0x6a   : > { %5302 = vmatpush1.bf16.msra.mxu0 %v7143_v28  ;;  %4830 = vmatprep.subr.bf16.mxu1 %v7144_v30  ;;  %v7239_v28 = vld [vmem:[%s8395_s22 + $0xca4] ss:$8 sps:$4 sm:$0xff]   ;;  %v7237_v30 = vld [vmem:[%s8395_s22 + $0xca0] ss:$8 sps:$4 sm:$0xff]  }
  0x6b   : > { %5303 = vmatprep.subr.bf16.mxu0 %v7146_v31  ;;  %v7242_v31 = vld [vmem:[%s8395_s22 + $0x1b4] ss:$8 sps:$4 sm:$0xff]  }
  0x6d   : > { %4831 = vmatpush1.bf16.msra.mxu1 %v7148_v33  ;;  %v7240_v33 = vld [vmem:[%s8395_s22 + $0x1b0] ss:$8 sps:$4 sm:$0xff]  }
  0x6e   : > { %5304 = vmatpush1.bf16.msra.mxu0 %v7149_v34  ;;  %4832 = vmatprep.subr.bf16.mxu1 %v7150_v35  ;;  %v7243_v34 = vld [vmem:[%s8395_s22 + $0xcb0] ss:$8 sps:$4 sm:$0xff]   ;;  %v7248_v35 = vld [vmem:[%s8395_s22 + $0x1c4] ss:$8 sps:$4 sm:$0xff]  }
  0x6f   : > { %5305 = vmatprep.subr.bf16.mxu0 %v7152_v36  ;;  %v7251_v36 = vld [vmem:[%s8395_s22 + $0xcc4] ss:$8 sps:$4 sm:$0xff]  }
  0x71   : > { %4833 = vmatpush1.bf16.msra.mxu1 %v7154_v37  ;;  %v7246_v37 = vld [vmem:[%s8395_s22 + $0x1c0] ss:$8 sps:$4 sm:$0xff]  }
  0x72   : > { %5306 = vmatpush1.bf16.msra.mxu0 %v7155_v38  ;;  %4834 = vmatprep.subr.bf16.mxu1 %v7156_v39  ;;  %v7249_v38 = vld [vmem:[%s8395_s22 + $0xcc0] ss:$8 sps:$4 sm:$0xff]   ;;  %v7254_v39 = vld [vmem:[%s8395_s22 + $0x1d4] ss:$8 sps:$4 sm:$0xff]  }
  0x73   : > { %5307 = vmatprep.subr.bf16.mxu0 %v7158_v40  ;;  %v7257_v40 = vld [vmem:[%s8395_s22 + $0xcd4] ss:$8 sps:$4 sm:$0xff]  }
  0x75   : > { %4835 = vmatpush1.bf16.msra.mxu1 %v7160_v41  ;;  %v7252_v41 = vld [vmem:[%s8395_s22 + $0x1d0] ss:$8 sps:$4 sm:$0xff]  }
  0x76   : > { %5308 = vmatpush1.bf16.msra.mxu0 %v7161_v42  ;;  %4836 = vmatprep.subr.bf16.mxu1 %v7162_v43  ;;  %v7255_v42 = vld [vmem:[%s8395_s22 + $0xcd0] ss:$8 sps:$4 sm:$0xff]   ;;  %v7260_v43 = vld [vmem:[%s8395_s22 + $0x1e4] ss:$8 sps:$4 sm:$0xff]  }
  0x77   : > { %5309 = vmatprep.subr.bf16.mxu0 %v7164_v44  ;;  %v7263_v44 = vld [vmem:[%s8395_s22 + $0xce4] ss:$8 sps:$4 sm:$0xff]  }
  0x79   : > { %4837 = vmatpush1.bf16.msra.mxu1 %v7166_v45  ;;  %v7258_v45 = vld [vmem:[%s8395_s22 + $0x1e0] ss:$8 sps:$4 sm:$0xff]  }
  0x7a   : > { %5310 = vmatpush1.bf16.msra.mxu0 %v7167_v46  ;;  %4849 = vmatprep.subr.bf16.mxu1 %v7173_v47  ;;  %v7261_v46 = vld [vmem:[%s8395_s22 + $0xce0] ss:$8 sps:$4 sm:$0xff]   ;;  %v7266_v47 = vld [vmem:[%s8395_s22 + $0x1f4] ss:$8 sps:$4 sm:$0xff]  }
  0x7b   : > { %5322 = vmatprep.subr.bf16.mxu0 %v7179_v48  ;;  %v7269_v48 = vld [vmem:[%s8395_s22 + $0xcf4] ss:$8 sps:$4 sm:$0xff]  }
  0x7c   : > { %4839 = vmatmul.mubr.bf16.vlgmr.msra.gmra.mrb[0].mxu1 %v7168_v49  ;;  %v7264_v49 = vld [vmem:[%s8395_s22 + $0x1f0] ss:$8 sps:$4 sm:$0xff]  }
  0x7d   : > { %5312 = vmatmul.mubr.bf16.vlgmr.msra.gmra.mrb[0].mxu0 %v7174_v51  ;;  %4850 = vmatpush1.bf16.msra.mxu1 %v7171_v50  ;;  %v7267_v50 = vld [vmem:[%s8395_s22 + $0xcf0] ss:$8 sps:$4 sm:$0xff]   ;;  %v7275_v51 = vld [vmem:[%s8395_s22 + $0x204] ss:$8 sps:$4 sm:$0xff]  }
  0x7e   : > { %5323 = vmatpush1.bf16.msra.mxu0 %v7177_v52  ;;  %4851 = vmatprep.subr.bf16.mxu1 %v7182_v53  ;;  %v7281_v52 = vld [vmem:[%s8395_s22 + $0xd04] ss:$8 sps:$4 sm:$0xff]  }
  0x7f   : > { %5324 = vmatprep.subr.bf16.mxu0 %v7185_v54  ;;  %4881 = vmatprep.mubr.bf16.mxu1 %v7272_v15  ;;  %v7270_v53 = vld [vmem:[%s8397_s23 + $0x8] ss:$172 sps:$4 sm:$0xff]  }
  0x80   : > { %5354 = vmatprep.mubr.bf16.mxu0 %v7278_v18  ;;  %v7273_v54 = vld [vmem:[%s8395_s22 + $0x200] ss:$8 sps:$4 sm:$0xff]   ;;  %v7314_v15 = vld [vmem:[%s8395_s22 + $0x264] ss:$8 sps:$4 sm:$0xff]  }
  0x81   : > { %4852 = vmatpush1.bf16.msra.mxu1 %v7180_v55  ;;  %v7276_v55 = vld [vmem:[%s8397_s23 + $0x60] ss:$172 sps:$4 sm:$0xff]  }
  0x82   : > { %5325 = vmatpush1.bf16.msra.mxu0 %v7183_v56  ;;  %4853 = vmatprep.subr.bf16.mxu1 %v7188_v57  ;;  %v7279_v56 = vld [vmem:[%s8395_s22 + $0xd00] ss:$8 sps:$4 sm:$0xff]   ;;  %v7284_v57 = vld [vmem:[%s8395_s22 + $0x214] ss:$8 sps:$4 sm:$0xff]  }
  0x83   : > { %5326 = vmatprep.subr.bf16.mxu0 %v7191_v58  ;;  %v7287_v58 = vld [vmem:[%s8395_s22 + $0xd14] ss:$8 sps:$4 sm:$0xff]   ;;  %v7315_v18 = vld [vmem:[%s8395_s22 + $0xd60] ss:$8 sps:$4 sm:$0xff]  }
  0x85   : > { %4854 = vmatpush1.bf16.msra.mxu1 %v7186_v59  ;;  %v7282_v59 = vld [vmem:[%s8395_s22 + $0x210] ss:$8 sps:$4 sm:$0xff]  }
  0x86   : > { %5327 = vmatpush1.bf16.msra.mxu0 %v7189_v60  ;;  %4855 = vmatprep.subr.bf16.mxu1 %v7194_v61  ;;  %v7285_v60 = vld [vmem:[%s8395_s22 + $0xd10] ss:$8 sps:$4 sm:$0xff]   ;;  %v7290_v61 = vld [vmem:[%s8395_s22 + $0x224] ss:$8 sps:$4 sm:$0xff]  }
  0x87   : > { %5328 = vmatprep.subr.bf16.mxu0 %v7197_v62  ;;  %v7293_v62 = vld [vmem:[%s8395_s22 + $0xd24] ss:$8 sps:$4 sm:$0xff]  }
  0x89   : > { %4856 = vmatpush1.bf16.msra.mxu1 %v7192_v63  ;;  %v7288_v63 = vld [vmem:[%s8395_s22 + $0x220] ss:$8 sps:$4 sm:$0xff]  }
  0x8a   : > { %5329 = vmatpush1.bf16.msra.mxu0 %v7195_v0  ;;  %4857 = vmatprep.subr.bf16.mxu1 %v7200_v1  ;;  %v7374_v0 = vld [vmem:[%s8397_s23 + $0x14] ss:$172 sps:$4 sm:$0xff]  }
  0x8b   : > { %5330 = vmatprep.subr.bf16.mxu0 %v7203_v2  ;;  %v7291_v1 = vld [vmem:[%s8395_s22 + $0xd20] ss:$8 sps:$4 sm:$0xff]   ;;  %v7296_v2 = vld [vmem:[%s8395_s22 + $0x234] ss:$8 sps:$4 sm:$0xff]  }
  0x8d   : > { %4858 = vmatpush1.bf16.msra.mxu1 %v7198_v3  ;;  %v7299_v3 = vld [vmem:[%s8395_s22 + $0xd34] ss:$8 sps:$4 sm:$0xff]  }
  0x8e   : > { %5331 = vmatpush1.bf16.msra.mxu0 %v7201_v4  ;;  %4859 = vmatprep.subr.bf16.mxu1 %v7206_v5  ;;  %v7380_v4 = vld [vmem:[%s8397_s23 + $0x6c] ss:$172 sps:$4 sm:$0xff]  }
  0x8f   : > { %5332 = vmatprep.subr.bf16.mxu0 %v7209_v6  ;;  %v7294_v5 = vld [vmem:[%s8395_s22 + $0x230] ss:$8 sps:$4 sm:$0xff]  }
  0x90   : > { %v7297_v6 = vld [vmem:[%s8395_s22 + $0xd30] ss:$8 sps:$4 sm:$0xff]  }
  0x91   : > { %4860 = vmatpush1.bf16.msra.mxu1 %v7204_v7  ;;  %v7302_v7 = vld [vmem:[%s8395_s22 + $0x244] ss:$8 sps:$4 sm:$0xff]  }
  0x92   : > { %5333 = vmatpush1.bf16.msra.mxu0 %v7207_v8  ;;  %4861 = vmatprep.subr.bf16.mxu1 %v7212_v9  ;;  %v7305_v8 = vld [vmem:[%s8395_s22 + $0xd44] ss:$8 sps:$4 sm:$0xff]   ;;  %v7300_v9 = vld [vmem:[%s8395_s22 + $0x240] ss:$8 sps:$4 sm:$0xff]  }
  0x93   : > { %5334 = vmatprep.subr.bf16.mxu0 %v7215_v10  ;;  %v7303_v10 = vld [vmem:[%s8395_s22 + $0xd40] ss:$8 sps:$4 sm:$0xff]  }
  0x95   : > { %4862 = vmatpush1.bf16.msra.mxu1 %v7210_v11  ;;  %v7308_v11 = vld [vmem:[%s8395_s22 + $0x254] ss:$8 sps:$4 sm:$0xff]  }
  0x96   : > { %5335 = vmatpush1.bf16.msra.mxu0 %v7213_v12  ;;  %4863 = vmatprep.subr.bf16.mxu1 %v7218_v13  ;;  %v7311_v12 = vld [vmem:[%s8395_s22 + $0xd54] ss:$8 sps:$4 sm:$0xff]   ;;  %v7306_v13 = vld [vmem:[%s8395_s22 + $0x250] ss:$8 sps:$4 sm:$0xff]  }
  0x97   : > { %5336 = vmatprep.subr.bf16.mxu0 %v7221_v14  ;;  %v7309_v14 = vld [vmem:[%s8395_s22 + $0xd50] ss:$8 sps:$4 sm:$0xff]  }
  0x99   : > { %4864 = vmatpush1.bf16.msra.mxu1 %v7216_v16  ;;  %v7317_v16 = vld [vmem:[%s8395_s22 + $0xd64] ss:$8 sps:$4 sm:$0xff]  }
  0x9a   : > { %5337 = vmatpush1.bf16.msra.mxu0 %v7219_v17  ;;  %4865 = vmatprep.subr.bf16.mxu1 %v7224_v19  ;;  %v7312_v17 = vld [vmem:[%s8395_s22 + $0x260] ss:$8 sps:$4 sm:$0xff]   ;;  %v7320_v19 = vld [vmem:[%s8395_s22 + $0x274] ss:$8 sps:$4 sm:$0xff]  }
  0x9b   : > { %5338 = vmatprep.subr.bf16.mxu0 %v7227_v20  ;;  %v7323_v20 = vld [vmem:[%s8395_s22 + $0xd74] ss:$8 sps:$4 sm:$0xff]  }
  0x9d   : > { %4866 = vmatpush1.bf16.msra.mxu1 %v7222_v21  ;;  %v7318_v21 = vld [vmem:[%s8395_s22 + $0x270] ss:$8 sps:$4 sm:$0xff]  }
  0x9e   : > { %5339 = vmatpush1.bf16.msra.mxu0 %v7225_v22  ;;  %4867 = vmatprep.subr.bf16.mxu1 %v7230_v23  ;;  %v7321_v22 = vld [vmem:[%s8395_s22 + $0xd70] ss:$8 sps:$4 sm:$0xff]   ;;  %v7326_v23 = vld [vmem:[%s8395_s22 + $0x284] ss:$8 sps:$4 sm:$0xff]  }
  0x9f   : > { %5340 = vmatprep.subr.bf16.mxu0 %v7233_v24  ;;  %v7329_v24 = vld [vmem:[%s8395_s22 + $0xd84] ss:$8 sps:$4 sm:$0xff]  }
  0xa1   : > { %4868 = vmatpush1.bf16.msra.mxu1 %v7228_v25  ;;  %v7324_v25 = vld [vmem:[%s8395_s22 + $0x280] ss:$8 sps:$4 sm:$0xff]  }
  0xa2   : > { %5341 = vmatpush1.bf16.msra.mxu0 %v7231_v26  ;;  %4869 = vmatprep.subr.bf16.mxu1 %v7236_v27  ;;  %v7327_v26 = vld [vmem:[%s8395_s22 + $0xd80] ss:$8 sps:$4 sm:$0xff]   ;;  %v7332_v27 = vld [vmem:[%s8395_s22 + $0x294] ss:$8 sps:$4 sm:$0xff]  }
  0xa3   : > { %5342 = vmatprep.subr.bf16.mxu0 %v7239_v28  ;;  %v7335_v28 = vld [vmem:[%s8395_s22 + $0xd94] ss:$8 sps:$4 sm:$0xff]  }
  0xa5   : > { %4870 = vmatpush1.bf16.msra.mxu1 %v7234_v29  ;;  %v7330_v29 = vld [vmem:[%s8395_s22 + $0x290] ss:$8 sps:$4 sm:$0xff]  }
  0xa6   : > { %5343 = vmatpush1.bf16.msra.mxu0 %v7237_v30  ;;  %4871 = vmatprep.subr.bf16.mxu1 %v7242_v31  ;;  %v7333_v30 = vld [vmem:[%s8395_s22 + $0xd90] ss:$8 sps:$4 sm:$0xff]   ;;  %v7338_v31 = vld [vmem:[%s8395_s22 + $0x2a4] ss:$8 sps:$4 sm:$0xff]  }
  0xa7   : > { %5344 = vmatprep.subr.bf16.mxu0 %v7245_v32  ;;  %v7341_v32 = vld [vmem:[%s8395_s22 + $0xda4] ss:$8 sps:$4 sm:$0xff]  }
  0xa9   : > { %4872 = vmatpush1.bf16.msra.mxu1 %v7240_v33  ;;  %v7336_v33 = vld [vmem:[%s8395_s22 + $0x2a0] ss:$8 sps:$4 sm:$0xff]  }
  0xaa   : > { %5345 = vmatpush1.bf16.msra.mxu0 %v7243_v34  ;;  %4873 = vmatprep.subr.bf16.mxu1 %v7248_v35  ;;  %v7339_v34 = vld [vmem:[%s8395_s22 + $0xda0] ss:$8 sps:$4 sm:$0xff]   ;;  %v7344_v35 = vld [vmem:[%s8395_s22 + $0x2b4] ss:$8 sps:$4 sm:$0xff]  }
  0xab   : > { %5346 = vmatprep.subr.bf16.mxu0 %v7251_v36  ;;  %v7347_v36 = vld [vmem:[%s8395_s22 + $0xdb4] ss:$8 sps:$4 sm:$0xff]  }
  0xad   : > { %4874 = vmatpush1.bf16.msra.mxu1 %v7246_v37  ;;  %v7342_v37 = vld [vmem:[%s8395_s22 + $0x2b0] ss:$8 sps:$4 sm:$0xff]  }
  0xae   : > { %5347 = vmatpush1.bf16.msra.mxu0 %v7249_v38  ;;  %4875 = vmatprep.subr.bf16.mxu1 %v7254_v39  ;;  %v7345_v38 = vld [vmem:[%s8395_s22 + $0xdb0] ss:$8 sps:$4 sm:$0xff]   ;;  %v7350_v39 = vld [vmem:[%s8395_s22 + $0x2c4] ss:$8 sps:$4 sm:$0xff]  }
  0xaf   : > { %5348 = vmatprep.subr.bf16.mxu0 %v7257_v40  ;;  %v7353_v40 = vld [vmem:[%s8395_s22 + $0xdc4] ss:$8 sps:$4 sm:$0xff]  }
  0xb1   : > { %4876 = vmatpush1.bf16.msra.mxu1 %v7252_v41  ;;  %v7348_v41 = vld [vmem:[%s8395_s22 + $0x2c0] ss:$8 sps:$4 sm:$0xff]  }
  0xb2   : > { %5349 = vmatpush1.bf16.msra.mxu0 %v7255_v42  ;;  %4877 = vmatprep.subr.bf16.mxu1 %v7260_v43  ;;  %v7351_v42 = vld [vmem:[%s8395_s22 + $0xdc0] ss:$8 sps:$4 sm:$0xff]   ;;  %v7356_v43 = vld [vmem:[%s8395_s22 + $0x2d4] ss:$8 sps:$4 sm:$0xff]  }
  0xb3   : > { %5350 = vmatprep.subr.bf16.mxu0 %v7263_v44  ;;  %v7359_v44 = vld [vmem:[%s8395_s22 + $0xdd4] ss:$8 sps:$4 sm:$0xff]  }
  0xb5   : > { %4878 = vmatpush1.bf16.msra.mxu1 %v7258_v45  ;;  %v7354_v45 = vld [vmem:[%s8395_s22 + $0x2d0] ss:$8 sps:$4 sm:$0xff]  }
  0xb6   : > { %5351 = vmatpush1.bf16.msra.mxu0 %v7261_v46  ;;  %4879 = vmatprep.subr.bf16.mxu1 %v7266_v47  ;;  %v7357_v46 = vld [vmem:[%s8395_s22 + $0xdd0] ss:$8 sps:$4 sm:$0xff]   ;;  %v7362_v47 = vld [vmem:[%s8395_s22 + $0x2e4] ss:$8 sps:$4 sm:$0xff]  }
  0xb7   : > { %5352 = vmatprep.subr.bf16.mxu0 %v7269_v48  ;;  %v7365_v48 = vld [vmem:[%s8395_s22 + $0xde4] ss:$8 sps:$4 sm:$0xff]  }
  0xb9   : > { %4880 = vmatpush1.bf16.msra.mxu1 %v7264_v49  ;;  %v7360_v49 = vld [vmem:[%s8395_s22 + $0x2e0] ss:$8 sps:$4 sm:$0xff]  }
  0xba   : > { %5353 = vmatpush1.bf16.msra.mxu0 %v7267_v50  ;;  %4892 = vmatprep.subr.bf16.mxu1 %v7275_v51  ;;  %v7363_v50 = vld [vmem:[%s8395_s22 + $0xde0] ss:$8 sps:$4 sm:$0xff]   ;;  %v7368_v51 = vld [vmem:[%s8395_s22 + $0x2f4] ss:$8 sps:$4 sm:$0xff]  }
  0xbb   : > { %5365 = vmatprep.subr.bf16.mxu0 %v7281_v52  ;;  %v7371_v52 = vld [vmem:[%s8395_s22 + $0xdf4] ss:$8 sps:$4 sm:$0xff]  }
  0xbc   : > { %4882 = vmatmul.mubr.bf16.vlgmr.msra.gmra.mrb[0].mxu1 %v7270_v53  ;;  %v7366_v53 = vld [vmem:[%s8395_s22 + $0x2f0] ss:$8 sps:$4 sm:$0xff]  }
  0xbd   : > { %5355 = vmatmul.mubr.bf16.vlgmr.msra.gmra.mrb[0].mxu0 %v7276_v55  ;;  %4893 = vmatpush1.bf16.msra.mxu1 %v7273_v54  ;;  %v7369_v54 = vld [vmem:[%s8395_s22 + $0xdf0] ss:$8 sps:$4 sm:$0xff]   ;;  %v7377_v55 = vld [vmem:[%s8395_s22 + $0x304] ss:$8 sps:$4 sm:$0xff]  }
  0xbe   : > { %5366 = vmatpush1.bf16.msra.mxu0 %v7279_v56  ;;  %4894 = vmatprep.subr.bf16.mxu1 %v7284_v57  ;;  %v7383_v56 = vld [vmem:[%s8395_s22 + $0xe04] ss:$8 sps:$4 sm:$0xff]   ;;  %v7372_v57 = vld [vmem:[%s8397_s23 + $0x10] ss:$172 sps:$4 sm:$0xff]  }
  0xbf   : > { %5367 = vmatprep.subr.bf16.mxu0 %v7287_v58  ;;  %4924 = vmatprep.mubr.bf16.mxu1 %v7374_v0  ;;  %v7375_v58 = vld [vmem:[%s8395_s22 + $0x300] ss:$8 sps:$4 sm:$0xff]  }
  0xc0   : > { %5397 = vmatprep.mubr.bf16.mxu0 %v7380_v4  ;;  %v7482_v0 = vld [vmem:[%s8397_s23 + $0x74] ss:$172 sps:$4 sm:$0xff]  }
  0xc1   : > { %4895 = vmatpush1.bf16.msra.mxu1 %v7282_v59  ;;  %v7378_v59 = vld [vmem:[%s8397_s23 + $0x68] ss:$172 sps:$4 sm:$0xff]  }
  0xc2   : > { %5368 = vmatpush1.bf16.msra.mxu0 %v7285_v60  ;;  %4896 = vmatprep.subr.bf16.mxu1 %v7290_v61  ;;  %v7381_v60 = vld [vmem:[%s8395_s22 + $0xe00] ss:$8 sps:$4 sm:$0xff]   ;;  %v7386_v61 = vld [vmem:[%s8395_s22 + $0x314] ss:$8 sps:$4 sm:$0xff]   ;;  %v7395_v4 = vld [vmem:[%s8395_s22 + $0xe24] ss:$8 sps:$4 sm:$0xff]  }
  0xc3   : > { %5369 = vmatprep.subr.bf16.mxu0 %v7293_v62  ;;  %v7389_v62 = vld [vmem:[%s8395_s22 + $0xe14] ss:$8 sps:$4 sm:$0xff]  }
  0xc5   : > { %4897 = vmatpush1.bf16.msra.mxu1 %v7288_v63  ;;  %v7476_v63 = vld [vmem:[%s8397_s23 + $0x1c] ss:$172 sps:$4 sm:$0xff]  }
  0xc6   : > { %5370 = vmatpush1.bf16.msra.mxu0 %v7291_v1  ;;  %4898 = vmatprep.subr.bf16.mxu1 %v7296_v2  ;;  %v7384_v1 = vld [vmem:[%s8395_s22 + $0x310] ss:$8 sps:$4 sm:$0xff]  }
  0xc7   : > { %5371 = vmatprep.subr.bf16.mxu0 %v7299_v3  ;;  %v7387_v2 = vld [vmem:[%s8395_s22 + $0xe10] ss:$8 sps:$4 sm:$0xff]   ;;  %v7392_v3 = vld [vmem:[%s8395_s22 + $0x324] ss:$8 sps:$4 sm:$0xff]  }
  0xc9   : > { %4899 = vmatpush1.bf16.msra.mxu1 %v7294_v5  ;;  %v7390_v5 = vld [vmem:[%s8395_s22 + $0x320] ss:$8 sps:$4 sm:$0xff]  }
  0xca   : > { %5372 = vmatpush1.bf16.msra.mxu0 %v7297_v6  ;;  %4900 = vmatprep.subr.bf16.mxu1 %v7302_v7  ;;  %v7393_v6 = vld [vmem:[%s8395_s22 + $0xe20] ss:$8 sps:$4 sm:$0xff]   ;;  %v7398_v7 = vld [vmem:[%s8395_s22 + $0x334] ss:$8 sps:$4 sm:$0xff]  }
  0xcb   : > { %5373 = vmatprep.subr.bf16.mxu0 %v7305_v8  ;;  %v7401_v8 = vld [vmem:[%s8395_s22 + $0xe34] ss:$8 sps:$4 sm:$0xff]  }
  0xcd   : > { %4901 = vmatpush1.bf16.msra.mxu1 %v7300_v9  ;;  %v7396_v9 = vld [vmem:[%s8395_s22 + $0x330] ss:$8 sps:$4 sm:$0xff]  }
  0xce   : > { %5374 = vmatpush1.bf16.msra.mxu0 %v7303_v10  ;;  %4902 = vmatprep.subr.bf16.mxu1 %v7308_v11  ;;  %v7399_v10 = vld [vmem:[%s8395_s22 + $0xe30] ss:$8 sps:$4 sm:$0xff]   ;;  %v7404_v11 = vld [vmem:[%s8395_s22 + $0x344] ss:$8 sps:$4 sm:$0xff]  }
  0xcf   : > { %5375 = vmatprep.subr.bf16.mxu0 %v7311_v12  ;;  %v7407_v12 = vld [vmem:[%s8395_s22 + $0xe44] ss:$8 sps:$4 sm:$0xff]  }
  0xd1   : > { %4903 = vmatpush1.bf16.msra.mxu1 %v7306_v13  ;;  %v7402_v13 = vld [vmem:[%s8395_s22 + $0x340] ss:$8 sps:$4 sm:$0xff]  }
  0xd2   : > { %5376 = vmatpush1.bf16.msra.mxu0 %v7309_v14  ;;  %4904 = vmatprep.subr.bf16.mxu1 %v7314_v15  ;;  %v7405_v14 = vld [vmem:[%s8395_s22 + $0xe40] ss:$8 sps:$4 sm:$0xff]   ;;  %v7410_v15 = vld [vmem:[%s8395_s22 + $0x354] ss:$8 sps:$4 sm:$0xff]  }
  0xd3   : > { %5377 = vmatprep.subr.bf16.mxu0 %v7317_v16  ;;  %v7413_v16 = vld [vmem:[%s8395_s22 + $0xe54] ss:$8 sps:$4 sm:$0xff]  }
  0xd5   : > { %4905 = vmatpush1.bf16.msra.mxu1 %v7312_v17  ;;  %v7408_v17 = vld [vmem:[%s8395_s22 + $0x350] ss:$8 sps:$4 sm:$0xff]  }
  0xd6   : > { %5378 = vmatpush1.bf16.msra.mxu0 %v7315_v18  ;;  %4906 = vmatprep.subr.bf16.mxu1 %v7320_v19  ;;  %v7411_v18 = vld [vmem:[%s8395_s22 + $0xe50] ss:$8 sps:$4 sm:$0xff]   ;;  %v7416_v19 = vld [vmem:[%s8395_s22 + $0x364] ss:$8 sps:$4 sm:$0xff]  }
  0xd7   : > { %5379 = vmatprep.subr.bf16.mxu0 %v7323_v20  ;;  %v7419_v20 = vld [vmem:[%s8395_s22 + $0xe64] ss:$8 sps:$4 sm:$0xff]  }
  0xd9   : > { %4907 = vmatpush1.bf16.msra.mxu1 %v7318_v21  ;;  %v7414_v21 = vld [vmem:[%s8395_s22 + $0x360] ss:$8 sps:$4 sm:$0xff]  }
  0xda   : > { %5380 = vmatpush1.bf16.msra.mxu0 %v7321_v22  ;;  %4908 = vmatprep.subr.bf16.mxu1 %v7326_v23  ;;  %v7417_v22 = vld [vmem:[%s8395_s22 + $0xe60] ss:$8 sps:$4 sm:$0xff]   ;;  %v7422_v23 = vld [vmem:[%s8395_s22 + $0x374] ss:$8 sps:$4 sm:$0xff]  }
  0xdb   : > { %5381 = vmatprep.subr.bf16.mxu0 %v7329_v24  ;;  %v7425_v24 = vld [vmem:[%s8395_s22 + $0xe74] ss:$8 sps:$4 sm:$0xff]  }
  0xdd   : > { %4909 = vmatpush1.bf16.msra.mxu1 %v7324_v25  ;;  %v7420_v25 = vld [vmem:[%s8395_s22 + $0x370] ss:$8 sps:$4 sm:$0xff]  }
  0xde   : > { %5382 = vmatpush1.bf16.msra.mxu0 %v7327_v26  ;;  %4910 = vmatprep.subr.bf16.mxu1 %v7332_v27  ;;  %v7423_v26 = vld [vmem:[%s8395_s22 + $0xe70] ss:$8 sps:$4 sm:$0xff]   ;;  %v7428_v27 = vld [vmem:[%s8395_s22 + $0x384] ss:$8 sps:$4 sm:$0xff]  }
  0xdf   : > { %5383 = vmatprep.subr.bf16.mxu0 %v7335_v28  ;;  %v7431_v28 = vld [vmem:[%s8395_s22 + $0xe84] ss:$8 sps:$4 sm:$0xff]  }
  0xe1   : > { %4911 = vmatpush1.bf16.msra.mxu1 %v7330_v29  ;;  %v7426_v29 = vld [vmem:[%s8395_s22 + $0x380] ss:$8 sps:$4 sm:$0xff]  }
  0xe2   : > { %5384 = vmatpush1.bf16.msra.mxu0 %v7333_v30  ;;  %4912 = vmatprep.subr.bf16.mxu1 %v7338_v31  ;;  %v7429_v30 = vld [vmem:[%s8395_s22 + $0xe80] ss:$8 sps:$4 sm:$0xff]   ;;  %v7434_v31 = vld [vmem:[%s8395_s22 + $0x394] ss:$8 sps:$4 sm:$0xff]  }
  0xe3   : > { %5385 = vmatprep.subr.bf16.mxu0 %v7341_v32  ;;  %v7437_v32 = vld [vmem:[%s8395_s22 + $0xe94] ss:$8 sps:$4 sm:$0xff]  }
  0xe5   : > { %4913 = vmatpush1.bf16.msra.mxu1 %v7336_v33  ;;  %v7432_v33 = vld [vmem:[%s8395_s22 + $0x390] ss:$8 sps:$4 sm:$0xff]  }
  0xe6   : > { %5386 = vmatpush1.bf16.msra.mxu0 %v7339_v34  ;;  %4914 = vmatprep.subr.bf16.mxu1 %v7344_v35  ;;  %v7435_v34 = vld [vmem:[%s8395_s22 + $0xe90] ss:$8 sps:$4 sm:$0xff]   ;;  %v7440_v35 = vld [vmem:[%s8395_s22 + $0x3a4] ss:$8 sps:$4 sm:$0xff]  }
  0xe7   : > { %5387 = vmatprep.subr.bf16.mxu0 %v7347_v36  ;;  %v7443_v36 = vld [vmem:[%s8395_s22 + $0xea4] ss:$8 sps:$4 sm:$0xff]  }
  0xe9   : > { %4915 = vmatpush1.bf16.msra.mxu1 %v7342_v37  ;;  %v7438_v37 = vld [vmem:[%s8395_s22 + $0x3a0] ss:$8 sps:$4 sm:$0xff]  }
  0xea   : > { %5388 = vmatpush1.bf16.msra.mxu0 %v7345_v38  ;;  %4916 = vmatprep.subr.bf16.mxu1 %v7350_v39  ;;  %v7441_v38 = vld [vmem:[%s8395_s22 + $0xea0] ss:$8 sps:$4 sm:$0xff]   ;;  %v7446_v39 = vld [vmem:[%s8395_s22 + $0x3b4] ss:$8 sps:$4 sm:$0xff]  }
  0xeb   : > { %5389 = vmatprep.subr.bf16.mxu0 %v7353_v40  ;;  %v7449_v40 = vld [vmem:[%s8395_s22 + $0xeb4] ss:$8 sps:$4 sm:$0xff]  }
  0xed   : > { %4917 = vmatpush1.bf16.msra.mxu1 %v7348_v41  ;;  %v7444_v41 = vld [vmem:[%s8395_s22 + $0x3b0] ss:$8 sps:$4 sm:$0xff]  }
  0xee   : > { %5390 = vmatpush1.bf16.msra.mxu0 %v7351_v42  ;;  %4918 = vmatprep.subr.bf16.mxu1 %v7356_v43  ;;  %v7447_v42 = vld [vmem:[%s8395_s22 + $0xeb0] ss:$8 sps:$4 sm:$0xff]   ;;  %v7452_v43 = vld [vmem:[%s8395_s22 + $0x3c4] ss:$8 sps:$4 sm:$0xff]  }
  0xef   : > { %5391 = vmatprep.subr.bf16.mxu0 %v7359_v44  ;;  %v7455_v44 = vld [vmem:[%s8395_s22 + $0xec4] ss:$8 sps:$4 sm:$0xff]  }
  0xf1   : > { %4919 = vmatpush1.bf16.msra.mxu1 %v7354_v45  ;;  %v7450_v45 = vld [vmem:[%s8395_s22 + $0x3c0] ss:$8 sps:$4 sm:$0xff]  }
  0xf2   : > { %5392 = vmatpush1.bf16.msra.mxu0 %v7357_v46  ;;  %4920 = vmatprep.subr.bf16.mxu1 %v7362_v47  ;;  %v7453_v46 = vld [vmem:[%s8395_s22 + $0xec0] ss:$8 sps:$4 sm:$0xff]   ;;  %v7458_v47 = vld [vmem:[%s8395_s22 + $0x3d4] ss:$8 sps:$4 sm:$0xff]  }
  0xf3   : > { %5393 = vmatprep.subr.bf16.mxu0 %v7365_v48  ;;  %v7461_v48 = vld [vmem:[%s8395_s22 + $0xed4] ss:$8 sps:$4 sm:$0xff]  }
  0xf5   : > { %4921 = vmatpush1.bf16.msra.mxu1 %v7360_v49  ;;  %v7456_v49 = vld [vmem:[%s8395_s22 + $0x3d0] ss:$8 sps:$4 sm:$0xff]  }
  0xf6   : > { %5394 = vmatpush1.bf16.msra.mxu0 %v7363_v50  ;;  %4922 = vmatprep.subr.bf16.mxu1 %v7368_v51  ;;  %v7459_v50 = vld [vmem:[%s8395_s22 + $0xed0] ss:$8 sps:$4 sm:$0xff]   ;;  %v7464_v51 = vld [vmem:[%s8395_s22 + $0x3e4] ss:$8 sps:$4 sm:$0xff]  }
  0xf7   : > { %5395 = vmatprep.subr.bf16.mxu0 %v7371_v52  ;;  %v7467_v52 = vld [vmem:[%s8395_s22 + $0xee4] ss:$8 sps:$4 sm:$0xff]  }
  0xf9   : > { %4923 = vmatpush1.bf16.msra.mxu1 %v7366_v53  ;;  %v7462_v53 = vld [vmem:[%s8395_s22 + $0x3e0] ss:$8 sps:$4 sm:$0xff]  }
  0xfa   : > { %5396 = vmatpush1.bf16.msra.mxu0 %v7369_v54  ;;  %4935 = vmatprep.subr.bf16.mxu1 %v7377_v55  ;;  %v7465_v54 = vld [vmem:[%s8395_s22 + $0xee0] ss:$8 sps:$4 sm:$0xff]   ;;  %v7470_v55 = vld [vmem:[%s8395_s22 + $0x3f4] ss:$8 sps:$4 sm:$0xff]  }
  0xfb   : > { %5408 = vmatprep.subr.bf16.mxu0 %v7383_v56  ;;  %v7473_v56 = vld [vmem:[%s8395_s22 + $0xef4] ss:$8 sps:$4 sm:$0xff]  }
  0xfc   : > { %4925 = vmatmul.mubr.bf16.vlgmr.msra.gmra.mrb[0].mxu1 %v7372_v57  ;;  %v7468_v57 = vld [vmem:[%s8395_s22 + $0x3f0] ss:$8 sps:$4 sm:$0xff]  }
  0xfd   : > { %5398 = vmatmul.mubr.bf16.vlgmr.msra.gmra.mrb[0].mxu0 %v7378_v59  ;;  %4936 = vmatpush1.bf16.msra.mxu1 %v7375_v58  ;;  %v7471_v58 = vld [vmem:[%s8395_s22 + $0xef0] ss:$8 sps:$4 sm:$0xff]   ;;  %v7479_v59 = vld [vmem:[%s8395_s22 + $0x404] ss:$8 sps:$4 sm:$0xff]  }
  0xfe   : > { %5409 = vmatpush1.bf16.msra.mxu0 %v7381_v60  ;;  %4937 = vmatprep.subr.bf16.mxu1 %v7386_v61  ;;  %v7485_v60 = vld [vmem:[%s8395_s22 + $0xf04] ss:$8 sps:$4 sm:$0xff]  }
  0xff   : > { %5410 = vmatprep.subr.bf16.mxu0 %v7389_v62  ;;  %4967 = vmatprep.mubr.bf16.mxu1 %v7476_v63  ;;  %v7474_v61 = vld [vmem:[%s8397_s23 + $0x18] ss:$172 sps:$4 sm:$0xff]   ;;  %v7477_v62 = vld [vmem:[%s8395_s22 + $0x400] ss:$8 sps:$4 sm:$0xff]  }
 0x100   : > { %5440 = vmatprep.mubr.bf16.mxu0 %v7482_v0  ;;  %v7480_v63 = vld [vmem:[%s8397_s23 + $0x70] ss:$172 sps:$4 sm:$0xff]  }
 0x101   : > { %4938 = vmatpush1.bf16.msra.mxu1 %v7384_v1  ;;  %v7483_v0 = vld [vmem:[%s8395_s22 + $0xf00] ss:$8 sps:$4 sm:$0xff]   ;;  %v7488_v1 = vld [vmem:[%s8395_s22 + $0x414] ss:$8 sps:$4 sm:$0xff]  }
 0x102   : > { %5411 = vmatpush1.bf16.msra.mxu0 %v7387_v2  ;;  %4939 = vmatprep.subr.bf16.mxu1 %v7392_v3  ;;  %v7491_v2 = vld [vmem:[%s8395_s22 + $0xf14] ss:$8 sps:$4 sm:$0xff]  }
 0x103   : > { %5412 = vmatprep.subr.bf16.mxu0 %v7395_v4  ;;  %v7578_v3 = vld [vmem:[%s8397_s23 + $0x24] ss:$172 sps:$4 sm:$0xff]   ;;  %v7584_v4 = vld [vmem:[%s8397_s23 + $0x7c] ss:$172 sps:$4 sm:$0xff]  }
 0x105   : > { %4940 = vmatpush1.bf16.msra.mxu1 %v7390_v5  ;;  %v7486_v5 = vld [vmem:[%s8395_s22 + $0x410] ss:$8 sps:$4 sm:$0xff]  }
 0x106   : > { %5413 = vmatpush1.bf16.msra.mxu0 %v7393_v6  ;;  %4941 = vmatprep.subr.bf16.mxu1 %v7398_v7  ;;  %v7489_v6 = vld [vmem:[%s8395_s22 + $0xf10] ss:$8 sps:$4 sm:$0xff]   ;;  %v7494_v7 = vld [vmem:[%s8395_s22 + $0x424] ss:$8 sps:$4 sm:$0xff]  }
 0x107   : > { %5414 = vmatprep.subr.bf16.mxu0 %v7401_v8  ;;  %v7497_v8 = vld [vmem:[%s8395_s22 + $0xf24] ss:$8 sps:$4 sm:$0xff]  }
 0x109   : > { %4942 = vmatpush1.bf16.msra.mxu1 %v7396_v9  ;;  %v7492_v9 = vld [vmem:[%s8395_s22 + $0x420] ss:$8 sps:$4 sm:$0xff]  }
 0x10a   : > { %5415 = vmatpush1.bf16.msra.mxu0 %v7399_v10  ;;  %4943 = vmatprep.subr.bf16.mxu1 %v7404_v11  ;;  %v7495_v10 = vld [vmem:[%s8395_s22 + $0xf20] ss:$8 sps:$4 sm:$0xff]   ;;  %v7500_v11 = vld [vmem:[%s8395_s22 + $0x434] ss:$8 sps:$4 sm:$0xff]  }
 0x10b   : > { %5416 = vmatprep.subr.bf16.mxu0 %v7407_v12  ;;  %v7503_v12 = vld [vmem:[%s8395_s22 + $0xf34] ss:$8 sps:$4 sm:$0xff]  }
 0x10d   : > { %4944 = vmatpush1.bf16.msra.mxu1 %v7402_v13  ;;  %v7498_v13 = vld [vmem:[%s8395_s22 + $0x430] ss:$8 sps:$4 sm:$0xff]  }
 0x10e   : > { %5417 = vmatpush1.bf16.msra.mxu0 %v7405_v14  ;;  %4945 = vmatprep.subr.bf16.mxu1 %v7410_v15  ;;  %v7501_v14 = vld [vmem:[%s8395_s22 + $0xf30] ss:$8 sps:$4 sm:$0xff]   ;;  %v7506_v15 = vld [vmem:[%s8395_s22 + $0x444] ss:$8 sps:$4 sm:$0xff]  }
 0x10f   : > { %5418 = vmatprep.subr.bf16.mxu0 %v7413_v16  ;;  %v7509_v16 = vld [vmem:[%s8395_s22 + $0xf44] ss:$8 sps:$4 sm:$0xff]  }
 0x111   : > { %4946 = vmatpush1.bf16.msra.mxu1 %v7408_v17  ;;  %v7504_v17 = vld [vmem:[%s8395_s22 + $0x440] ss:$8 sps:$4 sm:$0xff]  }
 0x112   : > { %5419 = vmatpush1.bf16.msra.mxu0 %v7411_v18  ;;  %4947 = vmatprep.subr.bf16.mxu1 %v7416_v19  ;;  %v7507_v18 = vld [vmem:[%s8395_s22 + $0xf40] ss:$8 sps:$4 sm:$0xff]   ;;  %v7512_v19 = vld [vmem:[%s8395_s22 + $0x454] ss:$8 sps:$4 sm:$0xff]  }
 0x113   : > { %5420 = vmatprep.subr.bf16.mxu0 %v7419_v20  ;;  %v7515_v20 = vld [vmem:[%s8395_s22 + $0xf54] ss:$8 sps:$4 sm:$0xff]  }
 0x115   : > { %4948 = vmatpush1.bf16.msra.mxu1 %v7414_v21  ;;  %v7510_v21 = vld [vmem:[%s8395_s22 + $0x450] ss:$8 sps:$4 sm:$0xff]  }
 0x116   : > { %5421 = vmatpush1.bf16.msra.mxu0 %v7417_v22  ;;  %4949 = vmatprep.subr.bf16.mxu1 %v7422_v23  ;;  %v7513_v22 = vld [vmem:[%s8395_s22 + $0xf50] ss:$8 sps:$4 sm:$0xff]   ;;  %v7518_v23 = vld [vmem:[%s8395_s22 + $0x464] ss:$8 sps:$4 sm:$0xff]  }
 0x117   : > { %5422 = vmatprep.subr.bf16.mxu0 %v7425_v24  ;;  %v7521_v24 = vld [vmem:[%s8395_s22 + $0xf64] ss:$8 sps:$4 sm:$0xff]  }
 0x119   : > { %4950 = vmatpush1.bf16.msra.mxu1 %v7420_v25  ;;  %v7516_v25 = vld [vmem:[%s8395_s22 + $0x460] ss:$8 sps:$4 sm:$0xff]  }
 0x11a   : > { %5423 = vmatpush1.bf16.msra.mxu0 %v7423_v26  ;;  %4951 = vmatprep.subr.bf16.mxu1 %v7428_v27  ;;  %v7519_v26 = vld [vmem:[%s8395_s22 + $0xf60] ss:$8 sps:$4 sm:$0xff]   ;;  %v7524_v27 = vld [vmem:[%s8395_s22 + $0x474] ss:$8 sps:$4 sm:$0xff]  }
 0x11b   : > { %5424 = vmatprep.subr.bf16.mxu0 %v7431_v28  ;;  %v7527_v28 = vld [vmem:[%s8395_s22 + $0xf74] ss:$8 sps:$4 sm:$0xff]  }
 0x11d   : > { %4952 = vmatpush1.bf16.msra.mxu1 %v7426_v29  ;;  %v7522_v29 = vld [vmem:[%s8395_s22 + $0x470] ss:$8 sps:$4 sm:$0xff]  }
 0x11e   : > { %5425 = vmatpush1.bf16.msra.mxu0 %v7429_v30  ;;  %4953 = vmatprep.subr.bf16.mxu1 %v7434_v31  ;;  %v7525_v30 = vld [vmem:[%s8395_s22 + $0xf70] ss:$8 sps:$4 sm:$0xff]   ;;  %v7530_v31 = vld [vmem:[%s8395_s22 + $0x484] ss:$8 sps:$4 sm:$0xff]  }
 0x11f   : > { %5426 = vmatprep.subr.bf16.mxu0 %v7437_v32  ;;  %v7533_v32 = vld [vmem:[%s8395_s22 + $0xf84] ss:$8 sps:$4 sm:$0xff]  }
 0x121   : > { %4954 = vmatpush1.bf16.msra.mxu1 %v7432_v33  ;;  %v7528_v33 = vld [vmem:[%s8395_s22 + $0x480] ss:$8 sps:$4 sm:$0xff]  }
 0x122   : > { %5427 = vmatpush1.bf16.msra.mxu0 %v7435_v34  ;;  %4955 = vmatprep.subr.bf16.mxu1 %v7440_v35  ;;  %v7531_v34 = vld [vmem:[%s8395_s22 + $0xf80] ss:$8 sps:$4 sm:$0xff]   ;;  %v7536_v35 = vld [vmem:[%s8395_s22 + $0x494] ss:$8 sps:$4 sm:$0xff]  }
 0x123   : > { %5428 = vmatprep.subr.bf16.mxu0 %v7443_v36  ;;  %v7539_v36 = vld [vmem:[%s8395_s22 + $0xf94] ss:$8 sps:$4 sm:$0xff]  }
 0x125   : > { %4956 = vmatpush1.bf16.msra.mxu1 %v7438_v37  ;;  %v7534_v37 = vld [vmem:[%s8395_s22 + $0x490] ss:$8 sps:$4 sm:$0xff]  }
 0x126   : > { %5429 = vmatpush1.bf16.msra.mxu0 %v7441_v38  ;;  %4957 = vmatprep.subr.bf16.mxu1 %v7446_v39  ;;  %v7537_v38 = vld [vmem:[%s8395_s22 + $0xf90] ss:$8 sps:$4 sm:$0xff]   ;;  %v7542_v39 = vld [vmem:[%s8395_s22 + $0x4a4] ss:$8 sps:$4 sm:$0xff]  }
 0x127   : > { %5430 = vmatprep.subr.bf16.mxu0 %v7449_v40  ;;  %v7545_v40 = vld [vmem:[%s8395_s22 + $0xfa4] ss:$8 sps:$4 sm:$0xff]  }
 0x129   : > { %4958 = vmatpush1.bf16.msra.mxu1 %v7444_v41  ;;  %v7540_v41 = vld [vmem:[%s8395_s22 + $0x4a0] ss:$8 sps:$4 sm:$0xff]  }
 0x12a   : > { %5431 = vmatpush1.bf16.msra.mxu0 %v7447_v42  ;;  %4959 = vmatprep.subr.bf16.mxu1 %v7452_v43  ;;  %v7543_v42 = vld [vmem:[%s8395_s22 + $0xfa0] ss:$8 sps:$4 sm:$0xff]   ;;  %v7548_v43 = vld [vmem:[%s8395_s22 + $0x4b4] ss:$8 sps:$4 sm:$0xff]  }
 0x12b   : > { %5432 = vmatprep.subr.bf16.mxu0 %v7455_v44  ;;  %v7551_v44 = vld [vmem:[%s8395_s22 + $0xfb4] ss:$8 sps:$4 sm:$0xff]  }
 0x12d   : > { %4960 = vmatpush1.bf16.msra.mxu1 %v7450_v45  ;;  %v7546_v45 = vld [vmem:[%s8395_s22 + $0x4b0] ss:$8 sps:$4 sm:$0xff]  }
 0x12e   : > { %5433 = vmatpush1.bf16.msra.mxu0 %v7453_v46  ;;  %4961 = vmatprep.subr.bf16.mxu1 %v7458_v47  ;;  %v7549_v46 = vld [vmem:[%s8395_s22 + $0xfb0] ss:$8 sps:$4 sm:$0xff]   ;;  %v7554_v47 = vld [vmem:[%s8395_s22 + $0x4c4] ss:$8 sps:$4 sm:$0xff]  }
 0x12f   : > { %5434 = vmatprep.subr.bf16.mxu0 %v7461_v48  ;;  %v7557_v48 = vld [vmem:[%s8395_s22 + $0xfc4] ss:$8 sps:$4 sm:$0xff]  }
 0x131   : > { %4962 = vmatpush1.bf16.msra.mxu1 %v7456_v49  ;;  %v7552_v49 = vld [vmem:[%s8395_s22 + $0x4c0] ss:$8 sps:$4 sm:$0xff]  }
 0x132   : > { %5435 = vmatpush1.bf16.msra.mxu0 %v7459_v50  ;;  %4963 = vmatprep.subr.bf16.mxu1 %v7464_v51  ;;  %v7555_v50 = vld [vmem:[%s8395_s22 + $0xfc0] ss:$8 sps:$4 sm:$0xff]   ;;  %v7560_v51 = vld [vmem:[%s8395_s22 + $0x4d4] ss:$8 sps:$4 sm:$0xff]  }
 0x133   : > { %5436 = vmatprep.subr.bf16.mxu0 %v7467_v52  ;;  %v7563_v52 = vld [vmem:[%s8395_s22 + $0xfd4] ss:$8 sps:$4 sm:$0xff]  }
 0x135   : > { %4964 = vmatpush1.bf16.msra.mxu1 %v7462_v53  ;;  %v7558_v53 = vld [vmem:[%s8395_s22 + $0x4d0] ss:$8 sps:$4 sm:$0xff]  }
 0x136   : > { %5437 = vmatpush1.bf16.msra.mxu0 %v7465_v54  ;;  %4965 = vmatprep.subr.bf16.mxu1 %v7470_v55  ;;  %v7561_v54 = vld [vmem:[%s8395_s22 + $0xfd0] ss:$8 sps:$4 sm:$0xff]   ;;  %v7566_v55 = vld [vmem:[%s8395_s22 + $0x4e4] ss:$8 sps:$4 sm:$0xff]  }
 0x137   : > { %5438 = vmatprep.subr.bf16.mxu0 %v7473_v56  ;;  %v7569_v56 = vld [vmem:[%s8395_s22 + $0xfe4] ss:$8 sps:$4 sm:$0xff]  }
 0x139   : > { %4966 = vmatpush1.bf16.msra.mxu1 %v7468_v57  ;;  %v7564_v57 = vld [vmem:[%s8395_s22 + $0x4e0] ss:$8 sps:$4 sm:$0xff]  }
 0x13a   : > { %5439 = vmatpush1.bf16.msra.mxu0 %v7471_v58  ;;  %4978 = vmatprep.subr.bf16.mxu1 %v7479_v59  ;;  %v7567_v58 = vld [vmem:[%s8395_s22 + $0xfe0] ss:$8 sps:$4 sm:$0xff]   ;;  %v7572_v59 = vld [vmem:[%s8395_s22 + $0x4f4] ss:$8 sps:$4 sm:$0xff]  }
 0x13b   : > { %5451 = vmatprep.subr.bf16.mxu0 %v7485_v60  ;;  %v7575_v60 = vld [vmem:[%s8395_s22 + $0xff4] ss:$8 sps:$4 sm:$0xff]  }
 0x13c   : > { %4968 = vmatmul.mubr.bf16.vlgmr.msra.gmra.mrb[0].mxu1 %v7474_v61  ;;  %v7570_v61 = vld [vmem:[%s8395_s22 + $0x4f0] ss:$8 sps:$4 sm:$0xff]  }
 0x13d   : > { %5441 = vmatmul.mubr.bf16.vlgmr.msra.gmra.mrb[0].mxu0 %v7480_v63  ;;  %4979 = vmatpush1.bf16.msra.mxu1 %v7477_v62  ;;  %v7573_v62 = vld [vmem:[%s8395_s22 + $0xff0] ss:$8 sps:$4 sm:$0xff]   ;;  %v7581_v63 = vld [vmem:[%s8395_s22 + $0x504] ss:$8 sps:$4 sm:$0xff]  }
 0x13e   : > { %5452 = vmatpush1.bf16.msra.mxu0 %v7483_v0  ;;  %4980 = vmatprep.subr.bf16.mxu1 %v7488_v1  ;;  %v7576_v0 = vld [vmem:[%s8397_s23 + $0x20] ss:$172 sps:$4 sm:$0xff]   ;;  %v7582_v1 = vld [vmem:[%s8397_s23 + $0x78] ss:$172 sps:$4 sm:$0xff]  }
 0x13f   : > { %5453 = vmatprep.subr.bf16.mxu0 %v7491_v2  ;;  %5010 = vmatprep.mubr.bf16.mxu1 %v7578_v3  ;;  %v7587_v2 = vld [vmem:[%s8395_s22 + $0x1004] ss:$8 sps:$4 sm:$0xff]   ;;  %v7579_v3 = vld [vmem:[%s8395_s22 + $0x500] ss:$8 sps:$4 sm:$0xff]  }
 0x140   : > { %5483 = vmatprep.mubr.bf16.mxu0 %v7584_v4  ;;  %v7585_v4 = vld [vmem:[%s8395_s22 + $0x1000] ss:$8 sps:$4 sm:$0xff]  }
 0x141   : > { %4981 = vmatpush1.bf16.msra.mxu1 %v7486_v5  ;;  %v7590_v5 = vld [vmem:[%s8395_s22 + $0x514] ss:$8 sps:$4 sm:$0xff]  }
 0x142   : > { %5454 = vmatpush1.bf16.msra.mxu0 %v7489_v6  ;;  %4982 = vmatprep.subr.bf16.mxu1 %v7494_v7  ;;  %v7593_v6 = vld [vmem:[%s8395_s22 + $0x1014] ss:$8 sps:$4 sm:$0xff]   ;;  %v7680_v7 = vld [vmem:[%s8397_s23 + $0x2c] ss:$172 sps:$4 sm:$0xff]  }
 0x143   : > { %5455 = vmatprep.subr.bf16.mxu0 %v7497_v8  ;;  %v7686_v8 = vld [vmem:[%s8397_s23 + $0x84] ss:$172 sps:$4 sm:$0xff]  }
 0x145   : > { %4983 = vmatpush1.bf16.msra.mxu1 %v7492_v9  ;;  %v7588_v9 = vld [vmem:[%s8395_s22 + $0x510] ss:$8 sps:$4 sm:$0xff]  }
 0x146   : > { %5456 = vmatpush1.bf16.msra.mxu0 %v7495_v10  ;;  %4984 = vmatprep.subr.bf16.mxu1 %v7500_v11  ;;  %v7591_v10 = vld [vmem:[%s8395_s22 + $0x1010] ss:$8 sps:$4 sm:$0xff]   ;;  %v7596_v11 = vld [vmem:[%s8395_s22 + $0x524] ss:$8 sps:$4 sm:$0xff]  }
 0x147   : > { %5457 = vmatprep.subr.bf16.mxu0 %v7503_v12  ;;  %v7599_v12 = vld [vmem:[%s8395_s22 + $0x1024] ss:$8 sps:$4 sm:$0xff]  }
 0x149   : > { %4985 = vmatpush1.bf16.msra.mxu1 %v7498_v13  ;;  %v7594_v13 = vld [vmem:[%s8395_s22 + $0x520] ss:$8 sps:$4 sm:$0xff]  }
 0x14a   : > { %5458 = vmatpush1.bf16.msra.mxu0 %v7501_v14  ;;  %4986 = vmatprep.subr.bf16.mxu1 %v7506_v15  ;;  %v7597_v14 = vld [vmem:[%s8395_s22 + $0x1020] ss:$8 sps:$4 sm:$0xff]   ;;  %v7602_v15 = vld [vmem:[%s8395_s22 + $0x534] ss:$8 sps:$4 sm:$0xff]  }
 0x14b   : > { %5459 = vmatprep.subr.bf16.mxu0 %v7509_v16  ;;  %v7605_v16 = vld [vmem:[%s8395_s22 + $0x1034] ss:$8 sps:$4 sm:$0xff]  }
 0x14d   : > { %4987 = vmatpush1.bf16.msra.mxu1 %v7504_v17  ;;  %v7600_v17 = vld [vmem:[%s8395_s22 + $0x530] ss:$8 sps:$4 sm:$0xff]  }
 0x14e   : > { %5460 = vmatpush1.bf16.msra.mxu0 %v7507_v18  ;;  %4988 = vmatprep.subr.bf16.mxu1 %v7512_v19  ;;  %v7603_v18 = vld [vmem:[%s8395_s22 + $0x1030] ss:$8 sps:$4 sm:$0xff]   ;;  %v7608_v19 = vld [vmem:[%s8395_s22 + $0x544] ss:$8 sps:$4 sm:$0xff]  }
 0x14f   : > { %5461 = vmatprep.subr.bf16.mxu0 %v7515_v20  ;;  %v7611_v20 = vld [vmem:[%s8395_s22 + $0x1044] ss:$8 sps:$4 sm:$0xff]  }
 0x151   : > { %4989 = vmatpush1.bf16.msra.mxu1 %v7510_v21  ;;  %v7606_v21 = vld [vmem:[%s8395_s22 + $0x540] ss:$8 sps:$4 sm:$0xff]  }
 0x152   : > { %5462 = vmatpush1.bf16.msra.mxu0 %v7513_v22  ;;  %4990 = vmatprep.subr.bf16.mxu1 %v7518_v23  ;;  %v7609_v22 = vld [vmem:[%s8395_s22 + $0x1040] ss:$8 sps:$4 sm:$0xff]   ;;  %v7614_v23 = vld [vmem:[%s8395_s22 + $0x554] ss:$8 sps:$4 sm:$0xff]  }
 0x153   : > { %5463 = vmatprep.subr.bf16.mxu0 %v7521_v24  ;;  %v7617_v24 = vld [vmem:[%s8395_s22 + $0x1054] ss:$8 sps:$4 sm:$0xff]  }
 0x155   : > { %4991 = vmatpush1.bf16.msra.mxu1 %v7516_v25  ;;  %v7612_v25 = vld [vmem:[%s8395_s22 + $0x550] ss:$8 sps:$4 sm:$0xff]  }
 0x156   : > { %5464 = vmatpush1.bf16.msra.mxu0 %v7519_v26  ;;  %4992 = vmatprep.subr.bf16.mxu1 %v7524_v27  ;;  %v7615_v26 = vld [vmem:[%s8395_s22 + $0x1050] ss:$8 sps:$4 sm:$0xff]   ;;  %v7620_v27 = vld [vmem:[%s8395_s22 + $0x564] ss:$8 sps:$4 sm:$0xff]  }
 0x157   : > { %5465 = vmatprep.subr.bf16.mxu0 %v7527_v28  ;;  %v7623_v28 = vld [vmem:[%s8395_s22 + $0x1064] ss:$8 sps:$4 sm:$0xff]  }
 0x159   : > { %4993 = vmatpush1.bf16.msra.mxu1 %v7522_v29  ;;  %v7618_v29 = vld [vmem:[%s8395_s22 + $0x560] ss:$8 sps:$4 sm:$0xff]  }
 0x15a   : > { %5466 = vmatpush1.bf16.msra.mxu0 %v7525_v30  ;;  %4994 = vmatprep.subr.bf16.mxu1 %v7530_v31  ;;  %v7621_v30 = vld [vmem:[%s8395_s22 + $0x1060] ss:$8 sps:$4 sm:$0xff]   ;;  %v7626_v31 = vld [vmem:[%s8395_s22 + $0x574] ss:$8 sps:$4 sm:$0xff]  }
 0x15b   : > { %5467 = vmatprep.subr.bf16.mxu0 %v7533_v32  ;;  %v7629_v32 = vld [vmem:[%s8395_s22 + $0x1074] ss:$8 sps:$4 sm:$0xff]  }
 0x15d   : > { %4995 = vmatpush1.bf16.msra.mxu1 %v7528_v33  ;;  %v7624_v33 = vld [vmem:[%s8395_s22 + $0x570] ss:$8 sps:$4 sm:$0xff]  }
 0x15e   : > { %5468 = vmatpush1.bf16.msra.mxu0 %v7531_v34  ;;  %4996 = vmatprep.subr.bf16.mxu1 %v7536_v35  ;;  %v7627_v34 = vld [vmem:[%s8395_s22 + $0x1070] ss:$8 sps:$4 sm:$0xff]   ;;  %v7632_v35 = vld [vmem:[%s8395_s22 + $0x584] ss:$8 sps:$4 sm:$0xff]  }
 0x15f   : > { %5469 = vmatprep.subr.bf16.mxu0 %v7539_v36  ;;  %v7635_v36 = vld [vmem:[%s8395_s22 + $0x1084] ss:$8 sps:$4 sm:$0xff]  }
 0x161   : > { %4997 = vmatpush1.bf16.msra.mxu1 %v7534_v37  ;;  %v7630_v37 = vld [vmem:[%s8395_s22 + $0x580] ss:$8 sps:$4 sm:$0xff]  }
 0x162   : > { %5470 = vmatpush1.bf16.msra.mxu0 %v7537_v38  ;;  %4998 = vmatprep.subr.bf16.mxu1 %v7542_v39  ;;  %v7633_v38 = vld [vmem:[%s8395_s22 + $0x1080] ss:$8 sps:$4 sm:$0xff]   ;;  %v7638_v39 = vld [vmem:[%s8395_s22 + $0x594] ss:$8 sps:$4 sm:$0xff]  }
 0x163   : > { %5471 = vmatprep.subr.bf16.mxu0 %v7545_v40  ;;  %v7641_v40 = vld [vmem:[%s8395_s22 + $0x1094] ss:$8 sps:$4 sm:$0xff]  }
 0x165   : > { %4999 = vmatpush1.bf16.msra.mxu1 %v7540_v41  ;;  %v7636_v41 = vld [vmem:[%s8395_s22 + $0x590] ss:$8 sps:$4 sm:$0xff]  }
 0x166   : > { %5472 = vmatpush1.bf16.msra.mxu0 %v7543_v42  ;;  %5000 = vmatprep.subr.bf16.mxu1 %v7548_v43  ;;  %v7639_v42 = vld [vmem:[%s8395_s22 + $0x1090] ss:$8 sps:$4 sm:$0xff]   ;;  %v7644_v43 = vld [vmem:[%s8395_s22 + $0x5a4] ss:$8 sps:$4 sm:$0xff]  }
 0x167   : > { %5473 = vmatprep.subr.bf16.mxu0 %v7551_v44  ;;  %v7647_v44 = vld [vmem:[%s8395_s22 + $0x10a4] ss:$8 sps:$4 sm:$0xff]  }
 0x169   : > { %5001 = vmatpush1.bf16.msra.mxu1 %v7546_v45  ;;  %v7642_v45 = vld [vmem:[%s8395_s22 + $0x5a0] ss:$8 sps:$4 sm:$0xff]  }
 0x16a   : > { %5474 = vmatpush1.bf16.msra.mxu0 %v7549_v46  ;;  %5002 = vmatprep.subr.bf16.mxu1 %v7554_v47  ;;  %v7645_v46 = vld [vmem:[%s8395_s22 + $0x10a0] ss:$8 sps:$4 sm:$0xff]   ;;  %v7650_v47 = vld [vmem:[%s8395_s22 + $0x5b4] ss:$8 sps:$4 sm:$0xff]  }
 0x16b   : > { %5475 = vmatprep.subr.bf16.mxu0 %v7557_v48  ;;  %v7653_v48 = vld [vmem:[%s8395_s22 + $0x10b4] ss:$8 sps:$4 sm:$0xff]  }
 0x16d   : > { %5003 = vmatpush1.bf16.msra.mxu1 %v7552_v49  ;;  %v7648_v49 = vld [vmem:[%s8395_s22 + $0x5b0] ss:$8 sps:$4 sm:$0xff]  }
 0x16e   : > { %5476 = vmatpush1.bf16.msra.mxu0 %v7555_v50  ;;  %5004 = vmatprep.subr.bf16.mxu1 %v7560_v51  ;;  %v7651_v50 = vld [vmem:[%s8395_s22 + $0x10b0] ss:$8 sps:$4 sm:$0xff]   ;;  %v7656_v51 = vld [vmem:[%s8395_s22 + $0x5c4] ss:$8 sps:$4 sm:$0xff]  }
 0x16f   : > { %5477 = vmatprep.subr.bf16.mxu0 %v7563_v52  ;;  %v7659_v52 = vld [vmem:[%s8395_s22 + $0x10c4] ss:$8 sps:$4 sm:$0xff]  }
 0x171   : > { %5005 = vmatpush1.bf16.msra.mxu1 %v7558_v53  ;;  %v7654_v53 = vld [vmem:[%s8395_s22 + $0x5c0] ss:$8 sps:$4 sm:$0xff]  }
 0x172   : > { %5478 = vmatpush1.bf16.msra.mxu0 %v7561_v54  ;;  %5006 = vmatprep.subr.bf16.mxu1 %v7566_v55  ;;  %v7657_v54 = vld [vmem:[%s8395_s22 + $0x10c0] ss:$8 sps:$4 sm:$0xff]   ;;  %v7662_v55 = vld [vmem:[%s8395_s22 + $0x5d4] ss:$8 sps:$4 sm:$0xff]  }
 0x173   : > { %5479 = vmatprep.subr.bf16.mxu0 %v7569_v56  ;;  %v7665_v56 = vld [vmem:[%s8395_s22 + $0x10d4] ss:$8 sps:$4 sm:$0xff]  }
 0x175   : > { %5007 = vmatpush1.bf16.msra.mxu1 %v7564_v57  ;;  %v7660_v57 = vld [vmem:[%s8395_s22 + $0x5d0] ss:$8 sps:$4 sm:$0xff]  }
 0x176   : > { %5480 = vmatpush1.bf16.msra.mxu0 %v7567_v58  ;;  %5008 = vmatprep.subr.bf16.mxu1 %v7572_v59  ;;  %v7663_v58 = vld [vmem:[%s8395_s22 + $0x10d0] ss:$8 sps:$4 sm:$0xff]   ;;  %v7668_v59 = vld [vmem:[%s8395_s22 + $0x5e4] ss:$8 sps:$4 sm:$0xff]  }
 0x177   : > { %5481 = vmatprep.subr.bf16.mxu0 %v7575_v60  ;;  %v7671_v60 = vld [vmem:[%s8395_s22 + $0x10e4] ss:$8 sps:$4 sm:$0xff]  }
 0x179   : > { %5009 = vmatpush1.bf16.msra.mxu1 %v7570_v61  ;;  %v7666_v61 = vld [vmem:[%s8395_s22 + $0x5e0] ss:$8 sps:$4 sm:$0xff]  }
 0x17a   : > { %5482 = vmatpush1.bf16.msra.mxu0 %v7573_v62  ;;  %5021 = vmatprep.subr.bf16.mxu1 %v7581_v63  ;;  %v7669_v62 = vld [vmem:[%s8395_s22 + $0x10e0] ss:$8 sps:$4 sm:$0xff]   ;;  %v7674_v63 = vld [vmem:[%s8395_s22 + $0x5f4] ss:$8 sps:$4 sm:$0xff]  }
 0x17b   : > { %5494 = vmatprep.subr.bf16.mxu0 %v7587_v2  ;;  %v7675_v2 = vld [vmem:[%s8395_s22 + $0x10f0] ss:$8 sps:$4 sm:$0xff]  }
 0x17c   : > { %5011 = vmatmul.mubr.bf16.vlgmr.msra.gmra.mrb[0].mxu1 %v7576_v0  ;;  %v7677_v0 = vld [vmem:[%s8395_s22 + $0x10f4] ss:$8 sps:$4 sm:$0xff]  }
 0x17d   : > { %5484 = vmatmul.mubr.bf16.vlgmr.msra.gmra.mrb[0].mxu0 %v7582_v1  ;;  %5022 = vmatpush1.bf16.msra.mxu1 %v7579_v3  ;;  %v7672_v1 = vld [vmem:[%s8395_s22 + $0x5f0] ss:$8 sps:$4 sm:$0xff]   ;;  %v7683_v3 = vld [vmem:[%s8395_s22 + $0x604] ss:$8 sps:$4 sm:$0xff]  }
 0x17e   : > { %5495 = vmatpush1.bf16.msra.mxu0 %v7585_v4  ;;  %5023 = vmatprep.subr.bf16.mxu1 %v7590_v5  ;;  %v7678_v4 = vld [vmem:[%s8397_s23 + $0x28] ss:$172 sps:$4 sm:$0xff]   ;;  %v7684_v5 = vld [vmem:[%s8397_s23 + $0x80] ss:$172 sps:$4 sm:$0xff]  }
 0x17f   : > { %5496 = vmatprep.subr.bf16.mxu0 %v7593_v6  ;;  %5053 = vmatprep.mubr.bf16.mxu1 %v7680_v7  ;;  %v7689_v6 = vld [vmem:[%s8395_s22 + $0x1104] ss:$8 sps:$4 sm:$0xff]   ;;  %v7681_v7 = vld [vmem:[%s8395_s22 + $0x600] ss:$8 sps:$4 sm:$0xff]  }
 0x180   : > { %5526 = vmatprep.mubr.bf16.mxu0 %v7686_v8  ;;  %v7687_v8 = vld [vmem:[%s8395_s22 + $0x1100] ss:$8 sps:$4 sm:$0xff]  }
 0x181   : > { %5024 = vmatpush1.bf16.msra.mxu1 %v7588_v9  ;;  %v7692_v9 = vld [vmem:[%s8395_s22 + $0x614] ss:$8 sps:$4 sm:$0xff]  }
 0x182   : > { %5497 = vmatpush1.bf16.msra.mxu0 %v7591_v10  ;;  %5025 = vmatprep.subr.bf16.mxu1 %v7596_v11  ;;  %v7695_v10 = vld [vmem:[%s8395_s22 + $0x1114] ss:$8 sps:$4 sm:$0xff]  }
 0x183   : > { %5498 = vmatprep.subr.bf16.mxu0 %v7599_v12  ;;  %v7782_v11 = vld [vmem:[%s8397_s23 + $0x34] ss:$172 sps:$4 sm:$0xff]   ;;  %v7788_v12 = vld [vmem:[%s8397_s23 + $0x8c] ss:$172 sps:$4 sm:$0xff]  }
 0x185   : > { %5026 = vmatpush1.bf16.msra.mxu1 %v7594_v13  ;;  %v7690_v13 = vld [vmem:[%s8395_s22 + $0x610] ss:$8 sps:$4 sm:$0xff]  }
 0x186   : > { %5499 = vmatpush1.bf16.msra.mxu0 %v7597_v14  ;;  %5027 = vmatprep.subr.bf16.mxu1 %v7602_v15  ;;  %v7693_v14 = vld [vmem:[%s8395_s22 + $0x1110] ss:$8 sps:$4 sm:$0xff]   ;;  %v7698_v15 = vld [vmem:[%s8395_s22 + $0x624] ss:$8 sps:$4 sm:$0xff]  }
 0x187   : > { %5500 = vmatprep.subr.bf16.mxu0 %v7605_v16  ;;  %v7701_v16 = vld [vmem:[%s8395_s22 + $0x1124] ss:$8 sps:$4 sm:$0xff]  }
 0x189   : > { %5028 = vmatpush1.bf16.msra.mxu1 %v7600_v17  ;;  %v7696_v17 = vld [vmem:[%s8395_s22 + $0x620] ss:$8 sps:$4 sm:$0xff]  }
 0x18a   : > { %5501 = vmatpush1.bf16.msra.mxu0 %v7603_v18  ;;  %5029 = vmatprep.subr.bf16.mxu1 %v7608_v19  ;;  %v7699_v18 = vld [vmem:[%s8395_s22 + $0x1120] ss:$8 sps:$4 sm:$0xff]   ;;  %v7704_v19 = vld [vmem:[%s8395_s22 + $0x634] ss:$8 sps:$4 sm:$0xff]  }
 0x18b   : > { %5502 = vmatprep.subr.bf16.mxu0 %v7611_v20  ;;  %v7707_v20 = vld [vmem:[%s8395_s22 + $0x1134] ss:$8 sps:$4 sm:$0xff]  }
 0x18d   : > { %5030 = vmatpush1.bf16.msra.mxu1 %v7606_v21  ;;  %v7702_v21 = vld [vmem:[%s8395_s22 + $0x630] ss:$8 sps:$4 sm:$0xff]  }
 0x18e   : > { %5503 = vmatpush1.bf16.msra.mxu0 %v7609_v22  ;;  %5031 = vmatprep.subr.bf16.mxu1 %v7614_v23  ;;  %v7705_v22 = vld [vmem:[%s8395_s22 + $0x1130] ss:$8 sps:$4 sm:$0xff]   ;;  %v7710_v23 = vld [vmem:[%s8395_s22 + $0x644] ss:$8 sps:$4 sm:$0xff]  }
 0x18f   : > { %5504 = vmatprep.subr.bf16.mxu0 %v7617_v24  ;;  %v7713_v24 = vld [vmem:[%s8395_s22 + $0x1144] ss:$8 sps:$4 sm:$0xff]  }
 0x191   : > { %5032 = vmatpush1.bf16.msra.mxu1 %v7612_v25  ;;  %v7708_v25 = vld [vmem:[%s8395_s22 + $0x640] ss:$8 sps:$4 sm:$0xff]  }
 0x192   : > { %5505 = vmatpush1.bf16.msra.mxu0 %v7615_v26  ;;  %5033 = vmatprep.subr.bf16.mxu1 %v7620_v27  ;;  %v7711_v26 = vld [vmem:[%s8395_s22 + $0x1140] ss:$8 sps:$4 sm:$0xff]   ;;  %v7716_v27 = vld [vmem:[%s8395_s22 + $0x654] ss:$8 sps:$4 sm:$0xff]  }
 0x193   : > { %5506 = vmatprep.subr.bf16.mxu0 %v7623_v28  ;;  %v7719_v28 = vld [vmem:[%s8395_s22 + $0x1154] ss:$8 sps:$4 sm:$0xff]  }
 0x195   : > { %5034 = vmatpush1.bf16.msra.mxu1 %v7618_v29  ;;  %v7714_v29 = vld [vmem:[%s8395_s22 + $0x650] ss:$8 sps:$4 sm:$0xff]  }
 0x196   : > { %5507 = vmatpush1.bf16.msra.mxu0 %v7621_v30  ;;  %5035 = vmatprep.subr.bf16.mxu1 %v7626_v31  ;;  %v7717_v30 = vld [vmem:[%s8395_s22 + $0x1150] ss:$8 sps:$4 sm:$0xff]   ;;  %v7722_v31 = vld [vmem:[%s8395_s22 + $0x664] ss:$8 sps:$4 sm:$0xff]  }
 0x197   : > { %5508 = vmatprep.subr.bf16.mxu0 %v7629_v32  ;;  %v7725_v32 = vld [vmem:[%s8395_s22 + $0x1164] ss:$8 sps:$4 sm:$0xff]  }
 0x199   : > { %5036 = vmatpush1.bf16.msra.mxu1 %v7624_v33  ;;  %v7720_v33 = vld [vmem:[%s8395_s22 + $0x660] ss:$8 sps:$4 sm:$0xff]  }
 0x19a   : > { %5509 = vmatpush1.bf16.msra.mxu0 %v7627_v34  ;;  %5037 = vmatprep.subr.bf16.mxu1 %v7632_v35  ;;  %v7723_v34 = vld [vmem:[%s8395_s22 + $0x1160] ss:$8 sps:$4 sm:$0xff]   ;;  %v7728_v35 = vld [vmem:[%s8395_s22 + $0x674] ss:$8 sps:$4 sm:$0xff]  }
 0x19b   : > { %5510 = vmatprep.subr.bf16.mxu0 %v7635_v36  ;;  %v7731_v36 = vld [vmem:[%s8395_s22 + $0x1174] ss:$8 sps:$4 sm:$0xff]  }
 0x19d   : > { %5038 = vmatpush1.bf16.msra.mxu1 %v7630_v37  ;;  %v7726_v37 = vld [vmem:[%s8395_s22 + $0x670] ss:$8 sps:$4 sm:$0xff]  }
 0x19e   : > { %5511 = vmatpush1.bf16.msra.mxu0 %v7633_v38  ;;  %5039 = vmatprep.subr.bf16.mxu1 %v7638_v39  ;;  %v7729_v38 = vld [vmem:[%s8395_s22 + $0x1170] ss:$8 sps:$4 sm:$0xff]   ;;  %v7734_v39 = vld [vmem:[%s8395_s22 + $0x684] ss:$8 sps:$4 sm:$0xff]  }
 0x19f   : > { %5512 = vmatprep.subr.bf16.mxu0 %v7641_v40  ;;  %v7737_v40 = vld [vmem:[%s8395_s22 + $0x1184] ss:$8 sps:$4 sm:$0xff]  }
 0x1a1   : > { %5040 = vmatpush1.bf16.msra.mxu1 %v7636_v41  ;;  %v7732_v41 = vld [vmem:[%s8395_s22 + $0x680] ss:$8 sps:$4 sm:$0xff]  }
 0x1a2   : > { %5513 = vmatpush1.bf16.msra.mxu0 %v7639_v42  ;;  %5041 = vmatprep.subr.bf16.mxu1 %v7644_v43  ;;  %v7735_v42 = vld [vmem:[%s8395_s22 + $0x1180] ss:$8 sps:$4 sm:$0xff]   ;;  %v7740_v43 = vld [vmem:[%s8395_s22 + $0x694] ss:$8 sps:$4 sm:$0xff]  }
 0x1a3   : > { %5514 = vmatprep.subr.bf16.mxu0 %v7647_v44  ;;  %v7743_v44 = vld [vmem:[%s8395_s22 + $0x1194] ss:$8 sps:$4 sm:$0xff]  }
 0x1a5   : > { %5042 = vmatpush1.bf16.msra.mxu1 %v7642_v45  ;;  %v7738_v45 = vld [vmem:[%s8395_s22 + $0x690] ss:$8 sps:$4 sm:$0xff]  }
 0x1a6   : > { %5515 = vmatpush1.bf16.msra.mxu0 %v7645_v46  ;;  %5043 = vmatprep.subr.bf16.mxu1 %v7650_v47  ;;  %v7741_v46 = vld [vmem:[%s8395_s22 + $0x1190] ss:$8 sps:$4 sm:$0xff]   ;;  %v7746_v47 = vld [vmem:[%s8395_s22 + $0x6a4] ss:$8 sps:$4 sm:$0xff]  }
 0x1a7   : > { %5516 = vmatprep.subr.bf16.mxu0 %v7653_v48  ;;  %v7749_v48 = vld [vmem:[%s8395_s22 + $0x11a4] ss:$8 sps:$4 sm:$0xff]  }
 0x1a9   : > { %5044 = vmatpush1.bf16.msra.mxu1 %v7648_v49  ;;  %v7744_v49 = vld [vmem:[%s8395_s22 + $0x6a0] ss:$8 sps:$4 sm:$0xff]  }
 0x1aa   : > { %5517 = vmatpush1.bf16.msra.mxu0 %v7651_v50  ;;  %5045 = vmatprep.subr.bf16.mxu1 %v7656_v51  ;;  %v7747_v50 = vld [vmem:[%s8395_s22 + $0x11a0] ss:$8 sps:$4 sm:$0xff]   ;;  %v7752_v51 = vld [vmem:[%s8395_s22 + $0x6b4] ss:$8 sps:$4 sm:$0xff]  }
 0x1ab   : > { %5518 = vmatprep.subr.bf16.mxu0 %v7659_v52  ;;  %v7755_v52 = vld [vmem:[%s8395_s22 + $0x11b4] ss:$8 sps:$4 sm:$0xff]  }
 0x1ad   : > { %5046 = vmatpush1.bf16.msra.mxu1 %v7654_v53  ;;  %v7750_v53 = vld [vmem:[%s8395_s22 + $0x6b0] ss:$8 sps:$4 sm:$0xff]  }
 0x1ae   : > { %5519 = vmatpush1.bf16.msra.mxu0 %v7657_v54  ;;  %5047 = vmatprep.subr.bf16.mxu1 %v7662_v55  ;;  %v7753_v54 = vld [vmem:[%s8395_s22 + $0x11b0] ss:$8 sps:$4 sm:$0xff]   ;;  %v7758_v55 = vld [vmem:[%s8395_s22 + $0x6c4] ss:$8 sps:$4 sm:$0xff]  }
 0x1af   : > { %5520 = vmatprep.subr.bf16.mxu0 %v7665_v56  ;;  %v7761_v56 = vld [vmem:[%s8395_s22 + $0x11c4] ss:$8 sps:$4 sm:$0xff]  }
 0x1b1   : > { %5048 = vmatpush1.bf16.msra.mxu1 %v7660_v57  ;;  %v7756_v57 = vld [vmem:[%s8395_s22 + $0x6c0] ss:$8 sps:$4 sm:$0xff]  }
 0x1b2   : > { %5521 = vmatpush1.bf16.msra.mxu0 %v7663_v58  ;;  %5049 = vmatprep.subr.bf16.mxu1 %v7668_v59  ;;  %v7759_v58 = vld [vmem:[%s8395_s22 + $0x11c0] ss:$8 sps:$4 sm:$0xff]   ;;  %v7764_v59 = vld [vmem:[%s8395_s22 + $0x6d4] ss:$8 sps:$4 sm:$0xff]  }
 0x1b3   : > { %5522 = vmatprep.subr.bf16.mxu0 %v7671_v60  ;;  %v7767_v60 = vld [vmem:[%s8395_s22 + $0x11d4] ss:$8 sps:$4 sm:$0xff]  }
 0x1b5   : > { %5050 = vmatpush1.bf16.msra.mxu1 %v7666_v61  ;;  %v7762_v61 = vld [vmem:[%s8395_s22 + $0x6d0] ss:$8 sps:$4 sm:$0xff]  }
 0x1b6   : > { %5523 = vmatpush1.bf16.msra.mxu0 %v7669_v62  ;;  %5051 = vmatprep.subr.bf16.mxu1 %v7674_v63  ;;  %v7765_v62 = vld [vmem:[%s8395_s22 + $0x11d0] ss:$8 sps:$4 sm:$0xff]   ;;  %v7770_v63 = vld [vmem:[%s8395_s22 + $0x6e4] ss:$8 sps:$4 sm:$0xff]  }
 0x1b7   : > { %5524 = vmatprep.subr.bf16.mxu0 %v7677_v0  ;;  %v7773_v0 = vld [vmem:[%s8395_s22 + $0x11e4] ss:$8 sps:$4 sm:$0xff]  }
 0x1b9   : > { %5052 = vmatpush1.bf16.msra.mxu1 %v7672_v1  ;;  %v7768_v1 = vld [vmem:[%s8395_s22 + $0x6e0] ss:$8 sps:$4 sm:$0xff]  }
 0x1ba   : > { %5525 = vmatpush1.bf16.msra.mxu0 %v7675_v2  ;;  %5064 = vmatprep.subr.bf16.mxu1 %v7683_v3  ;;  %v7771_v2 = vld [vmem:[%s8395_s22 + $0x11e0] ss:$8 sps:$4 sm:$0xff]   ;;  %v7776_v3 = vld [vmem:[%s8395_s22 + $0x6f4] ss:$8 sps:$4 sm:$0xff]  }
 0x1bb   : > { %5537 = vmatprep.subr.bf16.mxu0 %v7689_v6  ;;  %v7777_v6 = vld [vmem:[%s8395_s22 + $0x11f0] ss:$8 sps:$4 sm:$0xff]  }
 0x1bc   : > { %5054 = vmatmul.mubr.bf16.vlgmr.msra.gmra.mrb[0].mxu1 %v7678_v4  ;;  %v7779_v4 = vld [vmem:[%s8395_s22 + $0x11f4] ss:$8 sps:$4 sm:$0xff]  }
 0x1bd   : > { %5527 = vmatmul.mubr.bf16.vlgmr.msra.gmra.mrb[0].mxu0 %v7684_v5  ;;  %5065 = vmatpush1.bf16.msra.mxu1 %v7681_v7  ;;  %v7774_v5 = vld [vmem:[%s8395_s22 + $0x6f0] ss:$8 sps:$4 sm:$0xff]   ;;  %v7785_v7 = vld [vmem:[%s8395_s22 + $0x704] ss:$8 sps:$4 sm:$0xff]  }
 0x1be   : > { %5538 = vmatpush1.bf16.msra.mxu0 %v7687_v8  ;;  %5066 = vmatprep.subr.bf16.mxu1 %v7692_v9  ;;  %v7791_v8 = vld [vmem:[%s8395_s22 + $0x1204] ss:$8 sps:$4 sm:$0xff]   ;;  %v7780_v9 = vld [vmem:[%s8397_s23 + $0x30] ss:$172 sps:$4 sm:$0xff]  }
 0x1bf   : > { %5539 = vmatprep.subr.bf16.mxu0 %v7695_v10  ;;  %5096 = vmatprep.mubr.bf16.mxu1 %v7782_v11  ;;  %v7786_v10 = vld [vmem:[%s8397_s23 + $0x88] ss:$172 sps:$4 sm:$0xff]  }
 0x1c0   : > { %5569 = vmatprep.mubr.bf16.mxu0 %v7788_v12  ;;  %v7783_v11 = vld [vmem:[%s8395_s22 + $0x700] ss:$8 sps:$4 sm:$0xff]  }
 0x1c1   : > { %5067 = vmatpush1.bf16.msra.mxu1 %v7690_v13  ;;  %v7789_v12 = vld [vmem:[%s8395_s22 + $0x1200] ss:$8 sps:$4 sm:$0xff]   ;;  %v7794_v13 = vld [vmem:[%s8395_s22 + $0x714] ss:$8 sps:$4 sm:$0xff]  }
 0x1c2   : > { %5540 = vmatpush1.bf16.msra.mxu0 %v7693_v14  ;;  %5068 = vmatprep.subr.bf16.mxu1 %v7698_v15  ;;  %v7797_v14 = vld [vmem:[%s8395_s22 + $0x1214] ss:$8 sps:$4 sm:$0xff]  }
 0x1c3   : > { %5541 = vmatprep.subr.bf16.mxu0 %v7701_v16  ;;  %v7884_v15 = vld [vmem:[%s8397_s23 + $0x3c] ss:$172 sps:$4 sm:$0xff]   ;;  %v7890_v16 = vld [vmem:[%s8397_s23 + $0x94] ss:$172 sps:$4 sm:$0xff]  }
 0x1c5   : > { %5069 = vmatpush1.bf16.msra.mxu1 %v7696_v17  ;;  %v7792_v17 = vld [vmem:[%s8395_s22 + $0x710] ss:$8 sps:$4 sm:$0xff]  }
 0x1c6   : > { %5542 = vmatpush1.bf16.msra.mxu0 %v7699_v18  ;;  %5070 = vmatprep.subr.bf16.mxu1 %v7704_v19  ;;  %v7795_v18 = vld [vmem:[%s8395_s22 + $0x1210] ss:$8 sps:$4 sm:$0xff]   ;;  %v7800_v19 = vld [vmem:[%s8395_s22 + $0x724] ss:$8 sps:$4 sm:$0xff]  }
 0x1c7   : > { %5543 = vmatprep.subr.bf16.mxu0 %v7707_v20  ;;  %v7803_v20 = vld [vmem:[%s8395_s22 + $0x1224] ss:$8 sps:$4 sm:$0xff]  }
 0x1c9   : > { %5071 = vmatpush1.bf16.msra.mxu1 %v7702_v21  ;;  %v7798_v21 = vld [vmem:[%s8395_s22 + $0x720] ss:$8 sps:$4 sm:$0xff]  }
 0x1ca   : > { %5544 = vmatpush1.bf16.msra.mxu0 %v7705_v22  ;;  %5072 = vmatprep.subr.bf16.mxu1 %v7710_v23  ;;  %v7801_v22 = vld [vmem:[%s8395_s22 + $0x1220] ss:$8 sps:$4 sm:$0xff]   ;;  %v7806_v23 = vld [vmem:[%s8395_s22 + $0x734] ss:$8 sps:$4 sm:$0xff]  }
 0x1cb   : > { %5545 = vmatprep.subr.bf16.mxu0 %v7713_v24  ;;  %v7809_v24 = vld [vmem:[%s8395_s22 + $0x1234] ss:$8 sps:$4 sm:$0xff]  }
 0x1cd   : > { %5073 = vmatpush1.bf16.msra.mxu1 %v7708_v25  ;;  %v7804_v25 = vld [vmem:[%s8395_s22 + $0x730] ss:$8 sps:$4 sm:$0xff]  }
 0x1ce   : > { %5546 = vmatpush1.bf16.msra.mxu0 %v7711_v26  ;;  %5074 = vmatprep.subr.bf16.mxu1 %v7716_v27  ;;  %v7807_v26 = vld [vmem:[%s8395_s22 + $0x1230] ss:$8 sps:$4 sm:$0xff]   ;;  %v7812_v27 = vld [vmem:[%s8395_s22 + $0x744] ss:$8 sps:$4 sm:$0xff]  }
 0x1cf   : > { %5547 = vmatprep.subr.bf16.mxu0 %v7719_v28  ;;  %v7815_v28 = vld [vmem:[%s8395_s22 + $0x1244] ss:$8 sps:$4 sm:$0xff]  }
 0x1d1   : > { %5075 = vmatpush1.bf16.msra.mxu1 %v7714_v29  ;;  %v7810_v29 = vld [vmem:[%s8395_s22 + $0x740] ss:$8 sps:$4 sm:$0xff]  }
 0x1d2   : > { %5548 = vmatpush1.bf16.msra.mxu0 %v7717_v30  ;;  %5076 = vmatprep.subr.bf16.mxu1 %v7722_v31  ;;  %v7813_v30 = vld [vmem:[%s8395_s22 + $0x1240] ss:$8 sps:$4 sm:$0xff]   ;;  %v7818_v31 = vld [vmem:[%s8395_s22 + $0x754] ss:$8 sps:$4 sm:$0xff]  }
 0x1d3   : > { %5549 = vmatprep.subr.bf16.mxu0 %v7725_v32  ;;  %v7821_v32 = vld [vmem:[%s8395_s22 + $0x1254] ss:$8 sps:$4 sm:$0xff]  }
 0x1d5   : > { %5077 = vmatpush1.bf16.msra.mxu1 %v7720_v33  ;;  %v7816_v33 = vld [vmem:[%s8395_s22 + $0x750] ss:$8 sps:$4 sm:$0xff]  }
 0x1d6   : > { %5550 = vmatpush1.bf16.msra.mxu0 %v7723_v34  ;;  %5078 = vmatprep.subr.bf16.mxu1 %v7728_v35  ;;  %v7819_v34 = vld [vmem:[%s8395_s22 + $0x1250] ss:$8 sps:$4 sm:$0xff]   ;;  %v7824_v35 = vld [vmem:[%s8395_s22 + $0x764] ss:$8 sps:$4 sm:$0xff]  }
 0x1d7   : > { %5551 = vmatprep.subr.bf16.mxu0 %v7731_v36  ;;  %v7827_v36 = vld [vmem:[%s8395_s22 + $0x1264] ss:$8 sps:$4 sm:$0xff]  }
 0x1d9   : > { %5079 = vmatpush1.bf16.msra.mxu1 %v7726_v37  ;;  %v7822_v37 = vld [vmem:[%s8395_s22 + $0x760] ss:$8 sps:$4 sm:$0xff]  }
 0x1da   : > { %5552 = vmatpush1.bf16.msra.mxu0 %v7729_v38  ;;  %5080 = vmatprep.subr.bf16.mxu1 %v7734_v39  ;;  %v7825_v38 = vld [vmem:[%s8395_s22 + $0x1260] ss:$8 sps:$4 sm:$0xff]   ;;  %v7830_v39 = vld [vmem:[%s8395_s22 + $0x774] ss:$8 sps:$4 sm:$0xff]  }
 0x1db   : > { %5553 = vmatprep.subr.bf16.mxu0 %v7737_v40  ;;  %v7833_v40 = vld [vmem:[%s8395_s22 + $0x1274] ss:$8 sps:$4 sm:$0xff]  }
 0x1dd   : > { %5081 = vmatpush1.bf16.msra.mxu1 %v7732_v41  ;;  %v7828_v41 = vld [vmem:[%s8395_s22 + $0x770] ss:$8 sps:$4 sm:$0xff]  }
 0x1de   : > { %5554 = vmatpush1.bf16.msra.mxu0 %v7735_v42  ;;  %5082 = vmatprep.subr.bf16.mxu1 %v7740_v43  ;;  %v7831_v42 = vld [vmem:[%s8395_s22 + $0x1270] ss:$8 sps:$4 sm:$0xff]   ;;  %v7836_v43 = vld [vmem:[%s8395_s22 + $0x784] ss:$8 sps:$4 sm:$0xff]  }
 0x1df   : > { %5555 = vmatprep.subr.bf16.mxu0 %v7743_v44  ;;  %v7839_v44 = vld [vmem:[%s8395_s22 + $0x1284] ss:$8 sps:$4 sm:$0xff]  }
 0x1e1   : > { %5083 = vmatpush1.bf16.msra.mxu1 %v7738_v45  ;;  %v7834_v45 = vld [vmem:[%s8395_s22 + $0x780] ss:$8 sps:$4 sm:$0xff]  }
 0x1e2   : > { %5556 = vmatpush1.bf16.msra.mxu0 %v7741_v46  ;;  %5084 = vmatprep.subr.bf16.mxu1 %v7746_v47  ;;  %v7837_v46 = vld [vmem:[%s8395_s22 + $0x1280] ss:$8 sps:$4 sm:$0xff]   ;;  %v7842_v47 = vld [vmem:[%s8395_s22 + $0x794] ss:$8 sps:$4 sm:$0xff]  }
 0x1e3   : > { %5557 = vmatprep.subr.bf16.mxu0 %v7749_v48  ;;  %v7845_v48 = vld [vmem:[%s8395_s22 + $0x1294] ss:$8 sps:$4 sm:$0xff]  }
 0x1e5   : > { %5085 = vmatpush1.bf16.msra.mxu1 %v7744_v49  ;;  %v7840_v49 = vld [vmem:[%s8395_s22 + $0x790] ss:$8 sps:$4 sm:$0xff]  }
 0x1e6   : > { %5558 = vmatpush1.bf16.msra.mxu0 %v7747_v50  ;;  %5086 = vmatprep.subr.bf16.mxu1 %v7752_v51  ;;  %v7843_v50 = vld [vmem:[%s8395_s22 + $0x1290] ss:$8 sps:$4 sm:$0xff]   ;;  %v7848_v51 = vld [vmem:[%s8395_s22 + $0x7a4] ss:$8 sps:$4 sm:$0xff]  }
 0x1e7   : > { %5559 = vmatprep.subr.bf16.mxu0 %v7755_v52  ;;  %v7851_v52 = vld [vmem:[%s8395_s22 + $0x12a4] ss:$8 sps:$4 sm:$0xff]  }
 0x1e9   : > { %5087 = vmatpush1.bf16.msra.mxu1 %v7750_v53  ;;  %v7846_v53 = vld [vmem:[%s8395_s22 + $0x7a0] ss:$8 sps:$4 sm:$0xff]  }
 0x1ea   : > { %5560 = vmatpush1.bf16.msra.mxu0 %v7753_v54  ;;  %5088 = vmatprep.subr.bf16.mxu1 %v7758_v55  ;;  %v7849_v54 = vld [vmem:[%s8395_s22 + $0x12a0] ss:$8 sps:$4 sm:$0xff]   ;;  %v7854_v55 = vld [vmem:[%s8395_s22 + $0x7b4] ss:$8 sps:$4 sm:$0xff]  }
 0x1eb   : > { %5561 = vmatprep.subr.bf16.mxu0 %v7761_v56  ;;  %v7857_v56 = vld [vmem:[%s8395_s22 + $0x12b4] ss:$8 sps:$4 sm:$0xff]  }
 0x1ed   : > { %5089 = vmatpush1.bf16.msra.mxu1 %v7756_v57  ;;  %v7852_v57 = vld [vmem:[%s8395_s22 + $0x7b0] ss:$8 sps:$4 sm:$0xff]  }
 0x1ee   : > { %5562 = vmatpush1.bf16.msra.mxu0 %v7759_v58  ;;  %5090 = vmatprep.subr.bf16.mxu1 %v7764_v59  ;;  %v7855_v58 = vld [vmem:[%s8395_s22 + $0x12b0] ss:$8 sps:$4 sm:$0xff]   ;;  %v7860_v59 = vld [vmem:[%s8395_s22 + $0x7c4] ss:$8 sps:$4 sm:$0xff]  }
 0x1ef   : > { %5563 = vmatprep.subr.bf16.mxu0 %v7767_v60  ;;  %v7863_v60 = vld [vmem:[%s8395_s22 + $0x12c4] ss:$8 sps:$4 sm:$0xff]  }
 0x1f1   : > { %5091 = vmatpush1.bf16.msra.mxu1 %v7762_v61  ;;  %v7858_v61 = vld [vmem:[%s8395_s22 + $0x7c0] ss:$8 sps:$4 sm:$0xff]  }
 0x1f2   : > { %5564 = vmatpush1.bf16.msra.mxu0 %v7765_v62  ;;  %5092 = vmatprep.subr.bf16.mxu1 %v7770_v63  ;;  %v7861_v62 = vld [vmem:[%s8395_s22 + $0x12c0] ss:$8 sps:$4 sm:$0xff]   ;;  %v7866_v63 = vld [vmem:[%s8395_s22 + $0x7d4] ss:$8 sps:$4 sm:$0xff]  }
 0x1f3   : > { %5565 = vmatprep.subr.bf16.mxu0 %v7773_v0  ;;  %v7869_v0 = vld [vmem:[%s8395_s22 + $0x12d4] ss:$8 sps:$4 sm:$0xff]  }
 0x1f5   : > { %5093 = vmatpush1.bf16.msra.mxu1 %v7768_v1  ;;  %v7864_v1 = vld [vmem:[%s8395_s22 + $0x7d0] ss:$8 sps:$4 sm:$0xff]  }
 0x1f6   : > { %5566 = vmatpush1.bf16.msra.mxu0 %v7771_v2  ;;  %5094 = vmatprep.subr.bf16.mxu1 %v7776_v3  ;;  %v7867_v2 = vld [vmem:[%s8395_s22 + $0x12d0] ss:$8 sps:$4 sm:$0xff]   ;;  %v7872_v3 = vld [vmem:[%s8395_s22 + $0x7e4] ss:$8 sps:$4 sm:$0xff]  }
 0x1f7   : > { %5567 = vmatprep.subr.bf16.mxu0 %v7779_v4  ;;  %v7875_v4 = vld [vmem:[%s8395_s22 + $0x12e4] ss:$8 sps:$4 sm:$0xff]  }
 0x1f9   : > { %5095 = vmatpush1.bf16.msra.mxu1 %v7774_v5  ;;  %v7870_v5 = vld [vmem:[%s8395_s22 + $0x7e0] ss:$8 sps:$4 sm:$0xff]  }
 0x1fa   : > { %5568 = vmatpush1.bf16.msra.mxu0 %v7777_v6  ;;  %5107 = vmatprep.subr.bf16.mxu1 %v7785_v7  ;;  %v7873_v6 = vld [vmem:[%s8395_s22 + $0x12e0] ss:$8 sps:$4 sm:$0xff]   ;;  %v7878_v7 = vld [vmem:[%s8395_s22 + $0x7f4] ss:$8 sps:$4 sm:$0xff]  }
 0x1fb   : > { %5580 = vmatprep.subr.bf16.mxu0 %v7791_v8  ;;  %v7881_v8 = vld [vmem:[%s8395_s22 + $0x12f4] ss:$8 sps:$4 sm:$0xff]  }
 0x1fc   : > { %5097 = vmatmul.mubr.bf16.vlgmr.msra.gmra.mrb[0].mxu1 %v7780_v9  ;;  %v7876_v9 = vld [vmem:[%s8395_s22 + $0x7f0] ss:$8 sps:$4 sm:$0xff]  }
 0x1fd   : > { %5570 = vmatmul.mubr.bf16.vlgmr.msra.gmra.mrb[0].mxu0 %v7786_v10  ;;  %5108 = vmatpush1.bf16.msra.mxu1 %v7783_v11  ;;  %v7879_v10 = vld [vmem:[%s8395_s22 + $0x12f0] ss:$8 sps:$4 sm:$0xff]   ;;  %v7887_v11 = vld [vmem:[%s8395_s22 + $0x804] ss:$8 sps:$4 sm:$0xff]  }
 0x1fe   : > { %5581 = vmatpush1.bf16.msra.mxu0 %v7789_v12  ;;  %5109 = vmatprep.subr.bf16.mxu1 %v7794_v13  ;;  %v7893_v12 = vld [vmem:[%s8395_s22 + $0x1304] ss:$8 sps:$4 sm:$0xff]  }
 0x1ff   : > { %5582 = vmatprep.subr.bf16.mxu0 %v7797_v14  ;;  %5139 = vmatprep.mubr.bf16.mxu1 %v7884_v15  ;;  %v7882_v13 = vld [vmem:[%s8397_s23 + $0x38] ss:$172 sps:$4 sm:$0xff]   ;;  %v7888_v14 = vld [vmem:[%s8397_s23 + $0x90] ss:$172 sps:$4 sm:$0xff]  }
 0x200   : > { %5612 = vmatprep.mubr.bf16.mxu0 %v7890_v16  ;;  %v7885_v15 = vld [vmem:[%s8395_s22 + $0x800] ss:$8 sps:$4 sm:$0xff]  }
 0x201   : > { %5110 = vmatpush1.bf16.msra.mxu1 %v7792_v17  ;;  %v7891_v16 = vld [vmem:[%s8395_s22 + $0x1300] ss:$8 sps:$4 sm:$0xff]   ;;  %v7896_v17 = vld [vmem:[%s8395_s22 + $0x814] ss:$8 sps:$4 sm:$0xff]  }
 0x202   : > { %5583 = vmatpush1.bf16.msra.mxu0 %v7795_v18  ;;  %5111 = vmatprep.subr.bf16.mxu1 %v7800_v19  ;;  %v7899_v18 = vld [vmem:[%s8395_s22 + $0x1314] ss:$8 sps:$4 sm:$0xff]  }
 0x203   : > { %5584 = vmatprep.subr.bf16.mxu0 %v7803_v20  ;;  %v7986_v19 = vld [vmem:[%s8397_s23 + $0x44] ss:$172 sps:$4 sm:$0xff]   ;;  %v7992_v20 = vld [vmem:[%s8397_s23 + $0x9c] ss:$172 sps:$4 sm:$0xff]  }
 0x205   : > { %5112 = vmatpush1.bf16.msra.mxu1 %v7798_v21  ;;  %v7894_v21 = vld [vmem:[%s8395_s22 + $0x810] ss:$8 sps:$4 sm:$0xff]  }
 0x206   : > { %5585 = vmatpush1.bf16.msra.mxu0 %v7801_v22  ;;  %5113 = vmatprep.subr.bf16.mxu1 %v7806_v23  ;;  %v7897_v22 = vld [vmem:[%s8395_s22 + $0x1310] ss:$8 sps:$4 sm:$0xff]   ;;  %v7902_v23 = vld [vmem:[%s8395_s22 + $0x824] ss:$8 sps:$4 sm:$0xff]  }
 0x207   : > { %5586 = vmatprep.subr.bf16.mxu0 %v7809_v24  ;;  %v7905_v24 = vld [vmem:[%s8395_s22 + $0x1324] ss:$8 sps:$4 sm:$0xff]  }
 0x209   : > { %5114 = vmatpush1.bf16.msra.mxu1 %v7804_v25  ;;  %v7900_v25 = vld [vmem:[%s8395_s22 + $0x820] ss:$8 sps:$4 sm:$0xff]  }
 0x20a   : > { %5587 = vmatpush1.bf16.msra.mxu0 %v7807_v26  ;;  %5115 = vmatprep.subr.bf16.mxu1 %v7812_v27  ;;  %v7903_v26 = vld [vmem:[%s8395_s22 + $0x1320] ss:$8 sps:$4 sm:$0xff]   ;;  %v7908_v27 = vld [vmem:[%s8395_s22 + $0x834] ss:$8 sps:$4 sm:$0xff]  }
 0x20b   : > { %5588 = vmatprep.subr.bf16.mxu0 %v7815_v28  ;;  %v7911_v28 = vld [vmem:[%s8395_s22 + $0x1334] ss:$8 sps:$4 sm:$0xff]  }
 0x20d   : > { %5116 = vmatpush1.bf16.msra.mxu1 %v7810_v29  ;;  %v7906_v29 = vld [vmem:[%s8395_s22 + $0x830] ss:$8 sps:$4 sm:$0xff]  }
 0x20e   : > { %5589 = vmatpush1.bf16.msra.mxu0 %v7813_v30  ;;  %5117 = vmatprep.subr.bf16.mxu1 %v7818_v31  ;;  %v7909_v30 = vld [vmem:[%s8395_s22 + $0x1330] ss:$8 sps:$4 sm:$0xff]   ;;  %v7914_v31 = vld [vmem:[%s8395_s22 + $0x844] ss:$8 sps:$4 sm:$0xff]  }
 0x20f   : > { %5590 = vmatprep.subr.bf16.mxu0 %v7821_v32  ;;  %v7917_v32 = vld [vmem:[%s8395_s22 + $0x1344] ss:$8 sps:$4 sm:$0xff]  }
 0x211   : > { %5118 = vmatpush1.bf16.msra.mxu1 %v7816_v33  ;;  %v7912_v33 = vld [vmem:[%s8395_s22 + $0x840] ss:$8 sps:$4 sm:$0xff]  }
 0x212   : > { %5591 = vmatpush1.bf16.msra.mxu0 %v7819_v34  ;;  %5119 = vmatprep.subr.bf16.mxu1 %v7824_v35  ;;  %v7915_v34 = vld [vmem:[%s8395_s22 + $0x1340] ss:$8 sps:$4 sm:$0xff]   ;;  %v7920_v35 = vld [vmem:[%s8395_s22 + $0x854] ss:$8 sps:$4 sm:$0xff]  }
 0x213   : > { %5592 = vmatprep.subr.bf16.mxu0 %v7827_v36  ;;  %v7923_v36 = vld [vmem:[%s8395_s22 + $0x1354] ss:$8 sps:$4 sm:$0xff]  }
 0x215   : > { %5120 = vmatpush1.bf16.msra.mxu1 %v7822_v37  ;;  %v7918_v37 = vld [vmem:[%s8395_s22 + $0x850] ss:$8 sps:$4 sm:$0xff]  }
 0x216   : > { %5593 = vmatpush1.bf16.msra.mxu0 %v7825_v38  ;;  %5121 = vmatprep.subr.bf16.mxu1 %v7830_v39  ;;  %v7921_v38 = vld [vmem:[%s8395_s22 + $0x1350] ss:$8 sps:$4 sm:$0xff]   ;;  %v7926_v39 = vld [vmem:[%s8395_s22 + $0x864] ss:$8 sps:$4 sm:$0xff]  }
 0x217   : > { %5594 = vmatprep.subr.bf16.mxu0 %v7833_v40  ;;  %v7929_v40 = vld [vmem:[%s8395_s22 + $0x1364] ss:$8 sps:$4 sm:$0xff]  }
 0x219   : > { %5122 = vmatpush1.bf16.msra.mxu1 %v7828_v41  ;;  %v7924_v41 = vld [vmem:[%s8395_s22 + $0x860] ss:$8 sps:$4 sm:$0xff]  }
 0x21a   : > { %5595 = vmatpush1.bf16.msra.mxu0 %v7831_v42  ;;  %5123 = vmatprep.subr.bf16.mxu1 %v7836_v43  ;;  %v7927_v42 = vld [vmem:[%s8395_s22 + $0x1360] ss:$8 sps:$4 sm:$0xff]   ;;  %v7932_v43 = vld [vmem:[%s8395_s22 + $0x874] ss:$8 sps:$4 sm:$0xff]  }
 0x21b   : > { %5596 = vmatprep.subr.bf16.mxu0 %v7839_v44  ;;  %v7935_v44 = vld [vmem:[%s8395_s22 + $0x1374] ss:$8 sps:$4 sm:$0xff]  }
 0x21d   : > { %5124 = vmatpush1.bf16.msra.mxu1 %v7834_v45  ;;  %v7930_v45 = vld [vmem:[%s8395_s22 + $0x870] ss:$8 sps:$4 sm:$0xff]  }
 0x21e   : > { %5597 = vmatpush1.bf16.msra.mxu0 %v7837_v46  ;;  %5125 = vmatprep.subr.bf16.mxu1 %v7842_v47  ;;  %v7933_v46 = vld [vmem:[%s8395_s22 + $0x1370] ss:$8 sps:$4 sm:$0xff]   ;;  %v7938_v47 = vld [vmem:[%s8395_s22 + $0x884] ss:$8 sps:$4 sm:$0xff]  }
 0x21f   : > { %5598 = vmatprep.subr.bf16.mxu0 %v7845_v48  ;;  %v7941_v48 = vld [vmem:[%s8395_s22 + $0x1384] ss:$8 sps:$4 sm:$0xff]  }
 0x221   : > { %5126 = vmatpush1.bf16.msra.mxu1 %v7840_v49  ;;  %v7936_v49 = vld [vmem:[%s8395_s22 + $0x880] ss:$8 sps:$4 sm:$0xff]  }
 0x222   : > { %5599 = vmatpush1.bf16.msra.mxu0 %v7843_v50  ;;  %5127 = vmatprep.subr.bf16.mxu1 %v7848_v51  ;;  %v7939_v50 = vld [vmem:[%s8395_s22 + $0x1380] ss:$8 sps:$4 sm:$0xff]   ;;  %v7944_v51 = vld [vmem:[%s8395_s22 + $0x894] ss:$8 sps:$4 sm:$0xff]  }
 0x223   : > { %5600 = vmatprep.subr.bf16.mxu0 %v7851_v52  ;;  %v7947_v52 = vld [vmem:[%s8395_s22 + $0x1394] ss:$8 sps:$4 sm:$0xff]  }
 0x225   : > { %5128 = vmatpush1.bf16.msra.mxu1 %v7846_v53  ;;  %v7942_v53 = vld [vmem:[%s8395_s22 + $0x890] ss:$8 sps:$4 sm:$0xff]  }
 0x226   : > { %5601 = vmatpush1.bf16.msra.mxu0 %v7849_v54  ;;  %5129 = vmatprep.subr.bf16.mxu1 %v7854_v55  ;;  %v7945_v54 = vld [vmem:[%s8395_s22 + $0x1390] ss:$8 sps:$4 sm:$0xff]   ;;  %v7950_v55 = vld [vmem:[%s8395_s22 + $0x8a4] ss:$8 sps:$4 sm:$0xff]  }
 0x227   : > { %5602 = vmatprep.subr.bf16.mxu0 %v7857_v56  ;;  %v7953_v56 = vld [vmem:[%s8395_s22 + $0x13a4] ss:$8 sps:$4 sm:$0xff]  }
 0x229   : > { %5130 = vmatpush1.bf16.msra.mxu1 %v7852_v57  ;;  %v7948_v57 = vld [vmem:[%s8395_s22 + $0x8a0] ss:$8 sps:$4 sm:$0xff]  }
 0x22a   : > { %5603 = vmatpush1.bf16.msra.mxu0 %v7855_v58  ;;  %5131 = vmatprep.subr.bf16.mxu1 %v7860_v59  ;;  %v7951_v58 = vld [vmem:[%s8395_s22 + $0x13a0] ss:$8 sps:$4 sm:$0xff]   ;;  %v7956_v59 = vld [vmem:[%s8395_s22 + $0x8b4] ss:$8 sps:$4 sm:$0xff]  }
 0x22b   : > { %5604 = vmatprep.subr.bf16.mxu0 %v7863_v60  ;;  %v7959_v60 = vld [vmem:[%s8395_s22 + $0x13b4] ss:$8 sps:$4 sm:$0xff]  }
 0x22d   : > { %5132 = vmatpush1.bf16.msra.mxu1 %v7858_v61  ;;  %v7954_v61 = vld [vmem:[%s8395_s22 + $0x8b0] ss:$8 sps:$4 sm:$0xff]  }
 0x22e   : > { %5605 = vmatpush1.bf16.msra.mxu0 %v7861_v62  ;;  %5133 = vmatprep.subr.bf16.mxu1 %v7866_v63  ;;  %v7957_v62 = vld [vmem:[%s8395_s22 + $0x13b0] ss:$8 sps:$4 sm:$0xff]   ;;  %v7962_v63 = vld [vmem:[%s8395_s22 + $0x8c4] ss:$8 sps:$4 sm:$0xff]  }
 0x22f   : > { %5606 = vmatprep.subr.bf16.mxu0 %v7869_v0  ;;  %v7965_v0 = vld [vmem:[%s8395_s22 + $0x13c4] ss:$8 sps:$4 sm:$0xff]  }
 0x231   : > { %5134 = vmatpush1.bf16.msra.mxu1 %v7864_v1  ;;  %v7960_v1 = vld [vmem:[%s8395_s22 + $0x8c0] ss:$8 sps:$4 sm:$0xff]  }
 0x232   : > { %5607 = vmatpush1.bf16.msra.mxu0 %v7867_v2  ;;  %5135 = vmatprep.subr.bf16.mxu1 %v7872_v3  ;;  %v7963_v2 = vld [vmem:[%s8395_s22 + $0x13c0] ss:$8 sps:$4 sm:$0xff]   ;;  %v7968_v3 = vld [vmem:[%s8395_s22 + $0x8d4] ss:$8 sps:$4 sm:$0xff]  }
 0x233   : > { %5608 = vmatprep.subr.bf16.mxu0 %v7875_v4  ;;  %v7971_v4 = vld [vmem:[%s8395_s22 + $0x13d4] ss:$8 sps:$4 sm:$0xff]  }
 0x235   : > { %5136 = vmatpush1.bf16.msra.mxu1 %v7870_v5  ;;  %v7966_v5 = vld [vmem:[%s8395_s22 + $0x8d0] ss:$8 sps:$4 sm:$0xff]  }
 0x236   : > { %5609 = vmatpush1.bf16.msra.mxu0 %v7873_v6  ;;  %5137 = vmatprep.subr.bf16.mxu1 %v7878_v7  ;;  %v7969_v6 = vld [vmem:[%s8395_s22 + $0x13d0] ss:$8 sps:$4 sm:$0xff]   ;;  %v7974_v7 = vld [vmem:[%s8395_s22 + $0x8e4] ss:$8 sps:$4 sm:$0xff]  }
 0x237   : > { %5610 = vmatprep.subr.bf16.mxu0 %v7881_v8  ;;  %v7977_v8 = vld [vmem:[%s8395_s22 + $0x13e4] ss:$8 sps:$4 sm:$0xff]  }
 0x239   : > { %5138 = vmatpush1.bf16.msra.mxu1 %v7876_v9  ;;  %v7972_v9 = vld [vmem:[%s8395_s22 + $0x8e0] ss:$8 sps:$4 sm:$0xff]  }
 0x23a   : > { %5611 = vmatpush1.bf16.msra.mxu0 %v7879_v10  ;;  %5150 = vmatprep.subr.bf16.mxu1 %v7887_v11  ;;  %v7975_v10 = vld [vmem:[%s8395_s22 + $0x13e0] ss:$8 sps:$4 sm:$0xff]   ;;  %v7980_v11 = vld [vmem:[%s8395_s22 + $0x8f4] ss:$8 sps:$4 sm:$0xff]  }
 0x23b   : > { %5623 = vmatprep.subr.bf16.mxu0 %v7893_v12  ;;  %v7983_v12 = vld [vmem:[%s8395_s22 + $0x13f4] ss:$8 sps:$4 sm:$0xff]  }
 0x23c   : > { %5140 = vmatmul.mubr.bf16.vlgmr.msra.gmra.mrb[0].mxu1 %v7882_v13  ;;  %v7978_v13 = vld [vmem:[%s8395_s22 + $0x8f0] ss:$8 sps:$4 sm:$0xff]  }
 0x23d   : > { %5613 = vmatmul.mubr.bf16.vlgmr.msra.gmra.mrb[0].mxu0 %v7888_v14  ;;  %5151 = vmatpush1.bf16.msra.mxu1 %v7885_v15  ;;  %v7981_v14 = vld [vmem:[%s8395_s22 + $0x13f0] ss:$8 sps:$4 sm:$0xff]   ;;  %v7989_v15 = vld [vmem:[%s8395_s22 + $0x904] ss:$8 sps:$4 sm:$0xff]  }
 0x23e   : > { %5624 = vmatpush1.bf16.msra.mxu0 %v7891_v16  ;;  %5152 = vmatprep.subr.bf16.mxu1 %v7896_v17  ;;  %v7995_v16 = vld [vmem:[%s8395_s22 + $0x1404] ss:$8 sps:$4 sm:$0xff]  }
 0x23f   : > { %5625 = vmatprep.subr.bf16.mxu0 %v7899_v18  ;;  %5182 = vmatprep.mubr.bf16.mxu1 %v7986_v19  ;;  %v7984_v17 = vld [vmem:[%s8397_s23 + $0x40] ss:$172 sps:$4 sm:$0xff]   ;;  %v7990_v18 = vld [vmem:[%s8397_s23 + $0x98] ss:$172 sps:$4 sm:$0xff]  }
 0x240   : > { %5655 = vmatprep.mubr.bf16.mxu0 %v7992_v20  ;;  %v7987_v19 = vld [vmem:[%s8395_s22 + $0x900] ss:$8 sps:$4 sm:$0xff]  }
 0x241   : > { %5153 = vmatpush1.bf16.msra.mxu1 %v7894_v21  ;;  %v7993_v20 = vld [vmem:[%s8395_s22 + $0x1400] ss:$8 sps:$4 sm:$0xff]   ;;  %v7998_v21 = vld [vmem:[%s8395_s22 + $0x914] ss:$8 sps:$4 sm:$0xff]  }
 0x242   : > { %5626 = vmatpush1.bf16.msra.mxu0 %v7897_v22  ;;  %5154 = vmatprep.subr.bf16.mxu1 %v7902_v23  ;;  %v8001_v22 = vld [vmem:[%s8395_s22 + $0x1414] ss:$8 sps:$4 sm:$0xff]   ;;  %v8088_v23 = vld [vmem:[%s8397_s23 + $0x4c] ss:$172 sps:$4 sm:$0xff]  }
 0x243   : > { %5627 = vmatprep.subr.bf16.mxu0 %v7905_v24  ;;  %v8094_v24 = vld [vmem:[%s8397_s23 + $0xa4] ss:$172 sps:$4 sm:$0xff]  }
 0x245   : > { %5155 = vmatpush1.bf16.msra.mxu1 %v7900_v25  ;;  %v7996_v25 = vld [vmem:[%s8395_s22 + $0x910] ss:$8 sps:$4 sm:$0xff]  }
 0x246   : > { %5628 = vmatpush1.bf16.msra.mxu0 %v7903_v26  ;;  %5156 = vmatprep.subr.bf16.mxu1 %v7908_v27  ;;  %v7999_v26 = vld [vmem:[%s8395_s22 + $0x1410] ss:$8 sps:$4 sm:$0xff]   ;;  %v8004_v27 = vld [vmem:[%s8395_s22 + $0x924] ss:$8 sps:$4 sm:$0xff]  }
 0x247   : > { %5629 = vmatprep.subr.bf16.mxu0 %v7911_v28  ;;  %v8007_v28 = vld [vmem:[%s8395_s22 + $0x1424] ss:$8 sps:$4 sm:$0xff]  }
 0x249   : > { %5157 = vmatpush1.bf16.msra.mxu1 %v7906_v29  ;;  %v8002_v29 = vld [vmem:[%s8395_s22 + $0x920] ss:$8 sps:$4 sm:$0xff]  }
 0x24a   : > { %5630 = vmatpush1.bf16.msra.mxu0 %v7909_v30  ;;  %5158 = vmatprep.subr.bf16.mxu1 %v7914_v31  ;;  %v8005_v30 = vld [vmem:[%s8395_s22 + $0x1420] ss:$8 sps:$4 sm:$0xff]   ;;  %v8010_v31 = vld [vmem:[%s8395_s22 + $0x934] ss:$8 sps:$4 sm:$0xff]  }
 0x24b   : > { %5631 = vmatprep.subr.bf16.mxu0 %v7917_v32  ;;  %v8013_v32 = vld [vmem:[%s8395_s22 + $0x1434] ss:$8 sps:$4 sm:$0xff]  }
 0x24d   : > { %5159 = vmatpush1.bf16.msra.mxu1 %v7912_v33  ;;  %v8008_v33 = vld [vmem:[%s8395_s22 + $0x930] ss:$8 sps:$4 sm:$0xff]  }
 0x24e   : > { %5632 = vmatpush1.bf16.msra.mxu0 %v7915_v34  ;;  %5160 = vmatprep.subr.bf16.mxu1 %v7920_v35  ;;  %v8011_v34 = vld [vmem:[%s8395_s22 + $0x1430] ss:$8 sps:$4 sm:$0xff]   ;;  %v8016_v35 = vld [vmem:[%s8395_s22 + $0x944] ss:$8 sps:$4 sm:$0xff]  }
 0x24f   : > { %5633 = vmatprep.subr.bf16.mxu0 %v7923_v36  ;;  %v8019_v36 = vld [vmem:[%s8395_s22 + $0x1444] ss:$8 sps:$4 sm:$0xff]  }
 0x251   : > { %5161 = vmatpush1.bf16.msra.mxu1 %v7918_v37  ;;  %v8014_v37 = vld [vmem:[%s8395_s22 + $0x940] ss:$8 sps:$4 sm:$0xff]  }
 0x252   : > { %5634 = vmatpush1.bf16.msra.mxu0 %v7921_v38  ;;  %5162 = vmatprep.subr.bf16.mxu1 %v7926_v39  ;;  %v8017_v38 = vld [vmem:[%s8395_s22 + $0x1440] ss:$8 sps:$4 sm:$0xff]   ;;  %v8022_v39 = vld [vmem:[%s8395_s22 + $0x954] ss:$8 sps:$4 sm:$0xff]  }
 0x253   : > { %5635 = vmatprep.subr.bf16.mxu0 %v7929_v40  ;;  %v8025_v40 = vld [vmem:[%s8395_s22 + $0x1454] ss:$8 sps:$4 sm:$0xff]  }
 0x255   : > { %5163 = vmatpush1.bf16.msra.mxu1 %v7924_v41  ;;  %v8020_v41 = vld [vmem:[%s8395_s22 + $0x950] ss:$8 sps:$4 sm:$0xff]  }
 0x256   : > { %5636 = vmatpush1.bf16.msra.mxu0 %v7927_v42  ;;  %5164 = vmatprep.subr.bf16.mxu1 %v7932_v43  ;;  %v8023_v42 = vld [vmem:[%s8395_s22 + $0x1450] ss:$8 sps:$4 sm:$0xff]   ;;  %v8028_v43 = vld [vmem:[%s8395_s22 + $0x964] ss:$8 sps:$4 sm:$0xff]  }
 0x257   : > { %5637 = vmatprep.subr.bf16.mxu0 %v7935_v44  ;;  %v8031_v44 = vld [vmem:[%s8395_s22 + $0x1464] ss:$8 sps:$4 sm:$0xff]  }
 0x259   : > { %5165 = vmatpush1.bf16.msra.mxu1 %v7930_v45  ;;  %v8026_v45 = vld [vmem:[%s8395_s22 + $0x960] ss:$8 sps:$4 sm:$0xff]  }
 0x25a   : > { %5638 = vmatpush1.bf16.msra.mxu0 %v7933_v46  ;;  %5166 = vmatprep.subr.bf16.mxu1 %v7938_v47  ;;  %v8029_v46 = vld [vmem:[%s8395_s22 + $0x1460] ss:$8 sps:$4 sm:$0xff]   ;;  %v8034_v47 = vld [vmem:[%s8395_s22 + $0x974] ss:$8 sps:$4 sm:$0xff]  }
 0x25b   : > { %5639 = vmatprep.subr.bf16.mxu0 %v7941_v48  ;;  %v8037_v48 = vld [vmem:[%s8395_s22 + $0x1474] ss:$8 sps:$4 sm:$0xff]  }
 0x25d   : > { %5167 = vmatpush1.bf16.msra.mxu1 %v7936_v49  ;;  %v8032_v49 = vld [vmem:[%s8395_s22 + $0x970] ss:$8 sps:$4 sm:$0xff]  }
 0x25e   : > { %5640 = vmatpush1.bf16.msra.mxu0 %v7939_v50  ;;  %5168 = vmatprep.subr.bf16.mxu1 %v7944_v51  ;;  %v8035_v50 = vld [vmem:[%s8395_s22 + $0x1470] ss:$8 sps:$4 sm:$0xff]   ;;  %v8040_v51 = vld [vmem:[%s8395_s22 + $0x984] ss:$8 sps:$4 sm:$0xff]  }
 0x25f   : > { %5641 = vmatprep.subr.bf16.mxu0 %v7947_v52  ;;  %v8043_v52 = vld [vmem:[%s8395_s22 + $0x1484] ss:$8 sps:$4 sm:$0xff]  }
 0x261   : > { %5169 = vmatpush1.bf16.msra.mxu1 %v7942_v53  ;;  %v8038_v53 = vld [vmem:[%s8395_s22 + $0x980] ss:$8 sps:$4 sm:$0xff]  }
 0x262   : > { %5642 = vmatpush1.bf16.msra.mxu0 %v7945_v54  ;;  %5170 = vmatprep.subr.bf16.mxu1 %v7950_v55  ;;  %v8041_v54 = vld [vmem:[%s8395_s22 + $0x1480] ss:$8 sps:$4 sm:$0xff]   ;;  %v8046_v55 = vld [vmem:[%s8395_s22 + $0x994] ss:$8 sps:$4 sm:$0xff]  }
 0x263   : > { %5643 = vmatprep.subr.bf16.mxu0 %v7953_v56  ;;  %v8049_v56 = vld [vmem:[%s8395_s22 + $0x1494] ss:$8 sps:$4 sm:$0xff]  }
 0x265   : > { %5171 = vmatpush1.bf16.msra.mxu1 %v7948_v57  ;;  %v8044_v57 = vld [vmem:[%s8395_s22 + $0x990] ss:$8 sps:$4 sm:$0xff]  }
 0x266   : > { %5644 = vmatpush1.bf16.msra.mxu0 %v7951_v58  ;;  %5172 = vmatprep.subr.bf16.mxu1 %v7956_v59  ;;  %v8047_v58 = vld [vmem:[%s8395_s22 + $0x1490] ss:$8 sps:$4 sm:$0xff]   ;;  %v8052_v59 = vld [vmem:[%s8395_s22 + $0x9a4] ss:$8 sps:$4 sm:$0xff]  }
 0x267   : > { %5645 = vmatprep.subr.bf16.mxu0 %v7959_v60  ;;  %v8055_v60 = vld [vmem:[%s8395_s22 + $0x14a4] ss:$8 sps:$4 sm:$0xff]  }
 0x269   : > { %5173 = vmatpush1.bf16.msra.mxu1 %v7954_v61  ;;  %v8050_v61 = vld [vmem:[%s8395_s22 + $0x9a0] ss:$8 sps:$4 sm:$0xff]  }
 0x26a   : > { %5646 = vmatpush1.bf16.msra.mxu0 %v7957_v62  ;;  %5174 = vmatprep.subr.bf16.mxu1 %v7962_v63  ;;  %v8053_v62 = vld [vmem:[%s8395_s22 + $0x14a0] ss:$8 sps:$4 sm:$0xff]   ;;  %v8058_v63 = vld [vmem:[%s8395_s22 + $0x9b4] ss:$8 sps:$4 sm:$0xff]  }
 0x26b   : > { %5647 = vmatprep.subr.bf16.mxu0 %v7965_v0  ;;  %v8061_v0 = vld [vmem:[%s8395_s22 + $0x14b4] ss:$8 sps:$4 sm:$0xff]  }
 0x26d   : > { %5175 = vmatpush1.bf16.msra.mxu1 %v7960_v1  ;;  %v8056_v1 = vld [vmem:[%s8395_s22 + $0x9b0] ss:$8 sps:$4 sm:$0xff]  }
 0x26e   : > { %5648 = vmatpush1.bf16.msra.mxu0 %v7963_v2  ;;  %5176 = vmatprep.subr.bf16.mxu1 %v7968_v3  ;;  %v8059_v2 = vld [vmem:[%s8395_s22 + $0x14b0] ss:$8 sps:$4 sm:$0xff]   ;;  %v8064_v3 = vld [vmem:[%s8395_s22 + $0x9c4] ss:$8 sps:$4 sm:$0xff]  }
 0x26f   : > { %5649 = vmatprep.subr.bf16.mxu0 %v7971_v4  ;;  %v8067_v4 = vld [vmem:[%s8395_s22 + $0x14c4] ss:$8 sps:$4 sm:$0xff]  }
 0x271   : > { %5177 = vmatpush1.bf16.msra.mxu1 %v7966_v5  ;;  %v8062_v5 = vld [vmem:[%s8395_s22 + $0x9c0] ss:$8 sps:$4 sm:$0xff]  }
 0x272   : > { %5650 = vmatpush1.bf16.msra.mxu0 %v7969_v6  ;;  %5178 = vmatprep.subr.bf16.mxu1 %v7974_v7  ;;  %v8065_v6 = vld [vmem:[%s8395_s22 + $0x14c0] ss:$8 sps:$4 sm:$0xff]   ;;  %v8070_v7 = vld [vmem:[%s8395_s22 + $0x9d4] ss:$8 sps:$4 sm:$0xff]  }
 0x273   : > { %5651 = vmatprep.subr.bf16.mxu0 %v7977_v8  ;;  %v8073_v8 = vld [vmem:[%s8395_s22 + $0x14d4] ss:$8 sps:$4 sm:$0xff]  }
 0x275   : > { %5179 = vmatpush1.bf16.msra.mxu1 %v7972_v9  ;;  %v8068_v9 = vld [vmem:[%s8395_s22 + $0x9d0] ss:$8 sps:$4 sm:$0xff]  }
 0x276   : > { %5652 = vmatpush1.bf16.msra.mxu0 %v7975_v10  ;;  %5180 = vmatprep.subr.bf16.mxu1 %v7980_v11  ;;  %v8071_v10 = vld [vmem:[%s8395_s22 + $0x14d0] ss:$8 sps:$4 sm:$0xff]   ;;  %v8076_v11 = vld [vmem:[%s8395_s22 + $0x9e4] ss:$8 sps:$4 sm:$0xff]  }
 0x277   : > { %5653 = vmatprep.subr.bf16.mxu0 %v7983_v12  ;;  %v8079_v12 = vld [vmem:[%s8395_s22 + $0x14e4] ss:$8 sps:$4 sm:$0xff]  }
 0x279   : > { %5181 = vmatpush1.bf16.msra.mxu1 %v7978_v13  ;;  %v8074_v13 = vld [vmem:[%s8395_s22 + $0x9e0] ss:$8 sps:$4 sm:$0xff]  }
 0x27a   : > { %5654 = vmatpush1.bf16.msra.mxu0 %v7981_v14  ;;  %5193 = vmatprep.subr.bf16.mxu1 %v7989_v15  ;;  %v8077_v14 = vld [vmem:[%s8395_s22 + $0x14e0] ss:$8 sps:$4 sm:$0xff]   ;;  %v8082_v15 = vld [vmem:[%s8395_s22 + $0x9f4] ss:$8 sps:$4 sm:$0xff]  }
 0x27b   : > { %5666 = vmatprep.subr.bf16.mxu0 %v7995_v16  ;;  %v8085_v16 = vld [vmem:[%s8395_s22 + $0x14f4] ss:$8 sps:$4 sm:$0xff]  }
 0x27c   : > { %5183 = vmatmul.mubr.bf16.vlgmr.msra.gmra.mrb[0].mxu1 %v7984_v17  ;;  %v8080_v17 = vld [vmem:[%s8395_s22 + $0x9f0] ss:$8 sps:$4 sm:$0xff]  }
 0x27d   : > { %5656 = vmatmul.mubr.bf16.vlgmr.msra.gmra.mrb[0].mxu0 %v7990_v18  ;;  %5194 = vmatpush1.bf16.msra.mxu1 %v7987_v19  ;;  %v8083_v18 = vld [vmem:[%s8395_s22 + $0x14f0] ss:$8 sps:$4 sm:$0xff]   ;;  %v8091_v19 = vld [vmem:[%s8395_s22 + $0xa04] ss:$8 sps:$4 sm:$0xff]  }
 0x27e   : > { %5667 = vmatpush1.bf16.msra.mxu0 %v7993_v20  ;;  %5195 = vmatprep.subr.bf16.mxu1 %v7998_v21  ;;  %v8097_v20 = vld [vmem:[%s8395_s22 + $0x1504] ss:$8 sps:$4 sm:$0xff]  }
 0x27f   : > { %5668 = vmatprep.subr.bf16.mxu0 %v8001_v22  ;;  %5225 = vmatprep.mubr.bf16.mxu1 %v8088_v23  ;;  %v8086_v21 = vld [vmem:[%s8397_s23 + $0x48] ss:$172 sps:$4 sm:$0xff]   ;;  %v8092_v22 = vld [vmem:[%s8397_s23 + $0xa0] ss:$172 sps:$4 sm:$0xff]  }
 0x280   : > { %5698 = vmatprep.mubr.bf16.mxu0 %v8094_v24  ;;  %v8089_v23 = vld [vmem:[%s8395_s22 + $0xa00] ss:$8 sps:$4 sm:$0xff]  }
 0x281   : > { %5196 = vmatpush1.bf16.msra.mxu1 %v7996_v25  ;;  %v8095_v24 = vld [vmem:[%s8395_s22 + $0x1500] ss:$8 sps:$4 sm:$0xff]   ;;  %v8100_v25 = vld [vmem:[%s8395_s22 + $0xa14] ss:$8 sps:$4 sm:$0xff]  }
 0x282   : > { %5669 = vmatpush1.bf16.msra.mxu0 %v7999_v26  ;;  %5197 = vmatprep.subr.bf16.mxu1 %v8004_v27  ;;  %v8103_v26 = vld [vmem:[%s8395_s22 + $0x1514] ss:$8 sps:$4 sm:$0xff]  }
 0x283   : > { %5670 = vmatprep.subr.bf16.mxu0 %v8007_v28  ;;  %v8167_v27 = vld [vmem:[%s8397_s23 + $0x54] ss:$172 sps:$4 sm:$0xff]  }
 0x284   : > { %v8098_v28 = vld [vmem:[%s8395_s22 + $0xa10] ss:$8 sps:$4 sm:$0xff]  }
 0x285   : > { %5198 = vmatpush1.bf16.msra.mxu1 %v8002_v29  ;;  %v8101_v29 = vld [vmem:[%s8395_s22 + $0x1510] ss:$8 sps:$4 sm:$0xff]  }
 0x286   : > { %5671 = vmatpush1.bf16.msra.mxu0 %v8005_v30  ;;  %5199 = vmatprep.subr.bf16.mxu1 %v8010_v31  ;;  %v8106_v30 = vld [vmem:[%s8395_s22 + $0xa24] ss:$8 sps:$4 sm:$0xff]  }
 0x287   : > { %5672 = vmatprep.subr.bf16.mxu0 %v8013_v32  ;;  %v8109_v31 = vld [vmem:[%s8395_s22 + $0x1524] ss:$8 sps:$4 sm:$0xff]   ;;  %v8217_v32 = vmov 0  }
 0x289   : > { %5200 = vmatpush1.bf16.msra.mxu1 %v8008_v33  ;;  %v8104_v33 = vld [vmem:[%s8395_s22 + $0xa20] ss:$8 sps:$4 sm:$0xff]  }
 0x28a   : > { %5673 = vmatpush1.bf16.msra.mxu0 %v8011_v34  ;;  %5201 = vmatprep.subr.bf16.mxu1 %v8016_v35  ;;  %v8107_v34 = vld [vmem:[%s8395_s22 + $0x1520] ss:$8 sps:$4 sm:$0xff]   ;;  %v8112_v35 = vld [vmem:[%s8395_s22 + $0xa34] ss:$8 sps:$4 sm:$0xff]  }
 0x28b   : > { %5674 = vmatprep.subr.bf16.mxu0 %v8019_v36  ;;  %v8115_v36 = vld [vmem:[%s8395_s22 + $0x1534] ss:$8 sps:$4 sm:$0xff]  }
 0x28d   : > { %5202 = vmatpush1.bf16.msra.mxu1 %v8014_v37  ;;  %v8110_v37 = vld [vmem:[%s8395_s22 + $0xa30] ss:$8 sps:$4 sm:$0xff]  }
 0x28e   : > { %5675 = vmatpush1.bf16.msra.mxu0 %v8017_v38  ;;  %5203 = vmatprep.subr.bf16.mxu1 %v8022_v39  ;;  %v8113_v38 = vld [vmem:[%s8395_s22 + $0x1530] ss:$8 sps:$4 sm:$0xff]   ;;  %v8118_v39 = vld [vmem:[%s8395_s22 + $0xa44] ss:$8 sps:$4 sm:$0xff]  }
 0x28f   : > { %5676 = vmatprep.subr.bf16.mxu0 %v8025_v40  ;;  %v8121_v40 = vld [vmem:[%s8395_s22 + $0x1544] ss:$8 sps:$4 sm:$0xff]  }
 0x291   : > { %5204 = vmatpush1.bf16.msra.mxu1 %v8020_v41  ;;  %v8116_v41 = vld [vmem:[%s8395_s22 + $0xa40] ss:$8 sps:$4 sm:$0xff]  }
 0x292   : > { %5677 = vmatpush1.bf16.msra.mxu0 %v8023_v42  ;;  %5205 = vmatprep.subr.bf16.mxu1 %v8028_v43  ;;  %v8119_v42 = vld [vmem:[%s8395_s22 + $0x1540] ss:$8 sps:$4 sm:$0xff]   ;;  %v8124_v43 = vld [vmem:[%s8395_s22 + $0xa54] ss:$8 sps:$4 sm:$0xff]  }
 0x293   : > { %5678 = vmatprep.subr.bf16.mxu0 %v8031_v44  ;;  %v8127_v44 = vld [vmem:[%s8395_s22 + $0x1554] ss:$8 sps:$4 sm:$0xff]  }
 0x295   : > { %5206 = vmatpush1.bf16.msra.mxu1 %v8026_v45  ;;  %v8122_v45 = vld [vmem:[%s8395_s22 + $0xa50] ss:$8 sps:$4 sm:$0xff]  }
 0x296   : > { %5679 = vmatpush1.bf16.msra.mxu0 %v8029_v46  ;;  %5207 = vmatprep.subr.bf16.mxu1 %v8034_v47  ;;  %v8125_v46 = vld [vmem:[%s8395_s22 + $0x1550] ss:$8 sps:$4 sm:$0xff]   ;;  %v8130_v47 = vld [vmem:[%s8395_s22 + $0xa64] ss:$8 sps:$4 sm:$0xff]  }
 0x297   : > { %5680 = vmatprep.subr.bf16.mxu0 %v8037_v48  ;;  %v8133_v48 = vld [vmem:[%s8395_s22 + $0x1564] ss:$8 sps:$4 sm:$0xff]  }
 0x299   : > { %5208 = vmatpush1.bf16.msra.mxu1 %v8032_v49  ;;  %v8128_v49 = vld [vmem:[%s8395_s22 + $0xa60] ss:$8 sps:$4 sm:$0xff]  }
 0x29a   : > { %5681 = vmatpush1.bf16.msra.mxu0 %v8035_v50  ;;  %5209 = vmatprep.subr.bf16.mxu1 %v8040_v51  ;;  %v8131_v50 = vld [vmem:[%s8395_s22 + $0x1560] ss:$8 sps:$4 sm:$0xff]   ;;  %v8136_v51 = vld [vmem:[%s8395_s22 + $0xa74] ss:$8 sps:$4 sm:$0xff]  }
 0x29b   : > { %5682 = vmatprep.subr.bf16.mxu0 %v8043_v52  ;;  %v8139_v52 = vld [vmem:[%s8395_s22 + $0x1574] ss:$8 sps:$4 sm:$0xff]  }
 0x29d   : > { %5210 = vmatpush1.bf16.msra.mxu1 %v8038_v53  ;;  %v8134_v53 = vld [vmem:[%s8395_s22 + $0xa70] ss:$8 sps:$4 sm:$0xff]  }
 0x29e   : > { %5683 = vmatpush1.bf16.msra.mxu0 %v8041_v54  ;;  %5211 = vmatprep.subr.bf16.mxu1 %v8046_v55  ;;  %v8137_v54 = vld [vmem:[%s8395_s22 + $0x1570] ss:$8 sps:$4 sm:$0xff]   ;;  %v8142_v55 = vld [vmem:[%s8395_s22 + $0xa84] ss:$8 sps:$4 sm:$0xff]  }
 0x29f   : > { %5684 = vmatprep.subr.bf16.mxu0 %v8049_v56  ;;  %v8143_v56 = vld [vmem:[%s8397_s23 + $0xa8] ss:$172 sps:$4 sm:$0xff]  }
 0x2a1   : > { %5212 = vmatpush1.bf16.msra.mxu1 %v8044_v57  ;;  %v8140_v57 = vld [vmem:[%s8395_s22 + $0xa80] ss:$8 sps:$4 sm:$0xff]  }
 0x2a2   : > { %5685 = vmatpush1.bf16.msra.mxu0 %v8047_v58  ;;  %5213 = vmatprep.subr.bf16.mxu1 %v8052_v59  ;;  %v8146_v58 = vld [vmem:[%s8395_s22 + $0xa94] ss:$8 sps:$4 sm:$0xff]   ;;  %v8144_v59 = vld [vmem:[%s8395_s22 + $0xa90] ss:$8 sps:$4 sm:$0xff]  }
 0x2a3   : > { %5686 = vmatprep.subr.bf16.mxu0 %v8055_v60  ;;  %v8149_v60 = vld [vmem:[%s8395_s22 + $0xaa4] ss:$8 sps:$4 sm:$0xff]  }
 0x2a5   : > { %5214 = vmatpush1.bf16.msra.mxu1 %v8050_v61  ;;  %v8147_v61 = vld [vmem:[%s8395_s22 + $0xaa0] ss:$8 sps:$4 sm:$0xff]  }
 0x2a6   : > { %5687 = vmatpush1.bf16.msra.mxu0 %v8053_v62  ;;  %5215 = vmatprep.subr.bf16.mxu1 %v8058_v63  ;;  %v8152_v62 = vld [vmem:[%s8395_s22 + $0xab4] ss:$8 sps:$4 sm:$0xff]   ;;  %v8150_v63 = vld [vmem:[%s8395_s22 + $0xab0] ss:$8 sps:$4 sm:$0xff]  }
 0x2a7   : > { %5688 = vmatprep.subr.bf16.mxu0 %v8061_v0  ;;  %v8155_v0 = vld [vmem:[%s8395_s22 + $0xac4] ss:$8 sps:$4 sm:$0xff]  }
 0x2a9   : > { %5216 = vmatpush1.bf16.msra.mxu1 %v8056_v1  ;;  %v8153_v1 = vld [vmem:[%s8395_s22 + $0xac0] ss:$8 sps:$4 sm:$0xff]  }
 0x2aa   : > { %5689 = vmatpush1.bf16.msra.mxu0 %v8059_v2  ;;  %5217 = vmatprep.subr.bf16.mxu1 %v8064_v3  ;;  %v8158_v2 = vld [vmem:[%s8395_s22 + $0xad4] ss:$8 sps:$4 sm:$0xff]   ;;  %v8156_v3 = vld [vmem:[%s8395_s22 + $0xad0] ss:$8 sps:$4 sm:$0xff]  }
 0x2ab   : > { %5690 = vmatprep.subr.bf16.mxu0 %v8067_v4  ;;  %v8161_v4 = vld [vmem:[%s8395_s22 + $0xae4] ss:$8 sps:$4 sm:$0xff]  }
 0x2ad   : > { %5218 = vmatpush1.bf16.msra.mxu1 %v8062_v5  ;;  %v8159_v5 = vld [vmem:[%s8395_s22 + $0xae0] ss:$8 sps:$4 sm:$0xff]  }
 0x2ae   : > { %5691 = vmatpush1.bf16.msra.mxu0 %v8065_v6  ;;  %5219 = vmatprep.subr.bf16.mxu1 %v8070_v7  ;;  %v8164_v6 = vld [vmem:[%s8395_s22 + $0xaf4] ss:$8 sps:$4 sm:$0xff]   ;;  %v8162_v7 = vld [vmem:[%s8395_s22 + $0xaf0] ss:$8 sps:$4 sm:$0xff]  }
 0x2af   : > { %5692 = vmatprep.subr.bf16.mxu0 %v8073_v8  ;;  %v8165_v8 = vld [vmem:[%s8397_s23 + $0x50] ss:$172 sps:$4 sm:$0xff]  }
 0x2b1   : > { %5220 = vmatpush1.bf16.msra.mxu1 %v8068_v9 }
 0x2b2   : > { %5693 = vmatpush1.bf16.msra.mxu0 %v8071_v10  ;;  %5221 = vmatprep.subr.bf16.mxu1 %v8076_v11 }
 0x2b3   : > { %5694 = vmatprep.subr.bf16.mxu0 %v8079_v12 }
 0x2b5   : > { %5222 = vmatpush1.bf16.msra.mxu1 %v8074_v13  ;;  %v414_v13 = vld [vmem:[#allocation2] sm:$0xff] }
 0x2b6   : > { %5695 = vmatpush1.bf16.msra.mxu0 %v8077_v14  ;;  %5223 = vmatprep.subr.bf16.mxu1 %v8082_v15 }
 0x2b7   : > { %5696 = vmatprep.subr.bf16.mxu0 %v8085_v16  ;;  %v415_v16 = vld [vmem:[#allocation2 + $0x8] sm:$0xff] }
 0x2b9   : > { %5224 = vmatpush1.bf16.msra.mxu1 %v8080_v17 }
 0x2ba   : > { %5697 = vmatpush1.bf16.msra.mxu0 %v8083_v18  ;;  %5236 = vmatprep.subr.bf16.mxu1 %v8091_v19  ;;  %v416_v19 = vld [vmem:[#allocation2 + $0x10] sm:$0xff] }
 0x2bb   : > { %5709 = vmatprep.subr.bf16.mxu0 %v8097_v20 }
 0x2bc   : > { %5226 = vmatmul.mubr.bf16.vlgmr.msra.gmra.mrb[0].mxu1 %v8086_v21 }
 0x2bd   : > { %5699 = vmatmul.mubr.bf16.vlgmr.msra.gmra.mrb[0].mxu0 %v8092_v22  ;;  %5237 = vmatpush1.bf16.msra.mxu1 %v8089_v23  ;;  %v417_v23 = vld [vmem:[#allocation2 + $0x18] sm:$0xff] }
 0x2be   : > { %5710 = vmatpush1.bf16.msra.mxu0 %v8095_v24  ;;  %5238 = vmatprep.subr.bf16.mxu1 %v8100_v25 }
 0x2bf   : > { %5711 = vmatprep.subr.bf16.mxu0 %v8103_v26  ;;  %5741 = vmatprep.mubr.bf16.mxu0 %v8217_v32  ;;  %v8170_v32 = vld [vmem:[%s9241_s3 + $0x48] sm:$0xff] (!%p6876_p10)  }
 0x2c0   : > { %5268 = vmatprep.mubr.bf16.mxu1 %v8167_v27 }
 0x2c1   : > { %5239 = vmatpush1.bf16.msra.mxu1 %v8098_v28 }
 0x2c2   : > { %5712 = vmatpush1.bf16.msra.mxu0 %v8101_v29  ;;  %5240 = vmatprep.subr.bf16.mxu1 %v8106_v30  ;;  %v8168_v29 = vld [vmem:[%s9241_s3 + $0x40] sm:$0xff] (!%p6876_p10)  }
 0x2c3   : > { %5713 = vmatprep.subr.bf16.mxu0 %v8109_v31  ;;  %v8169_v30 = vld [vmem:[%s9241_s3] sm:$0xff] (!%p6876_p10)   ;;  %v8218_v31 = vmov (!%p6876_p10), 0.0  }
 0x2c5   : > { %5241 = vmatpush1.bf16.msra.mxu1 %v8104_v33  ;;  %v8171_v33 = vld [vmem:[%s9241_s3 + $0x8] sm:$0xff] (!%p6876_p10)  }
 0x2c6   : > { %5714 = vmatpush1.bf16.msra.mxu0 %v8107_v34  ;;  %5242 = vmatprep.subr.bf16.mxu1 %v8112_v35  ;;  %v8172_v34 = vld [vmem:[%s9241_s3 + $0x50] sm:$0xff] (!%p6876_p10)   ;;  %v5770_v35 = vlaneseq (!%p6876_p10) }
 0x2c7   : > { %5715 = vmatprep.subr.bf16.mxu0 %v8115_v36  ;;  %v8173_v36 = vld [vmem:[%s9241_s3 + $0x10] sm:$0xff] (!%p6876_p10)  }
 0x2c9   : > { %5243 = vmatpush1.bf16.msra.mxu1 %v8110_v37  ;;  %v8174_v37 = vld [vmem:[%s9241_s3 + $0x58] sm:$0xff] (!%p6876_p10)  }
 0x2ca   : > { %5716 = vmatpush1.bf16.msra.mxu0 %v8113_v38  ;;  %5244 = vmatprep.subr.bf16.mxu1 %v8118_v39  ;;  %v5771_v38 = vshrl.u32 (!%p6876_p10), %v5770_v35, 7  ;;  %v8175_v39 = vld [vmem:[%s9241_s3 + $0x18] sm:$0xff] (!%p6876_p10)  }
 0x2cb   : > { %5717 = vmatprep.subr.bf16.mxu0 %v8121_v40  ;;  %v8176_v40 = vld [vmem:[%s9241_s3 + $0x60] sm:$0xff] (!%p6876_p10)  }
 0x2cd   : > { %5245 = vmatpush1.bf16.msra.mxu1 %v8116_v41  ;;  %v5776_v41 = vsub.s32 (!%p6876_p10), 1, %v5771_v38 }
 0x2ce   : > { %5718 = vmatpush1.bf16.msra.mxu0 %v8119_v42  ;;  %5246 = vmatprep.subr.bf16.mxu1 %v8124_v43  ;;  %v8177_v42 = vld [vmem:[%s9241_s3 + $0x20] sm:$0xff] (!%p6876_p10)   ;;  %v5772_v43 = vsub.s32 (!%p6876_p10), 0, %v5771_v38 }
 0x2cf   : > { %5719 = vmatprep.subr.bf16.mxu0 %v8127_v44  ;;  %v8178_v44 = vld [vmem:[%s9241_s3 + $0x68] sm:$0xff] (!%p6876_p10)  }
 0x2d1   : > { %5247 = vmatpush1.bf16.msra.mxu1 %v8122_v45 }
 0x2d2   : > { %5720 = vmatpush1.bf16.msra.mxu0 %v8125_v46  ;;  %5248 = vmatprep.subr.bf16.mxu1 %v8130_v47  ;;  %v5768_v47 = vld [vmem:[%s9240_s2] sm:$0x3] (!%p6876_p10) }
 0x2d3   : > { %5721 = vmatprep.subr.bf16.mxu0 %v8133_v48  ;;  %v8179_v48 = vld [vmem:[%s9241_s3 + $0x28] sm:$0xff] (!%p6876_p10)  }
 0x2d5   : > { %5249 = vmatpush1.bf16.msra.mxu1 %v8128_v49  ;;  %v5777_v49 = vrot.slane (!%p6876_p10), %v5768_v47, %v5776_v41 }
 0x2d6   : > { %5722 = vmatpush1.bf16.msra.mxu0 %v8131_v50  ;;  %5250 = vmatprep.subr.bf16.mxu1 %v8136_v51  ;;  %v8180_v51 = vld [vmem:[%s9241_s3 + $0x70] sm:$0xff] (!%p6876_p10)  }
 0x2d7   : > { %5723 = vmatprep.subr.bf16.mxu0 %v8139_v52  ;;  %v5773_v52 = vrot.slane (!%p6876_p10), %v5768_v47, %v5772_v43 }
 0x2d9   : > { %5251 = vmatpush1.bf16.msra.mxu1 %v8134_v53  ;;  %v8184_v53 = vld [vmem:[%s9243_s5] sm:$0xff] (!%p6876_p10)  }
 0x2da   : > { %5724 = vmatpush1.bf16.msra.mxu0 %v8137_v54  ;;  %5252 = vmatprep.subr.bf16.mxu1 %v8142_v55 }
 0x2db   : > { %6907 = vmatprep.subr.bf16.mxu0 (!%p6876_p10), %v8168_v29 }
 0x2dd   : > { %5742 = vmatmul.mubr.bf16.vlgmr.msra.gmra.mrb[0].mxu0 %v8143_v56  ;;  %5253 = vmatpush1.bf16.msra.mxu1 %v8140_v57  ;;  %v8185_v57 = vld [vmem:[%s9243_s5 + $0x8] sm:$0xff] (!%p6876_p10)  }
 0x2de   : > { %5254 = vmatprep.subr.bf16.mxu1 %v8146_v58  ;;  %6908 = vmatpush3.bf16.msra.mxu0 (!%p6876_p10), %v8169_v30  ;;  %v8181_v58 = vld [vmem:[%s9241_s3 + $0x30] sm:$0xff] (!%p6876_p10)  }
 0x2df   : > { %6909 = vmatprep.subr.bf16.mxu0 (!%p6876_p10), %v8170_v32 }
 0x2e1   : > { %5255 = vmatpush1.bf16.msra.mxu1 %v8144_v59 }
 0x2e2   : > { %5256 = vmatprep.subr.bf16.mxu1 %v8149_v60  ;;  %6910 = vmatpush3.bf16.msra.mxu0 (!%p6876_p10), %v8171_v33 }
 0x2e3   : > { %6911 = vmatprep.subr.bf16.mxu0 (!%p6876_p10), %v8172_v34 }
 0x2e5   : > { %5257 = vmatpush1.bf16.msra.mxu1 %v8147_v61  ;;  %v8182_v61 = vld [vmem:[%s9241_s3 + $0x78] sm:$0xff] (!%p6876_p10)  }
 0x2e6   : > { %5258 = vmatprep.subr.bf16.mxu1 %v8152_v62  ;;  %6912 = vmatpush3.bf16.msra.mxu0 (!%p6876_p10), %v8173_v36 }
 0x2e7   : > { %6913 = vmatprep.subr.bf16.mxu0 (!%p6876_p10), %v8174_v37 }
 0x2e9   : > { %5259 = vmatpush1.bf16.msra.mxu1 %v8150_v63 }
 0x2ea   : > { %5260 = vmatprep.subr.bf16.mxu1 %v8155_v0  ;;  %6914 = vmatpush3.bf16.msra.mxu0 (!%p6876_p10), %v8175_v39 }
 0x2eb   : > { %6915 = vmatprep.subr.bf16.mxu0 (!%p6876_p10), %v8176_v40 }
 0x2ed   : > { %5261 = vmatpush1.bf16.msra.mxu1 %v8153_v1  ;;  %v8186_v1 = vld [vmem:[%s9243_s5 + $0x10] sm:$0xff] (!%p6876_p10)  }
 0x2ee   : > { %5262 = vmatprep.subr.bf16.mxu1 %v8158_v2  ;;  %6916 = vmatpush3.bf16.msra.mxu0 (!%p6876_p10), %v8177_v42 }
 0x2ef   : > { %6917 = vmatprep.subr.bf16.mxu0 (!%p6876_p10), %v8178_v44 }
 0x2f1   : > { %5263 = vmatpush1.bf16.msra.mxu1 %v8156_v3 }
 0x2f2   : > { %5264 = vmatprep.subr.bf16.mxu1 %v8161_v4  ;;  %6918 = vmatpush3.bf16.msra.mxu0 (!%p6876_p10), %v8179_v48  ;;  %v8183_v4 = vld [vmem:[%s9241_s3 + $0x38] sm:$0xff] (!%p6876_p10)  }
 0x2f3   : > { %6919 = vmatprep.subr.bf16.mxu0 (!%p6876_p10), %v8180_v51 }
 0x2f5   : > { %5265 = vmatpush1.bf16.msra.mxu1 %v8159_v5  ;;  %v8187_v5 = vld [vmem:[%s9243_s5 + $0x18] sm:$0xff] (!%p6876_p10)  }
 0x2f6   : > { %5266 = vmatprep.subr.bf16.mxu1 %v8164_v6  ;;  %6920 = vmatpush3.bf16.msra.mxu0 (!%p6876_p10), %v8181_v58 }
 0x2f7   : > { %6921 = vmatprep.subr.bf16.mxu0 (!%p6876_p10), %v8182_v61 }
 0x2f9   : > { %5267 = vmatpush1.bf16.msra.mxu1 %v8162_v7  ;;  %v8188_v7 = vld [vmem:[%s9243_s5 + $0x20] sm:$0xff] (!%p6876_p10)  }
 0x2fa   : > { %6938 = vmatprep.subr.bf16.mxu1 (!%p6876_p10), %v8218_v31  ;;  %6922 = vmatpush3.bf16.msra.mxu0 (!%p6876_p10), %v8183_v4 }
 0x2fc   : > { %5269 = vmatmul.mubr.bf16.vlgmr.msra.gmra.mrb[0].mxu1 %v8165_v8  ;;  %v8189_v8 = vld [vmem:[%s9243_s5 + $0x28] sm:$0xff] (!%p6876_p10)  }
 0x2fd   : > { %6939 = vmatpush3.bf16.msra.mxu1 (!%p6876_p10), %v8184_v53  ;;  %6954 = vmatprep.mubr.msk.bf16.mxu1 (!%p6876_p10), %vm8219_vm0, %v8218_v31 }
 0x2fe   : > { %6940 = vmatprep.subr.bf16.mxu1 (!%p6876_p10), %v8218_v31 }
 0x301   : > { %6941 = vmatpush3.bf16.msra.mxu1 (!%p6876_p10), %v8185_v57 }
 0x302   : > { %6942 = vmatprep.subr.bf16.mxu1 (!%p6876_p10), %v8218_v31 }
 0x305   : > { %6943 = vmatpush3.bf16.msra.mxu1 (!%p6876_p10), %v8186_v1 }
 0x306   : > { %6944 = vmatprep.subr.bf16.mxu1 (!%p6876_p10), %v8218_v31 }
 0x309   : > { %6945 = vmatpush3.bf16.msra.mxu1 (!%p6876_p10), %v8187_v5 }
 0x30a   : > { %6946 = vmatprep.subr.bf16.mxu1 (!%p6876_p10), %v8218_v31 }
 0x30d   : > { %6947 = vmatpush3.bf16.msra.mxu1 (!%p6876_p10), %v8188_v7 }
 0x30e   : > { %6948 = vmatprep.subr.bf16.mxu1 (!%p6876_p10), %v8218_v31 }
 0x311   : > { %6949 = vmatpush3.bf16.msra.mxu1 (!%p6876_p10), %v8189_v8 }
 0x312   : > { %6950 = vmatprep.subr.bf16.mxu1 (!%p6876_p10), %v8218_v31 }
 0x3b0   : > { %v5743_v9 = vpop.f32.mrb[0].mxu0 }
 0x3b1   : > { %v5745_v10 = vpop.f32.mrb[1].mxu0 }
 0x3b2   : > { %v5747_v11 = vpop.f32.mrb[2].mxu0 }
 0x3b3   : > { %v5749_v12 = vpop.f32.mrb[3].mxu0 }
 0x3cf   : > { %v5270_v14 = vpop.f32.mrb[0].mxu1 }
 0x3d0   : > { %v6958_v15 = vadd.f32 %v5743_v9, %v5270_v14  ;;  %v5272_v17 = vpop.f32.mrb[1].mxu1  ;;  %v8190_v9 = vld [vmem:[%s9243_s5 + $0x30] sm:$0xff] (!%p6876_p10)  }
 0x3d1   : > { %v6959_v18 = vadd.f32 %v5745_v10, %v5272_v17  ;;  %v5274_v20 = vpop.f32.mrb[2].mxu1  ;;  %5763 = sbr.rel (%p6876_p10) target bundleno = 1438 (0x59e), region = 82  ;;  %6951 = vmatpush3.bf16.msra.mxu1 (!%p6876_p10), %v8190_v9  ;;  %v8191_v10 = vld [vmem:[%s9243_s5 + $0x38] sm:$0xff] (!%p6876_p10)  }
 0x3d2   : > { %v5752_v21 = vadd.f32 %v6958_v15, %v414_v13  ;;  %v6960_v22 = vadd.f32 %v5747_v11, %v5274_v20  ;;  %v5276_v24 = vpop.f32.mrb[3].mxu1  ;;  %6952 = vmatprep.subr.bf16.mxu1 (!%p6876_p10), %v8218_v31 }
 0x3d3   : > { %v5753_v25 = vadd.f32 %v6959_v18, %v415_v16  ;;  %v6961_v26 = vadd.f32 %v5749_v12, %v5276_v24  ;;  %v6877_v12 = vld [vmem:[%s9242_s4] ss:$0 sm:$0xff] (!%p6876_p10) }
 0x3d4   : > { %5756 = vst [vmem:[#allocation2] sm:$0xff] %v5752_v21  ;;  %v5754_v27 = vadd.f32 %v6960_v22, %v416_v19 }
 0x3d5   : > { %5757 = vst [vmem:[#allocation2 + $0x8] sm:$0xff] %v5753_v25  ;;  %v5755_v28 = vadd.f32 %v6961_v26, %v417_v23  ;;  %6953 = vmatpush3.bf16.msra.mxu1 (!%p6876_p10), %v8191_v10  ;;  %v6894_v23 = vld [vmem:[%s9244_s6] ss:$0 sm:$0xff] (!%p6876_p10) }
 0x3d6   : > { %5758 = vst [vmem:[#allocation2 + $0x10] sm:$0xff] %v5754_v27 }
 0x3d7   : > { %5759 = vst [vmem:[#allocation2 + $0x18] sm:$0xff] %v5755_v28 }
 0x3db   : > { %v5764_v50 = vld [vmem:[#allocation2] sm:$0xff] }
 0x3dc   : > { %v5765_v45 = vld [vmem:[#allocation2 + $0x8] sm:$0xff]  ;;  %v5780_v62 = vadd.f32 %v5773_v52, %v5764_v50 }
 0x3dd   : > { %v5781_v54 = vadd.f32 %v5777_v49, %v5765_v45  ;;  %v5766_v56 = vld [vmem:[#allocation2 + $0x10] sm:$0xff] }
 0x3de   : > { %v5767_v46 = vld [vmem:[#allocation2 + $0x18] sm:$0xff]  ;;  %v5782_v63 = vadd.f32 %v5773_v52, %v5766_v56  ;;  %v5784_v2 = vmax.f32 %v5780_v62, 0.0 }
 0x3df   : > { %v5783_v55 = vadd.f32 %v5777_v49, %v5767_v46  ;;  %v5785_v59 = vmax.f32 %v5781_v54, 0.0 }
 0x3e0   : > { %v5786_v3 = vmax.f32 %v5782_v63, 0.0 }
 0x3e1   : > { %v5787_v60 = vmax.f32 %v5783_v55, 0.0 }
 0x3e2   : > { %v5788_v6 = vpack.c.bf16 %v5786_v3, %v5784_v2 }
 0x3e3   : > { %v5789_v0 = vpack.c.bf16 %v5787_v60, %v5785_v59 }
 0x3e5   : > { %5957 = vmatprep.mubr.bf16.mxu0 %v5789_v0 }
 0x3e6   : > { %5958 = vmatmul.mubr.bf16.vlgmr.msra.gmra.mrb[0].mxu0 %v5788_v6 }
 0x4b9   : > { %v6923_v11 = vpop.f32.mrb[0].mxu0 }
 0x4ba   : > { %v6924_v13 = vpop.f32.mrb[1].mxu0 }
 0x4bb   : > { %v6925_v14 = vadd.f32 %v6924_v13, %v6923_v11  ;;  %v6926_v15 = vpop.f32.mrb[2].mxu0 }
 0x4bc   : > { %v6927_v16 = vpop.f32.mrb[3].mxu0 }
 0x4bd   : > { %v5960_v17 = vadd.f32 %v6925_v14, %v6877_v12  ;;  %v6928_v18 = vadd.f32 %v6927_v16, %v6926_v15 }
 0x4bf   : > { %v5963_v19 = vadd.f32 %v6928_v18, %v6877_v12  ;;  %v5966_v20 = vmax.f32 %v5960_v17, 0.0 }
 0x4c1   : > { %v5967_v21 = vmax.f32 %v5963_v19, 0.0 }
 0x4c3   : > { %v5968_v22 = vpack.c.bf16 %v5967_v21, %v5966_v20 }
 0x4c5   : > { %6955 = vmatmul.mubr.bf16.vlgmr.msra.gmra.mrb[0].mxu1 %v5968_v22 }
 0x598   : > { %v6074_v24 = vpop.f32.mrb[0].mxu1 }
 0x599   : > { %v6075_v25 = vadd.f32 %v6894_v23, %v6074_v24  ;;  %v6956_v26 = vpop.f32.mrb[1].mxu1 }
 0x59a   : > { %v6077_v27 = vpop.f32.mrb[2].mxu1 }
 0x59b   : > { %6081 = vst [vmem:[%s9245_s7] sm:$0xff] %v6075_v25  ;;  %v6078_v28 = vadd.f32 %v6894_v23, %v6077_v27  ;;  %v6957_v29 = vpop.f32.mrb[3].mxu1 }
 0x59d   : > { %6082 = vst [vmem:[%s9245_s7 + $0x8] sm:$0xff] %v6078_v28 }
 0x59e PF: > { %p14_p11 = scmp.ge.s32.totalorder %s8279_s28, 4   ;;  %s9246_s24 = smov %s8210_s25 }
 0x59f   : > { %s9247_s25 = smov %s8288_s8  ;;  %s9248_s26 = smov %s8279_s28 }
 0x5a0   :  { %16 = sbr.rel (!%p14_p11) target bundleno = 2 (0x2), region = 122 }

</bundles_post_ra>
